<compile_context>
chip_gen: v5e
topology: v5e:2x2
jax: 0.10.0
libtpu: 0.0.40
codegen_flags: <defaults>
</compile_context>

<pallas_src>
import functools

import jax
import jax.numpy as jnp
import numpy as np
from jax import lax
from jax.experimental import pallas as pl
from jax.experimental.pallas import tpu as pltpu


# -----------------------------------------------------------------------------
# Helpers
# -----------------------------------------------------------------------------
def _round_up(x: int, m: int) -> int:
    return (x + m - 1) // m * m


def _pad2d(a: jnp.ndarray, rows: int, cols: int) -> jnp.ndarray:
    r, c = a.shape
    return jnp.pad(a, ((0, rows - r), (0, cols - c)))


# -----------------------------------------------------------------------------
# Pallas kernels
# -----------------------------------------------------------------------------
def _matmul_affine_act_kernel(a_ref, w_ref, s_ref, b_ref, o_ref, *, apply_silu):
    """One (TM, Kp) x (Kp, Np) tile: MXU bf16 matmul -> f32 folded-BN -> SiLU."""
    acc = jnp.dot(a_ref[...], w_ref[...], preferred_element_type=jnp.float32)
    y = acc * s_ref[...] + b_ref[...]                 # (TM, Np) * (1, Np) broadcast
    if apply_silu:
        # sigmoid via EUP exp + EUP approx reciprocal (no VPU divide)
        y = y * pl.reciprocal(1.0 + jnp.exp(-y), approx=True)
    o_ref[...] = y.astype(o_ref.dtype)


def fused_matmul_bn_silu(a, w, scale, bias, *, apply_silu, tm=None):
    """silu((a @ w) * scale + bias)   a:(M,K)  w:(K,N)  scale,bias:(N,) -> bf16."""
    M, K = a.shape
    Kw, N = w.shape
    assert K == Kw

    # Lane-dense padding: K/N -> multiples of 128, M -> multiple of 16 (bf16 tile).
    Kp = _round_up(K, 128)
    Np = _round_up(N, 128)
    Mp = _round_up(M, 16)

    if tm is None:
        if Mp >= 2048:
            tm = 1024                      # 2 tiles on layer 1 (1 per v7x TC)
        elif Mp >= 512:
            tm = _round_up(Mp // 2, 16)    # >=2 tiles so v7x's 2nd TC is not idle
        else:
            tm = Mp                        # tiny M: single tile, no step overhead
    TM = min(tm, Mp)
    Mp = _round_up(Mp, TM)

    a_p = _pad2d(a, Mp, Kp).astype(jnp.bfloat16)
    w_p = _pad2d(w, Kp, Np).astype(jnp.bfloat16)
    s_p = _pad2d(scale.astype(jnp.float32).reshape(1, N), 1, Np)
    b_p = _pad2d(bias.astype(jnp.float32).reshape(1, N), 1, Np)

    out = pl.pallas_call(
        functools.partial(_matmul_affine_act_kernel, apply_silu=apply_silu),
        out_shape=jax.ShapeDtypeStruct((Mp, Np), jnp.bfloat16),
        grid_spec=pl.GridSpec(
            grid=(Mp // TM,),
            in_specs=[
                pl.BlockSpec((TM, Kp), lambda i: (i, 0)),
                pl.BlockSpec((Kp, Np), lambda i: (0, 0)),   # VMEM-resident
                pl.BlockSpec((1, Np), lambda i: (0, 0)),    # VMEM-resident
                pl.BlockSpec((1, Np), lambda i: (0, 0)),    # VMEM-resident
            ],
            out_specs=pl.BlockSpec((TM, Np), lambda i: (i, 0)),
        ),
        compiler_params=pltpu.CompilerParams(
            dimension_semantics=("parallel",),          # independent M tiles
            vmem_limit_bytes=32 * 1024 * 1024,          # safe on v5e/v6e/v7x
        ),
    )(a_p, w_p, s_p, b_p)
    return out[:M, :N]


def _linear_logsoftmax_kernel(x_ref, w_ref, b_ref, o_ref, *, n_valid):
    logits = jnp.dot(x_ref[...], w_ref[...], preferred_element_type=jnp.float32)
    logits = logits + b_ref[...]
    col = lax.broadcasted_iota(jnp.int32, logits.shape, 1)
    logits = jnp.where(col < n_valid, logits, jnp.float32(-1e30))  # mask lane pad
    m = jnp.max(logits, axis=-1, keepdims=True)
    lse = jnp.log(jnp.sum(jnp.exp(logits - m), axis=-1, keepdims=True)) + m
    o_ref[...] = (logits - lse).astype(o_ref.dtype)


def linear_logsoftmax(x, w_kn, b):
    """log_softmax(x @ w_kn + b)   x:(B,K)  w_kn:(K,N)  b:(N,)."""
    B, K = x.shape
    Kw, N = w_kn.shape
    assert K == Kw
    Kp = _round_up(K, 128)
    Np = _round_up(N, 128)
    Bp = _round_up(B, 16)

    x_p = _pad2d(x, Bp, Kp).astype(jnp.bfloat16)
    w_p = _pad2d(w_kn, Kp, Np).astype(jnp.bfloat16)
    b_p = _pad2d(b.astype(jnp.float32).reshape(1, N), 1, Np)

    out = pl.pallas_call(
        functools.partial(_linear_logsoftmax_kernel, n_valid=N),
        out_shape=jax.ShapeDtypeStruct((Bp, Np), jnp.float32),
        grid_spec=pl.GridSpec(
            grid=(1,),
            in_specs=[
                pl.BlockSpec((Bp, Kp), lambda i: (0, 0)),
                pl.BlockSpec((Kp, Np), lambda i: (0, 0)),
                pl.BlockSpec((1, Np), lambda i: (0, 0)),
            ],
            out_specs=pl.BlockSpec((Bp, Np), lambda i: (0, 0)),
        ),
        compiler_params=pltpu.CompilerParams(
            dimension_semantics=("arbitrary",),
            vmem_limit_bytes=32 * 1024 * 1024,
        ),
    )(x_p, w_p, b_p)
    return out[:B, :N]


# -----------------------------------------------------------------------------
# Conv layer = NHWC im2col (JAX glue) + fused Pallas matmul/BN/SiLU kernel
# -----------------------------------------------------------------------------
def _im2col_nhwc(x, ksize, stride, padding):
    """x:(B,H,W,C) -> patches (B*OH*OW, K*K*C), columns ordered (kh, kw, c)."""
    B, H, W, C = x.shape
    xp = jnp.pad(x, ((0, 0), (padding, padding), (padding, padding), (0, 0)))
    Hp, Wp = H + 2 * padding, W + 2 * padding
    OH = (Hp - ksize) // stride + 1
    OW = (Wp - ksize) // stride + 1
    cols = []
    for kh in range(ksize):
        for kw in range(ksize):
            cols.append(
                xp[:, kh:kh + stride * OH:stride, kw:kw + stride * OW:stride, :]
            )                                              # (B, OH, OW, C)
    patches = jnp.stack(cols, axis=3)                      # (B, OH, OW, K*K, C)
    return patches.reshape(B * OH * OW, ksize * ksize * C), OH, OW


def _conv_weight_matrix(w):
    """PyTorch (Cout, Cin, K, K) -> (K*K*Cin, Cout) matching (kh, kw, cin) cols."""
    Cout, Cin, K, _ = w.shape
    return w.transpose(2, 3, 1, 0).reshape(K * K * Cin, Cout)


def conv_bn_silu(x_nhwc, w, scale, bias, *, stride, padding, apply_silu):
    """x:(B,H,W,Cin), w:(Cout,Cin,K,K) -> NHWC output (B,OH,OW,Cout) in bf16."""
    B = x_nhwc.shape[0]
    Cout, Cin, K, _ = w.shape
    patches, OH, OW = _im2col_nhwc(x_nhwc, K, stride, padding)  # (B*OH*OW, K*K*Cin)
    w_mat = _conv_weight_matrix(w)
    y = fused_matmul_bn_silu(patches, w_mat, scale, bias, apply_silu=apply_silu)
    return y.reshape(B, OH, OW, Cout)


# -----------------------------------------------------------------------------
# SimpleCNN2D: params, Pallas forward, pure-JAX reference
# -----------------------------------------------------------------------------
_LAYER_CFG = [
    # (Cout, k, stride, padding, has_bn_and_silu)
    (32, 7, 2, 3, True),
    (64, 5, 2, 2, True),
    (128, 3, 2, 0, True),
    (256, 3, 2, 0, True),
    (512, 3, 2, 0, False),   # final conv: only Flatten afterwards
]
_BN_EPS = 1e-5


def init_params(key, n_classes, hw):
    h, w = hw
    params = {"convs": []}
    cin = 1
    for (cout, k, s, p, has_bn) in _LAYER_CFG:
        key, kconv = jax.random.split(key)
        fan_in = cin * k * k
        wgt = jax.random.normal(kconv, (cout, cin, k, k), jnp.float32) / np.sqrt(fan_in)
        if has_bn:
            key, k1, k2, k3, k4 = jax.random.split(key, 5)
            bn = dict(
                gamma=1.0 + 0.1 * jax.random.normal(k1, (cout,), jnp.float32),
                beta=0.1 * jax.random.normal(k2, (cout,), jnp.float32),
                mean=0.1 * jax.random.normal(k3, (cout,), jnp.float32),
                var=jax.random.uniform(k4, (cout,), jnp.float32, minval=0.5, maxval=1.5),
            )
        else:
            bn = None
        params["convs"].append(dict(w=wgt, bn=bn))
        cin = cout
        h = (h + 2 * p - k) // s + 1
        w = (w + 2 * p - k) // s + 1
    hidden = cin * h * w
    key, kfc1, kfc2 = jax.random.split(key, 3)
    params["fc_w"] = jax.random.normal(kfc1, (n_classes, hidden), jnp.float32) / np.sqrt(hidden)
    params["fc_b"] = 0.1 * jax.random.normal(kfc2, (n_classes,), jnp.float32)
    return params


def _folded_bn(bn):
    inv = lax.rsqrt(bn["var"] + _BN_EPS)
    scale = bn["gamma"] * inv
    bias = bn["beta"] - bn["mean"] * scale
    return scale, bias


def simple_cnn2d_forward(data, params):
    """data:(B,H,W) float32 -> log-probs (B, n_classes). Pallas path (NHWC)."""
    x = data[:, :, :, None]                                # unsqueeze(1) -> NHWC C=1
    # Layers 1-4: conv + folded-BN + SiLU, fully fused per layer.
    for (cout, k, s, pad, has_bn), layer in zip(_LAYER_CFG[:4], params["convs"][:4]):
        scale, bias = _folded_bn(layer["bn"])
        x = conv_bn_silu(x, layer["w"], scale, bias,
                         stride=s, padding=pad, apply_silu=True)

    # Layer 5 (no BN / bias / activation) fused with Flatten + Linear + LogSoftmax.
    cout5, k5, s5, pad5, _ = _LAYER_CFG[4]
    w5 = params["convs"][4]["w"]
    patches, OH5, OW5 = _im2col_nhwc(x, k5, s5, pad5)      # (B*OH5*OW5, 2304)
    w5_mat = _conv_weight_matrix(w5)                       # (2304, 512)

    if OH5 * OW5 == 1:
        # Exact pre-composition of the two linear maps (f32 in the wrapper).
        w_comb = jnp.dot(w5_mat, params["fc_w"].T,
                         precision=lax.Precision.HIGHEST)  # (2304, n_classes)
        return linear_logsoftmax(patches, w_comb, params["fc_b"])

    # Fallback (conv5 spatial > 1x1): unfused conv5, NCHW-order flatten, linear.
    feat = fused_matmul_bn_silu(
        patches, w5_mat,
        jnp.ones((cout5,), jnp.float32), jnp.zeros((cout5,), jnp.float32),
        apply_silu=False)
    B = x.shape[0]
    feat = feat.reshape(B, OH5, OW5, cout5).transpose(0, 3, 1, 2).reshape(B, -1)
    return linear_logsoftmax(feat, params["fc_w"].T, params["fc_b"])


def simple_cnn2d_reference(data, params):
    """Pure-JAX f32 reference (XLA convs at HIGHEST precision, NCHW)."""
    x = data[:, None, :, :]
    for (cout, k, s, pad, has_bn), layer in zip(_LAYER_CFG, params["convs"]):
        x = lax.conv_general_dilated(
            x, layer["w"], window_strides=(s, s), padding=[(pad, pad), (pad, pad)],
            dimension_numbers=("NCHW", "OIHW", "NCHW"),
            precision=lax.Precision.HIGHEST)
        if has_bn:
            scale, bias = _folded_bn(layer["bn"])
            x = x * scale[None, :, None, None] + bias[None, :, None, None]
            x = x * (1.0 / (1.0 + jnp.exp(-x)))
    feat = x.reshape(x.shape[0], -1)
    logits = jnp.dot(feat, params["fc_w"].T, precision=lax.Precision.HIGHEST)
    logits = logits + params["fc_b"]
    return jax.nn.log_softmax(logits, axis=-1)


# -----------------------------------------------------------------------------
if __name__ == "__main__":
    B, H, W = 2, 64, 64         # (batch, H, W): module unsqueezes the channel dim
    N_CLASSES = 4

    key = jax.random.PRNGKey(0)
    kx, kp = jax.random.split(key)
    data = jax.random.normal(kx, (B, H, W), dtype=jnp.float32)
    params = init_params(kp, N_CLASSES, (H, W))

    out = jax.block_until_ready(jax.jit(simple_cnn2d_forward)(data, params))
    ref = jax.block_until_ready(jax.jit(simple_cnn2d_reference)(data, params))

    assert out.shape == (B, N_CLASSES)
    # bf16 matmul operands (f32 accumulation): compare against the f32 reference
    # at a bf16-appropriate tolerance.
    np.testing.assert_allclose(np.asarray(out), np.asarray(ref), rtol=3e-2, atol=3e-2)
    # log-softmax rows must normalize to 1.
    np.testing.assert_allclose(np.exp(np.asarray(out)).sum(axis=-1),
                               np.ones(B), rtol=1e-3, atol=1e-3)

    print("KERNEL_OK")
</pallas_src>

<mosaic_0001>
module attributes {stable_mosaic.version = 11 : i64} {
  func.func @_matmul_affine_act_kernel(%arg0: i32, %arg1: memref<1024x128xbf16, #tpu.memory_space<vmem>>, %arg2: memref<128x128xbf16, #tpu.memory_space<vmem>>, %arg3: memref<1x128xf32, #tpu.memory_space<vmem>>, %arg4: memref<1x128xf32, #tpu.memory_space<vmem>>, %arg5: memref<1024x128xbf16, #tpu.memory_space<vmem>>) attributes {dimension_semantics = [#tpu.dimension_semantics<parallel>], iteration_bounds = array<i64: 2>, scalar_prefetch = 0 : i64, scratch_operands = 0 : i64, tpu.core_type = #tpu.core_type<tc>, window_params = [{transform_indices = @transform_0, window_bounds = array<i64: 1024, 128>}, {pipeline_mode = #tpu.pipeline_mode<synchronous>, transform_indices = @transform_1, window_bounds = array<i64: 128, 128>}, {pipeline_mode = #tpu.pipeline_mode<synchronous>, transform_indices = @transform_2, window_bounds = array<i64: 1, 128>}, {pipeline_mode = #tpu.pipeline_mode<synchronous>, transform_indices = @transform_3, window_bounds = array<i64: 1, 128>}, {transform_indices = @transform_4, window_bounds = array<i64: 1024, 128>}]} {
    %c0 = arith.constant 0 : index
    %c0_0 = arith.constant 0 : index
    %0 = vector.load %arg1[%c0, %c0_0] : memref<1024x128xbf16, #tpu.memory_space<vmem>>, vector<1024x128xbf16>
    %c0_1 = arith.constant 0 : index
    %c0_2 = arith.constant 0 : index
    %1 = vector.load %arg2[%c0_1, %c0_2] : memref<128x128xbf16, #tpu.memory_space<vmem>>, vector<128x128xbf16>
    %cst = arith.constant dense<0.000000e+00> : vector<1024x128xf32>
    %2 = tpu.matmul %0, %1, %cst {dimension_numbers = #tpu.dot_dimension_numbers<[1], [0], [0], [1], [0, 0, 1, 1], [], []>} : vector<1024x128xbf16>, vector<128x128xbf16>, vector<1024x128xf32> -> vector<1024x128xf32>
    %c0_3 = arith.constant 0 : index
    %c0_4 = arith.constant 0 : index
    %3 = vector.load %arg3[%c0_3, %c0_4] : memref<1x128xf32, #tpu.memory_space<vmem>>, vector<1x128xf32>
    %4 = vector.broadcast %3 : vector<1x128xf32> to vector<1024x128xf32>
    %5 = arith.mulf %2, %4 : vector<1024x128xf32>
    %c0_5 = arith.constant 0 : index
    %c0_6 = arith.constant 0 : index
    %6 = vector.load %arg4[%c0_5, %c0_6] : memref<1x128xf32, #tpu.memory_space<vmem>>, vector<1x128xf32>
    %7 = vector.broadcast %6 : vector<1x128xf32> to vector<1024x128xf32>
    %8 = arith.addf %5, %7 : vector<1024x128xf32>
    %cst_7 = arith.constant 0.000000e+00 : f32
    %9 = vector.broadcast %cst_7 : f32 to vector<1024x128xf32>
    %10 = arith.subf %9, %8 : vector<1024x128xf32>
    %11 = math.exp %10 : vector<1024x128xf32>
    %cst_8 = arith.constant 1.000000e+00 : f32
    %12 = vector.broadcast %cst_8 : f32 to vector<1024x128xf32>
    %13 = arith.addf %12, %11 : vector<1024x128xf32>
    %14 = tpu.reciprocal %13 {approx = true} : vector<1024x128xf32> -> vector<1024x128xf32>
    %15 = arith.mulf %8, %14 : vector<1024x128xf32>
    %16 = arith.truncf %15 : vector<1024x128xf32> to vector<1024x128xbf16>
    %c0_9 = arith.constant 0 : index
    %c0_10 = arith.constant 0 : index
    %17 = vector.load %arg5[%c0_9, %c0_10] : memref<1024x128xbf16, #tpu.memory_space<vmem>>, vector<1024x128xbf16>
    tpu.vector_store %arg5[%c0_9, %c0_10], %16 {strides = array<i32>} : memref<1024x128xbf16, #tpu.memory_space<vmem>>, vector<1024x128xbf16>,
    return
  }
  func.func @transform_0(%arg0: i32) -> (i32, i32) {
    %c0_i32 = arith.constant 0 : i32
    %c0_i32_0 = arith.constant 0 : i32
    return %arg0, %c0_i32 : i32, i32
  }
  func.func @transform_1(%arg0: i32) -> (i32, i32) {
    %c0_i32 = arith.constant 0 : i32
    %c0_i32_0 = arith.constant 0 : i32
    %c0_i32_1 = arith.constant 0 : i32
    return %c0_i32, %c0_i32_0 : i32, i32
  }
  func.func @transform_2(%arg0: i32) -> (i32, i32) {
    %c0_i32 = arith.constant 0 : i32
    %c0_i32_0 = arith.constant 0 : i32
    %c0_i32_1 = arith.constant 0 : i32
    return %c0_i32, %c0_i32_0 : i32, i32
  }
  func.func @transform_3(%arg0: i32) -> (i32, i32) {
    %c0_i32 = arith.constant 0 : i32
    %c0_i32_0 = arith.constant 0 : i32
    %c0_i32_1 = arith.constant 0 : i32
    return %c0_i32, %c0_i32_0 : i32, i32
  }
  func.func @transform_4(%arg0: i32) -> (i32, i32) {
    %c0_i32 = arith.constant 0 : i32
    %c0_i32_0 = arith.constant 0 : i32
    return %arg0, %c0_i32 : i32, i32
  }
}

module attributes {stable_mosaic.version = 11 : i64} {
  func.func @_matmul_affine_act_kernel(%arg0: i32, %arg1: memref<256x896xbf16, #tpu.memory_space<vmem>>, %arg2: memref<896x128xbf16, #tpu.memory_space<vmem>>, %arg3: memref<1x128xf32, #tpu.memory_space<vmem>>, %arg4: memref<1x128xf32, #tpu.memory_space<vmem>>, %arg5: memref<256x128xbf16, #tpu.memory_space<vmem>>) attributes {dimension_semantics = [#tpu.dimension_semantics<parallel>], iteration_bounds = array<i64: 2>, scalar_prefetch = 0 : i64, scratch_operands = 0 : i64, tpu.core_type = #tpu.core_type<tc>, window_params = [{transform_indices = @transform_0, window_bounds = array<i64: 256, 896>}, {pipeline_mode = #tpu.pipeline_mode<synchronous>, transform_indices = @transform_1, window_bounds = array<i64: 896, 128>}, {pipeline_mode = #tpu.pipeline_mode<synchronous>, transform_indices = @transform_2, window_bounds = array<i64: 1, 128>}, {pipeline_mode = #tpu.pipeline_mode<synchronous>, transform_indices = @transform_3, window_bounds = array<i64: 1, 128>}, {transform_indices = @transform_4, window_bounds = array<i64: 256, 128>}]} {
    %c0 = arith.constant 0 : index
    %c0_0 = arith.constant 0 : index
    %0 = vector.load %arg1[%c0, %c0_0] : memref<256x896xbf16, #tpu.memory_space<vmem>>, vector<256x896xbf16>
    %c0_1 = arith.constant 0 : index
    %c0_2 = arith.constant 0 : index
    %1 = vector.load %arg2[%c0_1, %c0_2] : memref<896x128xbf16, #tpu.memory_space<vmem>>, vector<896x128xbf16>
    %cst = arith.constant dense<0.000000e+00> : vector<256x128xf32>
    %2 = tpu.matmul %0, %1, %cst {dimension_numbers = #tpu.dot_dimension_numbers<[1], [0], [0], [1], [0, 0, 1, 1], [], []>} : vector<256x896xbf16>, vector<896x128xbf16>, vector<256x128xf32> -> vector<256x128xf32>
    %c0_3 = arith.constant 0 : index
    %c0_4 = arith.constant 0 : index
    %3 = vector.load %arg3[%c0_3, %c0_4] : memref<1x128xf32, #tpu.memory_space<vmem>>, vector<1x128xf32>
    %4 = vector.broadcast %3 : vector<1x128xf32> to vector<256x128xf32>
    %5 = arith.mulf %2, %4 : vector<256x128xf32>
    %c0_5 = arith.constant 0 : index
    %c0_6 = arith.constant 0 : index
    %6 = vector.load %arg4[%c0_5, %c0_6] : memref<1x128xf32, #tpu.memory_space<vmem>>, vector<1x128xf32>
    %7 = vector.broadcast %6 : vector<1x128xf32> to vector<256x128xf32>
    %8 = arith.addf %5, %7 : vector<256x128xf32>
    %cst_7 = arith.constant 0.000000e+00 : f32
    %9 = vector.broadcast %cst_7 : f32 to vector<256x128xf32>
    %10 = arith.subf %9, %8 : vector<256x128xf32>
    %11 = math.exp %10 : vector<256x128xf32>
    %cst_8 = arith.constant 1.000000e+00 : f32
    %12 = vector.broadcast %cst_8 : f32 to vector<256x128xf32>
    %13 = arith.addf %12, %11 : vector<256x128xf32>
    %14 = tpu.reciprocal %13 {approx = true} : vector<256x128xf32> -> vector<256x128xf32>
    %15 = arith.mulf %8, %14 : vector<256x128xf32>
    %16 = arith.truncf %15 : vector<256x128xf32> to vector<256x128xbf16>
    %c0_9 = arith.constant 0 : index
    %c0_10 = arith.constant 0 : index
    %17 = vector.load %arg5[%c0_9, %c0_10] : memref<256x128xbf16, #tpu.memory_space<vmem>>, vector<256x128xbf16>
    tpu.vector_store %arg5[%c0_9, %c0_10], %16 {strides = array<i32>} : memref<256x128xbf16, #tpu.memory_space<vmem>>, vector<256x128xbf16>,
    return
  }
  func.func @transform_0(%arg0: i32) -> (i32, i32) {
    %c0_i32 = arith.constant 0 : i32
    %c0_i32_0 = arith.constant 0 : i32
    return %arg0, %c0_i32 : i32, i32
  }
  func.func @transform_1(%arg0: i32) -> (i32, i32) {
    %c0_i32 = arith.constant 0 : i32
    %c0_i32_0 = arith.constant 0 : i32
    %c0_i32_1 = arith.constant 0 : i32
    return %c0_i32, %c0_i32_0 : i32, i32
  }
  func.func @transform_2(%arg0: i32) -> (i32, i32) {
    %c0_i32 = arith.constant 0 : i32
    %c0_i32_0 = arith.constant 0 : i32
    %c0_i32_1 = arith.constant 0 : i32
    return %c0_i32, %c0_i32_0 : i32, i32
  }
  func.func @transform_3(%arg0: i32) -> (i32, i32) {
    %c0_i32 = arith.constant 0 : i32
    %c0_i32_0 = arith.constant 0 : i32
    %c0_i32_1 = arith.constant 0 : i32
    return %c0_i32, %c0_i32_0 : i32, i32
  }
  func.func @transform_4(%arg0: i32) -> (i32, i32) {
    %c0_i32 = arith.constant 0 : i32
    %c0_i32_0 = arith.constant 0 : i32
    return %arg0, %c0_i32 : i32, i32
  }
}

module attributes {stable_mosaic.version = 11 : i64} {
  func.func @_matmul_affine_act_kernel(%arg0: i32, %arg1: memref<112x640xbf16, #tpu.memory_space<vmem>>, %arg2: memref<640x128xbf16, #tpu.memory_space<vmem>>, %arg3: memref<1x128xf32, #tpu.memory_space<vmem>>, %arg4: memref<1x128xf32, #tpu.memory_space<vmem>>, %arg5: memref<112x128xbf16, #tpu.memory_space<vmem>>) attributes {dimension_semantics = [#tpu.dimension_semantics<parallel>], iteration_bounds = array<i64: 1>, scalar_prefetch = 0 : i64, scratch_operands = 0 : i64, tpu.core_type = #tpu.core_type<tc>, window_params = [{transform_indices = @transform_0, window_bounds = array<i64: 112, 640>}, {pipeline_mode = #tpu.pipeline_mode<synchronous>, transform_indices = @transform_1, window_bounds = array<i64: 640, 128>}, {pipeline_mode = #tpu.pipeline_mode<synchronous>, transform_indices = @transform_2, window_bounds = array<i64: 1, 128>}, {pipeline_mode = #tpu.pipeline_mode<synchronous>, transform_indices = @transform_3, window_bounds = array<i64: 1, 128>}, {transform_indices = @transform_4, window_bounds = array<i64: 112, 128>}]} {
    %c0 = arith.constant 0 : index
    %c0_0 = arith.constant 0 : index
    %0 = vector.load %arg1[%c0, %c0_0] : memref<112x640xbf16, #tpu.memory_space<vmem>>, vector<112x640xbf16>
    %c0_1 = arith.constant 0 : index
    %c0_2 = arith.constant 0 : index
    %1 = vector.load %arg2[%c0_1, %c0_2] : memref<640x128xbf16, #tpu.memory_space<vmem>>, vector<640x128xbf16>
    %cst = arith.constant dense<0.000000e+00> : vector<112x128xf32>
    %2 = tpu.matmul %0, %1, %cst {dimension_numbers = #tpu.dot_dimension_numbers<[1], [0], [0], [1], [0, 0, 1, 1], [], []>} : vector<112x640xbf16>, vector<640x128xbf16>, vector<112x128xf32> -> vector<112x128xf32>
    %c0_3 = arith.constant 0 : index
    %c0_4 = arith.constant 0 : index
    %3 = vector.load %arg3[%c0_3, %c0_4] : memref<1x128xf32, #tpu.memory_space<vmem>>, vector<1x128xf32>
    %4 = vector.broadcast %3 : vector<1x128xf32> to vector<112x128xf32>
    %5 = arith.mulf %2, %4 : vector<112x128xf32>
    %c0_5 = arith.constant 0 : index
    %c0_6 = arith.constant 0 : index
    %6 = vector.load %arg4[%c0_5, %c0_6] : memref<1x128xf32, #tpu.memory_space<vmem>>, vector<1x128xf32>
    %7 = vector.broadcast %6 : vector<1x128xf32> to vector<112x128xf32>
    %8 = arith.addf %5, %7 : vector<112x128xf32>
    %cst_7 = arith.constant 0.000000e+00 : f32
    %9 = vector.broadcast %cst_7 : f32 to vector<112x128xf32>
    %10 = arith.subf %9, %8 : vector<112x128xf32>
    %11 = math.exp %10 : vector<112x128xf32>
    %cst_8 = arith.constant 1.000000e+00 : f32
    %12 = vector.broadcast %cst_8 : f32 to vector<112x128xf32>
    %13 = arith.addf %12, %11 : vector<112x128xf32>
    %14 = tpu.reciprocal %13 {approx = true} : vector<112x128xf32> -> vector<112x128xf32>
    %15 = arith.mulf %8, %14 : vector<112x128xf32>
    %16 = arith.truncf %15 : vector<112x128xf32> to vector<112x128xbf16>
    %c0_9 = arith.constant 0 : index
    %c0_10 = arith.constant 0 : index
    %17 = vector.load %arg5[%c0_9, %c0_10] : memref<112x128xbf16, #tpu.memory_space<vmem>>, vector<112x128xbf16>
    tpu.vector_store %arg5[%c0_9, %c0_10], %16 {strides = array<i32>} : memref<112x128xbf16, #tpu.memory_space<vmem>>, vector<112x128xbf16>,
    return
  }
  func.func @transform_0(%arg0: i32) -> (i32, i32) {
    %c0_i32 = arith.constant 0 : i32
    %c0_i32_0 = arith.constant 0 : i32
    return %arg0, %c0_i32 : i32, i32
  }
  func.func @transform_1(%arg0: i32) -> (i32, i32) {
    %c0_i32 = arith.constant 0 : i32
    %c0_i32_0 = arith.constant 0 : i32
    %c0_i32_1 = arith.constant 0 : i32
    return %c0_i32, %c0_i32_0 : i32, i32
  }
  func.func @transform_2(%arg0: i32) -> (i32, i32) {
    %c0_i32 = arith.constant 0 : i32
    %c0_i32_0 = arith.constant 0 : i32
    %c0_i32_1 = arith.constant 0 : i32
    return %c0_i32, %c0_i32_0 : i32, i32
  }
  func.func @transform_3(%arg0: i32) -> (i32, i32) {
    %c0_i32 = arith.constant 0 : i32
    %c0_i32_0 = arith.constant 0 : i32
    %c0_i32_1 = arith.constant 0 : i32
    return %c0_i32, %c0_i32_0 : i32, i32
  }
  func.func @transform_4(%arg0: i32) -> (i32, i32) {
    %c0_i32 = arith.constant 0 : i32
    %c0_i32_0 = arith.constant 0 : i32
    return %arg0, %c0_i32 : i32, i32
  }
}

module attributes {stable_mosaic.version = 11 : i64} {
  func.func @_matmul_affine_act_kernel(%arg0: i32, %arg1: memref<32x1152xbf16, #tpu.memory_space<vmem>>, %arg2: memref<1152x256xbf16, #tpu.memory_space<vmem>>, %arg3: memref<1x256xf32, #tpu.memory_space<vmem>>, %arg4: memref<1x256xf32, #tpu.memory_space<vmem>>, %arg5: memref<32x256xbf16, #tpu.memory_space<vmem>>) attributes {dimension_semantics = [#tpu.dimension_semantics<parallel>], iteration_bounds = array<i64: 1>, scalar_prefetch = 0 : i64, scratch_operands = 0 : i64, tpu.core_type = #tpu.core_type<tc>, window_params = [{transform_indices = @transform_0, window_bounds = array<i64: 32, 1152>}, {pipeline_mode = #tpu.pipeline_mode<synchronous>, transform_indices = @transform_1, window_bounds = array<i64: 1152, 256>}, {pipeline_mode = #tpu.pipeline_mode<synchronous>, transform_indices = @transform_2, window_bounds = array<i64: 1, 256>}, {pipeline_mode = #tpu.pipeline_mode<synchronous>, transform_indices = @transform_3, window_bounds = array<i64: 1, 256>}, {transform_indices = @transform_4, window_bounds = array<i64: 32, 256>}]} {
    %c0 = arith.constant 0 : index
    %c0_0 = arith.constant 0 : index
    %0 = vector.load %arg1[%c0, %c0_0] : memref<32x1152xbf16, #tpu.memory_space<vmem>>, vector<32x1152xbf16>
    %c0_1 = arith.constant 0 : index
    %c0_2 = arith.constant 0 : index
    %1 = vector.load %arg2[%c0_1, %c0_2] : memref<1152x256xbf16, #tpu.memory_space<vmem>>, vector<1152x256xbf16>
    %cst = arith.constant dense<0.000000e+00> : vector<32x256xf32>
    %2 = tpu.matmul %0, %1, %cst {dimension_numbers = #tpu.dot_dimension_numbers<[1], [0], [0], [1], [0, 0, 1, 1], [], []>} : vector<32x1152xbf16>, vector<1152x256xbf16>, vector<32x256xf32> -> vector<32x256xf32>
    %c0_3 = arith.constant 0 : index
    %c0_4 = arith.constant 0 : index
    %3 = vector.load %arg3[%c0_3, %c0_4] : memref<1x256xf32, #tpu.memory_space<vmem>>, vector<1x256xf32>
    %4 = vector.broadcast %3 : vector<1x256xf32> to vector<32x256xf32>
    %5 = arith.mulf %2, %4 : vector<32x256xf32>
    %c0_5 = arith.constant 0 : index
    %c0_6 = arith.constant 0 : index
    %6 = vector.load %arg4[%c0_5, %c0_6] : memref<1x256xf32, #tpu.memory_space<vmem>>, vector<1x256xf32>
    %7 = vector.broadcast %6 : vector<1x256xf32> to vector<32x256xf32>
    %8 = arith.addf %5, %7 : vector<32x256xf32>
    %cst_7 = arith.constant 0.000000e+00 : f32
    %9 = vector.broadcast %cst_7 : f32 to vector<32x256xf32>
    %10 = arith.subf %9, %8 : vector<32x256xf32>
    %11 = math.exp %10 : vector<32x256xf32>
    %cst_8 = arith.constant 1.000000e+00 : f32
    %12 = vector.broadcast %cst_8 : f32 to vector<32x256xf32>
    %13 = arith.addf %12, %11 : vector<32x256xf32>
    %14 = tpu.reciprocal %13 {approx = true} : vector<32x256xf32> -> vector<32x256xf32>
    %15 = arith.mulf %8, %14 : vector<32x256xf32>
    %16 = arith.truncf %15 : vector<32x256xf32> to vector<32x256xbf16>
    %c0_9 = arith.constant 0 : index
    %c0_10 = arith.constant 0 : index
    %17 = vector.load %arg5[%c0_9, %c0_10] : memref<32x256xbf16, #tpu.memory_space<vmem>>, vector<32x256xbf16>
    tpu.vector_store %arg5[%c0_9, %c0_10], %16 {strides = array<i32>} : memref<32x256xbf16, #tpu.memory_space<vmem>>, vector<32x256xbf16>,
    return
  }
  func.func @transform_0(%arg0: i32) -> (i32, i32) {
    %c0_i32 = arith.constant 0 : i32
    %c0_i32_0 = arith.constant 0 : i32
    return %arg0, %c0_i32 : i32, i32
  }
  func.func @transform_1(%arg0: i32) -> (i32, i32) {
    %c0_i32 = arith.constant 0 : i32
    %c0_i32_0 = arith.constant 0 : i32
    %c0_i32_1 = arith.constant 0 : i32
    return %c0_i32, %c0_i32_0 : i32, i32
  }
  func.func @transform_2(%arg0: i32) -> (i32, i32) {
    %c0_i32 = arith.constant 0 : i32
    %c0_i32_0 = arith.constant 0 : i32
    %c0_i32_1 = arith.constant 0 : i32
    return %c0_i32, %c0_i32_0 : i32, i32
  }
  func.func @transform_3(%arg0: i32) -> (i32, i32) {
    %c0_i32 = arith.constant 0 : i32
    %c0_i32_0 = arith.constant 0 : i32
    %c0_i32_1 = arith.constant 0 : i32
    return %c0_i32, %c0_i32_0 : i32, i32
  }
  func.func @transform_4(%arg0: i32) -> (i32, i32) {
    %c0_i32 = arith.constant 0 : i32
    %c0_i32_0 = arith.constant 0 : i32
    return %arg0, %c0_i32 : i32, i32
  }
}

module attributes {stable_mosaic.version = 11 : i64} {
  func.func @_linear_logsoftmax_kernel(%arg0: i32, %arg1: memref<16x2304xbf16, #tpu.memory_space<vmem>>, %arg2: memref<2304x128xbf16, #tpu.memory_space<vmem>>, %arg3: memref<1x128xf32, #tpu.memory_space<vmem>>, %arg4: memref<16x128xf32, #tpu.memory_space<vmem>>) attributes {dimension_semantics = [#tpu.dimension_semantics<arbitrary>], iteration_bounds = array<i64: 1>, scalar_prefetch = 0 : i64, scratch_operands = 0 : i64, tpu.core_type = #tpu.core_type<tc>, window_params = [{pipeline_mode = #tpu.pipeline_mode<synchronous>, transform_indices = @transform_0, window_bounds = array<i64: 16, 2304>}, {pipeline_mode = #tpu.pipeline_mode<synchronous>, transform_indices = @transform_1, window_bounds = array<i64: 2304, 128>}, {pipeline_mode = #tpu.pipeline_mode<synchronous>, transform_indices = @transform_2, window_bounds = array<i64: 1, 128>}, {pipeline_mode = #tpu.pipeline_mode<synchronous>, transform_indices = @transform_3, window_bounds = array<i64: 16, 128>}]} {
    %c0 = arith.constant 0 : index
    %c0_0 = arith.constant 0 : index
    %0 = vector.load %arg1[%c0, %c0_0] : memref<16x2304xbf16, #tpu.memory_space<vmem>>, vector<16x2304xbf16>
    %c0_1 = arith.constant 0 : index
    %c0_2 = arith.constant 0 : index
    %1 = vector.load %arg2[%c0_1, %c0_2] : memref<2304x128xbf16, #tpu.memory_space<vmem>>, vector<2304x128xbf16>
    %cst = arith.constant dense<0.000000e+00> : vector<16x128xf32>
    %2 = tpu.matmul %0, %1, %cst {dimension_numbers = #tpu.dot_dimension_numbers<[1], [0], [0], [1], [0, 0, 1, 1], [], []>} : vector<16x2304xbf16>, vector<2304x128xbf16>, vector<16x128xf32> -> vector<16x128xf32>
    %c0_3 = arith.constant 0 : index
    %c0_4 = arith.constant 0 : index
    %3 = vector.load %arg3[%c0_3, %c0_4] : memref<1x128xf32, #tpu.memory_space<vmem>>, vector<1x128xf32>
    %4 = vector.broadcast %3 : vector<1x128xf32> to vector<16x128xf32>
    %5 = arith.addf %2, %4 : vector<16x128xf32>
    %6 = tpu.iota {dimensions = array<i32: 1>} : vector<16x128xi32>
    %c4_i32 = arith.constant 4 : i32
    %7 = vector.broadcast %c4_i32 : i32 to vector<16x128xi32>
    %8 = arith.cmpi slt, %6, %7 : vector<16x128xi32>
    %cst_5 = arith.constant -1.000000e+30 : f32
    %9 = vector.broadcast %cst_5 : f32 to vector<16x128xf32>
    %10 = arith.select %8, %5, %9 : vector<16x128xi1>, vector<16x128xf32>
    %cst_6 = arith.constant dense<0xFF800000> : vector<16xf32>
    %11 = vector.multi_reduction <maximumf>, %10, %cst_6 [1] : vector<16x128xf32> to vector<16xf32>
    %12 = vector.shape_cast %11 : vector<16xf32> to vector<16x1xf32>
    %13 = vector.broadcast %12 : vector<16x1xf32> to vector<16x128xf32>
    %14 = arith.subf %10, %13 : vector<16x128xf32>
    %15 = math.exp %14 : vector<16x128xf32>
    %cst_7 = arith.constant dense<0.000000e+00> : vector<16xf32>
    %16 = vector.multi_reduction <add>, %15, %cst_7 [1] : vector<16x128xf32> to vector<16xf32>
    %17 = vector.shape_cast %16 : vector<16xf32> to vector<16x1xf32>
    %18 = math.log %17 : vector<16x1xf32>
    %19 = arith.addf %18, %12 : vector<16x1xf32>
    %20 = vector.broadcast %19 : vector<16x1xf32> to vector<16x128xf32>
    %21 = arith.subf %10, %20 : vector<16x128xf32>
    %c0_8 = arith.constant 0 : index
    %c0_9 = arith.constant 0 : index
    %22 = vector.load %arg4[%c0_8, %c0_9] : memref<16x128xf32, #tpu.memory_space<vmem>>, vector<16x128xf32>
    tpu.vector_store %arg4[%c0_8, %c0_9], %21 {strides = array<i32>} : memref<16x128xf32, #tpu.memory_space<vmem>>, vector<16x128xf32>,
    return
  }
  func.func @transform_0(%arg0: i32) -> (i32, i32) {
    %c0_i32 = arith.constant 0 : i32
    %c0_i32_0 = arith.constant 0 : i32
    %c0_i32_1 = arith.constant 0 : i32
    return %c0_i32, %c0_i32_0 : i32, i32
  }
  func.func @transform_1(%arg0: i32) -> (i32, i32) {
    %c0_i32 = arith.constant 0 : i32
    %c0_i32_0 = arith.constant 0 : i32
    %c0_i32_1 = arith.constant 0 : i32
    return %c0_i32, %c0_i32_0 : i32, i32
  }
  func.func @transform_2(%arg0: i32) -> (i32, i32) {
    %c0_i32 = arith.constant 0 : i32
    %c0_i32_0 = arith.constant 0 : i32
    %c0_i32_1 = arith.constant 0 : i32
    return %c0_i32, %c0_i32_0 : i32, i32
  }
  func.func @transform_3(%arg0: i32) -> (i32, i32) {
    %c0_i32 = arith.constant 0 : i32
    %c0_i32_0 = arith.constant 0 : i32
    %c0_i32_1 = arith.constant 0 : i32
    return %c0_i32, %c0_i32_0 : i32, i32
  }
}

</mosaic_0001>

<bundles_post_ra>
// kernel: simple_cnn2d_forward.5
= control target key start
LH: loop header
LB: loop body
LE: loop exit
PB: predicated region body
PF: predicated region fallthrough
CT: control target
= control target key end

     0   :  { %s3787_s15 = smov 0   ;;  %s4903_s0 = inlined_call_operand.vmem [shape: bf16[2048,128], index: 0, kind: input, shape index: {}]   ;;  %s4904_s1 = inlined_call_operand.vmem [shape: bf16[128,128], index: 1, kind: input, shape index: {}]   ;;  %s4905_s2 = inlined_call_operand.vmem [shape: f32[1,128], index: 2, kind: input, shape index: {}]   ;;  %s4906_s3 = inlined_call_operand.vmem [shape: f32[1,128], index: 3, kind: input, shape index: {}]   ;;  %s4907_s4 = inlined_call_operand.vmem [shape: bf16[2048,128], index: 4, kind: output, shape index: {}]  }
   0x1 LB: > { %s2450_s16 = sadd.s32 4294967295, %s3760_s15   ;;  %p2454_p0 = scmp.ge.s32.totalorder %s3760_s15, 1  ;;  %s3760_s15 = sphi %s3787_s15, %s14_s15  }
   0x2   : > { %p163_p1 = scmp.lt.s32.totalorder %s3760_s15, 3 }
   0x4   : > { %p164_p2 = pnand %p2454_p0, %p163_p1 }
   0x5   : > { %s2455_s25 = sshll.u32 (!%p164_p2), %s2450_s16, 7 }
   0x6   : > { %167 = sbr.rel (%p164_p2) target bundleno = 473 (0x1d9), region = 36  ;;  %p190_p3 = scmp.lt.s32.totalorder (!%p164_p2), %s2455_s25, 255 }
   0xb   : > { %v2820_v0 = vld [vmem:[%s4904_s1 + $0x38] sm:$0xff]  ;;  %v2819_v1 = vld [vmem:[%s4904_s1 + $0x30] sm:$0xff]  ;;  %v2818_v2 = vld [vmem:[%s4904_s1 + $0x28] sm:$0xff]  ;;  %s4909_s25 = smov (!%p190_p3, %s2455_s25), 255 }
   0xc   : > { %777 = vmatpush.bf16.msra.mxu0 %v2820_v0  ;;  %3204 = vmatpush.bf16.msra.mxu1 %v2820_v0  ;;  %v2817_v3 = vld [vmem:[%s4904_s1 + $0x20] sm:$0xff]  ;;  %v2816_v4 = vld [vmem:[%s4904_s1 + $0x18] sm:$0xff]  ;;  %v2815_v5 = vld [vmem:[%s4904_s1 + $0x10] sm:$0xff]  ;;  %s2456_s6 = sshll.u32 %s4909_s25, 2 }
   0xd   : > { %3205 = vmatpush.bf16.msra.mxu2 %v2820_v0  ;;  %3206 = vmatpush.bf16.msra.mxu3 %v2820_v0  ;;  %v2814_v6 = vld [vmem:[%s4904_s1 + $0x8] sm:$0xff]  ;;  %v2813_v7 = vld [vmem:[%s4904_s1] sm:$0xff]  ;;  %s3827_s11 = scalar_lea.vmem %s4903_s0, %s2456_s6  ;;  %s3987_s19 = scalar_lea.vmem %s4907_s4, %s2456_s6 }
   0xe   : > { %v2749_v8 = vld [vmem:[%s3827_s11] sm:$0xff]  ;;  %v2750_v12 = vld [vmem:[%s3827_s11 + $0x8] sm:$0xff]  ;;  %v2751_v16 = vld [vmem:[%s3827_s11 + $0x10] sm:$0xff] }
   0xf   : > { %v2765_v9 = vld [vmem:[%s3827_s11 + $0x80] sm:$0xff]  ;;  %v2766_v13 = vld [vmem:[%s3827_s11 + $0x88] sm:$0xff]  ;;  %v2767_v17 = vld [vmem:[%s3827_s11 + $0x90] sm:$0xff] }
  0x10   : > { %778 = vmatpush.bf16.msra.mxu0 %v2819_v1  ;;  %3207 = vmatpush.bf16.msra.mxu1 %v2819_v1  ;;  %v2781_v10 = vld [vmem:[%s3827_s11 + $0x100] sm:$0xff]  ;;  %v2782_v14 = vld [vmem:[%s3827_s11 + $0x108] sm:$0xff]  ;;  %v2783_v18 = vld [vmem:[%s3827_s11 + $0x110] sm:$0xff] }
  0x11   : > { %3208 = vmatpush.bf16.msra.mxu2 %v2819_v1  ;;  %3209 = vmatpush.bf16.msra.mxu3 %v2819_v1  ;;  %v2797_v11 = vld [vmem:[%s3827_s11 + $0x180] sm:$0xff]  ;;  %v2798_v15 = vld [vmem:[%s3827_s11 + $0x188] sm:$0xff]  ;;  %v2799_v19 = vld [vmem:[%s3827_s11 + $0x190] sm:$0xff] }
  0x12   : > { %v2752_v20 = vld [vmem:[%s3827_s11 + $0x18] sm:$0xff]  ;;  %v2753_v24 = vld [vmem:[%s3827_s11 + $0x20] sm:$0xff]  ;;  %v2754_v28 = vld [vmem:[%s3827_s11 + $0x28] sm:$0xff] }
  0x13   : > { %v2768_v21 = vld [vmem:[%s3827_s11 + $0x98] sm:$0xff]  ;;  %v2769_v25 = vld [vmem:[%s3827_s11 + $0xa0] sm:$0xff]  ;;  %v2770_v29 = vld [vmem:[%s3827_s11 + $0xa8] sm:$0xff] }
  0x14   : > { %779 = vmatpush.bf16.msra.mxu0 %v2818_v2  ;;  %3210 = vmatpush.bf16.msra.mxu1 %v2818_v2  ;;  %v2784_v22 = vld [vmem:[%s3827_s11 + $0x118] sm:$0xff]  ;;  %v2785_v26 = vld [vmem:[%s3827_s11 + $0x120] sm:$0xff]  ;;  %v2786_v30 = vld [vmem:[%s3827_s11 + $0x128] sm:$0xff] }
  0x15   : > { %3211 = vmatpush.bf16.msra.mxu2 %v2818_v2  ;;  %3212 = vmatpush.bf16.msra.mxu3 %v2818_v2  ;;  %v2800_v23 = vld [vmem:[%s3827_s11 + $0x198] sm:$0xff]  ;;  %v2801_v27 = vld [vmem:[%s3827_s11 + $0x1a0] sm:$0xff]  ;;  %v2802_v31 = vld [vmem:[%s3827_s11 + $0x1a8] sm:$0xff] }
  0x16   : > { %v2755_v32 = vld [vmem:[%s3827_s11 + $0x30] sm:$0xff]  ;;  %v2756_v36 = vld [vmem:[%s3827_s11 + $0x38] sm:$0xff]  ;;  %v3864_v40 = vld [vmem:[%s4905_s2] ss:$0 sm:$0xff] }
  0x17   : > { %v2771_v33 = vld [vmem:[%s3827_s11 + $0xb0] sm:$0xff]  ;;  %v2772_v37 = vld [vmem:[%s3827_s11 + $0xb8] sm:$0xff]  ;;  %v3869_v41 = vld [vmem:[%s4906_s3] ss:$0 sm:$0xff] }
  0x18   : > { %780 = vmatpush.bf16.msra.mxu0 %v2817_v3  ;;  %3213 = vmatpush.bf16.msra.mxu1 %v2817_v3  ;;  %v2787_v34 = vld [vmem:[%s3827_s11 + $0x130] sm:$0xff]  ;;  %v2788_v38 = vld [vmem:[%s3827_s11 + $0x138] sm:$0xff]  ;;  %v2757_v42 = vld [vmem:[%s3827_s11 + $0x40] sm:$0xff] }
  0x19   : > { %3214 = vmatpush.bf16.msra.mxu2 %v2817_v3  ;;  %3215 = vmatpush.bf16.msra.mxu3 %v2817_v3  ;;  %v2803_v35 = vld [vmem:[%s3827_s11 + $0x1b0] sm:$0xff]  ;;  %v2804_v39 = vld [vmem:[%s3827_s11 + $0x1b8] sm:$0xff]  ;;  %v2773_v43 = vld [vmem:[%s3827_s11 + $0xc0] sm:$0xff] }
  0x1a   : > { %v2789_v46 = vld [vmem:[%s3827_s11 + $0x140] sm:$0xff] }
  0x1b   : > { %v2805_v47 = vld [vmem:[%s3827_s11 + $0x1c0] sm:$0xff] }
  0x1c   : > { %781 = vmatpush.bf16.msra.mxu0 %v2816_v4  ;;  %3216 = vmatpush.bf16.msra.mxu1 %v2816_v4 }
  0x1d   : > { %3217 = vmatpush.bf16.msra.mxu2 %v2816_v4  ;;  %3218 = vmatpush.bf16.msra.mxu3 %v2816_v4 }
  0x20   : > { %782 = vmatpush.bf16.msra.mxu0 %v2815_v5  ;;  %3219 = vmatpush.bf16.msra.mxu1 %v2815_v5 }
  0x21   : > { %3220 = vmatpush.bf16.msra.mxu2 %v2815_v5  ;;  %3221 = vmatpush.bf16.msra.mxu3 %v2815_v5 }
  0x24   : > { %783 = vmatpush.bf16.msra.mxu0 %v2814_v6  ;;  %3222 = vmatpush.bf16.msra.mxu1 %v2814_v6 }
  0x25   : > { %3223 = vmatpush.bf16.msra.mxu2 %v2814_v6  ;;  %3224 = vmatpush.bf16.msra.mxu3 %v2814_v6 }
  0x28   : > { %784 = vmatpush.bf16.msra.mxu0 %v2813_v7  ;;  %3225 = vmatpush.bf16.msra.mxu1 %v2813_v7 }
  0x29   : > { %3226 = vmatpush.bf16.msra.mxu2 %v2813_v7  ;;  %3227 = vmatpush.bf16.msra.mxu3 %v2813_v7 }
  0x2b   : > { %785 = vmatmul.bf16.vlgmr.msra.gmra.mxu0 %v2749_v8  ;;  %865 = vmatmul.bf16.vlgmr.msra.gmra.mxu1 %v2765_v9 }
  0x2c   : > { %945 = vmatmul.bf16.vlgmr.msra.gmra.mxu2 %v2781_v10  ;;  %1025 = vmatmul.bf16.vlgmr.msra.gmra.mxu3 %v2797_v11 }
  0x3b   : > { %790 = vmatmul.bf16.gmra.mxu0 %v2750_v12  ;;  %870 = vmatmul.bf16.gmra.mxu1 %v2766_v13 }
  0x3c   : > { %950 = vmatmul.bf16.gmra.mxu2 %v2782_v14  ;;  %1030 = vmatmul.bf16.gmra.mxu3 %v2798_v15  ;;  %v2758_v14 = vld [vmem:[%s3827_s11 + $0x48] sm:$0xff] }
  0x3d   : > { %v2774_v15 = vld [vmem:[%s3827_s11 + $0xc8] sm:$0xff] }
  0x4b   : > { %795 = vmatmul.bf16.gmra.mxu0 %v2751_v16  ;;  %875 = vmatmul.bf16.gmra.mxu1 %v2767_v17 }
  0x4c   : > { %955 = vmatmul.bf16.gmra.mxu2 %v2783_v18  ;;  %1035 = vmatmul.bf16.gmra.mxu3 %v2799_v19 }
  0x5b   : > { %800 = vmatmul.bf16.gmra.mxu0 %v2752_v20  ;;  %880 = vmatmul.bf16.gmra.mxu1 %v2768_v21 }
  0x5c   : > { %960 = vmatmul.bf16.gmra.mxu2 %v2784_v22  ;;  %1040 = vmatmul.bf16.gmra.mxu3 %v2800_v23  ;;  %v2790_v22 = vld [vmem:[%s3827_s11 + $0x148] sm:$0xff] }
  0x5d   : > { %v2806_v23 = vld [vmem:[%s3827_s11 + $0x1c8] sm:$0xff] }
  0x6b   : > { %805 = vmatmul.bf16.gmra.mxu0 %v2753_v24  ;;  %885 = vmatmul.bf16.gmra.mxu1 %v2769_v25 }
  0x6c   : > { %965 = vmatmul.bf16.gmra.mxu2 %v2785_v26  ;;  %1045 = vmatmul.bf16.gmra.mxu3 %v2801_v27 }
  0x7b   : > { %810 = vmatmul.bf16.gmra.mxu0 %v2754_v28  ;;  %890 = vmatmul.bf16.gmra.mxu1 %v2770_v29 }
  0x7c   : > { %970 = vmatmul.bf16.gmra.mxu2 %v2786_v30  ;;  %1050 = vmatmul.bf16.gmra.mxu3 %v2802_v31 }
  0x8b   : > { %815 = vmatmul.bf16.gmra.mxu0 %v2755_v32  ;;  %895 = vmatmul.bf16.gmra.mxu1 %v2771_v33 }
  0x8c   : > { %975 = vmatmul.bf16.gmra.mxu2 %v2787_v34  ;;  %1055 = vmatmul.bf16.gmra.mxu3 %v2803_v35 }
  0x9b   : > { %820 = vmatmul.bf16.gmra.mxu0 %v2756_v36  ;;  %900 = vmatmul.bf16.gmra.mxu1 %v2772_v37 }
  0x9c   : > { %980 = vmatmul.bf16.gmra.mxu2 %v2788_v38  ;;  %1060 = vmatmul.bf16.gmra.mxu3 %v2804_v39 }
  0xa8   : > { %v786_v44 = vpop.f32.mrf.mxu0  ;;  %v866_v45 = vpop.f32.mrf.mxu1 }
  0xa9   : > { %v1110_v48 = vmul.f32 %v3864_v40, %v786_v44  ;;  %v1142_v49 = vmul.f32 %v3864_v40, %v866_v45 }
  0xab   : > { %v3878_v50 = vadd.f32 %v3869_v41, %v1110_v48  ;;  %v3881_v51 = vadd.f32 %v3869_v41, %v1142_v49  ;;  %825 = vmatmul.bf16.gmra.mxu0 %v2757_v42  ;;  %905 = vmatmul.bf16.gmra.mxu1 %v2773_v43 }
  0xac   : > { %985 = vmatmul.bf16.gmra.mxu2 %v2789_v46  ;;  %1065 = vmatmul.bf16.gmra.mxu3 %v2805_v47 }
  0xad   : > { %v1370_v52 = vsub.f32 0.0, %v3878_v50  ;;  %v1402_v53 = vsub.f32 0.0, %v3881_v51 }
  0xaf   : > { %v1498_v54 = vmul.f32 1.442695, %v1370_v52  ;;  %v1562_v55 = vmul.f32 1.442695, %v1402_v53  ;;  %v946_v56 = vpop.f32.mrf.mxu2  ;;  %v1026_v57 = vpop.f32.mrf.mxu3 }
  0xb0   : > { %v1174_v58 = vmul.f32 %v3864_v40, %v946_v56  ;;  %v1206_v59 = vmul.f32 %v3864_v40, %v1026_v57  ;;  %v788_v60 = vpop.f32.mrf.mxu0  ;;  %v868_v61 = vpop.f32.mrf.mxu1 }
  0xb1   : > { %3238 = vpow2.f32 %v1498_v54  ;;  %v1111_v62 = vmul.f32 %v3864_v40, %v788_v60  ;;  %v1143_v63 = vmul.f32 %v3864_v40, %v868_v61 }
  0xb2   : > { %3240 = vpow2.f32 %v1562_v55  ;;  %v3890_v0 = vadd.f32 %v3869_v41, %v1174_v58  ;;  %v3893_v1 = vadd.f32 %v3869_v41, %v1206_v59 }
  0xb3   : > { %v3896_v2 = vadd.f32 %v3869_v41, %v1111_v62  ;;  %v3899_v3 = vadd.f32 %v3869_v41, %v1143_v63 }
  0xb4   : > { %v1434_v4 = vsub.f32 0.0, %v3890_v0  ;;  %v1466_v5 = vsub.f32 0.0, %v3893_v1 }
  0xb5   : > { %v1371_v6 = vsub.f32 0.0, %v3896_v2  ;;  %v1403_v7 = vsub.f32 0.0, %v3899_v3 }
  0xb6   : > { %v1626_v8 = vmul.f32 1.442695, %v1434_v4  ;;  %v1690_v9 = vmul.f32 1.442695, %v1466_v5 }
  0xb7   : > { %v3239_v10 = vpop.eup %3238  ;;  %v1500_v11 = vmul.f32 1.442695, %v1371_v6  ;;  %v948_v12 = vpop.f32.mrf.mxu2  ;;  %v1564_v24 = vmul.f32 1.442695, %v1403_v7 }
  0xb8   : > { %v1028_v13 = vpop.f32.mrf.mxu3  ;;  %v3241_v16 = vpop.eup %3240  ;;  %v1754_v17 = vadd.f32 1.0, %v3239_v10  ;;  %3242 = vpow2.f32 %v1626_v8  ;;  %v1175_v18 = vmul.f32 %v3864_v40, %v948_v12 }
  0xb9   : > { %v1207_v19 = vmul.f32 %v3864_v40, %v1028_v13  ;;  %v791_v20 = vpop.f32.mrf.mxu0  ;;  %v871_v21 = vpop.f32.mrf.mxu1  ;;  %3244 = vpow2.f32 %v1690_v9  ;;  %v1786_v27 = vadd.f32 1.0, %v3241_v16 }
  0xba   : > { %v1112_v25 = vmul.f32 %v3864_v40, %v791_v20  ;;  %v1144_v26 = vmul.f32 %v3864_v40, %v871_v21  ;;  %v3914_v28 = vadd.f32 %v3869_v41, %v1175_v18  ;;  %3246 = vrcp.f32 %v1754_v17  ;;  %v2759_v20 = vld [vmem:[%s3827_s11 + $0x50] sm:$0xff] }
  0xbb   : > { %v3917_v29 = vadd.f32 %v3869_v41, %v1207_v19  ;;  %830 = vmatmul.bf16.gmra.mxu0 %v2758_v14  ;;  %910 = vmatmul.bf16.gmra.mxu1 %v2774_v15  ;;  %3248 = vpow2.f32 %v1500_v11  ;;  %v2775_v21 = vld [vmem:[%s3827_s11 + $0xd0] sm:$0xff] }
  0xbc   : > { %v3920_v30 = vadd.f32 %v3869_v41, %v1112_v25  ;;  %v3923_v31 = vadd.f32 %v3869_v41, %v1144_v26  ;;  %v1435_v32 = vsub.f32 0.0, %v3914_v28  ;;  %990 = vmatmul.bf16.gmra.mxu2 %v2790_v22  ;;  %1070 = vmatmul.bf16.gmra.mxu3 %v2806_v23  ;;  %3250 = vpow2.f32 %v1564_v24 }
  0xbd   : > { %v1467_v33 = vsub.f32 0.0, %v3917_v29  ;;  %3252 = vrcp.f32 %v1786_v27  ;;  %v2791_v27 = vld [vmem:[%s3827_s11 + $0x150] sm:$0xff] }
  0xbe   : > { %v1372_v34 = vsub.f32 0.0, %v3920_v30  ;;  %v3243_v35 = vpop.eup %3242  ;;  %v1628_v36 = vmul.f32 1.442695, %v1435_v32  ;;  %v1404_v37 = vsub.f32 0.0, %v3923_v31 }
  0xbf   : > { %v3245_v38 = vpop.eup %3244  ;;  %v1818_v39 = vadd.f32 1.0, %v3243_v35  ;;  %v1692_v42 = vmul.f32 1.442695, %v1467_v33  ;;  %v951_v44 = vpop.f32.mrf.mxu2 }
  0xc0   : > { %v1502_v43 = vmul.f32 1.442695, %v1372_v34  ;;  %v1031_v45 = vpop.f32.mrf.mxu3  ;;  %v1850_v46 = vadd.f32 1.0, %v3245_v38  ;;  %3254 = vpow2.f32 %v1628_v36  ;;  %v1176_v47 = vmul.f32 %v3864_v40, %v951_v44  ;;  %v3247_v53 = vpop.eup %3246 }
  0xc1   : > { %v1208_v48 = vmul.f32 %v3864_v40, %v1031_v45  ;;  %v793_v49 = vpop.f32.mrf.mxu0  ;;  %v873_v52 = vpop.f32.mrf.mxu1  ;;  %3256 = vrcp.f32 %v1818_v39  ;;  %v1566_v57 = vmul.f32 1.442695, %v1404_v37  ;;  %v3950_v11 = vmul.f32 %v3247_v53, %v3878_v50 }
  0xc2   : > { %v1113_v54 = vmul.f32 %v3864_v40, %v793_v49  ;;  %v1145_v55 = vmul.f32 %v3864_v40, %v873_v52  ;;  %v3249_v56 = vpop.eup %3248  ;;  %3258 = vrcp.f32 %v1850_v46  ;;  %v3934_v58 = vadd.f32 %v3869_v41, %v1176_v47 }
  0xc3   : > { %v3937_v59 = vadd.f32 %v3869_v41, %v1208_v48  ;;  %v3251_v60 = vpop.eup %3250  ;;  %v1755_v61 = vadd.f32 1.0, %v3249_v56  ;;  %3260 = vpow2.f32 %v1692_v42 }
  0xc4   : > { %v3940_v62 = vadd.f32 %v3869_v41, %v1113_v54  ;;  %v3943_v63 = vadd.f32 %v3869_v41, %v1145_v55  ;;  %v3253_v4 = vpop.eup %3252  ;;  %v1787_v5 = vadd.f32 1.0, %v3251_v60  ;;  %3262 = vpow2.f32 %v1502_v43 }
  0xc5   : > { %v1436_v6 = vsub.f32 0.0, %v3934_v58  ;;  %v1468_v7 = vsub.f32 0.0, %v3937_v59  ;;  %3264 = vrcp.f32 %v1755_v61  ;;  %v3953_v15 = vmul.f32 %v3253_v4, %v3881_v51  ;;  %v2807_v51 = vld [vmem:[%s3827_s11 + $0x1d0] sm:$0xff] }
  0xc6   : > { %v1373_v8 = vsub.f32 0.0, %v3940_v62  ;;  %v1405_v9 = vsub.f32 0.0, %v3943_v63  ;;  %v3255_v10 = vpop.eup %3254  ;;  %3266 = vrcp.f32 %v1787_v5 }
  0xc7   : > { %v1630_v12 = vmul.f32 1.442695, %v1436_v6  ;;  %v1694_v13 = vmul.f32 1.442695, %v1468_v7  ;;  %v3257_v14 = vpop.eup %3256  ;;  %v1819_v16 = vadd.f32 1.0, %v3255_v10  ;;  %3268 = vpow2.f32 %v1566_v57  ;;  %v953_v18 = vpop.f32.mrf.mxu2 }
  0xc8   : > { %v1504_v17 = vmul.f32 1.442695, %v1373_v8  ;;  %v1033_v19 = vpop.f32.mrf.mxu3  ;;  %v3259_v22 = vpop.eup %3258  ;;  %v1568_v50 = vmul.f32 1.442695, %v1405_v9  ;;  %v1177_v23 = vmul.f32 %v3864_v40, %v953_v18  ;;  %v3962_v33 = vmul.f32 %v3257_v14, %v3890_v0 }
  0xc9   : > { %3270 = vpow2.f32 %v1630_v12  ;;  %v1209_v24 = vmul.f32 %v3864_v40, %v1033_v19  ;;  %v796_v25 = vpop.f32.mrf.mxu0  ;;  %v876_v26 = vpop.f32.mrf.mxu1  ;;  %v2106_v52 = vmul.f32 %v3259_v22, %v3893_v1 }
  0xca   : > { %v3261_v32 = vpop.eup %3260  ;;  %3272 = vrcp.f32 %v1819_v16  ;;  %v1114_v34 = vmul.f32 %v3864_v40, %v796_v25  ;;  %v1146_v35 = vmul.f32 %v3864_v40, %v876_v26  ;;  %v3967_v38 = vadd.f32 %v3869_v41, %v1177_v23 }
  0xcb   : > { %v3263_v36 = vpop.eup %3262  ;;  %v1851_v37 = vadd.f32 1.0, %v3261_v32  ;;  %3274 = vpow2.f32 %v1694_v13  ;;  %v3970_v39 = vadd.f32 %v3869_v41, %v1209_v24  ;;  %835 = vmatmul.bf16.gmra.mxu0 %v2759_v20  ;;  %915 = vmatmul.bf16.gmra.mxu1 %v2775_v21 }
  0xcc   : > { %v3265_v42 = vpop.eup %3264  ;;  %v1756_v43 = vadd.f32 1.0, %v3263_v36  ;;  %3276 = vpow2.f32 %v1504_v17  ;;  %v3973_v0 = vadd.f32 %v3869_v41, %v1114_v34  ;;  %v3976_v44 = vadd.f32 %v3869_v41, %v1146_v35  ;;  %995 = vmatmul.bf16.gmra.mxu2 %v2791_v27  ;;  %1075 = vmatmul.bf16.gmra.mxu3 %v2807_v51 }
  0xcd   : > { %v3267_v45 = vpop.eup %3266  ;;  %v2011_v46 = vmul.f32 %v3265_v42, %v3896_v2  ;;  %3278 = vrcp.f32 %v1851_v37  ;;  %v1437_v47 = vsub.f32 0.0, %v3967_v38  ;;  %v1469_v48 = vsub.f32 0.0, %v3970_v39 }
  0xce   : > { %v3269_v49 = vpop.eup %3268  ;;  %v2043_v53 = vmul.f32 %v3267_v45, %v3899_v3  ;;  %3280 = vrcp.f32 %v1756_v43  ;;  %v1374_v2 = vsub.f32 0.0, %v3973_v0  ;;  %v1406_v5 = vsub.f32 0.0, %v3976_v44 }
  0xcf   : > { %v3271_v54 = vpop.eup %3270  ;;  %v2824_v55 = vpack.c.bf16 %v2011_v46, %v3950_v11  ;;  %v1788_v56 = vadd.f32 1.0, %v3269_v49  ;;  %3282 = vpow2.f32 %v1568_v50  ;;  %v1632_v57 = vmul.f32 1.442695, %v1437_v47  ;;  %v956_v6 = vpop.f32.mrf.mxu2  ;;  %v2760_v47 = vld [vmem:[%s3827_s11 + $0x58] sm:$0xff] }
  0xd0   : > { %v3273_v60 = vpop.eup %3272  ;;  %v2904_v1 = vpack.c.bf16 %v2043_v53, %v3953_v15  ;;  %v1820_v61 = vadd.f32 1.0, %v3271_v54  ;;  %v1696_v4 = vmul.f32 1.442695, %v1469_v48  ;;  %v1036_v3 = vpop.f32.mrf.mxu3  ;;  %v1506_v9 = vmul.f32 1.442695, %v1374_v2  ;;  %v2776_v48 = vld [vmem:[%s3827_s11 + $0xd8] sm:$0xff] }
  0xd1   : > { %v3275_v7 = vpop.eup %3274  ;;  %2825 = vst [vmem:[%s3987_s19] sm:$0xff] %v2824_v55   ;;  %v2075_v8 = vmul.f32 %v3273_v60, %v3914_v28  ;;  %3284 = vrcp.f32 %v1788_v56  ;;  %v1178_v10 = vmul.f32 %v3864_v40, %v956_v6  ;;  %v798_v11 = vpop.f32.mrf.mxu0  ;;  %v1210_v15 = vmul.f32 %v3864_v40, %v1036_v3  ;;  %v2792_v55 = vld [vmem:[%s3827_s11 + $0x158] sm:$0xff] }
  0xd2   : > { %v878_v12 = vpop.f32.mrf.mxu1  ;;  %v3277_v13 = vpop.eup %3276  ;;  %3156 = vst [vmem:[%s3987_s19 + $0x80] sm:$0xff] %v2904_v1   ;;  %3286 = vrcp.f32 %v1820_v61  ;;  %v1852_v14 = vadd.f32 1.0, %v3275_v7  ;;  %v1115_v16 = vmul.f32 %v3864_v40, %v798_v11  ;;  %v1570_v24 = vmul.f32 1.442695, %v1406_v5  ;;  %v2808_v56 = vld [vmem:[%s3827_s11 + $0x1d8] sm:$0xff] }
  0xd3   : > { %v3279_v17 = vpop.eup %3278  ;;  %v2984_v18 = vpack.c.bf16 %v2075_v8, %v3962_v33  ;;  %v1757_v19 = vadd.f32 1.0, %v3277_v13  ;;  %3288 = vpow2.f32 %v1632_v57  ;;  %v4002_v28 = vadd.f32 %v3869_v41, %v1178_v10 }
  0xd4   : > { %v3281_v20 = vpop.eup %3280  ;;  %v2107_v21 = vmul.f32 %v3279_v17, %v3917_v29  ;;  %3290 = vrcp.f32 %v1852_v14  ;;  %v4006_v22 = vadd.f32 %v3869_v41, %v1210_v15  ;;  %v4009_v50 = vadd.f32 %v3869_v41, %v1115_v16 }
  0xd5   : > { %v3283_v23 = vpop.eup %3282  ;;  %3172 = vst [vmem:[%s3987_s19 + $0x100] sm:$0xff] %v2984_v18   ;;  %3292 = vrcp.f32 %v1757_v19  ;;  %v1438_v25 = vsub.f32 0.0, %v4002_v28  ;;  %v1147_v26 = vmul.f32 %v3864_v40, %v878_v12  ;;  %v2012_v37 = vmul.f32 %v3281_v20, %v3920_v30 }
  0xd6   : > { %v3064_v27 = vpack.c.bf16 %v2107_v21, %v2106_v52  ;;  %v1789_v51 = vadd.f32 1.0, %v3283_v23  ;;  %3294 = vpow2.f32 %v1696_v4  ;;  %v1470_v29 = vsub.f32 0.0, %v4006_v22 }
  0xd7   : > { %v3285_v32 = vpop.eup %3284  ;;  %3296 = vpow2.f32 %v1506_v9  ;;  %v1634_v33 = vmul.f32 1.442695, %v1438_v25  ;;  %v1375_v34 = vsub.f32 0.0, %v4009_v50  ;;  %v4017_v35 = vadd.f32 %v3869_v41, %v1147_v26  ;;  %v958_v45 = vpop.f32.mrf.mxu2 }
  0xd8   : > { %v3287_v36 = vpop.eup %3286  ;;  %3188 = vst [vmem:[%s3987_s19 + $0x180] sm:$0xff] %v3064_v27   ;;  %v4022_v42 = vmul.f32 %v3285_v32, %v3923_v31  ;;  %3298 = vrcp.f32 %v1789_v51  ;;  %v1698_v43 = vmul.f32 1.442695, %v1470_v29  ;;  %v1038_v46 = vpop.f32.mrf.mxu3  ;;  %v1179_v60 = vmul.f32 %v3864_v40, %v958_v45 }
  0xd9   : > { %v3289_v49 = vpop.eup %3288  ;;  %v4027_v52 = vmul.f32 %v3287_v36, %v3934_v58  ;;  %3300 = vpow2.f32 %v1570_v24  ;;  %v1508_v53 = vmul.f32 1.442695, %v1375_v34  ;;  %v1407_v2 = vsub.f32 0.0, %v4017_v35  ;;  %v801_v54 = vpop.f32.mrf.mxu0 }
  0xda   : > { %v881_v30 = vpop.f32.mrf.mxu1  ;;  %v3291_v31 = vpop.eup %3290  ;;  %v1821_v57 = vadd.f32 1.0, %v3289_v49  ;;  %3302 = vpow2.f32 %v1634_v33  ;;  %v1211_v1 = vmul.f32 %v3864_v40, %v1038_v46  ;;  %v1116_v5 = vmul.f32 %v3864_v40, %v801_v54 }
  0xdb   : > { %v3293_v61 = vpop.eup %3292  ;;  %v4035_v4 = vmul.f32 %v3291_v31, %v3937_v59  ;;  %3304 = vpow2.f32 %v1698_v43  ;;  %v1572_v58 = vmul.f32 1.442695, %v1407_v2  ;;  %v4040_v7 = vadd.f32 %v3869_v41, %v1179_v60  ;;  %840 = vmatmul.bf16.gmra.mxu0 %v2760_v47  ;;  %920 = vmatmul.bf16.gmra.mxu1 %v2776_v48 }
  0xdc   : > { %v3295_v6 = vpop.eup %3294  ;;  %v2013_v3 = vmul.f32 %v3293_v61, %v3940_v62  ;;  %3306 = vrcp.f32 %v1821_v57  ;;  %v4043_v8 = vadd.f32 %v3869_v41, %v1211_v1  ;;  %v4046_v59 = vadd.f32 %v3869_v41, %v1116_v5  ;;  %1000 = vmatmul.bf16.gmra.mxu2 %v2792_v55  ;;  %1080 = vmatmul.bf16.gmra.mxu3 %v2808_v56 }
  0xdd   : > { %v3297_v9 = vpop.eup %3296  ;;  %v1853_v10 = vadd.f32 1.0, %v3295_v6  ;;  %3308 = vpow2.f32 %v1508_v53  ;;  %v1148_v11 = vmul.f32 %v3864_v40, %v881_v30  ;;  %v1439_v14 = vsub.f32 0.0, %v4040_v7 }
  0xde   : > { %v3299_v62 = vpop.eup %3298  ;;  %v2829_v12 = vpack.c.bf16 %v2013_v3, %v2012_v37  ;;  %v1758_v13 = vadd.f32 1.0, %v3297_v9  ;;  %3310 = vpow2.f32 %v1572_v58  ;;  %v1471_v17 = vsub.f32 0.0, %v4043_v8 }
  0xdf   : > { %v3301_v15 = vpop.eup %3300  ;;  %v2045_v16 = vmul.f32 %v3299_v62, %v3943_v63  ;;  %3312 = vrcp.f32 %v1853_v10  ;;  %v1376_v18 = vsub.f32 0.0, %v4046_v59  ;;  %v1636_v21 = vmul.f32 1.442695, %v1439_v14  ;;  %v961_v24 = vpop.f32.mrf.mxu2  ;;  %v2761_v10 = vld [vmem:[%s3827_s11 + $0x60] sm:$0xff] }
  0xe0   : > { %v3303_v19 = vpop.eup %3302  ;;  %3141 = vst [vmem:[%s3987_s19 + $0x8] sm:$0xff] %v2829_v12   ;;  %3314 = vrcp.f32 %v1758_v13  ;;  %v1790_v20 = vadd.f32 1.0, %v3301_v15  ;;  %v4055_v23 = vadd.f32 %v3869_v41, %v1148_v11  ;;  %v1041_v25 = vpop.f32.mrf.mxu3  ;;  %v1700_v51 = vmul.f32 1.442695, %v1471_v17  ;;  %v2793_v15 = vld [vmem:[%s3827_s11 + $0x160] sm:$0xff] }
  0xe1   : > { %v3305_v26 = vpop.eup %3304  ;;  %v2909_v27 = vpack.c.bf16 %v2045_v16, %v4022_v42  ;;  %v1822_v63 = vadd.f32 1.0, %v3303_v19  ;;  %v1510_v29 = vmul.f32 1.442695, %v1376_v18  ;;  %v803_v32 = vpop.f32.mrf.mxu0  ;;  %v1180_v43 = vmul.f32 %v3864_v40, %v961_v24  ;;  %v2809_v16 = vld [vmem:[%s3827_s11 + $0x1e0] sm:$0xff] }
  0xe2   : > { %v883_v33 = vpop.f32.mrf.mxu1  ;;  %v3307_v34 = vpop.eup %3306  ;;  %3316 = vrcp.f32 %v1790_v20  ;;  %v1854_v36 = vadd.f32 1.0, %v3305_v26  ;;  %v1408_v37 = vsub.f32 0.0, %v4055_v23  ;;  %v1212_v47 = vmul.f32 %v3864_v40, %v1041_v25 }
  0xe3   : > { %v3309_v45 = vpop.eup %3308  ;;  %3157 = vst [vmem:[%s3987_s19 + $0x88] sm:$0xff] %v2909_v27   ;;  %v2077_v46 = vmul.f32 %v3307_v34, %v3967_v38  ;;  %3318 = vrcp.f32 %v1822_v63  ;;  %v1117_v42 = vmul.f32 %v3864_v40, %v803_v32  ;;  %v4065_v2 = vadd.f32 %v3869_v41, %v1180_v43 }
  0xe4   : > { %v3311_v48 = vpop.eup %3310  ;;  %3320 = vrcp.f32 %v1854_v36  ;;  %v1759_v49 = vadd.f32 1.0, %v3309_v45  ;;  %v1574_v53 = vmul.f32 1.442695, %v1408_v37  ;;  %v4069_v38 = vadd.f32 %v3869_v41, %v1212_v47 }
  0xe5   : > { %v3313_v54 = vpop.eup %3312  ;;  %v2989_v30 = vpack.c.bf16 %v2077_v46, %v4027_v52  ;;  %v1791_v55 = vadd.f32 1.0, %v3311_v48  ;;  %3322 = vpow2.f32 %v1636_v21  ;;  %v1440_v57 = vsub.f32 0.0, %v4065_v2 }
  0xe6   : > { %v3315_v56 = vpop.eup %3314  ;;  %v2109_v31 = vmul.f32 %v3313_v54, %v3970_v39  ;;  %3324 = vrcp.f32 %v1759_v49  ;;  %v4074_v60 = vadd.f32 %v3869_v41, %v1117_v42  ;;  %v1472_v52 = vsub.f32 0.0, %v4069_v38 }
  0xe7   : > { %3173 = vst [vmem:[%s3987_s19 + $0x108] sm:$0xff] %v2989_v30   ;;  %v4078_v1 = vmul.f32 %v3315_v56, %v3973_v0  ;;  %3326 = vrcp.f32 %v1791_v55  ;;  %v1149_v61 = vmul.f32 %v3864_v40, %v883_v33  ;;  %v1638_v5 = vmul.f32 1.442695, %v1440_v57  ;;  %v963_v3 = vpop.f32.mrf.mxu2  ;;  %v2777_v0 = vld [vmem:[%s3827_s11 + $0xe0] sm:$0xff] }
  0xe8   : > { %v3317_v58 = vpop.eup %3316  ;;  %v3069_v39 = vpack.c.bf16 %v2109_v31, %v4035_v4  ;;  %3328 = vpow2.f32 %v1700_v51  ;;  %v1377_v6 = vsub.f32 0.0, %v4074_v60  ;;  %v1043_v9 = vpop.f32.mrf.mxu3  ;;  %v1702_v12 = vmul.f32 1.442695, %v1472_v52 }
  0xe9   : > { %v3319_v11 = vpop.eup %3318  ;;  %v2046_v62 = vmul.f32 %v3317_v58, %v3976_v44  ;;  %3330 = vpow2.f32 %v1510_v29  ;;  %v4088_v13 = vadd.f32 %v3869_v41, %v1149_v61  ;;  %v806_v14 = vpop.f32.mrf.mxu0  ;;  %v1181_v20 = vmul.f32 %v3864_v40, %v963_v3 }
  0xea   : > { %v886_v4 = vpop.f32.mrf.mxu1  ;;  %v3321_v17 = vpop.eup %3320  ;;  %3189 = vst [vmem:[%s3987_s19 + $0x188] sm:$0xff] %v3069_v39   ;;  %v4094_v18 = vmul.f32 %v3319_v11, %v4002_v28  ;;  %3332 = vpow2.f32 %v1574_v53  ;;  %v1512_v19 = vmul.f32 1.442695, %v1377_v6  ;;  %v1213_v25 = vmul.f32 %v3864_v40, %v1043_v9 }
  0xeb   : > { %v3323_v21 = vpop.eup %3322  ;;  %v4098_v44 = vmul.f32 %v3321_v17, %v4006_v22  ;;  %3334 = vpow2.f32 %v1638_v5  ;;  %v1409_v24 = vsub.f32 0.0, %v4088_v13  ;;  %v4103_v63 = vadd.f32 %v3869_v41, %v1181_v20  ;;  %845 = vmatmul.bf16.gmra.mxu0 %v2761_v10  ;;  %925 = vmatmul.bf16.gmra.mxu1 %v2777_v0 }
  0xec   : > { %v3325_v26 = vpop.eup %3324  ;;  %v1823_v27 = vadd.f32 1.0, %v3323_v21  ;;  %3336 = vpow2.f32 %v1702_v12  ;;  %v1118_v28 = vmul.f32 %v3864_v40, %v806_v14  ;;  %v4108_v32 = vadd.f32 %v3869_v41, %v1213_v25  ;;  %1005 = vmatmul.bf16.gmra.mxu2 %v2793_v15  ;;  %1085 = vmatmul.bf16.gmra.mxu3 %v2809_v16 }
  0xed   : > { %v3327_v51 = vpop.eup %3326  ;;  %v2015_v29 = vmul.f32 %v3325_v26, %v4009_v50  ;;  %3338 = vpow2.f32 %v1512_v19  ;;  %v1576_v22 = vmul.f32 1.442695, %v1409_v24  ;;  %v1441_v36 = vsub.f32 0.0, %v4103_v63 }
  0xee   : > { %v3329_v33 = vpop.eup %3328  ;;  %v2047_v34 = vmul.f32 %v3327_v51, %v4017_v35  ;;  %3340 = vrcp.f32 %v1823_v27  ;;  %v4113_v37 = vadd.f32 %v3869_v41, %v1118_v28  ;;  %v1473_v46 = vsub.f32 0.0, %v4108_v32 }
  0xef   : > { %v3331_v43 = vpop.eup %3330  ;;  %v2834_v50 = vpack.c.bf16 %v2015_v29, %v4078_v1  ;;  %v1855_v45 = vadd.f32 1.0, %v3329_v33  ;;  %3342 = vpow2.f32 %v1576_v22  ;;  %v1640_v49 = vmul.f32 1.442695, %v1441_v36  ;;  %v966_v53 = vpop.f32.mrf.mxu2  ;;  %v2762_v22 = vld [vmem:[%s3827_s11 + $0x68] sm:$0xff] }
  0xf0   : > { %v3333_v47 = vpop.eup %3332  ;;  %v2914_v42 = vpack.c.bf16 %v2047_v34, %v2046_v62  ;;  %v1760_v48 = vadd.f32 1.0, %v3331_v43  ;;  %v1378_v35 = vsub.f32 0.0, %v4113_v37  ;;  %v1046_v54 = vpop.f32.mrf.mxu3  ;;  %v1704_v56 = vmul.f32 1.442695, %v1473_v46 }
  0xf1   : > { %v3335_v30 = vpop.eup %3334  ;;  %3142 = vst [vmem:[%s3987_s19 + $0x10] sm:$0xff] %v2834_v50   ;;  %3344 = vrcp.f32 %v1855_v45  ;;  %v1792_v55 = vadd.f32 1.0, %v3333_v47  ;;  %v1150_v31 = vmul.f32 %v3864_v40, %v886_v4  ;;  %v808_v57 = vpop.f32.mrf.mxu0  ;;  %v1182_v39 = vmul.f32 %v3864_v40, %v966_v53  ;;  %v2778_v50 = vld [vmem:[%s3827_s11 + $0xe8] sm:$0xff] }
  0xf2   : > { %v888_v1 = vpop.f32.mrf.mxu1  ;;  %v3337_v52 = vpop.eup %3336  ;;  %3158 = vst [vmem:[%s3987_s19 + $0x90] sm:$0xff] %v2914_v42   ;;  %3346 = vrcp.f32 %v1760_v48  ;;  %v1824_v61 = vadd.f32 1.0, %v3335_v30  ;;  %v1514_v58 = vmul.f32 1.442695, %v1378_v35  ;;  %v1214_v9 = vmul.f32 %v3864_v40, %v1046_v54  ;;  %v2794_v45 = vld [vmem:[%s3827_s11 + $0x168] sm:$0xff] }
  0xf3   : > { %v3339_v5 = vpop.eup %3338  ;;  %3348 = vrcp.f32 %v1792_v55  ;;  %v1856_v6 = vadd.f32 1.0, %v3337_v52  ;;  %v4123_v3 = vadd.f32 %v3869_v41, %v1150_v31  ;;  %v4127_v11 = vadd.f32 %v3869_v41, %v1182_v39 }
  0xf4   : > { %v3341_v10 = vpop.eup %3340  ;;  %3350 = vrcp.f32 %v1824_v61  ;;  %v1761_v0 = vadd.f32 1.0, %v3339_v5  ;;  %v1119_v62 = vmul.f32 %v3864_v40, %v808_v57  ;;  %v4133_v15 = vadd.f32 %v3869_v41, %v1214_v9 }
  0xf5   : > { %v3343_v12 = vpop.eup %3342  ;;  %v2079_v14 = vmul.f32 %v3341_v10, %v4040_v7  ;;  %3352 = vrcp.f32 %v1856_v6  ;;  %v1410_v4 = vsub.f32 0.0, %v4123_v3  ;;  %v1442_v17 = vsub.f32 0.0, %v4127_v11 }
  0xf6   : > { %3354 = vrcp.f32 %v1761_v0  ;;  %v1793_v16 = vadd.f32 1.0, %v3343_v12  ;;  %v4137_v19 = vadd.f32 %v3869_v41, %v1119_v62  ;;  %v1474_v24 = vsub.f32 0.0, %v4133_v15 }
  0xf7   : > { %v3345_v20 = vpop.eup %3344  ;;  %v2994_v21 = vpack.c.bf16 %v2079_v14, %v4094_v18  ;;  %3356 = vpow2.f32 %v1640_v49  ;;  %v1578_v7 = vmul.f32 1.442695, %v1410_v4  ;;  %v1642_v27 = vmul.f32 1.442695, %v1442_v17  ;;  %v968_v51 = vpop.f32.mrf.mxu2  ;;  %v2810_v49 = vld [vmem:[%s3827_s11 + $0x1e8] sm:$0xff] }
  0xf8   : > { %v3347_v25 = vpop.eup %3346  ;;  %v2111_v26 = vmul.f32 %v3345_v20, %v4043_v8  ;;  %3358 = vrcp.f32 %v1793_v16  ;;  %v1379_v28 = vsub.f32 0.0, %v4137_v19  ;;  %v1048_v29 = vpop.f32.mrf.mxu3  ;;  %v1706_v34 = vmul.f32 1.442695, %v1474_v24 }
  0xf9   : > { %v3349_v33 = vpop.eup %3348  ;;  %3174 = vst [vmem:[%s3987_s19 + $0x110] sm:$0xff] %v2994_v21   ;;  %v2016_v18 = vmul.f32 %v3347_v25, %v4046_v59  ;;  %3360 = vpow2.f32 %v1704_v56  ;;  %v1151_v36 = vmul.f32 %v3864_v40, %v888_v1  ;;  %v811_v43 = vpop.f32.mrf.mxu0  ;;  %v1183_v54 = vmul.f32 %v3864_v40, %v968_v51 }
  0xfa   : > { %v4147_v8 = vpop.f32.mrf.mxu1  ;;  %v3351_v46 = vpop.eup %3350  ;;  %v3074_v47 = vpack.c.bf16 %v2111_v26, %v4098_v44  ;;  %v2048_v42 = vmul.f32 %v3349_v33, %v4055_v23  ;;  %3362 = vpow2.f32 %v1514_v58  ;;  %v1516_v48 = vmul.f32 1.442695, %v1379_v28 }
  0xfb   : > { %v3353_v35 = vpop.eup %3352  ;;  %v4155_v59 = vmul.f32 %v3351_v46, %v4065_v2  ;;  %3364 = vpow2.f32 %v1578_v7  ;;  %v4158_v53 = vadd.f32 %v3869_v41, %v1151_v36  ;;  %v1215_v23 = vmul.f32 %v3864_v40, %v1048_v29  ;;  %850 = vmatmul.bf16.gmra.mxu0 %v2762_v22  ;;  %930 = vmatmul.bf16.gmra.mxu1 %v2778_v50 }
  0xfc   : > { %v3355_v30 = vpop.eup %3354  ;;  %3190 = vst [vmem:[%s3987_s19 + $0x190] sm:$0xff] %v3074_v47   ;;  %v4163_v55 = vmul.f32 %v3353_v35, %v4069_v38  ;;  %3366 = vpow2.f32 %v1642_v27  ;;  %v1120_v44 = vmul.f32 %v3864_v40, %v811_v43  ;;  %v4170_v57 = vadd.f32 %v3869_v41, %v1183_v54  ;;  %1010 = vmatmul.bf16.gmra.mxu2 %v2794_v45 }
  0xfd   : > { %v3357_v56 = vpop.eup %3356  ;;  %v2017_v2 = vmul.f32 %v3355_v30, %v4074_v60  ;;  %3368 = vpow2.f32 %v1706_v34  ;;  %v1411_v31 = vsub.f32 0.0, %v4158_v53  ;;  %v4173_v52 = vadd.f32 %v3869_v41, %v1215_v23  ;;  %1090 = vmatmul.bf16.gmra.mxu3 %v2810_v49 }
  0xfe   : > { %v3359_v1 = vpop.eup %3358  ;;  %v1825_v38 = vadd.f32 1.0, %v3357_v56  ;;  %3370 = vpow2.f32 %v1516_v48  ;;  %v4176_v61 = vadd.f32 %v3869_v41, %v1120_v44  ;;  %v1443_v6 = vsub.f32 0.0, %v4170_v57 }
  0xff   : > { %v3361_v60 = vpop.eup %3360  ;;  %v2839_v58 = vpack.c.bf16 %v2017_v2, %v2016_v18  ;;  %v2049_v39 = vmul.f32 %v3359_v1, %v4088_v13  ;;  %v1580_v5 = vmul.f32 1.442695, %v1411_v31  ;;  %v1475_v0 = vsub.f32 0.0, %v4173_v52  ;;  %v971_v12 = vpop.f32.mrf.mxu2 }
 0x100   : > { %v3363_v9 = vpop.eup %3362  ;;  %3372 = vrcp.f32 %v1825_v38  ;;  %v1857_v10 = vadd.f32 1.0, %v3361_v60  ;;  %v1380_v62 = vsub.f32 0.0, %v4176_v61  ;;  %v1051_v14 = vpop.f32.mrf.mxu3  ;;  %v1644_v20 = vmul.f32 1.442695, %v1443_v6 }
 0x101   : > { %v3365_v4 = vpop.eup %3364  ;;  %3143 = vst [vmem:[%s3987_s19 + $0x18] sm:$0xff] %v2839_v58   ;;  %v2919_v16 = vpack.c.bf16 %v2049_v39, %v2048_v42  ;;  %v1762_v17 = vadd.f32 1.0, %v3363_v9  ;;  %3374 = vpow2.f32 %v1580_v5  ;;  %v813_v13 = vpop.f32.mrf.mxu0  ;;  %v1708_v25 = vmul.f32 1.442695, %v1475_v0  ;;  %v2779_v58 = vld [vmem:[%s3827_s11 + $0xf0] sm:$0xff] }
 0x102   : > { %v893_v21 = vpop.f32.mrf.mxu1  ;;  %v3367_v7 = vpop.eup %3366  ;;  %3376 = vrcp.f32 %v1857_v10  ;;  %v1794_v24 = vadd.f32 1.0, %v3365_v4  ;;  %v1518_v26 = vmul.f32 1.442695, %v1380_v62  ;;  %v1152_v51 = vmul.f32 %v3864_v40, %v4147_v8  ;;  %v2795_v10 = vld [vmem:[%s3827_s11 + $0x170] sm:$0xff] }
 0x103   : > { %v3369_v27 = vpop.eup %3368  ;;  %3159 = vst [vmem:[%s3987_s19 + $0x98] sm:$0xff] %v2919_v16   ;;  %3378 = vrcp.f32 %v1762_v17  ;;  %v1826_v28 = vadd.f32 1.0, %v3367_v7  ;;  %v1184_v29 = vmul.f32 %v3864_v40, %v971_v12  ;;  %v1216_v18 = vmul.f32 %v3864_v40, %v1051_v14  ;;  %v2811_v0 = vld [vmem:[%s3827_s11 + $0x1f0] sm:$0xff] }
 0x104   : > { %v3371_v22 = vpop.eup %3370  ;;  %3380 = vrcp.f32 %v1794_v24  ;;  %v1858_v33 = vadd.f32 1.0, %v3369_v27  ;;  %v1121_v34 = vmul.f32 %v3864_v40, %v813_v13  ;;  %v4190_v43 = vadd.f32 %v3869_v41, %v1152_v51 }
 0x105   : > { %3382 = vrcp.f32 %v1826_v28  ;;  %v1763_v36 = vadd.f32 1.0, %v3371_v22  ;;  %v4193_v50 = vadd.f32 %v3869_v41, %v1184_v29  ;;  %v4196_v8 = vadd.f32 %v3869_v41, %v1216_v18 }
 0x106   : > { %v3373_v45 = vpop.eup %3372  ;;  %3384 = vrcp.f32 %v1858_v33  ;;  %v4199_v46 = vadd.f32 %v3869_v41, %v1121_v34  ;;  %v1153_v47 = vmul.f32 %v3864_v40, %v893_v21  ;;  %v1412_v49 = vsub.f32 0.0, %v4190_v43  ;;  %v2763_v40 = vld [vmem:[%s3827_s11 + $0x70] sm:$0xff] }
 0x107   : > { %v3375_v42 = vpop.eup %3374  ;;  %v2081_v48 = vmul.f32 %v3373_v45, %v4103_v63  ;;  %3386 = vrcp.f32 %v1763_v36  ;;  %v1444_v35 = vsub.f32 0.0, %v4193_v50  ;;  %v1476_v23 = vsub.f32 0.0, %v4196_v8  ;;  %v973_v41 = vpop.f32.mrf.mxu2 }
 0x108   : > { %v3377_v54 = vpop.eup %3376  ;;  %v1795_v30 = vadd.f32 1.0, %v3375_v42  ;;  %3388 = vpow2.f32 %v1644_v20  ;;  %v1381_v44 = vsub.f32 0.0, %v4199_v46  ;;  %v1053_v56 = vpop.f32.mrf.mxu3  ;;  %v1582_v1 = vmul.f32 1.442695, %v1412_v49 }
 0x109   : > { %v3379_v2 = vpop.eup %3378  ;;  %v2999_v63 = vpack.c.bf16 %v2081_v48, %v4155_v59  ;;  %v2113_v31 = vmul.f32 %v3377_v54, %v4108_v32  ;;  %3390 = vpow2.f32 %v1708_v25  ;;  %v816_v38 = vpop.f32.mrf.mxu0  ;;  %v1646_v6 = vmul.f32 1.442695, %v1444_v35 }
 0x10a   : > { %v896_v60 = vpop.f32.mrf.mxu1  ;;  %v3381_v39 = vpop.eup %3380  ;;  %v2018_v5 = vmul.f32 %v3379_v2, %v4113_v37  ;;  %3392 = vrcp.f32 %v1795_v30  ;;  %v1710_v9 = vmul.f32 1.442695, %v1476_v23  ;;  %v1520_v12 = vmul.f32 1.442695, %v1381_v44  ;;  %v4223_v37 = vld [vmem:[%s4906_s3] ss:$0 sm:$0xff] }
 0x10b   : > { %v3383_v62 = vpop.eup %3382  ;;  %3175 = vst [vmem:[%s3987_s19 + $0x118] sm:$0xff] %v2999_v63   ;;  %v3079_v59 = vpack.c.bf16 %v2113_v31, %v4163_v55  ;;  %v2050_v32 = vmul.f32 %v3381_v39, %v4123_v3  ;;  %3394 = vpow2.f32 %v1518_v26  ;;  %v4226_v16 = vadd.f32 %v4223_v37, %v1153_v47  ;;  %v4231_v55 = vld [vmem:[%s4905_s2] ss:$0 sm:$0xff]  ;;  %855 = vmatmul.bf16.gmra.mxu0 %v2763_v40 }
 0x10c   : > { %v3385_v14 = vpop.eup %3384  ;;  %v4218_v4 = vmul.f32 %v3383_v62, %v4127_v11  ;;  %3396 = vpow2.f32 %v1582_v1  ;;  %v1185_v3 = vmul.f32 %v4231_v55, %v973_v41  ;;  %v1217_v20 = vmul.f32 %v4231_v55, %v1053_v56  ;;  %935 = vmatmul.bf16.gmra.mxu1 %v2779_v58  ;;  %1015 = vmatmul.bf16.gmra.mxu2 %v2795_v10 }
 0x10d   : > { %v3387_v17 = vpop.eup %3386  ;;  %3191 = vst [vmem:[%s3987_s19 + $0x198] sm:$0xff] %v3079_v59   ;;  %v4236_v11 = vmul.f32 %v3385_v14, %v4133_v15  ;;  %3398 = vpow2.f32 %v1646_v6  ;;  %v1122_v13 = vmul.f32 %v4231_v55, %v816_v38  ;;  %v1413_v24 = vsub.f32 0.0, %v4226_v16  ;;  %1095 = vmatmul.bf16.gmra.mxu3 %v2811_v0 }
 0x10e   : > { %v3389_v21 = vpop.eup %3388  ;;  %v2019_v7 = vmul.f32 %v3387_v17, %v4137_v19  ;;  %3400 = vpow2.f32 %v1710_v9  ;;  %v4243_v25 = vadd.f32 %v4223_v37, %v1185_v3  ;;  %v4246_v27 = vadd.f32 %v4223_v37, %v1217_v20  ;;  %v2764_v20 = vld [vmem:[%s3827_s11 + $0x78] sm:$0xff] }
 0x10f   : > { %v3391_v26 = vpop.eup %3390  ;;  %v1827_v15 = vadd.f32 1.0, %v3389_v21  ;;  %3402 = vpow2.f32 %v1520_v12  ;;  %v4249_v28 = vadd.f32 %v4223_v37, %v1122_v13  ;;  %v1584_v22 = vmul.f32 1.442695, %v1413_v24  ;;  %v976_v18 = vpop.f32.mrf.mxu2 }
 0x110   : > { %v3393_v51 = vpop.eup %3392  ;;  %v2844_v19 = vpack.c.bf16 %v2019_v7, %v2018_v5  ;;  %v1859_v29 = vadd.f32 1.0, %v3391_v26  ;;  %v1445_v33 = vsub.f32 0.0, %v4243_v25  ;;  %v1056_v34 = vpop.f32.mrf.mxu3  ;;  %v1477_v47 = vsub.f32 0.0, %v4246_v27 }
 0x111   : > { %v3395_v36 = vpop.eup %3394  ;;  %v2051_v45 = vmul.f32 %v3393_v51, %v4158_v53  ;;  %3404 = vrcp.f32 %v1827_v15  ;;  %v1382_v42 = vsub.f32 0.0, %v4249_v28  ;;  %v818_v48 = vpop.f32.mrf.mxu0  ;;  %v1154_v23 = vmul.f32 %v4231_v55, %v896_v60  ;;  %v2780_v15 = vld [vmem:[%s3827_s11 + $0xf8] sm:$0xff] }
 0x112   : > { %v898_v49 = vpop.f32.mrf.mxu1  ;;  %v3397_v35 = vpop.eup %3396  ;;  %3144 = vst [vmem:[%s3987_s19 + $0x20] sm:$0xff] %v2844_v19   ;;  %3406 = vrcp.f32 %v1859_v29  ;;  %v1764_v54 = vadd.f32 1.0, %v3395_v36  ;;  %v1648_v30 = vmul.f32 1.442695, %v1445_v33  ;;  %v1712_v53 = vmul.f32 1.442695, %v1477_v47 }
 0x113   : > { %v3399_v44 = vpop.eup %3398  ;;  %v2924_v41 = vpack.c.bf16 %v2051_v45, %v2050_v32  ;;  %v1796_v56 = vadd.f32 1.0, %v3397_v35  ;;  %3408 = vpow2.f32 %v1584_v22  ;;  %v1522_v63 = vmul.f32 1.442695, %v1382_v42  ;;  %v2796_v33 = vld [vmem:[%s3827_s11 + $0x178] sm:$0xff] }
 0x114   : > { %v3401_v40 = vpop.eup %3400  ;;  %3410 = vrcp.f32 %v1764_v54  ;;  %v1828_v2 = vadd.f32 1.0, %v3399_v44  ;;  %v4258_v31 = vadd.f32 %v4223_v37, %v1154_v23  ;;  %v1186_v58 = vmul.f32 %v4231_v55, %v976_v18 }
 0x115   : > { %v3403_v1 = vpop.eup %3402  ;;  %3160 = vst [vmem:[%s3987_s19 + $0xa0] sm:$0xff] %v2924_v41   ;;  %3412 = vrcp.f32 %v1796_v56  ;;  %v1860_v38 = vadd.f32 1.0, %v3401_v40  ;;  %v1218_v60 = vmul.f32 %v4231_v55, %v1056_v34  ;;  %v1123_v6 = vmul.f32 %v4231_v55, %v818_v48 }
 0x116   : > { %3414 = vrcp.f32 %v1828_v2  ;;  %v1765_v39 = vadd.f32 1.0, %v3403_v1  ;;  %v1414_v5 = vsub.f32 0.0, %v4258_v31  ;;  %v4266_v10 = vadd.f32 %v4223_v37, %v1186_v58 }
 0x117   : > { %v3405_v9 = vpop.eup %3404  ;;  %3416 = vrcp.f32 %v1860_v38  ;;  %v4269_v0 = vadd.f32 %v4223_v37, %v1218_v60  ;;  %v1155_v62 = vmul.f32 %v4231_v55, %v898_v49  ;;  %v4274_v14 = vadd.f32 %v4223_v37, %v1123_v6  ;;  %v978_v3 = vpop.f32.mrf.mxu2 }
 0x118   : > { %v3407_v59 = vpop.eup %3406  ;;  %v2083_v32 = vmul.f32 %v3405_v9, %v4170_v57  ;;  %3418 = vrcp.f32 %v1765_v39  ;;  %v1586_v12 = vmul.f32 1.442695, %v1414_v5  ;;  %v1058_v17 = vpop.f32.mrf.mxu3  ;;  %v1446_v7 = vsub.f32 0.0, %v4266_v10 }
 0x119   : > { %v3409_v13 = vpop.eup %3408  ;;  %v2115_v21 = vmul.f32 %v3407_v59, %v4173_v52  ;;  %3420 = vpow2.f32 %v1648_v30  ;;  %v1478_v24 = vsub.f32 0.0, %v4269_v0  ;;  %v821_v26 = vpop.f32.mrf.mxu0  ;;  %v1383_v22 = vsub.f32 0.0, %v4274_v14  ;;  %v2812_v52 = vld [vmem:[%s3827_s11 + $0x1f8] sm:$0xff] }
 0x11a   : > { %v4280_v57 = vpop.f32.mrf.mxu1  ;;  %v3411_v51 = vpop.eup %3410  ;;  %v3004_v19 = vpack.c.bf16 %v2083_v32, %v4218_v4  ;;  %v1797_v29 = vadd.f32 1.0, %v3409_v13  ;;  %3422 = vpow2.f32 %v1712_v53  ;;  %v1650_v45 = vmul.f32 1.442695, %v1446_v7 }
 0x11b   : > { %v3413_v18 = vpop.eup %3412  ;;  %v3084_v34 = vpack.c.bf16 %v2115_v21, %v4236_v11  ;;  %v2020_v36 = vmul.f32 %v3411_v51, %v4176_v61  ;;  %3424 = vpow2.f32 %v1522_v63  ;;  %v1714_v4 = vmul.f32 1.442695, %v1478_v24  ;;  %860 = vmatmul.bf16.gmra.mxu0 %v2764_v20 }
 0x11c   : > { %v3415_v47 = vpop.eup %3414  ;;  %3176 = vst [vmem:[%s3987_s19 + $0x120] sm:$0xff] %v3004_v19   ;;  %v4291_v42 = vmul.f32 %v3413_v18, %v4190_v43  ;;  %3426 = vrcp.f32 %v1797_v29  ;;  %v1524_v48 = vmul.f32 1.442695, %v1383_v22  ;;  %v4298_v11 = vadd.f32 %v4223_v37, %v1155_v62  ;;  %940 = vmatmul.bf16.gmra.mxu1 %v2780_v15  ;;  %1020 = vmatmul.bf16.gmra.mxu2 %v2796_v33 }
 0x11d   : > { %v3417_v49 = vpop.eup %3416  ;;  %3192 = vst [vmem:[%s3987_s19 + $0x1a0] sm:$0xff] %v3084_v34   ;;  %v4295_v35 = vmul.f32 %v3415_v47, %v4193_v50  ;;  %3428 = vpow2.f32 %v1586_v12  ;;  %v1187_v61 = vmul.f32 %v4231_v55, %v978_v3  ;;  %v1219_v30 = vmul.f32 %v4231_v55, %v1058_v17  ;;  %1100 = vmatmul.bf16.gmra.mxu3 %v2812_v52 }
 0x11e   : > { %v3419_v54 = vpop.eup %3418  ;;  %v4302_v43 = vmul.f32 %v3417_v49, %v4196_v8  ;;  %3430 = vpow2.f32 %v1650_v45  ;;  %v1124_v23 = vmul.f32 %v4231_v55, %v821_v26  ;;  %v1415_v41 = vsub.f32 0.0, %v4298_v11 }
 0x11f   : > { %v3421_v50 = vpop.eup %3420  ;;  %v2021_v44 = vmul.f32 %v3419_v54, %v4199_v46  ;;  %3432 = vpow2.f32 %v1714_v4  ;;  %v4309_v56 = vadd.f32 %v4223_v37, %v1187_v61  ;;  %v4312_v8 = vadd.f32 %v4223_v37, %v1219_v30  ;;  %v981_v63 = vpop.f32.mrf.mxu2 }
 0x120   : > { %v3423_v53 = vpop.eup %3422  ;;  %v1829_v40 = vadd.f32 1.0, %v3421_v50  ;;  %3434 = vpow2.f32 %v1524_v48  ;;  %v4315_v2 = vadd.f32 %v4223_v37, %v1124_v23  ;;  %v1061_v1 = vpop.f32.mrf.mxu3  ;;  %v1588_v60 = vmul.f32 1.442695, %v1415_v41 }
 0x121   : > { %v3425_v38 = vpop.eup %3424  ;;  %v2849_v46 = vpack.c.bf16 %v2021_v44, %v2020_v36  ;;  %v1861_v58 = vadd.f32 1.0, %v3423_v53  ;;  %v1447_v39 = vsub.f32 0.0, %v4309_v56  ;;  %v823_v5 = vpop.f32.mrf.mxu0  ;;  %v1479_v59 = vsub.f32 0.0, %v4312_v8 }
 0x122   : > { %v903_v6 = vpop.f32.mrf.mxu1  ;;  %v3427_v9 = vpop.eup %3426  ;;  %3436 = vrcp.f32 %v1829_v40  ;;  %v1766_v62 = vadd.f32 1.0, %v3425_v38  ;;  %v1384_v32 = vsub.f32 0.0, %v4315_v2  ;;  %v1156_v20 = vmul.f32 %v4231_v55, %v4280_v57 }
 0x123   : > { %v3429_v12 = vpop.eup %3428  ;;  %3145 = vst [vmem:[%s3987_s19 + $0x28] sm:$0xff] %v2849_v46   ;;  %v2053_v3 = vmul.f32 %v3427_v9, %v4226_v16  ;;  %3438 = vrcp.f32 %v1861_v58  ;;  %v1652_v17 = vmul.f32 1.442695, %v1447_v39  ;;  %v1716_v7 = vmul.f32 1.442695, %v1479_v59 }
 0x124   : > { %v3431_v13 = vpop.eup %3430  ;;  %3440 = vrcp.f32 %v1766_v62  ;;  %v1798_v21 = vadd.f32 1.0, %v3429_v12  ;;  %v1526_v24 = vmul.f32 1.442695, %v1384_v32  ;;  %v4326_v19 = vadd.f32 %v4223_v37, %v1156_v20 }
 0x125   : > { %v3433_v26 = vpop.eup %3432  ;;  %v2929_v15 = vpack.c.bf16 %v2053_v3, %v4291_v42  ;;  %v1830_v51 = vadd.f32 1.0, %v3431_v13  ;;  %3442 = vpow2.f32 %v1588_v60  ;;  %v1188_v22 = vmul.f32 %v4231_v55, %v981_v63 }
 0x126   : > { %v3435_v16 = vpop.eup %3434  ;;  %3444 = vrcp.f32 %v1798_v21  ;;  %v1862_v29 = vadd.f32 1.0, %v3433_v26  ;;  %v1220_v57 = vmul.f32 %v4231_v55, %v1061_v1  ;;  %v1416_v52 = vsub.f32 0.0, %v4326_v19 }
 0x127   : > { %3161 = vst [vmem:[%s3987_s19 + $0xa8] sm:$0xff] %v2929_v15   ;;  %3446 = vrcp.f32 %v1830_v51  ;;  %v1767_v33 = vadd.f32 1.0, %v3435_v16  ;;  %v1125_v18 = vmul.f32 %v4231_v55, %v823_v5  ;;  %v4334_v36 = vadd.f32 %v4223_v37, %v1188_v22  ;;  %v983_v42 = vpop.f32.mrf.mxu2 }
 0x128   : > { %v3437_v34 = vpop.eup %3436  ;;  %3448 = vrcp.f32 %v1862_v29  ;;  %v4337_v45 = vadd.f32 %v4223_v37, %v1220_v57  ;;  %v1157_v47 = vmul.f32 %v4231_v55, %v903_v6  ;;  %v1063_v4 = vpop.f32.mrf.mxu3  ;;  %v1590_v61 = vmul.f32 1.442695, %v1416_v52 }
 0x129   : > { %v3439_v48 = vpop.eup %3438  ;;  %v2085_v49 = vmul.f32 %v3437_v34, %v4243_v25  ;;  %3450 = vrcp.f32 %v1767_v33  ;;  %v4342_v54 = vadd.f32 %v4223_v37, %v1125_v18  ;;  %v826_v30 = vpop.f32.mrf.mxu0  ;;  %v1448_v41 = vsub.f32 0.0, %v4334_v36 }
 0x12a   : > { %v906_v23 = vpop.f32.mrf.mxu1  ;;  %v3441_v50 = vpop.eup %3440  ;;  %v2117_v44 = vmul.f32 %v3439_v48, %v4246_v27  ;;  %3452 = vpow2.f32 %v1652_v17  ;;  %v1480_v53 = vsub.f32 0.0, %v4337_v45  ;;  %v4360_v9 = vadd.f32 %v4223_v37, %v1157_v47 }
 0x12b   : > { %v3443_v40 = vpop.eup %3442  ;;  %v3009_v63 = vpack.c.bf16 %v2085_v49, %v4295_v35  ;;  %v2022_v25 = vmul.f32 %v3441_v50, %v4249_v28  ;;  %3454 = vpow2.f32 %v1716_v7  ;;  %v1385_v1 = vsub.f32 0.0, %v4342_v54 }
 0x12c   : > { %v3445_v38 = vpop.eup %3444  ;;  %v3089_v46 = vpack.c.bf16 %v2117_v44, %v4302_v43  ;;  %v1799_v58 = vadd.f32 1.0, %v3443_v40  ;;  %3456 = vpow2.f32 %v1526_v24  ;;  %v1654_v27 = vmul.f32 1.442695, %v1448_v41 }
 0x12d   : > { %v3447_v60 = vpop.eup %3446  ;;  %3177 = vst [vmem:[%s3987_s19 + $0x128] sm:$0xff] %v3009_v63   ;;  %v4353_v39 = vmul.f32 %v3445_v38, %v4258_v31  ;;  %3458 = vpow2.f32 %v1590_v61  ;;  %v1718_v5 = vmul.f32 1.442695, %v1480_v53  ;;  %v1528_v35 = vmul.f32 1.442695, %v1385_v1 }
 0x12e   : > { %v3449_v6 = vpop.eup %3448  ;;  %3193 = vst [vmem:[%s3987_s19 + $0x1a8] sm:$0xff] %v3089_v46   ;;  %v4357_v28 = vmul.f32 %v3447_v60, %v4266_v10  ;;  %3460 = vrcp.f32 %v1799_v58  ;;  %v1189_v43 = vmul.f32 %v4231_v55, %v983_v42  ;;  %v1221_v31 = vmul.f32 %v4231_v55, %v1063_v4 }
 0x12f   : > { %v3451_v62 = vpop.eup %3450  ;;  %v4364_v59 = vmul.f32 %v3449_v6, %v4269_v0  ;;  %3462 = vpow2.f32 %v1654_v27  ;;  %v1126_v32 = vmul.f32 %v4231_v55, %v826_v30  ;;  %v1417_v10 = vsub.f32 0.0, %v4360_v9  ;;  %v986_v20 = vpop.f32.mrf.mxu2 }
 0x130   : > { %v3453_v12 = vpop.eup %3452  ;;  %v2023_v3 = vmul.f32 %v3451_v62, %v4274_v14  ;;  %3464 = vpow2.f32 %v1718_v5  ;;  %v4371_v17 = vadd.f32 %v4223_v37, %v1189_v43  ;;  %v1066_v13 = vpop.f32.mrf.mxu3  ;;  %v4374_v0 = vadd.f32 %v4223_v37, %v1221_v31 }
 0x131   : > { %v3455_v21 = vpop.eup %3454  ;;  %v1831_v7 = vadd.f32 1.0, %v3453_v12  ;;  %3466 = vpow2.f32 %v1528_v35  ;;  %v4377_v24 = vadd.f32 %v4223_v37, %v1126_v32  ;;  %v828_v26 = vpop.f32.mrf.mxu0  ;;  %v1592_v29 = vmul.f32 1.442695, %v1417_v10 }
 0x132   : > { %v908_v14 = vpop.f32.mrf.mxu1  ;;  %v3457_v15 = vpop.eup %3456  ;;  %v2854_v51 = vpack.c.bf16 %v2023_v3, %v2022_v25  ;;  %v1863_v16 = vadd.f32 1.0, %v3455_v21  ;;  %v1449_v22 = vsub.f32 0.0, %v4371_v17  ;;  %v1481_v52 = vsub.f32 0.0, %v4374_v0 }
 0x133   : > { %v3459_v57 = vpop.eup %3458  ;;  %3468 = vrcp.f32 %v1831_v7  ;;  %v1768_v33 = vadd.f32 1.0, %v3457_v15  ;;  %v1386_v18 = vsub.f32 0.0, %v4377_v24  ;;  %v1158_v4 = vmul.f32 %v4231_v55, %v906_v23 }
 0x134   : > { %v3461_v34 = vpop.eup %3460  ;;  %3146 = vst [vmem:[%s3987_s19 + $0x30] sm:$0xff] %v2854_v51   ;;  %3470 = vrcp.f32 %v1863_v16  ;;  %v1800_v47 = vadd.f32 1.0, %v3459_v57  ;;  %v1656_v42 = vmul.f32 1.442695, %v1449_v22  ;;  %v1720_v61 = vmul.f32 1.442695, %v1481_v52 }
 0x135   : > { %v3463_v48 = vpop.eup %3462  ;;  %v2055_v49 = vmul.f32 %v3461_v34, %v4298_v11  ;;  %3472 = vrcp.f32 %v1768_v33  ;;  %v1530_v30 = vmul.f32 1.442695, %v1386_v18  ;;  %v4386_v41 = vadd.f32 %v4223_v37, %v1158_v4 }
 0x136   : > { %v3465_v50 = vpop.eup %3464  ;;  %3474 = vrcp.f32 %v1800_v47  ;;  %v1832_v44 = vadd.f32 1.0, %v3463_v48  ;;  %v1190_v53 = vmul.f32 %v4231_v55, %v986_v20  ;;  %v1222_v23 = vmul.f32 %v4231_v55, %v1066_v13 }
 0x137   : > { %v3467_v40 = vpop.eup %3466  ;;  %v2934_v63 = vpack.c.bf16 %v2055_v49, %v4353_v39  ;;  %v1864_v25 = vadd.f32 1.0, %v3465_v50  ;;  %3476 = vpow2.f32 %v1592_v29  ;;  %v1418_v1 = vsub.f32 0.0, %v4386_v41  ;;  %v988_v46 = vpop.f32.mrf.mxu2 }
 0x138   : > { %3478 = vrcp.f32 %v1832_v44  ;;  %v1769_v11 = vadd.f32 1.0, %v3467_v40  ;;  %v4393_v38 = vadd.f32 %v4223_v37, %v1190_v53  ;;  %v1068_v58 = vpop.f32.mrf.mxu3  ;;  %v4397_v60 = vadd.f32 %v4223_v37, %v1222_v23 }
 0x139   : > { %v3469_v27 = vpop.eup %3468  ;;  %3162 = vst [vmem:[%s3987_s19 + $0xb0] sm:$0xff] %v2934_v63   ;;  %3480 = vrcp.f32 %v1864_v25  ;;  %v1127_v39 = vmul.f32 %v4231_v55, %v828_v26  ;;  %v1159_v5 = vmul.f32 %v4231_v55, %v908_v14  ;;  %v831_v35 = vpop.f32.mrf.mxu0  ;;  %v1594_v31 = vmul.f32 1.442695, %v1418_v1 }
 0x13a   : > { %v911_v6 = vpop.f32.mrf.mxu1  ;;  %v3471_v43 = vpop.eup %3470  ;;  %v2087_v62 = vmul.f32 %v3469_v27, %v4309_v56  ;;  %3482 = vrcp.f32 %v1769_v11  ;;  %v1450_v32 = vsub.f32 0.0, %v4393_v38  ;;  %v1482_v10 = vsub.f32 0.0, %v4397_v60 }
 0x13b   : > { %v3473_v12 = vpop.eup %3472  ;;  %v2119_v3 = vmul.f32 %v3471_v43, %v4312_v8  ;;  %3484 = vpow2.f32 %v1656_v42  ;;  %v4406_v20 = vadd.f32 %v4223_v37, %v1127_v39  ;;  %v1128_v44 = vmul.f32 %v4231_v55, %v831_v35 }
 0x13c   : > { %v3475_v13 = vpop.eup %3474  ;;  %v3014_v21 = vpack.c.bf16 %v2087_v62, %v4357_v28  ;;  %v2024_v56 = vmul.f32 %v3473_v12, %v4315_v2  ;;  %3486 = vpow2.f32 %v1720_v61  ;;  %v1658_v7 = vmul.f32 1.442695, %v1450_v32 }
 0x13d   : > { %v3477_v26 = vpop.eup %3476  ;;  %v3094_v14 = vpack.c.bf16 %v2119_v3, %v4364_v59  ;;  %v4412_v15 = vmul.f32 %v3475_v13, %v4326_v19  ;;  %3488 = vpow2.f32 %v1530_v30  ;;  %v1722_v8 = vmul.f32 1.442695, %v1482_v10 }
 0x13e   : > { %v3479_v51 = vpop.eup %3478  ;;  %3178 = vst [vmem:[%s3987_s19 + $0x130] sm:$0xff] %v3014_v21   ;;  %v1801_v16 = vadd.f32 1.0, %v3477_v26  ;;  %3490 = vpow2.f32 %v1594_v31  ;;  %v1387_v29 = vsub.f32 0.0, %v4406_v20  ;;  %v4417_v28 = vadd.f32 %v4223_v37, %v1159_v5 }
 0x13f   : > { %v3481_v2 = vpop.eup %3480  ;;  %3194 = vst [vmem:[%s3987_s19 + $0x1b0] sm:$0xff] %v3094_v14   ;;  %v4421_v22 = vmul.f32 %v3479_v51, %v4334_v36  ;;  %3492 = vpow2.f32 %v1658_v7  ;;  %v1191_v19 = vmul.f32 %v4231_v55, %v988_v46  ;;  %v1223_v59 = vmul.f32 %v4231_v55, %v1068_v58  ;;  %v991_v34 = vpop.f32.mrf.mxu2 }
 0x140   : > { %v3483_v57 = vpop.eup %3482  ;;  %v4426_v33 = vmul.f32 %v3481_v2, %v4337_v45  ;;  %3494 = vrcp.f32 %v1801_v16  ;;  %v1532_v52 = vmul.f32 1.442695, %v1387_v29  ;;  %v1419_v18 = vsub.f32 0.0, %v4417_v28  ;;  %v1071_v47 = vpop.f32.mrf.mxu3 }
 0x141   : > { %v3485_v42 = vpop.eup %3484  ;;  %v2025_v4 = vmul.f32 %v3483_v57, %v4342_v54  ;;  %3496 = vpow2.f32 %v1722_v8  ;;  %v4431_v36 = vadd.f32 %v4223_v37, %v1191_v19  ;;  %v4434_v48 = vadd.f32 %v4223_v37, %v1223_v59  ;;  %v833_v49 = vpop.f32.mrf.mxu0 }
 0x142   : > { %v913_v61 = vpop.f32.mrf.mxu1  ;;  %v3487_v45 = vpop.eup %3486  ;;  %v1833_v30 = vadd.f32 1.0, %v3485_v42  ;;  %3498 = vpow2.f32 %v1532_v52  ;;  %v1596_v50 = vmul.f32 1.442695, %v1419_v18  ;;  %v4440_v1 = vadd.f32 %v4223_v37, %v1128_v44 }
 0x143   : > { %v3489_v53 = vpop.eup %3488  ;;  %v2859_v40 = vpack.c.bf16 %v2025_v4, %v2024_v56  ;;  %v1865_v63 = vadd.f32 1.0, %v3487_v45  ;;  %v1451_v54 = vsub.f32 0.0, %v4431_v36  ;;  %v1483_v25 = vsub.f32 0.0, %v4434_v48 }
 0x144   : > { %v3491_v23 = vpop.eup %3490  ;;  %3500 = vrcp.f32 %v1833_v30  ;;  %v1770_v11 = vadd.f32 1.0, %v3489_v53  ;;  %v1160_v46 = vmul.f32 %v4231_v55, %v911_v6  ;;  %v1388_v62 = vsub.f32 0.0, %v4440_v1 }
 0x145   : > { %v3493_v58 = vpop.eup %3492  ;;  %3147 = vst [vmem:[%s3987_s19 + $0x38] sm:$0xff] %v2859_v40   ;;  %3502 = vrcp.f32 %v1865_v63  ;;  %v1802_v27 = vadd.f32 1.0, %v3491_v23  ;;  %v1660_v39 = vmul.f32 1.442695, %v1451_v54  ;;  %v1724_v5 = vmul.f32 1.442695, %v1483_v25 }
 0x146   : > { %v3495_v35 = vpop.eup %3494  ;;  %3504 = vrcp.f32 %v1770_v11  ;;  %v1834_v43 = vadd.f32 1.0, %v3493_v58  ;;  %v4446_v31 = vadd.f32 %v4223_v37, %v1160_v46  ;;  %v1192_v6 = vmul.f32 %v4231_v55, %v991_v34 }
 0x147   : > { %v3497_v32 = vpop.eup %3496  ;;  %v2057_v12 = vmul.f32 %v3495_v35, %v4360_v9  ;;  %3506 = vrcp.f32 %v1802_v27  ;;  %v1224_v3 = vmul.f32 %v4231_v55, %v1071_v47  ;;  %v1534_v21 = vmul.f32 1.442695, %v1388_v62  ;;  %v993_v7 = vpop.f32.mrf.mxu2 }
 0x148   : > { %v3499_v10 = vpop.eup %3498  ;;  %3508 = vrcp.f32 %v1834_v43  ;;  %v1866_v13 = vadd.f32 1.0, %v3497_v32  ;;  %v1420_v56 = vsub.f32 0.0, %v4446_v31  ;;  %v1073_v26 = vpop.f32.mrf.mxu3  ;;  %v4454_v9 = vadd.f32 %v4223_v37, %v1192_v6 }
 0x149   : > { %v2939_v14 = vpack.c.bf16 %v2057_v12, %v4412_v15  ;;  %v1771_v8 = vadd.f32 1.0, %v3499_v10  ;;  %3510 = vpow2.f32 %v1596_v50  ;;  %v836_v51 = vpop.f32.mrf.mxu0  ;;  %v4459_v19 = vadd.f32 %v4223_v37, %v1224_v3 }
 0x14a   : > { %v4456_v16 = vpop.f32.mrf.mxu1  ;;  %v3501_v29 = vpop.eup %3500  ;;  %3512 = vrcp.f32 %v1866_v13  ;;  %v1598_v2 = vmul.f32 1.442695, %v1420_v56  ;;  %v1129_v59 = vmul.f32 %v4231_v55, %v833_v49  ;;  %v1452_v52 = vsub.f32 0.0, %v4454_v9 }
 0x14b   : > { %v3503_v57 = vpop.eup %3502  ;;  %3163 = vst [vmem:[%s3987_s19 + $0xb8] sm:$0xff] %v2939_v14   ;;  %v2089_v15 = vmul.f32 %v3501_v29, %v4371_v17  ;;  %3514 = vrcp.f32 %v1771_v8  ;;  %v1161_v18 = vmul.f32 %v4231_v55, %v913_v61  ;;  %v1484_v42 = vsub.f32 0.0, %v4459_v19 }
 0x14c   : > { %v3505_v34 = vpop.eup %3504  ;;  %v2121_v47 = vmul.f32 %v3503_v57, %v4374_v0  ;;  %3516 = vpow2.f32 %v1660_v39  ;;  %v4469_v4 = vadd.f32 %v4223_v37, %v1129_v59  ;;  %v1662_v30 = vmul.f32 1.442695, %v1452_v52 }
 0x14d   : > { %v3507_v49 = vpop.eup %3506  ;;  %v3019_v45 = vpack.c.bf16 %v2089_v15, %v4421_v22  ;;  %v2026_v17 = vmul.f32 %v3505_v34, %v4377_v24  ;;  %3518 = vpow2.f32 %v1724_v5  ;;  %v1726_v0 = vmul.f32 1.442695, %v1484_v42 }
 0x14e   : > { %v3509_v50 = vpop.eup %3508  ;;  %v3099_v61 = vpack.c.bf16 %v2121_v47, %v4426_v33  ;;  %v4475_v44 = vmul.f32 %v3507_v49, %v4386_v41  ;;  %3520 = vpow2.f32 %v1534_v21  ;;  %v1389_v22 = vsub.f32 0.0, %v4469_v4 }
 0x14f   : > { %v3511_v53 = vpop.eup %3510  ;;  %3179 = vst [vmem:[%s3987_s19 + $0x138] sm:$0xff] %v3019_v45   ;;  %v4479_v40 = vmul.f32 %v3509_v50, %v4393_v38  ;;  %3522 = vpow2.f32 %v1598_v2  ;;  %v4483_v24 = vadd.f32 %v4223_v37, %v1161_v18  ;;  %v1193_v41 = vmul.f32 %v4231_v55, %v993_v7  ;;  %v996_v25 = vpop.f32.mrf.mxu2 }
 0x150   : > { %v3513_v63 = vpop.eup %3512  ;;  %3195 = vst [vmem:[%s3987_s19 + $0x1b8] sm:$0xff] %v3099_v61   ;;  %v1803_v54 = vadd.f32 1.0, %v3511_v53  ;;  %3524 = vpow2.f32 %v1662_v30  ;;  %v1225_v33 = vmul.f32 %v4231_v55, %v1073_v26  ;;  %v1076_v23 = vpop.f32.mrf.mxu3  ;;  %v1536_v46 = vmul.f32 1.442695, %v1389_v22 }
 0x151   : > { %v3515_v11 = vpop.eup %3514  ;;  %v4489_v38 = vmul.f32 %v3513_v63, %v4397_v60  ;;  %3526 = vpow2.f32 %v1726_v0  ;;  %v1421_v58 = vsub.f32 0.0, %v4483_v24  ;;  %v838_v27 = vpop.f32.mrf.mxu0  ;;  %v4496_v43 = vadd.f32 %v4223_v37, %v1193_v41 }
 0x152   : > { %v4492_v39 = vpop.f32.mrf.mxu1  ;;  %v3517_v5 = vpop.eup %3516  ;;  %v2027_v35 = vmul.f32 %v3515_v11, %v4406_v20  ;;  %3528 = vrcp.f32 %v1803_v54  ;;  %v4499_v62 = vadd.f32 %v4223_v37, %v1225_v33  ;;  %v1130_v6 = vmul.f32 %v4231_v55, %v836_v51 }
 0x153   : > { %v3519_v32 = vpop.eup %3518  ;;  %v1835_v60 = vadd.f32 1.0, %v3517_v5  ;;  %3530 = vpow2.f32 %v1536_v46  ;;  %v1600_v12 = vmul.f32 1.442695, %v1421_v58  ;;  %v1453_v21 = vsub.f32 0.0, %v4496_v43 }
 0x154   : > { %v3521_v3 = vpop.eup %3520  ;;  %v2864_v10 = vpack.c.bf16 %v2027_v35, %v2026_v17  ;;  %v1867_v13 = vadd.f32 1.0, %v3519_v32  ;;  %v1485_v20 = vsub.f32 0.0, %v4499_v62  ;;  %v4505_v26 = vadd.f32 %v4223_v37, %v1130_v6 }
 0x155   : > { %v3523_v56 = vpop.eup %3522  ;;  %3532 = vrcp.f32 %v1835_v60  ;;  %v1772_v7 = vadd.f32 1.0, %v3521_v3  ;;  %v1162_v14 = vmul.f32 %v4231_v55, %v4456_v16  ;;  %v1664_v29 = vmul.f32 1.442695, %v1453_v21 }
 0x156   : > { %v3525_v8 = vpop.eup %3524  ;;  %3148 = vst [vmem:[%s3987_s19 + $0x40] sm:$0xff] %v2864_v10   ;;  %3534 = vrcp.f32 %v1867_v13  ;;  %v1804_v51 = vadd.f32 1.0, %v3523_v56  ;;  %v1728_v2 = vmul.f32 1.442695, %v1485_v20  ;;  %v1390_v15 = vsub.f32 0.0, %v4505_v26 }
 0x157   : > { %v3527_v59 = vpop.eup %3526  ;;  %3536 = vrcp.f32 %v1772_v7  ;;  %v1836_v57 = vadd.f32 1.0, %v3525_v8  ;;  %v4512_v52 = vadd.f32 %v4223_v37, %v1162_v14  ;;  %v1194_v47 = vmul.f32 %v4231_v55, %v996_v25  ;;  %v998_v42 = vpop.f32.mrf.mxu2 }
 0x158   : > { %v3529_v18 = vpop.eup %3528  ;;  %3538 = vrcp.f32 %v1804_v51  ;;  %v1868_v34 = vadd.f32 1.0, %v3527_v59  ;;  %v1226_v16 = vmul.f32 %v4231_v55, %v1076_v23  ;;  %v1078_v49 = vpop.f32.mrf.mxu3  ;;  %v1538_v30 = vmul.f32 1.442695, %v1390_v15 }
 0x159   : > { %v3531_v45 = vpop.eup %3530  ;;  %v2059_v17 = vmul.f32 %v3529_v18, %v4417_v28  ;;  %3540 = vrcp.f32 %v1836_v57  ;;  %v1422_v50 = vsub.f32 0.0, %v4512_v52  ;;  %v841_v61 = vpop.f32.mrf.mxu0  ;;  %v4519_v22 = vadd.f32 %v4223_v37, %v1194_v47 }
 0x15a   : > { %v921_v0 = vpop.f32.mrf.mxu1  ;;  %3542 = vrcp.f32 %v1868_v34  ;;  %v1773_v53 = vadd.f32 1.0, %v3531_v45  ;;  %v4522_v63 = vadd.f32 %v4223_v37, %v1226_v16  ;;  %v1131_v33 = vmul.f32 %v4231_v55, %v838_v27  ;;  %v4570_v16 = vld [vmem:[%s4905_s2] ss:$0 sm:$0xff] }
 0x15b   : > { %v3533_v54 = vpop.eup %3532  ;;  %v2944_v41 = vpack.c.bf16 %v2059_v17, %v4475_v44  ;;  %3544 = vpow2.f32 %v1600_v12  ;;  %v1602_v28 = vmul.f32 1.442695, %v1422_v50  ;;  %v1454_v11 = vsub.f32 0.0, %v4519_v22  ;;  %v4578_v50 = vld [vmem:[%s4906_s3] ss:$0 sm:$0xff] }
 0x15c   : > { %v3535_v25 = vpop.eup %3534  ;;  %v2091_v23 = vmul.f32 %v3533_v54, %v4431_v36  ;;  %3546 = vrcp.f32 %v1773_v53  ;;  %v1486_v46 = vsub.f32 0.0, %v4522_v63  ;;  %v4532_v44 = vadd.f32 %v4223_v37, %v1131_v33 }
 0x15d   : > { %v3537_v58 = vpop.eup %3536  ;;  %3164 = vst [vmem:[%s3987_s19 + $0xc0] sm:$0xff] %v2944_v41   ;;  %v2123_v5 = vmul.f32 %v3535_v25, %v4434_v48  ;;  %3548 = vpow2.f32 %v1664_v29  ;;  %v1163_v27 = vmul.f32 %v4231_v55, %v4492_v39  ;;  %v1666_v60 = vmul.f32 1.442695, %v1454_v11 }
 0x15e   : > { %v3539_v35 = vpop.eup %3538  ;;  %v3024_v36 = vpack.c.bf16 %v2091_v23, %v4479_v40  ;;  %v2028_v32 = vmul.f32 %v3537_v58, %v4440_v1  ;;  %3550 = vpow2.f32 %v1728_v2  ;;  %v1730_v3 = vmul.f32 1.442695, %v1486_v46 }
 0x15f   : > { %v3541_v12 = vpop.eup %3540  ;;  %v3104_v6 = vpack.c.bf16 %v2123_v5, %v4489_v38  ;;  %v4540_v48 = vmul.f32 %v3539_v35, %v4446_v31  ;;  %3552 = vpow2.f32 %v1538_v30  ;;  %v1391_v40 = vsub.f32 0.0, %v4532_v44  ;;  %v1001_v13 = vpop.f32.mrf.mxu2 }
 0x160   : > { %v3543_v10 = vpop.eup %3542  ;;  %3180 = vst [vmem:[%s3987_s19 + $0x140] sm:$0xff] %v3024_v36   ;;  %v4544_v39 = vmul.f32 %v3541_v12, %v4454_v9  ;;  %3554 = vpow2.f32 %v1602_v28  ;;  %v4548_v1 = vadd.f32 %v4223_v37, %v1163_v27  ;;  %v1081_v21 = vpop.f32.mrf.mxu3  ;;  %v1195_v38 = vmul.f32 %v4231_v55, %v998_v42 }
 0x161   : > { %v3545_v20 = vpop.eup %3544  ;;  %3196 = vst [vmem:[%s3987_s19 + $0x1c0] sm:$0xff] %v3104_v6   ;;  %v4552_v31 = vmul.f32 %v3543_v10, %v4459_v19  ;;  %3556 = vpow2.f32 %v1666_v60  ;;  %v1227_v56 = vmul.f32 %v4231_v55, %v1078_v49  ;;  %v843_v9 = vpop.f32.mrf.mxu0  ;;  %v1540_v51 = vmul.f32 1.442695, %v1391_v40 }
 0x162   : > { %v4556_v7 = vpop.f32.mrf.mxu1  ;;  %v3547_v14 = vpop.eup %3546  ;;  %v1805_v8 = vadd.f32 1.0, %v3545_v20  ;;  %3558 = vpow2.f32 %v1730_v3  ;;  %v1423_v29 = vsub.f32 0.0, %v4548_v1  ;;  %v4561_v19 = vadd.f32 %v4223_v37, %v1195_v38 }
 0x163   : > { %v3549_v2 = vpop.eup %3548  ;;  %v2029_v59 = vmul.f32 %v3547_v14, %v4469_v4  ;;  %v4564_v57 = vadd.f32 %v4223_v37, %v1227_v56  ;;  %v1132_v15 = vmul.f32 %v4231_v55, %v841_v61  ;;  %v1164_v4 = vmul.f32 %v4570_v16, %v921_v0 }
 0x164   : > { %v3551_v18 = vpop.eup %3550  ;;  %3560 = vrcp.f32 %v1805_v8  ;;  %v1837_v34 = vadd.f32 1.0, %v3549_v2  ;;  %v1604_v47 = vmul.f32 1.442695, %v1423_v29  ;;  %v1455_v37 = vsub.f32 0.0, %v4561_v19 }
 0x165   : > { %v3553_v42 = vpop.eup %3552  ;;  %v2869_v49 = vpack.c.bf16 %v2029_v59, %v2028_v32  ;;  %v1869_v45 = vadd.f32 1.0, %v3551_v18  ;;  %3562 = vpow2.f32 %v1540_v51  ;;  %v1487_v30 = vsub.f32 0.0, %v4564_v57 }
 0x166   : > { %v3555_v17 = vpop.eup %3554  ;;  %3564 = vrcp.f32 %v1837_v34  ;;  %v1774_v55 = vadd.f32 1.0, %v3553_v42  ;;  %v4581_v61 = vadd.f32 %v4578_v50, %v1132_v15  ;;  %v1668_v54 = vmul.f32 1.442695, %v1455_v37 }
 0x167   : > { %v3557_v0 = vpop.eup %3556  ;;  %3149 = vst [vmem:[%s3987_s19 + $0x48] sm:$0xff] %v2869_v49   ;;  %3566 = vrcp.f32 %v1869_v45  ;;  %v1806_v53 = vadd.f32 1.0, %v3555_v17  ;;  %v4585_v41 = vadd.f32 %v4578_v50, %v1164_v4  ;;  %v1732_v25 = vmul.f32 1.442695, %v1487_v30  ;;  %v1003_v11 = vpop.f32.mrf.mxu2 }
 0x168   : > { %v3559_v28 = vpop.eup %3558  ;;  %3568 = vrcp.f32 %v1774_v55  ;;  %v1838_v33 = vadd.f32 1.0, %v3557_v0  ;;  %v1392_v23 = vsub.f32 0.0, %v4581_v61  ;;  %v1083_v46 = vpop.f32.mrf.mxu3  ;;  %v1196_v27 = vmul.f32 %v4570_v16, %v1001_v13 }
 0x169   : > { %3570 = vrcp.f32 %v1806_v53  ;;  %v1870_v58 = vadd.f32 1.0, %v3559_v28  ;;  %v1424_v5 = vsub.f32 0.0, %v4585_v41  ;;  %v846_v35 = vpop.f32.mrf.mxu0  ;;  %v1228_v12 = vmul.f32 %v4570_v16, %v1081_v21 }
 0x16a   : > { %v4590_v36 = vpop.f32.mrf.mxu1  ;;  %v3561_v32 = vpop.eup %3560  ;;  %3572 = vrcp.f32 %v1838_v33  ;;  %v1542_v60 = vmul.f32 1.442695, %v1392_v23  ;;  %v1133_v6 = vmul.f32 %v4570_v16, %v843_v9  ;;  %v4596_v20 = vadd.f32 %v4578_v50, %v1196_v27 }
 0x16b   : > { %v3563_v3 = vpop.eup %3562  ;;  %v2061_v10 = vmul.f32 %v3561_v32, %v4483_v24  ;;  %3574 = vrcp.f32 %v1870_v58  ;;  %v1606_v40 = vmul.f32 1.442695, %v1424_v5  ;;  %v4599_v56 = vadd.f32 %v4578_v50, %v1228_v12 }
 0x16c   : > { %v3565_v38 = vpop.eup %3564  ;;  %v1775_v13 = vadd.f32 1.0, %v3563_v3  ;;  %3576 = vpow2.f32 %v1604_v47  ;;  %v4602_v14 = vadd.f32 %v4578_v50, %v1133_v6  ;;  %v1456_v8 = vsub.f32 0.0, %v4596_v20 }
 0x16d   : > { %v3567_v21 = vpop.eup %3566  ;;  %v2949_v9 = vpack.c.bf16 %v2061_v10, %v4540_v48  ;;  %v2093_v24 = vmul.f32 %v3565_v38, %v4496_v43  ;;  %3578 = vpow2.f32 %v1668_v54  ;;  %v1488_v2 = vsub.f32 0.0, %v4599_v56 }
 0x16e   : > { %v3569_v51 = vpop.eup %3568  ;;  %v2125_v29 = vmul.f32 %v3567_v21, %v4499_v62  ;;  %3580 = vrcp.f32 %v1775_v13  ;;  %v1393_v59 = vsub.f32 0.0, %v4602_v14  ;;  %v1670_v43 = vmul.f32 1.442695, %v1456_v8 }
 0x16f   : > { %v3571_v15 = vpop.eup %3570  ;;  %3165 = vst [vmem:[%s3987_s19 + $0xc8] sm:$0xff] %v2949_v9   ;;  %v3029_v18 = vpack.c.bf16 %v2093_v24, %v4544_v39  ;;  %v2030_v48 = vmul.f32 %v3569_v51, %v4505_v26  ;;  %3582 = vpow2.f32 %v1732_v25  ;;  %v1734_v4 = vmul.f32 1.442695, %v1488_v2  ;;  %v1006_v42 = vpop.f32.mrf.mxu2 }
 0x170   : > { %v3573_v34 = vpop.eup %3572  ;;  %v3109_v47 = vpack.c.bf16 %v2125_v29, %v4552_v31  ;;  %v4615_v62 = vmul.f32 %v3571_v15, %v4512_v52  ;;  %3584 = vpow2.f32 %v1542_v60  ;;  %v1086_v49 = vpop.f32.mrf.mxu3  ;;  %v1544_v26 = vmul.f32 1.442695, %v1393_v59 }
 0x171   : > { %v3575_v45 = vpop.eup %3574  ;;  %3181 = vst [vmem:[%s3987_s19 + $0x148] sm:$0xff] %v3029_v18   ;;  %v4619_v37 = vmul.f32 %v3573_v34, %v4519_v22  ;;  %3586 = vpow2.f32 %v1606_v40  ;;  %v1165_v39 = vmul.f32 %v4570_v16, %v4556_v7  ;;  %v848_v17 = vpop.f32.mrf.mxu0  ;;  %v1197_v30 = vmul.f32 %v4570_v16, %v1003_v11 }
 0x172   : > { %v4623_v55 = vpop.f32.mrf.mxu1  ;;  %v3577_v31 = vpop.eup %3576  ;;  %3197 = vst [vmem:[%s3987_s19 + $0x1c8] sm:$0xff] %v3109_v47   ;;  %v4627_v52 = vmul.f32 %v3575_v45, %v4522_v63  ;;  %3588 = vpow2.f32 %v1670_v43  ;;  %v1229_v0 = vmul.f32 %v4570_v16, %v1083_v46  ;;  %v1134_v7 = vmul.f32 %v4570_v16, %v846_v35 }
 0x173   : > { %v3579_v22 = vpop.eup %3578  ;;  %v1807_v53 = vadd.f32 1.0, %v3577_v31  ;;  %3590 = vpow2.f32 %v1734_v4  ;;  %v4632_v54 = vadd.f32 %v4578_v50, %v1165_v39  ;;  %v4636_v25 = vadd.f32 %v4578_v50, %v1197_v30 }
 0x174   : > { %v3581_v28 = vpop.eup %3580  ;;  %v1839_v33 = vadd.f32 1.0, %v3579_v22  ;;  %3592 = vpow2.f32 %v1544_v26  ;;  %v4639_v63 = vadd.f32 %v4578_v50, %v1229_v0  ;;  %v4644_v58 = vadd.f32 %v4578_v50, %v1134_v7 }
 0x175   : > { %v3583_v23 = vpop.eup %3582  ;;  %v2031_v11 = vmul.f32 %v3581_v28, %v4532_v44  ;;  %3594 = vrcp.f32 %v1807_v53  ;;  %v1425_v46 = vsub.f32 0.0, %v4632_v54  ;;  %v1457_v35 = vsub.f32 0.0, %v4636_v25 }
 0x176   : > { %v3585_v5 = vpop.eup %3584  ;;  %3596 = vrcp.f32 %v1839_v33  ;;  %v1871_v27 = vadd.f32 1.0, %v3583_v23  ;;  %v1489_v32 = vsub.f32 0.0, %v4639_v63  ;;  %v1394_v44 = vsub.f32 0.0, %v4644_v58 }
 0x177   : > { %v3587_v60 = vpop.eup %3586  ;;  %v2874_v12 = vpack.c.bf16 %v2031_v11, %v2030_v48  ;;  %v1776_v6 = vadd.f32 1.0, %v3585_v5  ;;  %v1608_v3 = vmul.f32 1.442695, %v1425_v46  ;;  %v1672_v38 = vmul.f32 1.442695, %v1457_v35  ;;  %v1008_v21 = vpop.f32.mrf.mxu2 }
 0x178   : > { %v3589_v10 = vpop.eup %3588  ;;  %3598 = vrcp.f32 %v1871_v27  ;;  %v1808_v40 = vadd.f32 1.0, %v3587_v60  ;;  %v1736_v13 = vmul.f32 1.442695, %v1489_v32  ;;  %v1088_v9 = vpop.f32.mrf.mxu3  ;;  %v1546_v51 = vmul.f32 1.442695, %v1394_v44 }
 0x179   : > { %v3591_v24 = vpop.eup %3590  ;;  %3150 = vst [vmem:[%s3987_s19 + $0x50] sm:$0xff] %v2874_v12   ;;  %3600 = vrcp.f32 %v1776_v6  ;;  %v1840_v8 = vadd.f32 1.0, %v3589_v10  ;;  %v1166_v29 = vmul.f32 %v4570_v16, %v4590_v36  ;;  %v4652_v2 = vpop.f32.mrf.mxu0  ;;  %v1198_v18 = vmul.f32 %v4570_v16, %v1006_v42 }
 0x17a   : > { %v3593_v59 = vpop.eup %3592  ;;  %3602 = vrcp.f32 %v1808_v40  ;;  %v1872_v15 = vadd.f32 1.0, %v3591_v24  ;;  %v1230_v48 = vmul.f32 %v4570_v16, %v1086_v49  ;;  %v1135_v4 = vmul.f32 %v4570_v16, %v848_v17  ;;  %v4660_v45 = vpop.f32.mrf.mxu1 }
 0x17b   : > { %v3595_v43 = vpop.eup %3594  ;;  %3604 = vrcp.f32 %v1840_v8  ;;  %v1777_v34 = vadd.f32 1.0, %v3593_v59  ;;  %v4657_v47 = vadd.f32 %v4578_v50, %v1166_v29  ;;  %v4664_v39 = vadd.f32 %v4578_v50, %v1198_v18 }
 0x17c   : > { %v3597_v36 = vpop.eup %3596  ;;  %v2063_v26 = vmul.f32 %v3595_v43, %v4548_v1  ;;  %3606 = vrcp.f32 %v1872_v15  ;;  %v4667_v42 = vadd.f32 %v4578_v50, %v1230_v48  ;;  %v4672_v17 = vadd.f32 %v4578_v50, %v1135_v4 }
 0x17d   : > { %v2095_v49 = vmul.f32 %v3597_v36, %v4561_v19  ;;  %3608 = vrcp.f32 %v1777_v34  ;;  %v1426_v31 = vsub.f32 0.0, %v4657_v47  ;;  %v1458_v1 = vsub.f32 0.0, %v4664_v39 }
 0x17e   : > { %v3599_v30 = vpop.eup %3598  ;;  %v2954_v0 = vpack.c.bf16 %v2063_v26, %v4615_v62  ;;  %3610 = vpow2.f32 %v1608_v3  ;;  %v1490_v22 = vsub.f32 0.0, %v4667_v42  ;;  %v1199_v12 = vmul.f32 %v4570_v16, %v1008_v21 }
 0x17f   : > { %v3601_v53 = vpop.eup %3600  ;;  %v3034_v7 = vpack.c.bf16 %v2095_v49, %v4619_v37  ;;  %v2127_v19 = vmul.f32 %v3599_v30, %v4564_v57  ;;  %3612 = vpow2.f32 %v1672_v38  ;;  %v1610_v28 = vmul.f32 1.442695, %v1426_v31  ;;  %v1011_v37 = vpop.f32.mrf.mxu2 }
 0x180   : > { %v3603_v33 = vpop.eup %3602  ;;  %3166 = vst [vmem:[%s3987_s19 + $0xd0] sm:$0xff] %v2954_v0   ;;  %v2032_v23 = vmul.f32 %v3601_v53, %v4581_v61  ;;  %3614 = vpow2.f32 %v1736_v13  ;;  %v1674_v11 = vmul.f32 1.442695, %v1458_v1  ;;  %v1738_v62 = vmul.f32 1.442695, %v1490_v22  ;;  %v1091_v35 = vpop.f32.mrf.mxu3 }
 0x181   : > { %v3605_v46 = vpop.eup %3604  ;;  %3182 = vst [vmem:[%s3987_s19 + $0x150] sm:$0xff] %v3034_v7   ;;  %v3114_v5 = vpack.c.bf16 %v2127_v19, %v4627_v52  ;;  %v4684_v27 = vmul.f32 %v3603_v33, %v4585_v41  ;;  %3616 = vpow2.f32 %v1546_v51  ;;  %v1395_v57 = vsub.f32 0.0, %v4672_v17  ;;  %v853_v44 = vpop.f32.mrf.mxu0 }
 0x182   : > { %v3607_v32 = vpop.eup %3606  ;;  %v4688_v60 = vmul.f32 %v3605_v46, %v4596_v20  ;;  %3618 = vpow2.f32 %v1610_v28  ;;  %v1167_v61 = vmul.f32 %v4570_v16, %v4623_v55  ;;  %v1231_v3 = vmul.f32 %v4570_v16, %v1088_v9  ;;  %v933_v9 = vpop.f32.mrf.mxu1 }
 0x183   : > { %v3609_v6 = vpop.eup %3608  ;;  %3198 = vst [vmem:[%s3987_s19 + $0x1d0] sm:$0xff] %v3114_v5   ;;  %v4695_v41 = vmul.f32 %v3607_v32, %v4599_v56  ;;  %3620 = vpow2.f32 %v1674_v11  ;;  %v1548_v52 = vmul.f32 1.442695, %v1395_v57  ;;  %v4703_v55 = vadd.f32 %v4578_v50, %v1199_v12 }
 0x184   : > { %v3611_v10 = vpop.eup %3610  ;;  %v2033_v20 = vmul.f32 %v3609_v6, %v4602_v14  ;;  %3622 = vpow2.f32 %v1738_v62  ;;  %v4700_v40 = vadd.f32 %v4578_v50, %v1167_v61  ;;  %v4706_v56 = vadd.f32 %v4578_v50, %v1231_v3 }
 0x185   : > { %v3613_v38 = vpop.eup %3612  ;;  %v1809_v13 = vadd.f32 1.0, %v3611_v10  ;;  %3624 = vpow2.f32 %v1548_v52  ;;  %v1136_v21 = vmul.f32 %v4570_v16, %v4652_v2  ;;  %v1459_v29 = vsub.f32 0.0, %v4703_v55 }
 0x186   : > { %v3615_v24 = vpop.eup %3614  ;;  %v2879_v14 = vpack.c.bf16 %v2033_v20, %v2032_v23  ;;  %v1841_v8 = vadd.f32 1.0, %v3613_v38  ;;  %v1427_v51 = vsub.f32 0.0, %v4700_v40  ;;  %v1491_v18 = vsub.f32 0.0, %v4706_v56 }
 0x187   : > { %v3617_v59 = vpop.eup %3616  ;;  %3626 = vrcp.f32 %v1809_v13  ;;  %v1873_v15 = vadd.f32 1.0, %v3615_v24  ;;  %v4714_v48 = vadd.f32 %v4578_v50, %v1136_v21  ;;  %v1676_v4 = vmul.f32 1.442695, %v1459_v29  ;;  %v1013_v33 = vpop.f32.mrf.mxu2 }
 0x188   : > { %v3619_v43 = vpop.eup %3618  ;;  %3151 = vst [vmem:[%s3987_s19 + $0x58] sm:$0xff] %v2879_v14   ;;  %3628 = vrcp.f32 %v1841_v8  ;;  %v1778_v2 = vadd.f32 1.0, %v3617_v59  ;;  %v1612_v34 = vmul.f32 1.442695, %v1427_v51  ;;  %v1740_v49 = vmul.f32 1.442695, %v1491_v18  ;;  %v1093_v23 = vpop.f32.mrf.mxu3 }
 0x189   : > { %v3621_v36 = vpop.eup %3620  ;;  %3630 = vrcp.f32 %v1873_v15  ;;  %v1810_v26 = vadd.f32 1.0, %v3619_v43  ;;  %v1396_v31 = vsub.f32 0.0, %v4714_v48  ;;  %v1168_v1 = vmul.f32 %v4570_v16, %v4660_v45 }
 0x18a   : > { %v3623_v30 = vpop.eup %3622  ;;  %3632 = vrcp.f32 %v1778_v2  ;;  %v1842_v0 = vadd.f32 1.0, %v3621_v36  ;;  %v1200_v22 = vmul.f32 %v4570_v16, %v1011_v37  ;;  %v1232_v28 = vmul.f32 %v4570_v16, %v1091_v35  ;;  %v856_v35 = vpop.f32.mrf.mxu0 }
 0x18b   : > { %v3625_v53 = vpop.eup %3624  ;;  %3634 = vrcp.f32 %v1810_v26  ;;  %v1874_v7 = vadd.f32 1.0, %v3623_v30  ;;  %v1550_v19 = vmul.f32 1.442695, %v1396_v31  ;;  %v4723_v62 = vadd.f32 %v4578_v50, %v1168_v1  ;;  %v936_v20 = vpop.f32.mrf.mxu1 }
 0x18c   : > { %3636 = vrcp.f32 %v1842_v0  ;;  %v1779_v11 = vadd.f32 1.0, %v3625_v53  ;;  %v4726_v46 = vadd.f32 %v4578_v50, %v1200_v22  ;;  %v4729_v45 = vadd.f32 %v4578_v50, %v1232_v28 }
 0x18d   : > { %v3627_v5 = vpop.eup %3626  ;;  %3638 = vrcp.f32 %v1874_v7  ;;  %v1137_v57 = vmul.f32 %v4570_v16, %v853_v44  ;;  %v1169_v37 = vmul.f32 %v4570_v16, %v933_v9  ;;  %v1428_v12 = vsub.f32 0.0, %v4723_v62 }
 0x18e   : > { %v3629_v32 = vpop.eup %3628  ;;  %v2065_v61 = vmul.f32 %v3627_v5, %v4632_v54  ;;  %3640 = vrcp.f32 %v1779_v11  ;;  %v1460_v6 = vsub.f32 0.0, %v4726_v46  ;;  %v1492_v10 = vsub.f32 0.0, %v4729_v45 }
 0x18f   : > { %v3631_v52 = vpop.eup %3630  ;;  %v2097_v3 = vmul.f32 %v3629_v32, %v4636_v25  ;;  %3642 = vpow2.f32 %v1612_v34  ;;  %v4739_v44 = vadd.f32 %v4578_v50, %v1137_v57  ;;  %v1614_v21 = vmul.f32 1.442695, %v1428_v12 }
 0x190   : > { %v3633_v38 = vpop.eup %3632  ;;  %v2959_v13 = vpack.c.bf16 %v2065_v61, %v4684_v27  ;;  %v2129_v54 = vmul.f32 %v3631_v52, %v4639_v63  ;;  %3644 = vpow2.f32 %v1676_v4  ;;  %v1678_v14 = vmul.f32 1.442695, %v1460_v6  ;;  %v1016_v4 = vpop.f32.mrf.mxu2 }
 0x191   : > { %v3635_v9 = vpop.eup %3634  ;;  %v3039_v24 = vpack.c.bf16 %v2097_v3, %v4688_v60  ;;  %v2034_v25 = vmul.f32 %v3633_v38, %v4644_v58  ;;  %3646 = vpow2.f32 %v1740_v49  ;;  %v1742_v27 = vmul.f32 1.442695, %v1492_v10  ;;  %v1096_v36 = vpop.f32.mrf.mxu3 }
 0x192   : > { %v3637_v8 = vpop.eup %3636  ;;  %3167 = vst [vmem:[%s3987_s19 + $0xd8] sm:$0xff] %v2959_v13   ;;  %v3119_v51 = vpack.c.bf16 %v2129_v54, %v4695_v41  ;;  %v4748_v29 = vmul.f32 %v3635_v9, %v4657_v47  ;;  %3648 = vpow2.f32 %v1550_v19  ;;  %v1397_v58 = vsub.f32 0.0, %v4739_v44  ;;  %v858_v53 = vpop.f32.mrf.mxu0 }
 0x193   : > { %v3639_v63 = vpop.eup %3638  ;;  %3183 = vst [vmem:[%s3987_s19 + $0x158] sm:$0xff] %v3039_v24   ;;  %v4752_v59 = vmul.f32 %v3637_v8, %v4664_v39  ;;  %3650 = vpow2.f32 %v1614_v21  ;;  %v4756_v60 = vadd.f32 %v4578_v50, %v1169_v37  ;;  %v1201_v47 = vmul.f32 %v4570_v16, %v1013_v33  ;;  %v938_v37 = vpop.f32.mrf.mxu1 }
 0x194   : > { %v3641_v15 = vpop.eup %3640  ;;  %3199 = vst [vmem:[%s3987_s19 + $0x1d8] sm:$0xff] %v3119_v51   ;;  %v4760_v41 = vmul.f32 %v3639_v63, %v4667_v42  ;;  %3652 = vpow2.f32 %v1678_v14  ;;  %v1233_v18 = vmul.f32 %v4570_v16, %v1093_v23  ;;  %v1552_v2 = vmul.f32 1.442695, %v1397_v58 }
 0x195   : > { %v3643_v43 = vpop.eup %3642  ;;  %v2035_v39 = vmul.f32 %v3641_v15, %v4672_v17  ;;  %3654 = vpow2.f32 %v1742_v27  ;;  %v1429_v34 = vsub.f32 0.0, %v4756_v60  ;;  %v4767_v42 = vadd.f32 %v4578_v50, %v1201_v47 }
 0x196   : > { %v3645_v26 = vpop.eup %3644  ;;  %v1811_v49 = vadd.f32 1.0, %v3643_v43  ;;  %v4770_v31 = vadd.f32 %v4578_v50, %v1233_v18  ;;  %v1138_v30 = vmul.f32 %v4570_v16, %v856_v35  ;;  %3656 = vpow2.f32 %v1552_v2 }
 0x197   : > { %v3647_v0 = vpop.eup %3646  ;;  %v2884_v1 = vpack.c.bf16 %v2035_v39, %v2034_v25  ;;  %v1843_v17 = vadd.f32 1.0, %v3645_v26  ;;  %v1616_v22 = vmul.f32 1.442695, %v1429_v34  ;;  %v1461_v28 = vsub.f32 0.0, %v4767_v42 }
 0x198   : > { %v3649_v7 = vpop.eup %3648  ;;  %3658 = vrcp.f32 %v1811_v49  ;;  %v1875_v19 = vadd.f32 1.0, %v3647_v0  ;;  %v1493_v33 = vsub.f32 0.0, %v4770_v31  ;;  %v4777_v5 = vadd.f32 %v4578_v50, %v1138_v30  ;;  %v1018_v47 = vpop.f32.mrf.mxu2 }
 0x199   : > { %v3651_v23 = vpop.eup %3650  ;;  %3152 = vst [vmem:[%s3987_s19 + $0x60] sm:$0xff] %v2884_v1   ;;  %3660 = vrcp.f32 %v1843_v17  ;;  %v1780_v11 = vadd.f32 1.0, %v3649_v7  ;;  %v1170_v57 = vmul.f32 %v4570_v16, %v936_v20  ;;  %v1680_v61 = vmul.f32 1.442695, %v1461_v28  ;;  %v1098_v18 = vpop.f32.mrf.mxu3 }
 0x19a   : > { %v3653_v35 = vpop.eup %3652  ;;  %3662 = vrcp.f32 %v1875_v19  ;;  %v1812_v32 = vadd.f32 1.0, %v3651_v23  ;;  %v1744_v12 = vmul.f32 1.442695, %v1493_v33  ;;  %v1398_v3 = vsub.f32 0.0, %v4777_v5  ;;  %v861_v49 = vpop.f32.mrf.mxu0 }
 0x19b   : > { %v3655_v6 = vpop.eup %3654  ;;  %3664 = vrcp.f32 %v1780_v11  ;;  %v1844_v52 = vadd.f32 1.0, %v3653_v35  ;;  %v4782_v10 = vadd.f32 %v4578_v50, %v1170_v57  ;;  %v1202_v13 = vmul.f32 %v4570_v16, %v1016_v4 }
 0x19c   : > { %3666 = vrcp.f32 %v1812_v32  ;;  %v1876_v38 = vadd.f32 1.0, %v3655_v6  ;;  %v1234_v20 = vmul.f32 %v4570_v16, %v1096_v36  ;;  %v3657_v54 = vpop.eup %3656  ;;  %v1554_v21 = vmul.f32 1.442695, %v1398_v3 }
 0x19d   : > { %3668 = vrcp.f32 %v1844_v52  ;;  %v1430_v9 = vsub.f32 0.0, %v4782_v10  ;;  %v1139_v24 = vmul.f32 %v4570_v16, %v858_v53  ;;  %v1781_v14 = vadd.f32 1.0, %v3657_v54 }
 0x19e   : > { %v3659_v25 = vpop.eup %3658  ;;  %3670 = vrcp.f32 %v1876_v38  ;;  %v4789_v8 = vadd.f32 %v4578_v50, %v1202_v13  ;;  %v4792_v51 = vadd.f32 %v4578_v50, %v1234_v20  ;;  %v1171_v7 = vmul.f32 %v4570_v16, %v938_v37 }
 0x19f   : > { %v3661_v27 = vpop.eup %3660  ;;  %v2067_v63 = vmul.f32 %v3659_v25, %v4700_v40  ;;  %3672 = vpow2.f32 %v1616_v22  ;;  %v1618_v58 = vmul.f32 1.442695, %v1430_v9  ;;  %v4796_v15 = vadd.f32 %v4578_v50, %v1139_v24 }
 0x1a0   : > { %v3663_v43 = vpop.eup %3662  ;;  %v2099_v39 = vmul.f32 %v3661_v27, %v4703_v55  ;;  %3674 = vrcp.f32 %v1781_v14  ;;  %v1462_v2 = vsub.f32 0.0, %v4789_v8  ;;  %v1494_v34 = vsub.f32 0.0, %v4792_v51  ;;  %v1021_v54 = vpop.f32.mrf.mxu2 }
 0x1a1   : > { %v3665_v4 = vpop.eup %3664  ;;  %v2964_v36 = vpack.c.bf16 %v2067_v63, %v4748_v29  ;;  %v2131_v40 = vmul.f32 %v3663_v43, %v4706_v56  ;;  %3676 = vpow2.f32 %v1680_v61  ;;  %v1399_v26 = vsub.f32 0.0, %v4796_v15  ;;  %v941_v29 = vpop.f32.mrf.mxu1 }
 0x1a2   : > { %v3667_v30 = vpop.eup %3666  ;;  %v3044_v0 = vpack.c.bf16 %v2099_v39, %v4752_v59  ;;  %3678 = vpow2.f32 %v1744_v12  ;;  %v1682_v55 = vmul.f32 1.442695, %v1462_v2  ;;  %v1746_v22 = vmul.f32 1.442695, %v1494_v34 }
 0x1a3   : > { %v3669_v1 = vpop.eup %3668  ;;  %3168 = vst [vmem:[%s3987_s19 + $0xe0] sm:$0xff] %v2964_v36   ;;  %v3124_v17 = vpack.c.bf16 %v2131_v40, %v4760_v41  ;;  %3680 = vpow2.f32 %v1554_v21  ;;  %v1556_v56 = vmul.f32 1.442695, %v1399_v26  ;;  %v2036_v28 = vmul.f32 %v3665_v4, %v4714_v48  ;;  %v1101_v21 = vpop.f32.mrf.mxu3 }
 0x1a4   : > { %v3671_v53 = vpop.eup %3670  ;;  %3184 = vst [vmem:[%s3987_s19 + $0x160] sm:$0xff] %v3044_v0   ;;  %3682 = vpow2.f32 %v1618_v58  ;;  %v1203_v59 = vmul.f32 %v4570_v16, %v1018_v47  ;;  %v1235_v33 = vmul.f32 %v4570_v16, %v1098_v18  ;;  %v4814_v11 = vadd.f32 %v4578_v50, %v1171_v7  ;;  %v863_v47 = vpop.f32.mrf.mxu0 }
 0x1a5   : > { %v3673_v19 = vpop.eup %3672  ;;  %3200 = vst [vmem:[%s3987_s19 + $0x1e0] sm:$0xff] %v3124_v17   ;;  %3684 = vpow2.f32 %v1682_v55  ;;  %v1140_v57 = vmul.f32 %v4570_v16, %v861_v49  ;;  %v2068_v24 = vmul.f32 %v3667_v30, %v4723_v62  ;;  %v2100_v27 = vmul.f32 %v3669_v1, %v4726_v46 }
 0x1a6   : > { %v3675_v23 = vpop.eup %3674  ;;  %v1813_v41 = vadd.f32 1.0, %v3673_v19  ;;  %3686 = vpow2.f32 %v1746_v22  ;;  %v4819_v32 = vadd.f32 %v4578_v50, %v1203_v59  ;;  %v4822_v48 = vadd.f32 %v4578_v50, %v1235_v33 }
 0x1a7   : > { %v3677_v35 = vpop.eup %3676  ;;  %v2037_v37 = vmul.f32 %v3675_v23, %v4739_v44  ;;  %3688 = vpow2.f32 %v1556_v56  ;;  %v1431_v6 = vsub.f32 0.0, %v4814_v11  ;;  %v4826_v52 = vadd.f32 %v4578_v50, %v1140_v57 }
 0x1a8   : > { %v3679_v61 = vpop.eup %3678  ;;  %3690 = vrcp.f32 %v1813_v41  ;;  %v1845_v12 = vadd.f32 1.0, %v3677_v35  ;;  %v1463_v44 = vsub.f32 0.0, %v4819_v32  ;;  %v1495_v20 = vsub.f32 0.0, %v4822_v48 }
 0x1a9   : > { %v3681_v3 = vpop.eup %3680  ;;  %v2889_v38 = vpack.c.bf16 %v2037_v37, %v2036_v28  ;;  %v1877_v13 = vadd.f32 1.0, %v3679_v61  ;;  %v1400_v58 = vsub.f32 0.0, %v4826_v52  ;;  %v2132_v43 = vmul.f32 %v3671_v53, %v4729_v45  ;;  %v943_v46 = vpop.f32.mrf.mxu1 }
 0x1aa   : > { %v3683_v9 = vpop.eup %3682  ;;  %3692 = vrcp.f32 %v1845_v12  ;;  %v1782_v25 = vadd.f32 1.0, %v3681_v3  ;;  %v1620_v39 = vmul.f32 1.442695, %v1431_v6  ;;  %v1684_v2 = vmul.f32 1.442695, %v1463_v44  ;;  %v1023_v37 = vpop.f32.mrf.mxu2 }
 0x1ab   : > { %v3685_v14 = vpop.eup %3684  ;;  %3153 = vst [vmem:[%s3987_s19 + $0x68] sm:$0xff] %v2889_v38   ;;  %3694 = vrcp.f32 %v1877_v13  ;;  %v1814_v63 = vadd.f32 1.0, %v3683_v9  ;;  %v1172_v34 = vmul.f32 %v4570_v16, %v941_v29  ;;  %v1748_v36 = vmul.f32 1.442695, %v1495_v20  ;;  %v1103_v61 = vpop.f32.mrf.mxu3 }
 0x1ac   : > { %v3687_v18 = vpop.eup %3686  ;;  %3696 = vrcp.f32 %v1782_v25  ;;  %v1846_v62 = vadd.f32 1.0, %v3685_v14  ;;  %v1204_v40 = vmul.f32 %v4570_v16, %v1021_v54  ;;  %v1236_v0 = vmul.f32 %v4570_v16, %v1101_v21 }
 0x1ad   : > { %v3689_v4 = vpop.eup %3688  ;;  %v4838_v30 = vadd.f32 %v4578_v50, %v1172_v34  ;;  %v1141_v45 = vmul.f32 %v4570_v16, %v863_v47  ;;  %3698 = vrcp.f32 %v1814_v63  ;;  %v1558_v1 = vmul.f32 1.442695, %v1400_v58 }
 0x1ae   : > { %v3691_v26 = vpop.eup %3690  ;;  %v1783_v49 = vadd.f32 1.0, %v3689_v4  ;;  %v4844_v17 = vadd.f32 %v4578_v50, %v1204_v40  ;;  %v1173_v56 = vmul.f32 %v4570_v16, %v943_v46  ;;  %v1878_v33 = vadd.f32 1.0, %v3687_v18 }
 0x1af   : > { %v2069_v55 = vmul.f32 %v3691_v26, %v4756_v60  ;;  %v1432_v29 = vsub.f32 0.0, %v4838_v30  ;;  %v4848_v53 = vadd.f32 %v4578_v50, %v1141_v45  ;;  %v4855_v23 = vadd.f32 %v4578_v50, %v1236_v0 }
 0x1b0   : > { %v3693_v22 = vpop.eup %3692  ;;  %3700 = vrcp.f32 %v1783_v49  ;;  %v1464_v60 = vsub.f32 0.0, %v4844_v17  ;;  %v4861_v3 = vadd.f32 %v4578_v50, %v1173_v56  ;;  %v1205_v44 = vmul.f32 %v4570_v16, %v1023_v37 }
 0x1b1   : > { %v3695_v7 = vpop.eup %3694  ;;  %v2969_v19 = vpack.c.bf16 %v2069_v55, %v2068_v24  ;;  %v2101_v28 = vmul.f32 %v3693_v22, %v4767_v42  ;;  %3702 = vpow2.f32 %v1620_v39  ;;  %v1622_v35 = vmul.f32 1.442695, %v1432_v29 }
 0x1b2   : > { %v2133_v59 = vmul.f32 %v3695_v7, %v4770_v31  ;;  %3704 = vpow2.f32 %v1684_v2  ;;  %v3697_v41 = vpop.eup %3696  ;;  %v1686_v12 = vmul.f32 1.442695, %v1464_v60  ;;  %v1401_v31 = vsub.f32 0.0, %v4848_v53 }
 0x1b3   : > { %3169 = vst [vmem:[%s3987_s19 + $0xe8] sm:$0xff] %v2969_v19   ;;  %v3049_v57 = vpack.c.bf16 %v2101_v28, %v2100_v27  ;;  %3706 = vpow2.f32 %v1748_v36  ;;  %v3699_v6 = vpop.eup %3698  ;;  %v1496_v13 = vsub.f32 0.0, %v4855_v23  ;;  %v1237_v20 = vmul.f32 %v4570_v16, %v1103_v61 }
 0x1b4   : > { %v3129_v42 = vpack.c.bf16 %v2133_v59, %v2132_v43  ;;  %3708 = vpow2.f32 %v1558_v1  ;;  %v2038_v21 = vmul.f32 %v3697_v41, %v4777_v5  ;;  %v1560_v24 = vmul.f32 1.442695, %v1401_v31 }
 0x1b5   : > { %3185 = vst [vmem:[%s3987_s19 + $0x168] sm:$0xff] %v3049_v57   ;;  %3710 = vrcp.f32 %v1846_v62  ;;  %v4870_v27 = vadd.f32 %v4578_v50, %v1205_v44  ;;  %v4873_v63 = vadd.f32 %v4578_v50, %v1237_v20  ;;  %v1433_v5 = vsub.f32 0.0, %v4861_v3 }
 0x1b6   : > { %v3701_v38 = vpop.eup %3700  ;;  %3201 = vst [vmem:[%s3987_s19 + $0x1e8] sm:$0xff] %v3129_v42   ;;  %3712 = vrcp.f32 %v1878_v33  ;;  %v1750_v43 = vmul.f32 1.442695, %v1496_v13  ;;  %v2070_v1 = vmul.f32 %v3699_v6, %v4782_v10 }
 0x1b7   : > { %v3703_v54 = vpop.eup %3702  ;;  %v2039_v9 = vmul.f32 %v3701_v38, %v4796_v15  ;;  %3714 = vpow2.f32 %v1622_v35  ;;  %v1465_v2 = vsub.f32 0.0, %v4870_v27  ;;  %v1497_v50 = vsub.f32 0.0, %v4873_v63 }
 0x1b8   : > { %v3705_v25 = vpop.eup %3704  ;;  %v1815_v14 = vadd.f32 1.0, %v3703_v54  ;;  %3716 = vpow2.f32 %v1686_v12  ;;  %v1624_v36 = vmul.f32 1.442695, %v1433_v5 }
 0x1b9   : > { %v3707_v58 = vpop.eup %3706  ;;  %v2894_v47 = vpack.c.bf16 %v2039_v9, %v2038_v21  ;;  %v1847_v16 = vadd.f32 1.0, %v3705_v25  ;;  %3718 = vpow2.f32 %v1560_v24  ;;  %v1688_v26 = vmul.f32 1.442695, %v1465_v2 }
 0x1ba   : > { %v3709_v18 = vpop.eup %3708  ;;  %3720 = vrcp.f32 %v1815_v14  ;;  %v1879_v15 = vadd.f32 1.0, %v3707_v58  ;;  %v1752_v45 = vmul.f32 1.442695, %v1497_v50 }
 0x1bb   : > { %v3711_v39 = vpop.eup %3710  ;;  %3154 = vst [vmem:[%s3987_s19 + $0x70] sm:$0xff] %v2894_v47   ;;  %3722 = vrcp.f32 %v1847_v16  ;;  %v1784_v4 = vadd.f32 1.0, %v3709_v18 }
 0x1bc   : > { %v3713_v34 = vpop.eup %3712  ;;  %3724 = vrcp.f32 %v1879_v15  ;;  %v2102_v56 = vmul.f32 %v3711_v39, %v4789_v8 }
 0x1bd   : > { %v3715_v62 = vpop.eup %3714  ;;  %3726 = vpow2.f32 %v1750_v43  ;;  %v2134_v19 = vmul.f32 %v3713_v34, %v4792_v51 }
 0x1be   : > { %v3717_v40 = vpop.eup %3716  ;;  %3728 = vrcp.f32 %v1784_v4  ;;  %v1816_v10 = vadd.f32 1.0, %v3715_v62 }
 0x1bf   : > { %v3719_v46 = vpop.eup %3718  ;;  %3730 = vpow2.f32 %v1624_v36  ;;  %v1848_v41 = vadd.f32 1.0, %v3717_v40 }
 0x1c0   : > { %v3721_v49 = vpop.eup %3720  ;;  %v1785_v0 = vadd.f32 1.0, %v3719_v46 }
 0x1c1   : > { %v3723_v55 = vpop.eup %3722  ;;  %v2071_v22 = vmul.f32 %v3721_v49, %v4814_v11 }
 0x1c2   : > { %v3725_v29 = vpop.eup %3724  ;;  %v2103_v7 = vmul.f32 %v3723_v55, %v4819_v32  ;;  %3732 = vrcp.f32 %v1785_v0 }
 0x1c3   : > { %v2974_v28 = vpack.c.bf16 %v2071_v22, %v2070_v1  ;;  %v2135_v60 = vmul.f32 %v3725_v29, %v4822_v48  ;;  %3734 = vpow2.f32 %v1688_v26  ;;  %v3727_v59 = vpop.eup %3726 }
 0x1c4   : > { %v3054_v33 = vpack.c.bf16 %v2103_v7, %v2102_v56  ;;  %3736 = vpow2.f32 %v1752_v45  ;;  %v3729_v57 = vpop.eup %3728  ;;  %v1880_v32 = vadd.f32 1.0, %v3727_v59 }
 0x1c5   : > { %3170 = vst [vmem:[%s3987_s19 + $0xf0] sm:$0xff] %v2974_v28   ;;  %v3134_v11 = vpack.c.bf16 %v2135_v60, %v2134_v19  ;;  %v3731_v8 = vpop.eup %3730  ;;  %3738 = vrcp.f32 %v1816_v10  ;;  %v2040_v48 = vmul.f32 %v3729_v57, %v4826_v52 }
 0x1c6   : > { %3186 = vst [vmem:[%s3987_s19 + $0x170] sm:$0xff] %v3054_v33   ;;  %v1817_v51 = vadd.f32 1.0, %v3731_v8  ;;  %3740 = vrcp.f32 %v1848_v41 }
 0x1c7   : > { %3202 = vst [vmem:[%s3987_s19 + $0x1f0] sm:$0xff] %v3134_v11  }
 0x1c8   : > { %v3733_v35 = vpop.eup %3732  ;;  %3742 = vrcp.f32 %v1817_v51 }
 0x1c9   : > { %v3735_v37 = vpop.eup %3734  ;;  %v2041_v61 = vmul.f32 %v3733_v35, %v4848_v53  ;;  %3744 = vrcp.f32 %v1880_v32 }
 0x1ca   : > { %v3737_v42 = vpop.eup %3736  ;;  %v1849_v12 = vadd.f32 1.0, %v3735_v37 }
 0x1cb   : > { %v2899_v6 = vpack.c.bf16 %v2041_v61, %v2040_v48  ;;  %v1881_v31 = vadd.f32 1.0, %v3737_v42  ;;  %v3739_v38 = vpop.eup %3738 }
 0x1cc   : > { %3746 = vrcp.f32 %v1849_v12  ;;  %v3741_v13 = vpop.eup %3740  ;;  %v2072_v52 = vmul.f32 %v3739_v38, %v4838_v30 }
 0x1cd   : > { %3155 = vst [vmem:[%s3987_s19 + $0x78] sm:$0xff] %v2899_v6   ;;  %3748 = vrcp.f32 %v1881_v31  ;;  %v2104_v9 = vmul.f32 %v3741_v13, %v4844_v17 }
 0x1ce   : > { %v3743_v44 = vpop.eup %3742 }
 0x1cf   : > { %v3745_v20 = vpop.eup %3744  ;;  %v2073_v53 = vmul.f32 %v3743_v44, %v4861_v3 }
 0x1d0   : > { %v2136_v14 = vmul.f32 %v3745_v20, %v4855_v23 }
 0x1d1   : > { %v2979_v24 = vpack.c.bf16 %v2073_v53, %v2072_v52 }
 0x1d2   : > { %v3747_v54 = vpop.eup %3746 }
 0x1d3   : > { %v3749_v21 = vpop.eup %3748  ;;  %v2105_v25 = vmul.f32 %v3747_v54, %v4870_v27  ;;  %3171 = vst [vmem:[%s3987_s19 + $0xf8] sm:$0xff] %v2979_v24  }
 0x1d4   : > { %v2137_v58 = vmul.f32 %v3749_v21, %v4873_v63 }
 0x1d5   : > { %v3059_v47 = vpack.c.bf16 %v2105_v25, %v2104_v9 }
 0x1d6   : > { %v3139_v16 = vpack.c.bf16 %v2137_v58, %v2136_v14 }
 0x1d7   : > { %3187 = vst [vmem:[%s3987_s19 + $0x178] sm:$0xff] %v3059_v47  }
 0x1d8   : > { %3203 = vst [vmem:[%s3987_s19 + $0x1f8] sm:$0xff] %v3139_v16  }
 0x1d9 PF: > { %s14_s15 = sadd.s32 1, %s3760_s15  }
 0x1da   : > { %p11_p4 = scmp.ge.s32.totalorder %s14_s15, 4  }
 0x1dc   :  { %13 = sbr.rel (!%p11_p4) target bundleno = 1 (0x1), region = 66 }

// kernel: simple_cnn2d_forward.6
= control target key start
LH: loop header
LB: loop body
LE: loop exit
PB: predicated region body
PF: predicated region fallthrough
CT: control target
= control target key end

     0   :  { %s3507_s15 = smov 0   ;;  %s4312_s0 = inlined_call_operand.vmem [shape: bf16[512,896], index: 0, kind: input, shape index: {}]   ;;  %s4313_s1 = inlined_call_operand.vmem [shape: bf16[896,128], index: 1, kind: input, shape index: {}]   ;;  %s4314_s2 = inlined_call_operand.vmem [shape: f32[1,128], index: 2, kind: input, shape index: {}]   ;;  %s4315_s3 = inlined_call_operand.vmem [shape: f32[1,128], index: 3, kind: input, shape index: {}]   ;;  %s4316_s4 = inlined_call_operand.vmem [shape: bf16[512,128], index: 4, kind: output, shape index: {}]  }
   0x1 LB: > { %s2363_s16 = sadd.s32 4294967295, %s3480_s15   ;;  %p2367_p0 = scmp.ge.s32.totalorder %s3480_s15, 1  ;;  %s3480_s15 = sphi %s3507_s15, %s14_s15  }
   0x2   : > { %p164_p1 = scmp.lt.s32.totalorder %s3480_s15, 3 }
   0x4   : > { %p165_p2 = pnand %p2367_p0, %p164_p1 }
   0x5   : > { %s2368_s9 = sshll.u32 (!%p165_p2), %s2363_s16, 5 }
   0x6   : > { %168 = sbr.rel (%p165_p2) target bundleno = 652 (0x28c), region = 36  ;;  %p192_p3 = scmp.lt.s32.totalorder (!%p165_p2), %s2368_s9, 63 }
   0xb   : > { %v3165_v0 = vld [vmem:[%s4313_s1 + $0x38] sm:$0xff]  ;;  %v3164_v3 = vld [vmem:[%s4313_s1 + $0x30] sm:$0xff]  ;;  %v3163_v6 = vld [vmem:[%s4313_s1 + $0x28] sm:$0xff]  ;;  %s4318_s9 = smov (!%p192_p3, %s2368_s9), 63 }
   0xc   : > { %v3521_v1 = vld [vmem:[%s4313_s1 + $0x78] sm:$0xff]  ;;  %1356 = vmatpush.bf16.msra.mxu0 %v3165_v0  ;;  %3309 = vmatpush.bf16.msra.mxu3 %v3165_v0  ;;  %v3536_v4 = vld [vmem:[%s4313_s1 + $0x70] sm:$0xff]  ;;  %v3551_v7 = vld [vmem:[%s4313_s1 + $0x68] sm:$0xff]  ;;  %s3333_s25 = smul.u32 28, %s4318_s9  ;;  %s2371_s20 = sshll.u32 %s4318_s9, 2 }
   0xd   : > { %v3526_v2 = vld [vmem:[%s4313_s1 + $0xb8] sm:$0xff]  ;;  %1445 = vmatpush.bf16.msra.mxu1 %v3521_v1  ;;  %v3541_v5 = vld [vmem:[%s4313_s1 + $0xb0] sm:$0xff]  ;;  %v3556_v8 = vld [vmem:[%s4313_s1 + $0xa8] sm:$0xff]  ;;  %s4102_s22 = scalar_lea.vmem %s4316_s4, %s2371_s20 }
   0xe   : > { %1534 = vmatpush.bf16.msra.mxu2 %v3526_v2  ;;  %v3162_v9 = vld [vmem:[%s4313_s1 + $0x20] sm:$0xff]  ;;  %v3161_v12 = vld [vmem:[%s4313_s1 + $0x18] sm:$0xff]  ;;  %v3160_v15 = vld [vmem:[%s4313_s1 + $0x10] sm:$0xff]  ;;  %s3612_s8 = scalar_lea.vmem %s4312_s0, %s3333_s25 }
   0xf   : > { %v3566_v10 = vld [vmem:[%s4313_s1 + $0x60] sm:$0xff]  ;;  %v3583_v13 = vld [vmem:[%s4313_s1 + $0x58] sm:$0xff]  ;;  %v3599_v16 = vld [vmem:[%s4313_s1 + $0x50] sm:$0xff] }
  0x10   : > { %1357 = vmatpush.bf16.msra.mxu0 %v3164_v3  ;;  %3310 = vmatpush.bf16.msra.mxu3 %v3164_v3  ;;  %v3571_v11 = vld [vmem:[%s4313_s1 + $0xa0] sm:$0xff]  ;;  %v3588_v14 = vld [vmem:[%s4313_s1 + $0x98] sm:$0xff]  ;;  %v3604_v17 = vld [vmem:[%s4313_s1 + $0x90] sm:$0xff] }
  0x11   : > { %1446 = vmatpush.bf16.msra.mxu1 %v3536_v4  ;;  %v3159_v18 = vld [vmem:[%s4313_s1 + $0x8] sm:$0xff]  ;;  %v3158_v21 = vld [vmem:[%s4313_s1] sm:$0xff]  ;;  %v3049_v25 = vld [vmem:[%s3612_s8 + $0x18] sm:$0xf0] }
  0x12   : > { %1535 = vmatpush.bf16.msra.mxu2 %v3541_v5  ;;  %v3619_v19 = vld [vmem:[%s4313_s1 + $0x48] sm:$0xff]  ;;  %v3632_v22 = vld [vmem:[%s4313_s1 + $0x40] sm:$0xff]  ;;  %v3133_v27 = vld [vmem:[%s3612_s8 + $0x2b8] sm:$0xf0] }
  0x13   : > { %v3624_v20 = vld [vmem:[%s4313_s1 + $0x88] sm:$0xff]  ;;  %v3637_v23 = vld [vmem:[%s4313_s1 + $0x80] sm:$0xff]  ;;  %v3213_v32 = vld [vmem:[%s4313_s1 + $0x1b8] sm:$0xff] }
  0x14   : > { %1358 = vmatpush.bf16.msra.mxu0 %v3163_v6  ;;  %3311 = vmatpush.bf16.msra.mxu3 %v3163_v6  ;;  %v2374_v24 = vld [vmem:[%s3612_s8] sm:$0xf]  ;;  %v3046_v28 = vld [vmem:[%s3612_s8 + $0x4] sm:$0xf]  ;;  %v2382_v30 = vld [vmem:[%s3612_s8 + $0x8] sm:$0xf] }
  0x15   : > { %1447 = vmatpush.bf16.msra.mxu1 %v3551_v7  ;;  %v2710_v26 = vld [vmem:[%s3612_s8 + $0x2a0] sm:$0xf]  ;;  %v3050_v31 = vld [vmem:[%s3612_s8 + $0x20] sm:$0xf0]  ;;  %v2375_v33 = vor.u32 %v3049_v25, %v2374_v24  ;;  %v3197_v37 = vld [vmem:[%s4313_s1 + $0x138] sm:$0xff] }
  0x16   : > { %1536 = vmatpush.bf16.msra.mxu2 %v3556_v8  ;;  %v2376_v29 = vld [vmem:[%s3612_s8 + $0x1c] sm:$0xf0]  ;;  %v2711_v34 = vor.u32 %v3133_v27, %v2710_v26  ;;  %v2383_v36 = vor.u32 %v3050_v31, %v2382_v30  ;;  %v3205_v38 = vld [vmem:[%s4313_s1 + $0x178] sm:$0xff]  ;;  %v3212_v39 = vld [vmem:[%s4313_s1 + $0x1b0] sm:$0xff] }
  0x17   : > { %v2379_v35 = vor.u32 %v3046_v28, %v2376_v29  ;;  %v3196_v40 = vld [vmem:[%s4313_s1 + $0x130] sm:$0xff]  ;;  %v2402_v42 = vld [vmem:[%s3612_s8 + $0x38] sm:$0xf]  ;;  %v3053_v46 = vld [vmem:[%s3612_s8 + $0x3c] sm:$0xf] }
  0x18   : > { %1359 = vmatpush.bf16.msra.mxu0 %v3162_v9  ;;  %3312 = vmatpush.bf16.msra.mxu3 %v3162_v9  ;;  %v3204_v41 = vld [vmem:[%s4313_s1 + $0x170] sm:$0xff]  ;;  %v2738_v44 = vld [vmem:[%s3612_s8 + $0x2d8] sm:$0xf]  ;;  %v2410_v48 = vld [vmem:[%s3612_s8 + $0x40] sm:$0xf] }
  0x19   : > { %1448 = vmatpush.bf16.msra.mxu1 %v3566_v10  ;;  %v3056_v43 = vld [vmem:[%s3612_s8 + $0x50] sm:$0xf0]  ;;  %v2404_v47 = vld [vmem:[%s3612_s8 + $0x54] sm:$0xf0]  ;;  %v3057_v49 = vld [vmem:[%s3612_s8 + $0x58] sm:$0xf0] }
  0x1a   : > { %1537 = vmatpush.bf16.msra.mxu2 %v3571_v11  ;;  %v3140_v45 = vld [vmem:[%s3612_s8 + $0x2f0] sm:$0xf0]  ;;  %v2403_v50 = vor.u32 %v3056_v43, %v2402_v42  ;;  %v2407_v52 = vor.u32 %v3053_v46, %v2404_v47  ;;  %v2411_v53 = vor.u32 %v3057_v49, %v2410_v48  ;;  %v3211_v54 = vld [vmem:[%s4313_s1 + $0x1a8] sm:$0xff]  ;;  %v2430_v57 = vld [vmem:[%s3612_s8 + $0x70] sm:$0xf] }
  0x1b   : > { %v2739_v51 = vor.u32 %v3140_v45, %v2738_v44  ;;  %v3195_v55 = vld [vmem:[%s4313_s1 + $0x128] sm:$0xff]  ;;  %v2766_v59 = vld [vmem:[%s3612_s8 + $0x310] sm:$0xf]  ;;  %v3060_v61 = vld [vmem:[%s3612_s8 + $0x74] sm:$0xf] }
  0x1c   : > { %1360 = vmatpush.bf16.msra.mxu0 %v3161_v12  ;;  %3313 = vmatpush.bf16.msra.mxu3 %v3161_v12  ;;  %v3203_v56 = vld [vmem:[%s4313_s1 + $0x168] sm:$0xff]  ;;  %v2432_v62 = vld [vmem:[%s3612_s8 + $0x8c] sm:$0xf0]  ;;  %v2438_v63 = vld [vmem:[%s3612_s8 + $0x78] sm:$0xf] }
  0x1d   : > { %1449 = vmatpush.bf16.msra.mxu1 %v3583_v13  ;;  %v3063_v58 = vld [vmem:[%s3612_s8 + $0x88] sm:$0xf0]  ;;  %v3064_v0 = vld [vmem:[%s3612_s8 + $0x90] sm:$0xf0]  ;;  %v2458_v9 = vld [vmem:[%s3612_s8 + $0xa8] sm:$0xf] }
  0x1e   : > { %1538 = vmatpush.bf16.msra.mxu2 %v3588_v14  ;;  %v3147_v60 = vld [vmem:[%s3612_s8 + $0x328] sm:$0xf0]  ;;  %v2439_v6 = vor.u32 %v3064_v0, %v2438_v63  ;;  %v3154_v12 = vld [vmem:[%s3612_s8 + $0x360] sm:$0xf0]  ;;  %v3077_v24 = vld [vmem:[%s3612_s8 + $0xf8] sm:$0xf0] }
  0x1f   : > { %v2767_v3 = vor.u32 %v3147_v60, %v2766_v59  ;;  %v3074_v25 = vld [vmem:[%s3612_s8 + $0xe4] sm:$0xf]  ;;  %v2712_v27 = vld [vmem:[%s3612_s8 + $0x2bc] sm:$0xf0]  ;;  %v2494_v29 = vld [vmem:[%s3612_s8 + $0xe8] sm:$0xf] }
  0x20   : > { %1361 = vmatpush.bf16.msra.mxu0 %v3160_v15  ;;  %3314 = vmatpush.bf16.msra.mxu3 %v3160_v15  ;;  %v2460_v15 = vld [vmem:[%s3612_s8 + $0xc4] sm:$0xf0]  ;;  %v3130_v26 = vld [vmem:[%s3612_s8 + $0x2a4] sm:$0xf]  ;;  %v2488_v28 = vld [vmem:[%s3612_s8 + $0xfc] sm:$0xf0] }
  0x21   : > { %1450 = vmatpush.bf16.msra.mxu1 %v3599_v16  ;;  %v3078_v30 = vld [vmem:[%s3612_s8 + $0x100] sm:$0xf0]  ;;  %v3085_v42 = vld [vmem:[%s3612_s8 + $0x138] sm:$0xf0]  ;;  %v2542_v47 = vld [vmem:[%s3612_s8 + $0x150] sm:$0xf] }
  0x22   : > { %1539 = vmatpush.bf16.msra.mxu2 %v3604_v17  ;;  %v3091_v48 = vld [vmem:[%s3612_s8 + $0x168] sm:$0xf0]  ;;  %v3088_v49 = vld [vmem:[%s3612_s8 + $0x154] sm:$0xf]  ;;  %v3189_v60 = vld [vmem:[%s4313_s1 + $0xf8] sm:$0xff] }
  0x23   : > { %v3208_v59 = vld [vmem:[%s4313_s1 + $0x190] sm:$0xff]  ;;  %v2570_v0 = vld [vmem:[%s3612_s8 + $0x188] sm:$0xf] }
  0x24   : > { %1362 = vmatpush.bf16.msra.mxu0 %v3159_v18  ;;  %3315 = vmatpush.bf16.msra.mxu3 %v3159_v18  ;;  %v3071_v18 = vld [vmem:[%s3612_s8 + $0xc8] sm:$0xf0]  ;;  %v3188_v63 = vld [vmem:[%s4313_s1 + $0xf0] sm:$0xff] }
  0x25   : > { %1451 = vmatpush.bf16.msra.mxu1 %v3619_v19 }
  0x26   : > { %1540 = vmatpush.bf16.msra.mxu2 %v3624_v20 }
  0x28   : > { %1363 = vmatpush.bf16.msra.mxu0 %v3158_v21  ;;  %3316 = vmatpush.bf16.msra.mxu3 %v3158_v21 }
  0x29   : > { %1452 = vmatpush.bf16.msra.mxu1 %v3632_v22 }
  0x2a   : > { %1541 = vmatpush.bf16.msra.mxu2 %v3637_v23 }
  0x2b   : > { %1364 = vmatmul.bf16.vlgmr.msra.gmra.mxu0 %v2375_v33  ;;  %1424 = vmatmul.bf16.vlgmr.msra.gmra.mxu3 %v2711_v34  ;;  %v2495_v33 = vor.u32 %v3078_v30, %v2494_v29  ;;  %v3201_v34 = vld [vmem:[%s4313_s1 + $0x158] sm:$0xff] }
  0x2c   : > { %3317 = vmatpush.bf16.msrb.mxu3 %v3521_v1  ;;  %1453 = vmatmul.bf16.vlgmr.msra.gmra.mxu1 %v2379_v35  ;;  %v2431_v1 = vor.u32 %v3063_v58, %v2430_v57  ;;  %v2514_v35 = vld [vmem:[%s3612_s8 + $0x118] sm:$0xf] }
  0x2d   : > { %1542 = vmatmul.bf16.vlgmr.msra.gmra.mxu2 %v2383_v36  ;;  %1712 = vmatpush.bf16.msrb.mxu0 %v3197_v37  ;;  %v3084_v36 = vld [vmem:[%s3612_s8 + $0x130] sm:$0xf0]  ;;  %v3081_v37 = vld [vmem:[%s3612_s8 + $0x11c] sm:$0xf] }
  0x2e   : > { %1890 = vmatpush.bf16.msrb.mxu2 %v3213_v32  ;;  %1801 = vmatpush.bf16.msrb.mxu1 %v3205_v38  ;;  %v2715_v32 = vor.u32 %v3130_v26, %v2712_v27  ;;  %v3137_v38 = vld [vmem:[%s3612_s8 + $0x2dc] sm:$0xf]  ;;  %v2515_v43 = vor.u32 %v3084_v36, %v2514_v35  ;;  %v2606_v26 = vld [vmem:[%s3612_s8 + $0x1c8] sm:$0xf]  ;;  %v3106_v27 = vld [vmem:[%s3612_s8 + $0x1e0] sm:$0xf0] }
  0x30   : > { %3318 = vmatpush.bf16.msrb.mxu3 %v3536_v4  ;;  %v2435_v4 = vor.u32 %v3060_v61, %v2432_v62  ;;  %v3192_v61 = vld [vmem:[%s4313_s1 + $0x110] sm:$0xff] }
  0x31   : > { %1713 = vmatpush.bf16.msrb.mxu0 %v3196_v40  ;;  %v2516_v40 = vld [vmem:[%s3612_s8 + $0x134] sm:$0xf0]  ;;  %v3200_v62 = vld [vmem:[%s4313_s1 + $0x150] sm:$0xff] }
  0x32   : > { %1891 = vmatpush.bf16.msrb.mxu2 %v3212_v39  ;;  %1802 = vmatpush.bf16.msrb.mxu1 %v3204_v41  ;;  %v2740_v39 = vld [vmem:[%s3612_s8 + $0x2f4] sm:$0xf0]  ;;  %v2522_v41 = vld [vmem:[%s3612_s8 + $0x120] sm:$0xf]  ;;  %v2519_v45 = vor.u32 %v3081_v37, %v2516_v40 }
  0x33   : > { %v2743_v44 = vor.u32 %v3137_v38, %v2740_v39  ;;  %v2523_v46 = vor.u32 %v3085_v42, %v2522_v41  ;;  %v3184_v39 = vld [vmem:[%s4313_s1 + $0xd0] sm:$0xff]  ;;  %v2626_v40 = vld [vmem:[%s3612_s8 + $0x1f8] sm:$0xf]  ;;  %v3109_v42 = vld [vmem:[%s3612_s8 + $0x1fc] sm:$0xf] }
  0x34   : > { %3319 = vmatpush.bf16.msrb.mxu3 %v3551_v7  ;;  %v3210_v7 = vld [vmem:[%s4313_s1 + $0x1a0] sm:$0xff]  ;;  %v3112_v41 = vld [vmem:[%s3612_s8 + $0x210] sm:$0xf0] }
  0x35   : > { %1714 = vmatpush.bf16.msrb.mxu0 %v3195_v55  ;;  %v2543_v55 = vor.u32 %v3091_v48, %v2542_v47  ;;  %v3113_v47 = vld [vmem:[%s3612_s8 + $0x218] sm:$0xf0] }
  0x36   : > { %1892 = vmatpush.bf16.msrb.mxu2 %v3211_v54  ;;  %1803 = vmatpush.bf16.msrb.mxu1 %v3203_v56  ;;  %v3092_v54 = vld [vmem:[%s3612_s8 + $0x170] sm:$0xf0] }
  0x38   : > { %3320 = vmatpush.bf16.msrb.mxu3 %v3566_v10  ;;  %v2794_v10 = vld [vmem:[%s3612_s8 + $0x348] sm:$0xf] }
  0x39   : > { %v2795_v21 = vor.u32 %v3154_v12, %v2794_v10 }
  0x3a   : > { %1893 = vmatpush.bf16.msrb.mxu2 %v3210_v7  ;;  %v2572_v7 = vld [vmem:[%s3612_s8 + $0x1a4] sm:$0xf0] }
  0x3b   : > { %1369 = vmatmul.bf16.gmra.mxu0 %v2403_v50  ;;  %1429 = vmatmul.bf16.gmra.mxu3 %v2739_v51  ;;  %v3144_v50 = vld [vmem:[%s3612_s8 + $0x314] sm:$0xf]  ;;  %v2768_v51 = vld [vmem:[%s3612_s8 + $0x32c] sm:$0xf0] }
  0x3c   : > { %3321 = vmatpush.bf16.msrb.mxu3 %v3583_v13  ;;  %1458 = vmatmul.bf16.gmra.mxu1 %v2407_v52  ;;  %v3067_v13 = vld [vmem:[%s3612_s8 + $0xac] sm:$0xf]  ;;  %v2544_v52 = vld [vmem:[%s3612_s8 + $0x16c] sm:$0xf0]  ;;  %v2771_v56 = vor.u32 %v3144_v50, %v2768_v51  ;;  %v2627_v50 = vor.u32 %v3112_v41, %v2626_v40 }
  0x3d   : > { %1547 = vmatmul.bf16.gmra.mxu2 %v2411_v53  ;;  %v2550_v53 = vld [vmem:[%s3612_s8 + $0x158] sm:$0xf]  ;;  %v2547_v57 = vor.u32 %v3088_v49, %v2544_v52 }
  0x3e   : > { %v2551_v58 = vor.u32 %v3092_v54, %v2550_v53 }
  0x40   : > { %3322 = vmatpush.bf16.msrb.mxu3 %v3599_v16  ;;  %v2466_v16 = vld [vmem:[%s3612_s8 + $0xb0] sm:$0xf] }
  0x44   : > { %3323 = vmatpush.bf16.msrb.mxu3 %v3619_v19 }
  0x48   : > { %3324 = vmatpush.bf16.msrb.mxu3 %v3632_v22  ;;  %v2463_v22 = vor.u32 %v3067_v13, %v2460_v15 }
  0x4b   : > { %1374 = vmatmul.bf16.gmra.mxu0 %v2431_v1  ;;  %1434 = vmatmul.bf16.gmra.mxu3 %v2767_v3  ;;  %v3098_v1 = vld [vmem:[%s3612_s8 + $0x1a0] sm:$0xf0]  ;;  %v3095_v3 = vld [vmem:[%s3612_s8 + $0x18c] sm:$0xf] }
  0x4c   : > { %3325 = vmatpush.bf16.msra.mxu3 %v3526_v2  ;;  %1463 = vmatmul.bf16.gmra.mxu1 %v2435_v4  ;;  %v3070_v2 = vld [vmem:[%s3612_s8 + $0xc0] sm:$0xf0]  ;;  %v3151_v4 = vld [vmem:[%s3612_s8 + $0x34c] sm:$0xf]  ;;  %v2571_v10 = vor.u32 %v3098_v1, %v2570_v0  ;;  %v2575_v13 = vor.u32 %v3095_v3, %v2572_v7  ;;  %v2654_v7 = vld [vmem:[%s3612_s8 + $0x230] sm:$0xf] }
  0x4d   : > { %1552 = vmatmul.bf16.gmra.mxu2 %v2439_v6  ;;  %v2459_v19 = vor.u32 %v3070_v2, %v2458_v9  ;;  %v2796_v6 = vld [vmem:[%s3612_s8 + $0x364] sm:$0xf0]  ;;  %v2578_v9 = vld [vmem:[%s3612_s8 + $0x190] sm:$0xf]  ;;  %v3099_v2 = vld [vmem:[%s3612_s8 + $0x1a8] sm:$0xf0] }
  0x4e   : > { %v2799_v12 = vor.u32 %v3151_v4, %v2796_v6  ;;  %v2579_v15 = vor.u32 %v3099_v2, %v2578_v9  ;;  %v3182_v6 = vld [vmem:[%s4313_s1 + $0xc0] sm:$0xff]  ;;  %v3119_v9 = vld [vmem:[%s3612_s8 + $0x248] sm:$0xf0]  ;;  %v3116_v2 = vld [vmem:[%s3612_s8 + $0x234] sm:$0xf] }
  0x50   : > { %3326 = vmatpush.bf16.msra.mxu3 %v3541_v5  ;;  %v2467_v5 = vor.u32 %v3071_v18, %v2466_v16  ;;  %v3187_v16 = vld [vmem:[%s4313_s1 + $0xe8] sm:$0xff] }
  0x51   : > { %v3207_v18 = vld [vmem:[%s4313_s1 + $0x188] sm:$0xff] }
  0x54   : > { %3327 = vmatpush.bf16.msra.mxu3 %v3556_v8  ;;  %v3194_v8 = vld [vmem:[%s4313_s1 + $0x120] sm:$0xff] }
  0x55   : > { %1715 = vmatpush.bf16.msrb.mxu0 %v3194_v8  ;;  %v3199_v8 = vld [vmem:[%s4313_s1 + $0x148] sm:$0xff] }
  0x58   : > { %3328 = vmatpush.bf16.msra.mxu3 %v3571_v11  ;;  %v3202_v11 = vld [vmem:[%s4313_s1 + $0x160] sm:$0xff] }
  0x59   : > { %1804 = vmatpush.bf16.msrb.mxu1 %v3202_v11  ;;  %v3102_v11 = vld [vmem:[%s3612_s8 + $0x1c4] sm:$0xf] }
  0x5b   : > { %1379 = vmatmul.bf16.gmra.mxu0 %v2459_v19  ;;  %1439 = vmatmul.bf16.gmra.mxu3 %v2795_v21  ;;  %v3186_v19 = vld [vmem:[%s4313_s1 + $0xe0] sm:$0xff]  ;;  %v3191_v21 = vld [vmem:[%s4313_s1 + $0x108] sm:$0xff] }
  0x5c   : > { %3329 = vmatpush.bf16.msra.mxu3 %v3588_v14  ;;  %1468 = vmatmul.bf16.gmra.mxu1 %v2463_v22  ;;  %v2486_v14 = vld [vmem:[%s3612_s8 + $0xe0] sm:$0xf] }
  0x5d   : > { %1557 = vmatmul.bf16.gmra.mxu2 %v2467_v5  ;;  %v2487_v31 = vor.u32 %v3077_v24, %v2486_v14  ;;  %1805 = vmatpush.bf16.msrb.mxu1 %v3201_v34  ;;  %v2598_v22 = vld [vmem:[%s3612_s8 + $0x1c0] sm:$0xf]  ;;  %v3105_v5 = vld [vmem:[%s3612_s8 + $0x1d8] sm:$0xf0]  ;;  %v2718_v14 = vld [vmem:[%s3612_s8 + $0x2a8] sm:$0xf] }
  0x5e   : > { %v3134_v24 = vld [vmem:[%s3612_s8 + $0x2c0] sm:$0xf0] }
  0x5f   : > { %v2719_v29 = vor.u32 %v3134_v24, %v2718_v14 }
  0x60   : > { %3330 = vmatpush.bf16.msra.mxu3 %v3604_v17  ;;  %v2491_v17 = vor.u32 %v3074_v25, %v2488_v28  ;;  %v2600_v25 = vld [vmem:[%s3612_s8 + $0x1dc] sm:$0xf0]  ;;  %v2599_v28 = vor.u32 %v3105_v5, %v2598_v22 }
  0x61   : > { %1806 = vmatpush.bf16.msrb.mxu1 %v3200_v62 }
  0x64   : > { %3331 = vmatpush.bf16.msra.mxu3 %v3624_v20  ;;  %v3209_v20 = vld [vmem:[%s4313_s1 + $0x198] sm:$0xff] }
  0x65   : > { %1894 = vmatpush.bf16.msrb.mxu2 %v3209_v20  ;;  %1807 = vmatpush.bf16.msrb.mxu1 %v3199_v8  ;;  %v3185_v20 = vld [vmem:[%s4313_s1 + $0xd8] sm:$0xff] }
  0x68   : > { %3332 = vmatpush.bf16.msra.mxu3 %v3637_v23  ;;  %v3193_v23 = vld [vmem:[%s4313_s1 + $0x118] sm:$0xff] }
  0x69   : > { %1716 = vmatpush.bf16.msrb.mxu0 %v3193_v23  ;;  %1895 = vmatpush.bf16.msrb.mxu2 %v3208_v59  ;;  %v3183_v59 = vld [vmem:[%s4313_s1 + $0xc8] sm:$0xff] }
  0x6b   : > { %1384 = vmatmul.bf16.gmra.mxu0 %v2487_v31  ;;  %1513 = vmatmul.bf16.vlgmr.msrb.gmra.mxu3 %v2715_v32  ;;  %v2603_v31 = vor.u32 %v3102_v11, %v2600_v25  ;;  %v2607_v32 = vor.u32 %v3106_v27, %v2606_v26 }
  0x6c   : > { %1473 = vmatmul.bf16.gmra.mxu1 %v2491_v17  ;;  %1623 = vmatpush.bf16.msrb.mxu3 %v3189_v60  ;;  %v3190_v60 = vld [vmem:[%s4313_s1 + $0x100] sm:$0xff] }
  0x6d   : > { %1562 = vmatmul.bf16.gmra.mxu2 %v2495_v33  ;;  %1717 = vmatpush.bf16.msrb.mxu0 %v3192_v61  ;;  %v3198_v61 = vld [vmem:[%s4313_s1 + $0x140] sm:$0xff] }
  0x6e   : > { %1896 = vmatpush.bf16.msrb.mxu2 %v3207_v18  ;;  %1808 = vmatpush.bf16.msrb.mxu1 %v3198_v61  ;;  %v2398_v61 = vld [vmem:[%s3612_s8 + $0x18] sm:$0xf] }
  0x70   : > { %1624 = vmatpush.bf16.msrb.mxu3 %v3188_v63 }
  0x71   : > { %1718 = vmatpush.bf16.msrb.mxu0 %v3191_v21  ;;  %v2655_v21 = vor.u32 %v3119_v9, %v2654_v7 }
  0x74   : > { %1625 = vmatpush.bf16.msrb.mxu3 %v3187_v16  ;;  %v3120_v16 = vld [vmem:[%s3612_s8 + $0x250] sm:$0xf0] }
  0x75   : > { %1719 = vmatpush.bf16.msrb.mxu0 %v3190_v60  ;;  %v3051_v60 = vld [vmem:[%s3612_s8 + $0x28] sm:$0xf0] }
  0x78   : > { %1626 = vmatpush.bf16.msrb.mxu3 %v3186_v19 }
  0x7b   : > { %1389 = vmatmul.bf16.gmra.mxu0 %v2515_v43  ;;  %1518 = vmatmul.bf16.gmra.mxu3 %v2743_v44  ;;  %v2746_v43 = vld [vmem:[%s3612_s8 + $0x2e0] sm:$0xf]  ;;  %v3141_v44 = vld [vmem:[%s3612_s8 + $0x2f8] sm:$0xf0] }
  0x7c   : > { %1478 = vmatmul.bf16.gmra.mxu1 %v2519_v45  ;;  %1627 = vmatpush.bf16.msrb.mxu3 %v3185_v20  ;;  %v2628_v45 = vld [vmem:[%s3612_s8 + $0x214] sm:$0xf0]  ;;  %v2747_v51 = vor.u32 %v3141_v44, %v2746_v43  ;;  %v2802_v20 = vld [vmem:[%s3612_s8 + $0x350] sm:$0xf] }
  0x7d   : > { %1567 = vmatmul.bf16.gmra.mxu2 %v2523_v46  ;;  %v2634_v46 = vld [vmem:[%s3612_s8 + $0x200] sm:$0xf]  ;;  %v2631_v54 = vor.u32 %v3109_v42, %v2628_v45 }
  0x80   : > { %1628 = vmatpush.bf16.msrb.mxu3 %v3184_v39 }
  0x84   : > { %1629 = vmatpush.bf16.msrb.mxu3 %v3183_v59  ;;  %v2390_v59 = vld [vmem:[%s3612_s8 + $0x10] sm:$0xf] }
  0x85   : > { %v2391_v9 = vor.u32 %v3051_v60, %v2390_v59  ;;  %v3065_v59 = vld [vmem:[%s3612_s8 + $0x98] sm:$0xf0]  ;;  %v2454_v60 = vld [vmem:[%s3612_s8 + $0x88] sm:$0xf] }
  0x88   : > { %1630 = vmatpush.bf16.msrb.mxu3 %v3182_v6 }
  0x8b   : > { %1394 = vmatmul.bf16.gmra.mxu0 %v2543_v55  ;;  %1523 = vmatmul.bf16.gmra.mxu3 %v2771_v56  ;;  %v2635_v55 = vor.u32 %v3113_v47, %v2634_v46 }
  0x8c   : > { %1483 = vmatmul.bf16.gmra.mxu1 %v2547_v57 }
  0x8d   : > { %1572 = vmatmul.bf16.gmra.mxu2 %v2551_v58  ;;  %v3206_v58 = vld [vmem:[%s4313_s1 + $0x180] sm:$0xff] }
  0x8e   : > { %1897 = vmatpush.bf16.msrb.mxu2 %v3206_v58  ;;  %v2384_v58 = vld [vmem:[%s3612_s8 + $0x24] sm:$0xf0] }
  0x9b   : > { %1399 = vmatmul.bf16.gmra.mxu0 %v2571_v10  ;;  %1528 = vmatmul.bf16.gmra.mxu3 %v2799_v12  ;;  %v2774_v10 = vld [vmem:[%s3612_s8 + $0x318] sm:$0xf]  ;;  %v3148_v12 = vld [vmem:[%s3612_s8 + $0x330] sm:$0xf0] }
  0x9c   : > { %1488 = vmatmul.bf16.gmra.mxu1 %v2575_v13  ;;  %v2656_v13 = vld [vmem:[%s3612_s8 + $0x24c] sm:$0xf0]  ;;  %v2775_v22 = vor.u32 %v3148_v12, %v2774_v10 }
  0x9d   : > { %1577 = vmatmul.bf16.gmra.mxu2 %v2579_v15  ;;  %v2662_v15 = vld [vmem:[%s3612_s8 + $0x238] sm:$0xf]  ;;  %v2659_v11 = vor.u32 %v3116_v2, %v2656_v13 }
  0x9e   : > { %v2663_v14 = vor.u32 %v3120_v16, %v2662_v15 }
  0xa8   : > { %v1365_v30 = vpop.f32.mrf.mxu0 }
  0xa9   : > { %v1454_v17 = vpop.f32.mrf.mxu1 }
  0xaa   : > { %v1455_v33 = vadd.f32 %v1454_v17, %v1365_v30  ;;  %v3126_v17 = vld [vmem:[%s3612_s8 + $0x280] sm:$0xf0] }
  0xab   : > { %1404 = vmatmul.bf16.gmra.mxu0 %v2599_v28  ;;  %1602 = vmatmul.bf16.vlgmr.msra.gmra.mxu3 %v2719_v29 }
  0xac   : > { %1493 = vmatmul.bf16.gmra.mxu1 %v2603_v31 }
  0xad   : > { %1582 = vmatmul.bf16.gmra.mxu2 %v2607_v32  ;;  %v2682_v32 = vld [vmem:[%s3612_s8 + $0x268] sm:$0xf] }
  0xae   : > { %v3809_v23 = vpop.f32.mrf.mxu3  ;;  %v2683_v41 = vor.u32 %v3126_v17, %v2682_v32  ;;  %v3059_v32 = vld [vmem:[%s3612_s8 + $0x68] sm:$0xf0] }
  0xaf   : > { %v3055_v17 = vld [vmem:[%s3612_s8 + $0x4c] sm:$0xf] }
  0xb0   : > { %v1543_v34 = vpop.f32.mrf.mxu2  ;;  %v1367_v36 = vpop.f32.mrf.mxu0 }
  0xb1   : > { %v3811_v35 = vadd.f32 %v1543_v34, %v1455_v33  ;;  %v1456_v37 = vpop.f32.mrf.mxu1  ;;  %v3123_v33 = vld [vmem:[%s3612_s8 + $0x26c] sm:$0xf] }
  0xb2   : > { %v1457_v38 = vadd.f32 %v1456_v37, %v1367_v36  ;;  %v3155_v34 = vld [vmem:[%s3612_s8 + $0x368] sm:$0xf0]  ;;  %v2684_v36 = vld [vmem:[%s3612_s8 + $0x284] sm:$0xf0]  ;;  %v2690_v37 = vld [vmem:[%s3612_s8 + $0x270] sm:$0xf] }
  0xb3   : > { %v2803_v42 = vor.u32 %v3155_v34, %v2802_v20  ;;  %v2687_v45 = vor.u32 %v3123_v33, %v2684_v36  ;;  %v2420_v33 = vld [vmem:[%s3612_s8 + $0x64] sm:$0xf0] }
  0xb6   : > { %v3824_v48 = vpop.f32.mrf.mxu3 }
  0xb8   : > { %v1545_v49 = vpop.f32.mrf.mxu2  ;;  %v1370_v53 = vpop.f32.mrf.mxu0 }
  0xb9   : > { %v3826_v52 = vadd.f32 %v1545_v49, %v1457_v38  ;;  %v1459_v56 = vpop.f32.mrf.mxu1  ;;  %v3127_v38 = vld [vmem:[%s3612_s8 + $0x288] sm:$0xf0] }
  0xba   : > { %v1460_v57 = vadd.f32 %v1459_v56, %v1370_v53  ;;  %v2691_v46 = vor.u32 %v3127_v38, %v2690_v37 }
  0xbb   : > { %1409 = vmatmul.bf16.gmra.mxu0 %v2627_v50  ;;  %1607 = vmatmul.bf16.gmra.mxu3 %v2747_v51 }
  0xbc   : > { %1498 = vmatmul.bf16.gmra.mxu1 %v2631_v54 }
  0xbd   : > { %1587 = vmatmul.bf16.gmra.mxu2 %v2635_v55 }
  0xbe   : > { %v3840_v62 = vpop.f32.mrf.mxu3 }
  0xc0   : > { %v1548_v63 = vpop.f32.mrf.mxu2  ;;  %v1372_v1 = vpop.f32.mrf.mxu0 }
  0xc1   : > { %v3842_v0 = vadd.f32 %v1548_v63, %v1460_v57  ;;  %v1461_v3 = vpop.f32.mrf.mxu1  ;;  %v3047_v57 = vld [vmem:[%s3612_s8 + $0xc] sm:$0xf]  ;;  %v3052_v63 = vld [vmem:[%s3612_s8 + $0x30] sm:$0xf0] }
  0xc2   : > { %v1462_v4 = vadd.f32 %v1461_v3, %v1372_v1  ;;  %v3048_v1 = vld [vmem:[%s3612_s8 + $0x14] sm:$0xf]  ;;  %v2392_v3 = vld [vmem:[%s3612_s8 + $0x2c] sm:$0xf0]  ;;  %v2387_v7 = vor.u32 %v3047_v57, %v2384_v58  ;;  %v2399_v12 = vor.u32 %v3052_v63, %v2398_v61  ;;  %v2440_v57 = vld [vmem:[%s3612_s8 + $0x94] sm:$0xf0] }
  0xc3   : > { %v2395_v13 = vor.u32 %v3048_v1, %v2392_v3  ;;  %v2446_v58 = vld [vmem:[%s3612_s8 + $0x80] sm:$0xf]  ;;  %v3066_v61 = vld [vmem:[%s3612_s8 + $0xa0] sm:$0xf0] }
  0xc4   : > { %v3062_v63 = vld [vmem:[%s3612_s8 + $0x84] sm:$0xf]  ;;  %v2448_v1 = vld [vmem:[%s3612_s8 + $0x9c] sm:$0xf0] }
  0xc6   : > { %v3855_v18 = vpop.f32.mrf.mxu3 }
  0xc8   : > { %v1550_v19 = vpop.f32.mrf.mxu2  ;;  %v1375_v8 = vpop.f32.mrf.mxu0 }
  0xc9   : > { %v3857_v5 = vadd.f32 %v1550_v19, %v1462_v4  ;;  %v1464_v24 = vpop.f32.mrf.mxu1 }
  0xca   : > { %v1465_v25 = vadd.f32 %v1464_v24, %v1375_v8 }
  0xcb   : > { %1414 = vmatmul.bf16.gmra.mxu0 %v2655_v21  ;;  %1612 = vmatmul.bf16.gmra.mxu3 %v2775_v22 }
  0xcc   : > { %1503 = vmatmul.bf16.gmra.mxu1 %v2659_v11 }
  0xcd   : > { %1592 = vmatmul.bf16.gmra.mxu2 %v2663_v14 }
  0xce   : > { %v3859_v26 = vpop.f32.mrf.mxu3 }
  0xd0   : > { %v1553_v27 = vpop.f32.mrf.mxu2  ;;  %v1377_v29 = vpop.f32.mrf.mxu0 }
  0xd1   : > { %v3861_v28 = vadd.f32 %v1553_v27, %v1465_v25  ;;  %v1466_v30 = vpop.f32.mrf.mxu1  ;;  %v3054_v25 = vld [vmem:[%s3612_s8 + $0x44] sm:$0xf]  ;;  %v2412_v27 = vld [vmem:[%s3612_s8 + $0x5c] sm:$0xf0] }
  0xd2   : > { %v1467_v31 = vadd.f32 %v1466_v30, %v1377_v29  ;;  %v2418_v29 = vld [vmem:[%s3612_s8 + $0x48] sm:$0xf]  ;;  %v3058_v30 = vld [vmem:[%s3612_s8 + $0x60] sm:$0xf0]  ;;  %v2415_v36 = vor.u32 %v3054_v25, %v2412_v27 }
  0xd3   : > { %v2419_v37 = vor.u32 %v3058_v30, %v2418_v29  ;;  %v3068_v29 = vld [vmem:[%s3612_s8 + $0xb4] sm:$0xf]  ;;  %v2468_v30 = vld [vmem:[%s3612_s8 + $0xcc] sm:$0xf0] }
  0xd6   : > { %v3871_v39 = vpop.f32.mrf.mxu3 }
  0xd8   : > { %v1555_v40 = vpop.f32.mrf.mxu2  ;;  %v1380_v44 = vpop.f32.mrf.mxu0 }
  0xd9   : > { %v3873_v43 = vadd.f32 %v1555_v40, %v1467_v31  ;;  %v1469_v47 = vpop.f32.mrf.mxu1  ;;  %v2426_v31 = vld [vmem:[%s3612_s8 + $0x50] sm:$0xf] }
  0xda   : > { %v1470_v49 = vadd.f32 %v1469_v47, %v1380_v44 }
  0xdb   : > { %1419 = vmatmul.bf16.gmra.mxu0 %v2683_v41  ;;  %1617 = vmatmul.bf16.gmra.mxu3 %v2803_v42  ;;  %v2427_v41 = vor.u32 %v3059_v32, %v2426_v31  ;;  %v2423_v42 = vor.u32 %v3055_v17, %v2420_v33  ;;  %v2474_v31 = vld [vmem:[%s3612_s8 + $0xb8] sm:$0xf]  ;;  %v3072_v32 = vld [vmem:[%s3612_s8 + $0xd0] sm:$0xf0]  ;;  %v2482_v17 = vld [vmem:[%s3612_s8 + $0xc0] sm:$0xf] }
  0xdc   : > { %1508 = vmatmul.bf16.gmra.mxu1 %v2687_v45  ;;  %v3073_v33 = vld [vmem:[%s3612_s8 + $0xd8] sm:$0xf0] }
  0xdd   : > { %1597 = vmatmul.bf16.gmra.mxu2 %v2691_v46 }
  0xde   : > { %v3875_v50 = vpop.f32.mrf.mxu3 }
  0xe0   : > { %v1558_v51 = vpop.f32.mrf.mxu2  ;;  %v1382_v54 = vpop.f32.mrf.mxu0 }
  0xe1   : > { %v3877_v53 = vadd.f32 %v1558_v51, %v1470_v49  ;;  %v1471_v55 = vpop.f32.mrf.mxu1 }
  0xe2   : > { %v1472_v56 = vadd.f32 %v1471_v55, %v1382_v54 }
  0xe6   : > { %v3887_v4 = vpop.f32.mrf.mxu3 }
  0xe8   : > { %v1560_v6 = vpop.f32.mrf.mxu2  ;;  %v1385_v10 = vpop.f32.mrf.mxu0 }
  0xe9   : > { %v3889_v2 = vadd.f32 %v1560_v6, %v1472_v56  ;;  %v1474_v15 = vpop.f32.mrf.mxu1  ;;  %v3061_v56 = vld [vmem:[%s3612_s8 + $0x7c] sm:$0xf] }
  0xea   : > { %v1475_v16 = vadd.f32 %v1474_v15, %v1385_v10  ;;  %v2451_v15 = vor.u32 %v3062_v63, %v2448_v1  ;;  %v2502_v63 = vld [vmem:[%s3612_s8 + $0xf0] sm:$0xf]  ;;  %v3079_v1 = vld [vmem:[%s3612_s8 + $0x108] sm:$0xf0] }
  0xeb   : > { %1631 = vmatmul.bf16.vlgmr.msrb.gmra.mxu3 %v2387_v7  ;;  %1720 = vmatmul.bf16.vlgmr.msrb.gmra.mxu0 %v2391_v9  ;;  %v2443_v7 = vor.u32 %v3061_v56, %v2440_v57  ;;  %v2447_v9 = vor.u32 %v3065_v59, %v2446_v58 }
  0xec   : > { %1809 = vmatmul.bf16.vlgmr.msrb.gmra.mxu1 %v2395_v13  ;;  %v2455_v13 = vor.u32 %v3066_v61, %v2454_v60  ;;  %v3075_v60 = vld [vmem:[%s3612_s8 + $0xec] sm:$0xf]  ;;  %v2496_v61 = vld [vmem:[%s3612_s8 + $0x104] sm:$0xf0] }
  0xed   : > { %1898 = vmatmul.bf16.vlgmr.msrb.gmra.mxu2 %v2399_v12 }
  0xee   : > { %v1514_v19 = vpop.f32.mrf.mxu3 }
  0xef   : > { %v3892_v21 = vadd.f32 %v1514_v19, %v3809_v23 }
  0xf0   : > { %v1563_v22 = vpop.f32.mrf.mxu2  ;;  %v1387_v11 = vpop.f32.mrf.mxu0 }
  0xf1   : > { %v3894_v8 = vadd.f32 %v1563_v22, %v1475_v16  ;;  %v1476_v14 = vpop.f32.mrf.mxu1 }
  0xf2   : > { %v1477_v24 = vadd.f32 %v1476_v14, %v1387_v11 }
  0xf6   : > { %v1516_v20 = vpop.f32.mrf.mxu3 }
  0xf7   : > { %v3905_v34 = vadd.f32 %v1516_v20, %v3824_v48  ;;  %v3069_v20 = vld [vmem:[%s3612_s8 + $0xbc] sm:$0xf] }
  0xf8   : > { %v1565_v23 = vpop.f32.mrf.mxu2  ;;  %v1390_v40 = vpop.f32.mrf.mxu0 }
  0xf9   : > { %v3907_v38 = vadd.f32 %v1565_v23, %v1477_v24  ;;  %v1479_v44 = vpop.f32.mrf.mxu1  ;;  %v2476_v23 = vld [vmem:[%s3612_s8 + $0xd4] sm:$0xf0] }
  0xfa   : > { %v1480_v45 = vadd.f32 %v1479_v44, %v1390_v40  ;;  %v2471_v40 = vor.u32 %v3068_v29, %v2468_v30 }
  0xfb   : > { %1636 = vmatmul.bf16.gmra.mxu3 %v2415_v36  ;;  %1725 = vmatmul.bf16.gmra.mxu0 %v2419_v37 }
  0xfc   : > { %1814 = vmatmul.bf16.gmra.mxu1 %v2423_v42 }
  0xfd   : > { %1903 = vmatmul.bf16.gmra.mxu2 %v2427_v41  ;;  %v2475_v41 = vor.u32 %v3072_v32, %v2474_v31 }
  0xfe   : > { %v1519_v48 = vpop.f32.mrf.mxu3 }
  0xff   : > { %v3910_v46 = vadd.f32 %v1519_v48, %v3840_v62  ;;  %v2479_v48 = vor.u32 %v3069_v20, %v2476_v23  ;;  %v3082_v20 = vld [vmem:[%s3612_s8 + $0x124] sm:$0xf]  ;;  %v2524_v23 = vld [vmem:[%s3612_s8 + $0x13c] sm:$0xf0] }
 0x100   : > { %v1568_v47 = vpop.f32.mrf.mxu2  ;;  %v1392_v51 = vpop.f32.mrf.mxu0 }
 0x101   : > { %v3912_v49 = vadd.f32 %v1568_v47, %v1480_v45  ;;  %v1481_v54 = vpop.f32.mrf.mxu1  ;;  %v2483_v45 = vor.u32 %v3073_v33, %v2482_v17 }
 0x102   : > { %v1482_v55 = vadd.f32 %v1481_v54, %v1392_v51 }
 0x106   : > { %v1521_v3 = vpop.f32.mrf.mxu3 }
 0x107   : > { %v3923_v6 = vadd.f32 %v1521_v3, %v3855_v18  ;;  %v2510_v3 = vld [vmem:[%s3612_s8 + $0xf8] sm:$0xf] }
 0x108   : > { %v1570_v62 = vpop.f32.mrf.mxu2  ;;  %v1395_v12 = vpop.f32.mrf.mxu0 }
 0x109   : > { %v3925_v10 = vadd.f32 %v1570_v62, %v1482_v55  ;;  %v1484_v16 = vpop.f32.mrf.mxu1  ;;  %v3080_v62 = vld [vmem:[%s3612_s8 + $0x110] sm:$0xf0] }
 0x10a   : > { %v1485_v19 = vadd.f32 %v1484_v16, %v1395_v12  ;;  %v2503_v16 = vor.u32 %v3079_v1, %v2502_v63 }
 0x10b   : > { %1641 = vmatmul.bf16.gmra.mxu3 %v2443_v7  ;;  %1730 = vmatmul.bf16.gmra.mxu0 %v2447_v9  ;;  %v3076_v7 = vld [vmem:[%s3612_s8 + $0xf4] sm:$0xf]  ;;  %v2504_v9 = vld [vmem:[%s3612_s8 + $0x10c] sm:$0xf0] }
 0x10c   : > { %1819 = vmatmul.bf16.gmra.mxu1 %v2451_v15  ;;  %v2499_v15 = vor.u32 %v3075_v60, %v2496_v61 }
 0x10d   : > { %1908 = vmatmul.bf16.gmra.mxu2 %v2455_v13 }
 0x10e   : > { %v1524_v18 = vpop.f32.mrf.mxu3 }
 0x10f   : > { %v3928_v22 = vadd.f32 %v1524_v18, %v3859_v26 }
 0x110   : > { %v1573_v11 = vpop.f32.mrf.mxu2  ;;  %v1397_v24 = vpop.f32.mrf.mxu0 }
 0x111   : > { %v3930_v14 = vadd.f32 %v1573_v11, %v1485_v19  ;;  %v1486_v25 = vpop.f32.mrf.mxu1  ;;  %v2511_v11 = vor.u32 %v3080_v62, %v2510_v3 }
 0x112   : > { %v1487_v27 = vadd.f32 %v1486_v25, %v1397_v24  ;;  %v2507_v24 = vor.u32 %v3076_v7, %v2504_v9 }
 0x116   : > { %v1526_v36 = vpop.f32.mrf.mxu3 }
 0x117   : > { %v3941_v37 = vadd.f32 %v1526_v36, %v3871_v39  ;;  %v2530_v36 = vld [vmem:[%s3612_s8 + $0x128] sm:$0xf] }
 0x118   : > { %v1575_v26 = vpop.f32.mrf.mxu2  ;;  %v1400_v44 = vpop.f32.mrf.mxu0 }
 0x119   : > { %v3943_v42 = vadd.f32 %v1575_v26, %v1487_v27  ;;  %v1489_v47 = vpop.f32.mrf.mxu1  ;;  %v3086_v26 = vld [vmem:[%s3612_s8 + $0x140] sm:$0xf0] }
 0x11a   : > { %v1490_v51 = vadd.f32 %v1489_v47, %v1400_v44  ;;  %v3083_v44 = vld [vmem:[%s3612_s8 + $0x12c] sm:$0xf] }
 0x11b   : > { %1646 = vmatmul.bf16.gmra.mxu3 %v2471_v40  ;;  %1735 = vmatmul.bf16.gmra.mxu0 %v2475_v41  ;;  %v2538_v40 = vld [vmem:[%s3612_s8 + $0x130] sm:$0xf]  ;;  %v3087_v41 = vld [vmem:[%s3612_s8 + $0x148] sm:$0xf0] }
 0x11c   : > { %1824 = vmatmul.bf16.gmra.mxu1 %v2479_v48 }
 0x11d   : > { %1913 = vmatmul.bf16.gmra.mxu2 %v2483_v45  ;;  %v2532_v45 = vld [vmem:[%s3612_s8 + $0x144] sm:$0xf0] }
 0x11e   : > { %v1529_v39 = vpop.f32.mrf.mxu3 }
 0x11f   : > { %v3946_v54 = vadd.f32 %v1529_v39, %v3875_v50  ;;  %v2531_v39 = vor.u32 %v3086_v26, %v2530_v36 }
 0x120   : > { %v1578_v55 = vpop.f32.mrf.mxu2  ;;  %v1402_v57 = vpop.f32.mrf.mxu0 }
 0x121   : > { %v3948_v56 = vadd.f32 %v1578_v55, %v1490_v51  ;;  %v1491_v58 = vpop.f32.mrf.mxu1 }
 0x122   : > { %v1492_v59 = vadd.f32 %v1491_v58, %v1402_v57  ;;  %v2539_v58 = vor.u32 %v3087_v41, %v2538_v40 }
 0x126   : > { %v1531_v12 = vpop.f32.mrf.mxu3 }
 0x127   : > { %v3959_v13 = vadd.f32 %v1531_v12, %v3887_v4  ;;  %v3089_v12 = vld [vmem:[%s3612_s8 + $0x15c] sm:$0xf] }
 0x128   : > { %v1580_v50 = vpop.f32.mrf.mxu2  ;;  %v1405_v18 = vpop.f32.mrf.mxu0 }
 0x129   : > { %v3961_v19 = vadd.f32 %v1580_v50, %v1492_v59  ;;  %v1494_v25 = vpop.f32.mrf.mxu1  ;;  %v2535_v59 = vor.u32 %v3083_v44, %v2532_v45  ;;  %v2552_v50 = vld [vmem:[%s3612_s8 + $0x174] sm:$0xf0] }
 0x12a   : > { %v1495_v27 = vadd.f32 %v1494_v25, %v1405_v18  ;;  %v2566_v18 = vld [vmem:[%s3612_s8 + $0x168] sm:$0xf]  ;;  %v2560_v25 = vld [vmem:[%s3612_s8 + $0x17c] sm:$0xf0] }
 0x12b   : > { %1651 = vmatmul.bf16.gmra.mxu3 %v2499_v15  ;;  %1740 = vmatmul.bf16.gmra.mxu0 %v2503_v16  ;;  %v2558_v15 = vld [vmem:[%s3612_s8 + $0x160] sm:$0xf]  ;;  %v3093_v16 = vld [vmem:[%s3612_s8 + $0x178] sm:$0xf0] }
 0x12c   : > { %1829 = vmatmul.bf16.gmra.mxu1 %v2507_v24  ;;  %v3090_v24 = vld [vmem:[%s3612_s8 + $0x164] sm:$0xf] }
 0x12d   : > { %1918 = vmatmul.bf16.gmra.mxu2 %v2511_v11  ;;  %v3094_v11 = vld [vmem:[%s3612_s8 + $0x180] sm:$0xf0] }
 0x12e   : > { %v1603_v4 = vpop.f32.mrf.mxu3 }
 0x12f   : > { %v3964_v30 = vadd.f32 %v1603_v4, %v3892_v21  ;;  %v2527_v21 = vor.u32 %v3082_v20, %v2524_v23  ;;  %v2567_v20 = vor.u32 %v3094_v11, %v2566_v18  ;;  %v2563_v23 = vor.u32 %v3090_v24, %v2560_v25 }
 0x130   : > { %v1583_v29 = vpop.f32.mrf.mxu2  ;;  %v1407_v32 = vpop.f32.mrf.mxu0 }
 0x131   : > { %v3966_v31 = vadd.f32 %v1583_v29, %v1495_v27  ;;  %v1496_v17 = vpop.f32.mrf.mxu1 }
 0x132   : > { %v1497_v33 = vadd.f32 %v1496_v17, %v1407_v32  ;;  %v2559_v32 = vor.u32 %v3093_v16, %v2558_v15 }
 0x136   : > { %v1605_v48 = vpop.f32.mrf.mxu3 }
 0x137   : > { %v3977_v51 = vadd.f32 %v1605_v48, %v3905_v34 }
 0x138   : > { %v1585_v47 = vpop.f32.mrf.mxu2  ;;  %v1410_v57 = vpop.f32.mrf.mxu0 }
 0x139   : > { %v3979_v55 = vadd.f32 %v1585_v47, %v1497_v33  ;;  %v1499_v60 = vpop.f32.mrf.mxu1 }
 0x13a   : > { %v1500_v61 = vadd.f32 %v1499_v60, %v1410_v57  ;;  %v2586_v57 = vld [vmem:[%s3612_s8 + $0x198] sm:$0xf]  ;;  %v3101_v60 = vld [vmem:[%s3612_s8 + $0x1b8] sm:$0xf0] }
 0x13b   : > { %1656 = vmatmul.bf16.gmra.mxu3 %v2527_v21  ;;  %1745 = vmatmul.bf16.gmra.mxu0 %v2531_v39  ;;  %v3096_v21 = vld [vmem:[%s3612_s8 + $0x194] sm:$0xf]  ;;  %v2580_v39 = vld [vmem:[%s3612_s8 + $0x1ac] sm:$0xf0] }
 0x13c   : > { %1834 = vmatmul.bf16.gmra.mxu1 %v2535_v59  ;;  %v2594_v59 = vld [vmem:[%s3612_s8 + $0x1a0] sm:$0xf] }
 0x13d   : > { %1923 = vmatmul.bf16.gmra.mxu2 %v2539_v58  ;;  %v3100_v58 = vld [vmem:[%s3612_s8 + $0x1b0] sm:$0xf0]  ;;  %v2595_v15 = vor.u32 %v3101_v60, %v2594_v59 }
 0x13e   : > { %v1608_v34 = vpop.f32.mrf.mxu3 }
 0x13f   : > { %v3982_v1 = vadd.f32 %v1608_v34, %v3910_v46  ;;  %v2555_v46 = vor.u32 %v3089_v12, %v2552_v50  ;;  %v2588_v34 = vld [vmem:[%s3612_s8 + $0x1b4] sm:$0xf0] }
 0x140   : > { %v1588_v63 = vpop.f32.mrf.mxu2  ;;  %v1412_v62 = vpop.f32.mrf.mxu0 }
 0x141   : > { %v3984_v3 = vadd.f32 %v1588_v63, %v1500_v61  ;;  %v1501_v7 = vpop.f32.mrf.mxu1  ;;  %v3097_v61 = vld [vmem:[%s3612_s8 + $0x19c] sm:$0xf] }
 0x142   : > { %v1502_v9 = vadd.f32 %v1501_v7, %v1412_v62  ;;  %v2591_v16 = vor.u32 %v3097_v61, %v2588_v34 }
 0x146   : > { %v1610_v27 = vpop.f32.mrf.mxu3 }
 0x147   : > { %v3995_v29 = vadd.f32 %v1610_v27, %v3923_v6 }
 0x148   : > { %v1590_v4 = vpop.f32.mrf.mxu2  ;;  %v1415_v33 = vpop.f32.mrf.mxu0 }
 0x149   : > { %v3997_v17 = vadd.f32 %v1590_v4, %v1502_v9  ;;  %v1504_v36 = vpop.f32.mrf.mxu1  ;;  %v2587_v9 = vor.u32 %v3100_v58, %v2586_v57 }
 0x14a   : > { %v1505_v26 = vadd.f32 %v1504_v36, %v1415_v33  ;;  %v3103_v33 = vld [vmem:[%s3612_s8 + $0x1cc] sm:$0xf] }
 0x14b   : > { %1661 = vmatmul.bf16.gmra.mxu3 %v2555_v46  ;;  %1750 = vmatmul.bf16.gmra.mxu0 %v2559_v32  ;;  %v3107_v36 = vld [vmem:[%s3612_s8 + $0x1e8] sm:$0xf0] }
 0x14c   : > { %1839 = vmatmul.bf16.gmra.mxu1 %v2563_v23  ;;  %v2614_v23 = vld [vmem:[%s3612_s8 + $0x1d0] sm:$0xf] }
 0x14d   : > { %1928 = vmatmul.bf16.gmra.mxu2 %v2567_v20  ;;  %v2608_v20 = vld [vmem:[%s3612_s8 + $0x1e4] sm:$0xf0] }
 0x14e   : > { %v1613_v6 = vpop.f32.mrf.mxu3 }
 0x14f   : > { %v4000_v41 = vadd.f32 %v1613_v6, %v3928_v22  ;;  %v2583_v22 = vor.u32 %v3096_v21, %v2580_v39  ;;  %v3108_v6 = vld [vmem:[%s3612_s8 + $0x1f0] sm:$0xf0]  ;;  %v2615_v39 = vor.u32 %v3107_v36, %v2614_v23 }
 0x150   : > { %v1593_v40 = vpop.f32.mrf.mxu2  ;;  %v1417_v45 = vpop.f32.mrf.mxu0 }
 0x151   : > { %v4002_v44 = vadd.f32 %v1593_v40, %v1505_v26  ;;  %v1506_v48 = vpop.f32.mrf.mxu1  ;;  %v2622_v26 = vld [vmem:[%s3612_s8 + $0x1d8] sm:$0xf]  ;;  %v3104_v40 = vld [vmem:[%s3612_s8 + $0x1d4] sm:$0xf] }
 0x152   : > { %v1507_v47 = vadd.f32 %v1506_v48, %v1417_v45  ;;  %v2616_v45 = vld [vmem:[%s3612_s8 + $0x1ec] sm:$0xf0]  ;;  %v2623_v59 = vor.u32 %v3108_v6, %v2622_v26 }
 0x153   : > { %v2619_v60 = vor.u32 %v3104_v40, %v2616_v45 }
 0x156   : > { %v1615_v63 = vpop.f32.mrf.mxu3 }
 0x157   : > { %v4013_v7 = vadd.f32 %v1615_v63, %v3941_v37 }
 0x158   : > { %v1595_v62 = vpop.f32.mrf.mxu2  ;;  %v1420_v50 = vpop.f32.mrf.mxu0 }
 0x159   : > { %v4015_v12 = vadd.f32 %v1595_v62, %v1507_v47  ;;  %v1509_v18 = vpop.f32.mrf.mxu1 }
 0x15a   : > { %v1510_v11 = vadd.f32 %v1509_v18, %v1420_v50  ;;  %v4039_v50 = vld [vmem:[%s4314_s2] ss:$0 sm:$0xff]  ;;  %v3110_v18 = vld [vmem:[%s3612_s8 + $0x204] sm:$0xf] }
 0x15b   : > { %1666 = vmatmul.bf16.gmra.mxu3 %v2583_v22  ;;  %1755 = vmatmul.bf16.gmra.mxu0 %v2587_v9 }
 0x15c   : > { %1844 = vmatmul.bf16.gmra.mxu1 %v2591_v16  ;;  %v4044_v16 = vld [vmem:[%s4315_s3] ss:$0 sm:$0xff] }
 0x15d   : > { %1933 = vmatmul.bf16.gmra.mxu2 %v2595_v15 }
 0x15e   : > { %v1618_v37 = vpop.f32.mrf.mxu3 }
 0x15f   : > { %v4018_v25 = vadd.f32 %v1618_v37, %v3946_v54  ;;  %v2611_v54 = vor.u32 %v3103_v33, %v2608_v20  ;;  %v2642_v37 = vld [vmem:[%s3612_s8 + $0x208] sm:$0xf] }
 0x160   : > { %v1598_v24 = vpop.f32.mrf.mxu2  ;;  %v1422_v4 = vpop.f32.mrf.mxu0  ;;  %v2644_v33 = vld [vmem:[%s3612_s8 + $0x224] sm:$0xf0] }
 0x161   : > { %v4020_v27 = vadd.f32 %v1598_v24, %v1510_v11  ;;  %v1511_v46 = vpop.f32.mrf.mxu1  ;;  %v2636_v11 = vld [vmem:[%s3612_s8 + $0x21c] sm:$0xf0]  ;;  %v2650_v24 = vld [vmem:[%s3612_s8 + $0x210] sm:$0xf] }
 0x162   : > { %v1512_v32 = vadd.f32 %v1511_v46, %v1422_v4  ;;  %v3115_v46 = vld [vmem:[%s3612_s8 + $0x228] sm:$0xf0]  ;;  %v2639_v6 = vor.u32 %v3110_v18, %v2636_v11  ;;  %v3117_v11 = vld [vmem:[%s3612_s8 + $0x23c] sm:$0xf] }
 0x166   : > { %v1620_v48 = vpop.f32.mrf.mxu3 }
 0x167   : > { %v4031_v21 = vadd.f32 %v1620_v48, %v3959_v13  ;;  %v2651_v48 = vor.u32 %v3115_v46, %v2650_v24  ;;  %v2664_v24 = vld [vmem:[%s3612_s8 + $0x254] sm:$0xf0]  ;;  %v3121_v46 = vld [vmem:[%s3612_s8 + $0x258] sm:$0xf0] }
 0x168   : > { %v1600_v47 = vpop.f32.mrf.mxu2  ;;  %v1721_v58 = vpop.f32.mrf.mxu0 }
 0x169   : > { %v4033_v57 = vadd.f32 %v1600_v47, %v1512_v32  ;;  %v1810_v61 = vpop.f32.mrf.mxu1  ;;  %v3111_v32 = vld [vmem:[%s3612_s8 + $0x20c] sm:$0xf] }
 0x16a   : > { %v2647_v47 = vor.u32 %v3111_v32, %v2644_v33  ;;  %v2678_v32 = vld [vmem:[%s3612_s8 + $0x248] sm:$0xf]  ;;  %v3122_v33 = vld [vmem:[%s3612_s8 + $0x260] sm:$0xf0] }
 0x16b   : > { %1671 = vmatmul.bf16.gmra.mxu3 %v2611_v54  ;;  %1760 = vmatmul.bf16.gmra.mxu0 %v2615_v39 }
 0x16c   : > { %1849 = vmatmul.bf16.gmra.mxu1 %v2619_v60 }
 0x16d   : > { %1938 = vmatmul.bf16.gmra.mxu2 %v2623_v59 }
 0x16e   : > { %v1632_v13 = vpop.f32.mrf.mxu3 }
 0x16f   : > { %v1633_v34 = vadd.f32 %v1632_v13, %v3811_v35  ;;  %v3114_v35 = vld [vmem:[%s3612_s8 + $0x220] sm:$0xf0] }
 0x170   : > { %v1899_v63 = vpop.f32.mrf.mxu2  ;;  %v1723_v62 = vpop.f32.mrf.mxu0  ;;  %v2643_v40 = vor.u32 %v3114_v35, %v2642_v37 }
 0x171   : > { %v1722_v22 = vadd.f32 %v1721_v58, %v1633_v34  ;;  %v1812_v9 = vpop.f32.mrf.mxu1 }
 0x173   : > { %v1811_v15 = vadd.f32 %v1810_v61, %v1722_v22 }
 0x175   : > { %v1900_v4 = vadd.f32 %v1899_v63, %v1811_v15 }
 0x176   : > { %v1634_v20 = vpop.f32.mrf.mxu3 }
 0x177   : > { %v1983_v23 = vmul.f32 %v4039_v50, %v1900_v4  ;;  %v1635_v36 = vadd.f32 %v1634_v20, %v3826_v52  ;;  %v2670_v4 = vld [vmem:[%s3612_s8 + $0x240] sm:$0xf] }
 0x178   : > { %v1901_v26 = vpop.f32.mrf.mxu2  ;;  %v1726_v45 = vpop.f32.mrf.mxu0 }
 0x179   : > { %v4057_v54 = vadd.f32 %v4044_v16, %v1983_v23  ;;  %v1724_v39 = vadd.f32 %v1723_v62, %v1635_v36  ;;  %v1815_v58 = vpop.f32.mrf.mxu1  ;;  %v3118_v23 = vld [vmem:[%s3612_s8 + $0x244] sm:$0xf]  ;;  %v2672_v36 = vld [vmem:[%s3612_s8 + $0x25c] sm:$0xf0] }
 0x17b   : > { %v2051_v59 = vsub.f32 0.0, %v4057_v54  ;;  %v1813_v60 = vadd.f32 %v1812_v9, %v1724_v39  ;;  %1676 = vmatmul.bf16.gmra.mxu3 %v2639_v6  ;;  %1765 = vmatmul.bf16.gmra.mxu0 %v2643_v40  ;;  %v2667_v40 = vor.u32 %v3117_v11, %v2664_v24  ;;  %v2671_v39 = vor.u32 %v3121_v46, %v2670_v4 }
 0x17c   : > { %1854 = vmatmul.bf16.gmra.mxu1 %v2647_v47 }
 0x17d   : > { %1943 = vmatmul.bf16.gmra.mxu2 %v2651_v48  ;;  %v2083_v52 = vmul.f32 1.442695, %v2051_v59  ;;  %v1902_v61 = vadd.f32 %v1901_v26, %v1813_v60  ;;  %v2679_v59 = vor.u32 %v3122_v33, %v2678_v32  ;;  %v2675_v60 = vor.u32 %v3118_v23, %v2672_v36 }
 0x17e   : > { %v1637_v13 = vpop.f32.mrf.mxu3 }
 0x17f   : > { %v1984_v34 = vmul.f32 %v4039_v50, %v1902_v61  ;;  %v1638_v63 = vadd.f32 %v1637_v13, %v3842_v0  ;;  %3344 = vpow2.f32 %v2083_v52 }
 0x180   : > { %v1904_v62 = vpop.f32.mrf.mxu2  ;;  %v1728_v22 = vpop.f32.mrf.mxu0 }
 0x181   : > { %v4063_v9 = vadd.f32 %v4044_v16, %v1984_v34  ;;  %v1727_v15 = vadd.f32 %v1726_v45, %v1638_v63  ;;  %v1817_v18 = vpop.f32.mrf.mxu1 }
 0x183   : > { %v2052_v37 = vsub.f32 0.0, %v4063_v9  ;;  %v1816_v35 = vadd.f32 %v1815_v58, %v1727_v15 }
 0x185   : > { %v2085_v0 = vmul.f32 1.442695, %v2052_v37  ;;  %v1905_v20 = vadd.f32 %v1904_v62, %v1816_v35  ;;  %v3345_v26 = vpop.eup %3344 }
 0x186   : > { %v1639_v6 = vpop.f32.mrf.mxu3  ;;  %v2147_v52 = vadd.f32 1.0, %v3345_v26 }
 0x187   : > { %3346 = vpow2.f32 %v2085_v0  ;;  %v1985_v45 = vmul.f32 %v4039_v50, %v1905_v20  ;;  %v1640_v48 = vadd.f32 %v1639_v6, %v3857_v5  ;;  %v3124_v0 = vld [vmem:[%s3612_s8 + $0x274] sm:$0xf]  ;;  %v2692_v20 = vld [vmem:[%s3612_s8 + $0x28c] sm:$0xf0]  ;;  %v2698_v6 = vld [vmem:[%s3612_s8 + $0x278] sm:$0xf] }
 0x188   : > { %v1906_v47 = vpop.f32.mrf.mxu2  ;;  %v1731_v58 = vpop.f32.mrf.mxu0  ;;  %3348 = vrcp.f32 %v2147_v52 }
 0x189   : > { %v4077_v61 = vadd.f32 %v4044_v16, %v1985_v45  ;;  %v1729_v13 = vadd.f32 %v1728_v22, %v1640_v48  ;;  %v1820_v34 = vpop.f32.mrf.mxu1  ;;  %v3129_v45 = vld [vmem:[%s3612_s8 + $0x298] sm:$0xf0] }
 0x18b   : > { %v2053_v63 = vsub.f32 0.0, %v4077_v61  ;;  %v1818_v62 = vadd.f32 %v1817_v18, %v1729_v13  ;;  %1681 = vmatmul.bf16.gmra.mxu3 %v2667_v40  ;;  %1770 = vmatmul.bf16.gmra.mxu0 %v2671_v39  ;;  %v3128_v40 = vld [vmem:[%s3612_s8 + $0x290] sm:$0xf0] }
 0x18c   : > { %1859 = vmatmul.bf16.gmra.mxu1 %v2675_v60  ;;  %v2700_v60 = vld [vmem:[%s3612_s8 + $0x294] sm:$0xf0] }
 0x18d   : > { %1948 = vmatmul.bf16.gmra.mxu2 %v2679_v59  ;;  %v3347_v5 = vpop.eup %3346  ;;  %v2087_v15 = vmul.f32 1.442695, %v2053_v63  ;;  %v1907_v11 = vadd.f32 %v1906_v47, %v1818_v62  ;;  %v3125_v59 = vld [vmem:[%s3612_s8 + $0x27c] sm:$0xf]  ;;  %v2695_v63 = vor.u32 %v3124_v0, %v2692_v20  ;;  %v2699_v62 = vor.u32 %v3128_v40, %v2698_v6 }
 0x18e   : > { %v2148_v37 = vadd.f32 1.0, %v3347_v5  ;;  %v1642_v35 = vpop.f32.mrf.mxu3  ;;  %v3349_v23 = vpop.eup %3348 }
 0x18f   : > { %3350 = vpow2.f32 %v2087_v15  ;;  %v1986_v22 = vmul.f32 %v4039_v50, %v1907_v11  ;;  %v1643_v18 = vadd.f32 %v1642_v35, %v3861_v28  ;;  %v2706_v28 = vld [vmem:[%s3612_s8 + $0x280] sm:$0xf] }
 0x190   : > { %v1909_v24 = vpop.f32.mrf.mxu2  ;;  %3352 = vrcp.f32 %v2148_v37  ;;  %v1733_v4 = vpop.f32.mrf.mxu0  ;;  %v2707_v35 = vor.u32 %v3129_v45, %v2706_v28 }
 0x191   : > { %v4083_v46 = vadd.f32 %v4044_v16, %v1986_v22  ;;  %v1732_v32 = vadd.f32 %v1731_v58, %v1643_v18  ;;  %v1822_v33 = vpop.f32.mrf.mxu1  ;;  %v2211_v58 = vmul.f32 %v3349_v23, %v4057_v54  ;;  %v2703_v54 = vor.u32 %v3125_v59, %v2700_v60  ;;  %v2720_v59 = vld [vmem:[%s3612_s8 + $0x2c4] sm:$0xf0] }
 0x193   : > { %v2054_v36 = vsub.f32 0.0, %v4083_v46  ;;  %v1821_v26 = vadd.f32 %v1820_v34, %v1732_v32 }
 0x195   : > { %v3351_v48 = vpop.eup %3350  ;;  %v2089_v47 = vmul.f32 1.442695, %v2054_v36  ;;  %v1910_v39 = vadd.f32 %v1909_v24, %v1821_v26 }
 0x196   : > { %v3353_v52 = vpop.eup %3352  ;;  %v1644_v13 = vpop.f32.mrf.mxu3  ;;  %v2149_v18 = vadd.f32 1.0, %v3351_v48 }
 0x197   : > { %v2212_v5 = vmul.f32 %v3353_v52, %v4063_v9  ;;  %3354 = vpow2.f32 %v2089_v47  ;;  %v1987_v34 = vmul.f32 %v4039_v50, %v1910_v39  ;;  %v1645_v15 = vadd.f32 %v1644_v13, %v3873_v43  ;;  %v3131_v39 = vld [vmem:[%s3612_s8 + $0x2ac] sm:$0xf]  ;;  %v2726_v13 = vld [vmem:[%s3612_s8 + $0x2b0] sm:$0xf] }
 0x198   : > { %v1911_v11 = vpop.f32.mrf.mxu2  ;;  %v1736_v37 = vpop.f32.mrf.mxu0  ;;  %3356 = vrcp.f32 %v2149_v18  ;;  %v2723_v18 = vor.u32 %v3131_v39, %v2720_v59 }
 0x199   : > { %v3217_v22 = vpack.c.bf16 %v2212_v5, %v2211_v58  ;;  %v4105_v24 = vadd.f32 %v4044_v16, %v1987_v34  ;;  %v1734_v9 = vadd.f32 %v1733_v4, %v1645_v15  ;;  %v1825_v32 = vpop.f32.mrf.mxu1 }
 0x19b   : > { %3218 = vst [vmem:[%s4102_s22] sm:$0xff] %v3217_v22   ;;  %v2055_v43 = vsub.f32 0.0, %v4105_v24  ;;  %v1823_v0 = vadd.f32 %v1822_v33, %v1734_v9  ;;  %1686 = vmatmul.bf16.gmra.mxu3 %v2695_v63  ;;  %1775 = vmatmul.bf16.gmra.mxu0 %v2699_v62  ;;  %v3135_v63 = vld [vmem:[%s3612_s8 + $0x2c8] sm:$0xf0]  ;;  %v2734_v62 = vld [vmem:[%s3612_s8 + $0x2b8] sm:$0xf] }
 0x19c   : > { %1864 = vmatmul.bf16.gmra.mxu1 %v2703_v54  ;;  %v2727_v9 = vor.u32 %v3135_v63, %v2726_v13 }
 0x19d   : > { %1953 = vmatmul.bf16.gmra.mxu2 %v2707_v35  ;;  %v3355_v20 = vpop.eup %3354  ;;  %v2091_v23 = vmul.f32 1.442695, %v2055_v43  ;;  %v1912_v36 = vadd.f32 %v1911_v11, %v1823_v0  ;;  %v3132_v11 = vld [vmem:[%s3612_s8 + $0x2b4] sm:$0xf]  ;;  %v2728_v35 = vld [vmem:[%s3612_s8 + $0x2cc] sm:$0xf0] }
 0x19e   : > { %v2150_v26 = vadd.f32 1.0, %v3355_v20  ;;  %v1647_v6 = vpop.f32.mrf.mxu3  ;;  %v3357_v60 = vpop.eup %3356 }
 0x19f   : > { %3358 = vpow2.f32 %v2091_v23  ;;  %v1988_v4 = vmul.f32 %v4039_v50, %v1912_v36  ;;  %v1648_v33 = vadd.f32 %v1647_v6, %v3877_v53  ;;  %v3136_v53 = vld [vmem:[%s3612_s8 + $0x2d0] sm:$0xf0]  ;;  %v2213_v22 = vmul.f32 %v3357_v60, %v4077_v61 }
 0x1a0   : > { %v1914_v40 = vpop.f32.mrf.mxu2  ;;  %3360 = vrcp.f32 %v2150_v26  ;;  %v1738_v28 = vpop.f32.mrf.mxu0  ;;  %v2735_v36 = vor.u32 %v3136_v53, %v2734_v62  ;;  %v2731_v26 = vor.u32 %v3132_v11, %v2728_v35 }
 0x1a1   : > { %v4112_v45 = vadd.f32 %v4044_v16, %v1988_v4  ;;  %v1737_v48 = vadd.f32 %v1736_v37, %v1648_v33  ;;  %v1827_v47 = vpop.f32.mrf.mxu1 }
 0x1a3   : > { %v2056_v52 = vsub.f32 0.0, %v4112_v45  ;;  %v1826_v58 = vadd.f32 %v1825_v32, %v1737_v48 }
 0x1a5   : > { %v3359_v5 = vpop.eup %3358  ;;  %v2093_v34 = vmul.f32 1.442695, %v2056_v52  ;;  %v1915_v15 = vadd.f32 %v1914_v40, %v1826_v58 }
 0x1a6   : > { %v3361_v54 = vpop.eup %3360  ;;  %v1649_v37 = vpop.f32.mrf.mxu3  ;;  %v2151_v4 = vadd.f32 1.0, %v3359_v5  ;;  %v3138_v5 = vld [vmem:[%s3612_s8 + $0x2e4] sm:$0xf] }
 0x1a7   : > { %v2214_v43 = vmul.f32 %v3361_v54, %v4083_v46  ;;  %3362 = vpow2.f32 %v2093_v34  ;;  %v1989_v32 = vmul.f32 %v4039_v50, %v1915_v15  ;;  %v1650_v0 = vadd.f32 %v1649_v37, %v3889_v2  ;;  %v2748_v34 = vld [vmem:[%s3612_s8 + $0x2fc] sm:$0xf0]  ;;  %v2754_v54 = vld [vmem:[%s3612_s8 + $0x2e8] sm:$0xf]  ;;  %v2762_v37 = vld [vmem:[%s3612_s8 + $0x2f0] sm:$0xf] }
 0x1a8   : > { %v1916_v20 = vpop.f32.mrf.mxu2  ;;  %v1741_v23 = vpop.f32.mrf.mxu0  ;;  %3364 = vrcp.f32 %v2151_v4 }
 0x1a9   : > { %v3222_v6 = vpack.c.bf16 %v2214_v43, %v2213_v22  ;;  %v4128_v33 = vadd.f32 %v4044_v16, %v1989_v32  ;;  %v1739_v61 = vadd.f32 %v1738_v28, %v1650_v0  ;;  %v1830_v40 = vpop.f32.mrf.mxu1  ;;  %v3142_v22 = vld [vmem:[%s3612_s8 + $0x300] sm:$0xf0]  ;;  %v3139_v32 = vld [vmem:[%s3612_s8 + $0x2ec] sm:$0xf]  ;;  %v2756_v0 = vld [vmem:[%s3612_s8 + $0x304] sm:$0xf0] }
 0x1ab   : > { %3294 = vst [vmem:[%s4102_s22 + $0x8] sm:$0xff] %v3222_v6   ;;  %v2057_v48 = vsub.f32 0.0, %v4128_v33  ;;  %v1828_v46 = vadd.f32 %v1827_v47, %v1739_v61  ;;  %1691 = vmatmul.bf16.gmra.mxu3 %v2723_v18  ;;  %1780 = vmatmul.bf16.gmra.mxu0 %v2727_v9  ;;  %v2755_v6 = vor.u32 %v3142_v22, %v2754_v54 }
 0x1ac   : > { %1869 = vmatmul.bf16.gmra.mxu1 %v2731_v26  ;;  %v2751_v26 = vor.u32 %v3138_v5, %v2748_v34 }
 0x1ad   : > { %1958 = vmatmul.bf16.gmra.mxu2 %v2735_v36  ;;  %v3363_v2 = vpop.eup %3362  ;;  %v2095_v39 = vmul.f32 1.442695, %v2057_v48  ;;  %v1917_v59 = vadd.f32 %v1916_v20, %v1828_v46 }
 0x1ae   : > { %v2152_v60 = vadd.f32 1.0, %v3363_v2  ;;  %v1652_v52 = vpop.f32.mrf.mxu3  ;;  %v3365_v15 = vpop.eup %3364 }
 0x1af   : > { %3366 = vpow2.f32 %v2095_v39  ;;  %v1990_v28 = vmul.f32 %v4039_v50, %v1917_v59  ;;  %v1653_v47 = vadd.f32 %v1652_v52, %v3894_v8  ;;  %v3143_v8 = vld [vmem:[%s3612_s8 + $0x308] sm:$0xf0]  ;;  %v2215_v36 = vmul.f32 %v3365_v15, %v4105_v24 }
 0x1b0   : > { %v1919_v58 = vpop.f32.mrf.mxu2  ;;  %3368 = vrcp.f32 %v2152_v60  ;;  %v1743_v13 = vpop.f32.mrf.mxu0  ;;  %v2763_v2 = vor.u32 %v3143_v8, %v2762_v37  ;;  %v2759_v39 = vor.u32 %v3139_v32, %v2756_v0  ;;  %v3145_v37 = vld [vmem:[%s3612_s8 + $0x31c] sm:$0xf]  ;;  %v2776_v8 = vld [vmem:[%s3612_s8 + $0x334] sm:$0xf0]  ;;  %v2782_v32 = vld [vmem:[%s3612_s8 + $0x320] sm:$0xf] }
 0x1b1   : > { %v4135_v63 = vadd.f32 %v4044_v16, %v1990_v28  ;;  %v1742_v62 = vadd.f32 %v1741_v23, %v1653_v47  ;;  %v1832_v53 = vpop.f32.mrf.mxu1  ;;  %v3149_v0 = vld [vmem:[%s3612_s8 + $0x338] sm:$0xf0] }
 0x1b3   : > { %v2058_v11 = vsub.f32 0.0, %v4135_v63  ;;  %v1831_v35 = vadd.f32 %v1830_v40, %v1742_v62 }
 0x1b5   : > { %v3367_v18 = vpop.eup %3366  ;;  %v2097_v9 = vmul.f32 1.442695, %v2058_v11  ;;  %v1920_v43 = vadd.f32 %v1919_v58, %v1831_v35 }
 0x1b6   : > { %v3369_v20 = vpop.eup %3368  ;;  %v1654_v23 = vpop.f32.mrf.mxu3  ;;  %v2153_v60 = vadd.f32 1.0, %v3367_v18 }
 0x1b7   : > { %v2216_v4 = vmul.f32 %v3369_v20, %v4112_v45  ;;  %3370 = vpow2.f32 %v2097_v9  ;;  %v1991_v61 = vmul.f32 %v4039_v50, %v1920_v43  ;;  %v1655_v40 = vadd.f32 %v1654_v23, %v3907_v38  ;;  %v2790_v20 = vld [vmem:[%s3612_s8 + $0x328] sm:$0xf] }
 0x1b8   : > { %v1921_v48 = vpop.f32.mrf.mxu2  ;;  %v1746_v46 = vpop.f32.mrf.mxu0  ;;  %3372 = vrcp.f32 %v2153_v60 }
 0x1b9   : > { %v3227_v59 = vpack.c.bf16 %v2216_v4, %v2215_v36  ;;  %v4151_v52 = vadd.f32 %v4044_v16, %v1991_v61  ;;  %v1744_v24 = vadd.f32 %v1743_v13, %v1655_v40  ;;  %v1835_v28 = vpop.f32.mrf.mxu1  ;;  %v2784_v4 = vld [vmem:[%s3612_s8 + $0x33c] sm:$0xf0] }
 0x1bb   : > { %3295 = vst [vmem:[%s4102_s22 + $0x10] sm:$0xff] %v3227_v59   ;;  %v2059_v47 = vsub.f32 0.0, %v4151_v52  ;;  %v1833_v45 = vadd.f32 %v1832_v53, %v1744_v24  ;;  %1696 = vmatmul.bf16.gmra.mxu3 %v2751_v26  ;;  %1785 = vmatmul.bf16.gmra.mxu0 %v2755_v6  ;;  %v3146_v6 = vld [vmem:[%s3612_s8 + $0x324] sm:$0xf] }
 0x1bc   : > { %1874 = vmatmul.bf16.gmra.mxu1 %v2759_v39 }
 0x1bd   : > { %1963 = vmatmul.bf16.gmra.mxu2 %v2763_v2  ;;  %v3371_v38 = vpop.eup %3370  ;;  %v2099_v58 = vmul.f32 1.442695, %v2059_v47  ;;  %v1922_v62 = vadd.f32 %v1921_v48, %v1833_v45  ;;  %v2783_v2 = vor.u32 %v3149_v0, %v2782_v32  ;;  %v2787_v45 = vor.u32 %v3146_v6, %v2784_v4  ;;  %v3152_v32 = vld [vmem:[%s3612_s8 + $0x354] sm:$0xf]  ;;  %v2804_v0 = vld [vmem:[%s3612_s8 + $0x36c] sm:$0xf0] }
 0x1be   : > { %v2154_v5 = vadd.f32 1.0, %v3371_v38  ;;  %v1657_v34 = vpop.f32.mrf.mxu3  ;;  %v3373_v18 = vpop.eup %3372  ;;  %v2818_v6 = vld [vmem:[%s3612_s8 + $0x360] sm:$0xf] }
 0x1bf   : > { %3374 = vpow2.f32 %v2099_v58  ;;  %v1992_v13 = vmul.f32 %v4039_v50, %v1922_v62  ;;  %v1658_v53 = vadd.f32 %v1657_v34, %v3912_v49  ;;  %v3150_v49 = vld [vmem:[%s3612_s8 + $0x340] sm:$0xf0]  ;;  %v2217_v40 = vmul.f32 %v3373_v18, %v4128_v33 }
 0x1c0   : > { %v1924_v15 = vpop.f32.mrf.mxu2  ;;  %3376 = vrcp.f32 %v2154_v5  ;;  %v1748_v11 = vpop.f32.mrf.mxu0  ;;  %v2791_v47 = vor.u32 %v3150_v49, %v2790_v20 }
 0x1c1   : > { %v4158_v35 = vadd.f32 %v4044_v16, %v1992_v13  ;;  %v1747_v54 = vadd.f32 %v1746_v46, %v1658_v53  ;;  %v1837_v22 = vpop.f32.mrf.mxu1  ;;  %v2779_v46 = vor.u32 %v3145_v37, %v2776_v8 }
 0x1c3   : > { %v2060_v9 = vsub.f32 0.0, %v4158_v35  ;;  %v1836_v43 = vadd.f32 %v1835_v28, %v1747_v54 }
 0x1c5   : > { %v3375_v36 = vpop.eup %3374  ;;  %v2101_v23 = vmul.f32 1.442695, %v2060_v9  ;;  %v1925_v26 = vadd.f32 %v1924_v15, %v1836_v43 }
 0x1c6   : > { %v3377_v61 = vpop.eup %3376  ;;  %v1659_v48 = vpop.f32.mrf.mxu3  ;;  %v2155_v58 = vadd.f32 1.0, %v3375_v36 }
 0x1c7   : > { %v2218_v39 = vmul.f32 %v3377_v61, %v4135_v63  ;;  %3378 = vpow2.f32 %v2101_v23  ;;  %v1993_v59 = vmul.f32 %v4039_v50, %v1925_v26  ;;  %v1660_v60 = vadd.f32 %v1659_v48, %v3925_v10  ;;  %v2810_v23 = vld [vmem:[%s3612_s8 + $0x358] sm:$0xf]  ;;  %v3156_v26 = vld [vmem:[%s3612_s8 + $0x370] sm:$0xf0]  ;;  %v3153_v48 = vld [vmem:[%s3612_s8 + $0x35c] sm:$0xf] }
 0x1c8   : > { %v1926_v24 = vpop.f32.mrf.mxu2  ;;  %v1751_v28 = vpop.f32.mrf.mxu0  ;;  %3380 = vrcp.f32 %v2155_v58 }
 0x1c9   : > { %v3232_v38 = vpack.c.bf16 %v2218_v39, %v2217_v40  ;;  %v4174_v62 = vadd.f32 %v4044_v16, %v1993_v59  ;;  %v1749_v33 = vadd.f32 %v1748_v11, %v1660_v60  ;;  %v1840_v5 = vpop.f32.mrf.mxu1  ;;  %v2807_v60 = vor.u32 %v3152_v32, %v2804_v0 }
 0x1cb   : > { %3296 = vst [vmem:[%s4102_s22 + $0x18] sm:$0xff] %v3232_v38   ;;  %v2061_v34 = vsub.f32 0.0, %v4174_v62  ;;  %v1838_v63 = vadd.f32 %v1837_v22, %v1749_v33  ;;  %1701 = vmatmul.bf16.gmra.mxu3 %v2779_v46  ;;  %1790 = vmatmul.bf16.gmra.mxu0 %v2783_v2  ;;  %v2812_v46 = vld [vmem:[%s3612_s8 + $0x374] sm:$0xf0] }
 0x1cc   : > { %1879 = vmatmul.bf16.gmra.mxu1 %v2787_v45 }
 0x1cd   : > { %1968 = vmatmul.bf16.gmra.mxu2 %v2791_v47  ;;  %v3379_v10 = vpop.eup %3378  ;;  %v2103_v13 = vmul.f32 1.442695, %v2061_v34  ;;  %v1927_v53 = vadd.f32 %v1926_v24, %v1838_v63  ;;  %v2811_v24 = vor.u32 %v3156_v26, %v2810_v23 }
 0x1ce   : > { %v2156_v15 = vadd.f32 1.0, %v3379_v10  ;;  %v1662_v54 = vpop.f32.mrf.mxu3  ;;  %v3381_v20 = vpop.eup %3380 }
 0x1cf   : > { %3382 = vpow2.f32 %v2103_v13  ;;  %v1994_v11 = vmul.f32 %v4039_v50, %v1927_v53  ;;  %v1663_v22 = vadd.f32 %v1662_v54, %v3930_v14  ;;  %v3157_v14 = vld [vmem:[%s3612_s8 + $0x378] sm:$0xf0]  ;;  %v2219_v39 = vmul.f32 %v3381_v20, %v4151_v52 }
 0x1d0   : > { %v1929_v37 = vpop.f32.mrf.mxu2  ;;  %3384 = vrcp.f32 %v2156_v15  ;;  %v1753_v8 = vpop.f32.mrf.mxu0  ;;  %v2819_v33 = vor.u32 %v3157_v14, %v2818_v6 }
 0x1d1   : > { %v4181_v18 = vadd.f32 %v4044_v16, %v1994_v11  ;;  %v1752_v9 = vadd.f32 %v1751_v28, %v1663_v22  ;;  %v1842_v43 = vpop.f32.mrf.mxu1 }
 0x1d3   : > { %v2062_v49 = vsub.f32 0.0, %v4181_v18  ;;  %v1841_v36 = vadd.f32 %v1840_v5, %v1752_v9  ;;  %v2815_v5 = vor.u32 %v3153_v48, %v2812_v46 }
 0x1d5   : > { %v3383_v4 = vpop.eup %3382  ;;  %v2105_v61 = vmul.f32 1.442695, %v2062_v49  ;;  %v1930_v40 = vadd.f32 %v1929_v37, %v1841_v36 }
 0x1d6   : > { %v3385_v2 = vpop.eup %3384  ;;  %v1664_v59 = vpop.f32.mrf.mxu3  ;;  %v2157_v63 = vadd.f32 1.0, %v3383_v4 }
 0x1d7   : > { %v2220_v28 = vmul.f32 %v3385_v2, %v4158_v35  ;;  %3386 = vpow2.f32 %v2105_v61  ;;  %v1995_v47 = vmul.f32 %v4039_v50, %v1930_v40  ;;  %v1665_v45 = vadd.f32 %v1664_v59, %v3943_v42 }
 0x1d8   : > { %v1931_v38 = vpop.f32.mrf.mxu2  ;;  %v1756_v58 = vpop.f32.mrf.mxu0  ;;  %3388 = vrcp.f32 %v2157_v63 }
 0x1d9   : > { %v3237_v34 = vpack.c.bf16 %v2220_v28, %v2219_v39  ;;  %v4197_v10 = vadd.f32 %v4044_v16, %v1995_v47  ;;  %v1754_v52 = vadd.f32 %v1753_v8, %v1665_v45  ;;  %v1845_v13 = vpop.f32.mrf.mxu1 }
 0x1db   : > { %3297 = vst [vmem:[%s4102_s22 + $0x20] sm:$0xff] %v3237_v34   ;;  %v2063_v53 = vsub.f32 0.0, %v4197_v10  ;;  %v1843_v35 = vadd.f32 %v1842_v43, %v1754_v52  ;;  %1706 = vmatmul.bf16.gmra.mxu3 %v2807_v60  ;;  %1795 = vmatmul.bf16.gmra.mxu0 %v2811_v24 }
 0x1dc   : > { %1884 = vmatmul.bf16.gmra.mxu1 %v2815_v5 }
 0x1dd   : > { %1973 = vmatmul.bf16.gmra.mxu2 %v2819_v33  ;;  %v3387_v42 = vpop.eup %3386  ;;  %v2107_v15 = vmul.f32 1.442695, %v2063_v53  ;;  %v1932_v54 = vadd.f32 %v1931_v38, %v1843_v35 }
 0x1de   : > { %v2158_v11 = vadd.f32 1.0, %v3387_v42  ;;  %v1667_v22 = vpop.f32.mrf.mxu3  ;;  %v3389_v49 = vpop.eup %3388 }
 0x1df   : > { %3390 = vpow2.f32 %v2107_v15  ;;  %v1996_v37 = vmul.f32 %v4039_v50, %v1932_v54  ;;  %v1668_v8 = vadd.f32 %v1667_v22, %v3948_v56  ;;  %v2221_v61 = vmul.f32 %v3389_v49, %v4174_v62 }
 0x1e0   : > { %v1934_v9 = vpop.f32.mrf.mxu2  ;;  %3392 = vrcp.f32 %v2158_v11  ;;  %v1758_v32 = vpop.f32.mrf.mxu0 }
 0x1e1   : > { %v2032_v43 = vadd.f32 %v4044_v16, %v1996_v37  ;;  %v1757_v0 = vadd.f32 %v1756_v58, %v1668_v8  ;;  %v1847_v20 = vpop.f32.mrf.mxu1 }
 0x1e3   : > { %v2064_v36 = vsub.f32 0.0, %v2032_v43  ;;  %v1846_v23 = vadd.f32 %v1845_v13, %v1757_v0 }
 0x1e5   : > { %v3391_v26 = vpop.eup %3390  ;;  %v2109_v6 = vmul.f32 1.442695, %v2064_v36  ;;  %v1935_v14 = vadd.f32 %v1934_v9, %v1846_v23 }
 0x1e6   : > { %v3393_v4 = vpop.eup %3392  ;;  %v1669_v40 = vpop.f32.mrf.mxu3  ;;  %v2159_v60 = vadd.f32 1.0, %v3391_v26 }
 0x1e7   : > { %v2222_v56 = vmul.f32 %v3393_v4, %v4181_v18  ;;  %3394 = vpow2.f32 %v2109_v6  ;;  %v1997_v48 = vmul.f32 %v4039_v50, %v1935_v14  ;;  %v1670_v46 = vadd.f32 %v1669_v40, %v3961_v19 }
 0x1e8   : > { %v1936_v2 = vpop.f32.mrf.mxu2  ;;  %v1761_v39 = vpop.f32.mrf.mxu0  ;;  %3396 = vrcp.f32 %v2159_v60 }
 0x1e9   : > { %v3242_v59 = vpack.c.bf16 %v2222_v56, %v2221_v61  ;;  %v4209_v24 = vadd.f32 %v4044_v16, %v1997_v48  ;;  %v1759_v28 = vadd.f32 %v1758_v32, %v1670_v46  ;;  %v1850_v47 = vpop.f32.mrf.mxu1 }
 0x1eb   : > { %3298 = vst [vmem:[%s4102_s22 + $0x28] sm:$0xff] %v3242_v59   ;;  %v2065_v62 = vsub.f32 0.0, %v4209_v24  ;;  %v1848_v45 = vadd.f32 %v1847_v20, %v1759_v28 }
 0x1ed   : > { %v3395_v38 = vpop.eup %3394  ;;  %v2111_v18 = vmul.f32 1.442695, %v2065_v62  ;;  %v1937_v58 = vadd.f32 %v1936_v2, %v1848_v45 }
 0x1ee   : > { %v2160_v33 = vadd.f32 1.0, %v3395_v38  ;;  %v1672_v5 = vpop.f32.mrf.mxu3  ;;  %v3397_v42 = vpop.eup %3396 }
 0x1ef   : > { %3398 = vpow2.f32 %v2111_v18  ;;  %v1998_v19 = vmul.f32 %v4039_v50, %v1937_v58  ;;  %v1673_v34 = vadd.f32 %v1672_v5, %v3966_v31  ;;  %v2223_v9 = vmul.f32 %v3397_v42, %v4197_v10 }
 0x1f0   : > { %v1939_v63 = vpop.f32.mrf.mxu2  ;;  %3400 = vrcp.f32 %v2160_v33  ;;  %v1763_v52 = vpop.f32.mrf.mxu0 }
 0x1f1   : > { %v2034_v13 = vadd.f32 %v4044_v16, %v1998_v19  ;;  %v1762_v53 = vadd.f32 %v1761_v39, %v1673_v34  ;;  %v1852_v35 = vpop.f32.mrf.mxu1 }
 0x1f3   : > { %v2066_v15 = vsub.f32 0.0, %v2034_v13  ;;  %v1851_v54 = vadd.f32 %v1850_v47, %v1762_v53 }
 0x1f5   : > { %v3399_v11 = vpop.eup %3398  ;;  %v2113_v22 = vmul.f32 1.442695, %v2066_v15  ;;  %v1940_v37 = vadd.f32 %v1939_v63, %v1851_v54 }
 0x1f6   : > { %v3401_v8 = vpop.eup %3400  ;;  %v1674_v32 = vpop.f32.mrf.mxu3  ;;  %v2161_v26 = vadd.f32 1.0, %v3399_v11 }
 0x1f7   : > { %v2224_v0 = vmul.f32 %v3401_v8, %v2032_v43  ;;  %3402 = vpow2.f32 %v2113_v22  ;;  %v1999_v31 = vmul.f32 %v4039_v50, %v1940_v37  ;;  %v1675_v20 = vadd.f32 %v1674_v32, %v3979_v55 }
 0x1f8   : > { %v1941_v49 = vpop.f32.mrf.mxu2  ;;  %v1766_v36 = vpop.f32.mrf.mxu0  ;;  %3404 = vrcp.f32 %v2161_v26 }
 0x1f9   : > { %v3247_v23 = vpack.c.bf16 %v2224_v0, %v2223_v9  ;;  %v4220_v6 = vadd.f32 %v4044_v16, %v1999_v31  ;;  %v1764_v14 = vadd.f32 %v1763_v52, %v1675_v20  ;;  %v1855_v4 = vpop.f32.mrf.mxu1 }
 0x1fb   : > { %3299 = vst [vmem:[%s4102_s22 + $0x30] sm:$0xff] %v3247_v23   ;;  %v2067_v61 = vsub.f32 0.0, %v4220_v6  ;;  %v1853_v10 = vadd.f32 %v1852_v35, %v1764_v14 }
 0x1fd   : > { %v3403_v40 = vpop.eup %3402  ;;  %v2115_v43 = vmul.f32 1.442695, %v2067_v61  ;;  %v1942_v56 = vadd.f32 %v1941_v49, %v1853_v10 }
 0x1fe   : > { %v2162_v48 = vadd.f32 1.0, %v3403_v40  ;;  %v1677_v46 = vpop.f32.mrf.mxu3  ;;  %v3405_v62 = vpop.eup %3404 }
 0x1ff   : > { %3406 = vpow2.f32 %v2115_v43  ;;  %v2000_v55 = vmul.f32 %v4039_v50, %v1942_v56  ;;  %v1678_v2 = vadd.f32 %v1677_v46, %v3984_v3  ;;  %v2225_v19 = vmul.f32 %v3405_v62, %v4209_v24 }
 0x200   : > { %v1944_v39 = vpop.f32.mrf.mxu2  ;;  %3408 = vrcp.f32 %v2162_v48  ;;  %v1768_v59 = vpop.f32.mrf.mxu0 }
 0x201   : > { %v2036_v60 = vadd.f32 %v4044_v16, %v2000_v55  ;;  %v1767_v28 = vadd.f32 %v1766_v36, %v1678_v2  ;;  %v1857_v47 = vpop.f32.mrf.mxu1 }
 0x203   : > { %v2068_v45 = vsub.f32 0.0, %v2036_v60  ;;  %v1856_v38 = vadd.f32 %v1855_v4, %v1767_v28 }
 0x205   : > { %v3407_v18 = vpop.eup %3406  ;;  %v2117_v58 = vmul.f32 1.442695, %v2068_v45  ;;  %v1945_v33 = vadd.f32 %v1944_v39, %v1856_v38 }
 0x206   : > { %v3409_v5 = vpop.eup %3408  ;;  %v1679_v34 = vpop.f32.mrf.mxu3  ;;  %v2163_v15 = vadd.f32 1.0, %v3407_v18 }
 0x207   : > { %v2226_v63 = vmul.f32 %v3409_v5, %v2034_v13  ;;  %3410 = vpow2.f32 %v2117_v58  ;;  %v2001_v3 = vmul.f32 %v4039_v50, %v1945_v33  ;;  %v1680_v52 = vadd.f32 %v1679_v34, %v3997_v17 }
 0x208   : > { %v1946_v53 = vpop.f32.mrf.mxu2  ;;  %v1771_v35 = vpop.f32.mrf.mxu0  ;;  %3412 = vrcp.f32 %v2163_v15 }
 0x209   : > { %v3252_v42 = vpack.c.bf16 %v2226_v63, %v2225_v19  ;;  %v4231_v54 = vadd.f32 %v4044_v16, %v2001_v3  ;;  %v1769_v11 = vadd.f32 %v1768_v59, %v1680_v52  ;;  %v1860_v22 = vpop.f32.mrf.mxu1 }
 0x20b   : > { %3300 = vst [vmem:[%s4102_s22 + $0x38] sm:$0xff] %v3252_v42   ;;  %v2069_v37 = vsub.f32 0.0, %v4231_v54  ;;  %v1858_v24 = vadd.f32 %v1857_v47, %v1769_v11 }
 0x20d   : > { %v3411_v8 = vpop.eup %3410  ;;  %v2119_v13 = vmul.f32 1.442695, %v2069_v37  ;;  %v1947_v9 = vadd.f32 %v1946_v53, %v1858_v24 }
 0x20e   : > { %v2164_v32 = vadd.f32 1.0, %v3411_v8  ;;  %v1682_v0 = vpop.f32.mrf.mxu3  ;;  %v3413_v14 = vpop.eup %3412 }
 0x20f   : > { %3414 = vpow2.f32 %v2119_v13  ;;  %v2002_v17 = vmul.f32 %v4039_v50, %v1947_v9  ;;  %v1683_v31 = vadd.f32 %v1682_v0, %v4002_v44  ;;  %v2227_v48 = vmul.f32 %v3413_v14, %v4220_v6 }
 0x210   : > { %v1949_v20 = vpop.f32.mrf.mxu2  ;;  %3416 = vrcp.f32 %v2164_v32  ;;  %v1773_v49 = vpop.f32.mrf.mxu0 }
 0x211   : > { %v2038_v36 = vadd.f32 %v4044_v16, %v2002_v17  ;;  %v1772_v23 = vadd.f32 %v1771_v35, %v1683_v31  ;;  %v1862_v26 = vpop.f32.mrf.mxu1 }
 0x213   : > { %v2070_v4 = vsub.f32 0.0, %v2038_v36  ;;  %v1861_v61 = vadd.f32 %v1860_v22, %v1772_v23 }
 0x215   : > { %v3415_v10 = vpop.eup %3414  ;;  %v2121_v40 = vmul.f32 1.442695, %v2070_v4  ;;  %v1950_v43 = vadd.f32 %v1949_v20, %v1861_v61 }
 0x216   : > { %v3417_v56 = vpop.eup %3416  ;;  %v1684_v46 = vpop.f32.mrf.mxu3  ;;  %v2165_v47 = vadd.f32 1.0, %v3415_v10 }
 0x217   : > { %v2228_v55 = vmul.f32 %v3417_v56, %v2036_v60  ;;  %3418 = vpow2.f32 %v2121_v40  ;;  %v2003_v44 = vmul.f32 %v4039_v50, %v1950_v43  ;;  %v1685_v2 = vadd.f32 %v1684_v46, %v4015_v12 }
 0x218   : > { %v1951_v39 = vpop.f32.mrf.mxu2  ;;  %v1776_v59 = vpop.f32.mrf.mxu0  ;;  %3420 = vrcp.f32 %v2165_v47 }
 0x219   : > { %v3257_v28 = vpack.c.bf16 %v2228_v55, %v2227_v48  ;;  %v4242_v62 = vadd.f32 %v4044_v16, %v2003_v44  ;;  %v1774_v45 = vadd.f32 %v1773_v49, %v1685_v2  ;;  %v1865_v38 = vpop.f32.mrf.mxu1 }
 0x21b   : > { %3301 = vst [vmem:[%s4102_s22 + $0x40] sm:$0xff] %v3257_v28   ;;  %v2071_v18 = vsub.f32 0.0, %v4242_v62  ;;  %v1863_v6 = vadd.f32 %v1862_v26, %v1774_v45 }
 0x21d   : > { %v3419_v58 = vpop.eup %3418  ;;  %v2123_v60 = vmul.f32 1.442695, %v2071_v18  ;;  %v1952_v33 = vadd.f32 %v1951_v39, %v1863_v6 }
 0x21e   : > { %v2166_v5 = vadd.f32 1.0, %v3419_v58  ;;  %v1687_v19 = vpop.f32.mrf.mxu3  ;;  %v3421_v42 = vpop.eup %3420 }
 0x21f   : > { %3422 = vpow2.f32 %v2123_v60  ;;  %v2004_v12 = vmul.f32 %v4039_v50, %v1952_v33  ;;  %v1688_v34 = vadd.f32 %v1687_v19, %v4020_v27  ;;  %v2229_v13 = vmul.f32 %v3421_v42, %v4231_v54  ;;  %v4253_v27 = vld [vmem:[%s4314_s2] ss:$0 sm:$0xff] }
 0x220   : > { %v1954_v63 = vpop.f32.mrf.mxu2  ;;  %3424 = vrcp.f32 %v2166_v5  ;;  %v1778_v3 = vpop.f32.mrf.mxu0  ;;  %v4260_v54 = vld [vmem:[%s4315_s3] ss:$0 sm:$0xff] }
 0x221   : > { %v2040_v52 = vadd.f32 %v4044_v16, %v2004_v12  ;;  %v1777_v53 = vadd.f32 %v1776_v59, %v1688_v34  ;;  %v1867_v35 = vpop.f32.mrf.mxu1 }
 0x223   : > { %v2072_v15 = vsub.f32 0.0, %v2040_v52  ;;  %v1866_v11 = vadd.f32 %v1865_v38, %v1777_v53 }
 0x225   : > { %v3423_v22 = vpop.eup %3422  ;;  %v2125_v37 = vmul.f32 1.442695, %v2072_v15  ;;  %v1955_v24 = vadd.f32 %v1954_v63, %v1866_v11 }
 0x226   : > { %v3425_v8 = vpop.eup %3424  ;;  %v1689_v50 = vpop.f32.mrf.mxu3  ;;  %v2167_v20 = vadd.f32 1.0, %v3423_v22 }
 0x227   : > { %v2230_v9 = vmul.f32 %v3425_v8, %v2038_v36  ;;  %3426 = vpow2.f32 %v2125_v37  ;;  %v2005_v16 = vmul.f32 %v4253_v27, %v1955_v24  ;;  %v1690_v32 = vadd.f32 %v1689_v50, %v4033_v57 }
 0x228   : > { %v1956_v0 = vpop.f32.mrf.mxu2  ;;  %v1781_v17 = vpop.f32.mrf.mxu0  ;;  %3428 = vrcp.f32 %v2167_v20 }
 0x229   : > { %v3262_v31 = vpack.c.bf16 %v2230_v9, %v2229_v13  ;;  %v4263_v49 = vadd.f32 %v4260_v54, %v2005_v16  ;;  %v1779_v36 = vadd.f32 %v1778_v3, %v1690_v32  ;;  %v1870_v23 = vpop.f32.mrf.mxu1 }
 0x22b   : > { %3302 = vst [vmem:[%s4102_s22 + $0x48] sm:$0xff] %v3262_v31   ;;  %v2073_v26 = vsub.f32 0.0, %v4263_v49  ;;  %v1868_v14 = vadd.f32 %v1867_v35, %v1779_v36 }
 0x22d   : > { %v3427_v4 = vpop.eup %3426  ;;  %v2127_v57 = vmul.f32 1.442695, %v2073_v26  ;;  %v1957_v61 = vadd.f32 %v1956_v0, %v1868_v14 }
 0x22e   : > { %v2168_v10 = vadd.f32 1.0, %v3427_v4  ;;  %v1692_v40 = vpop.f32.mrf.mxu3  ;;  %v3429_v39 = vpop.eup %3428 }
 0x22f   : > { %3430 = vpow2.f32 %v2127_v57  ;;  %v2006_v43 = vmul.f32 %v4253_v27, %v1957_v61  ;;  %v1693_v56 = vadd.f32 %v1692_v40, %v3964_v30  ;;  %v2231_v6 = vmul.f32 %v3429_v39, %v4242_v62 }
 0x230   : > { %v1959_v48 = vpop.f32.mrf.mxu2  ;;  %3432 = vrcp.f32 %v2168_v10  ;;  %v1783_v46 = vpop.f32.mrf.mxu0 }
 0x231   : > { %v2042_v55 = vadd.f32 %v4260_v54, %v2006_v43  ;;  %v1782_v44 = vadd.f32 %v1781_v17, %v1693_v56  ;;  %v1872_v2 = vpop.f32.mrf.mxu1 }
 0x233   : > { %v2074_v59 = vsub.f32 0.0, %v2042_v55  ;;  %v1871_v28 = vadd.f32 %v1870_v23, %v1782_v44 }
 0x235   : > { %v3431_v47 = vpop.eup %3430  ;;  %v2129_v45 = vmul.f32 1.442695, %v2074_v59  ;;  %v1960_v38 = vadd.f32 %v1959_v48, %v1871_v28 }
 0x236   : > { %v3433_v18 = vpop.eup %3432  ;;  %v1694_v58 = vpop.f32.mrf.mxu3  ;;  %v2169_v34 = vadd.f32 1.0, %v3431_v47 }
 0x237   : > { %v2232_v60 = vmul.f32 %v3433_v18, %v2040_v52  ;;  %3434 = vpow2.f32 %v2129_v45  ;;  %v2007_v30 = vmul.f32 %v4253_v27, %v1960_v38  ;;  %v1695_v33 = vadd.f32 %v1694_v58, %v3977_v51 }
 0x238   : > { %v1961_v5 = vpop.f32.mrf.mxu2  ;;  %v1786_v19 = vpop.f32.mrf.mxu0  ;;  %3436 = vrcp.f32 %v2169_v34 }
 0x239   : > { %v3267_v12 = vpack.c.bf16 %v2232_v60, %v2231_v6  ;;  %v4274_v63 = vadd.f32 %v4260_v54, %v2007_v30  ;;  %v1784_v3 = vadd.f32 %v1783_v46, %v1695_v33  ;;  %v1875_v53 = vpop.f32.mrf.mxu1 }
 0x23b   : > { %3303 = vst [vmem:[%s4102_s22 + $0x50] sm:$0xff] %v3267_v12   ;;  %v2075_v35 = vsub.f32 0.0, %v4274_v63  ;;  %v1873_v62 = vadd.f32 %v1872_v2, %v1784_v3 }
 0x23d   : > { %v3435_v42 = vpop.eup %3434  ;;  %v2131_v52 = vmul.f32 1.442695, %v2075_v35  ;;  %v1962_v15 = vadd.f32 %v1961_v5, %v1873_v62 }
 0x23e   : > { %v2170_v11 = vadd.f32 1.0, %v3435_v42  ;;  %v1697_v22 = vpop.f32.mrf.mxu3  ;;  %v3437_v16 = vpop.eup %3436 }
 0x23f   : > { %3438 = vpow2.f32 %v2131_v52  ;;  %v2008_v51 = vmul.f32 %v4253_v27, %v1962_v15  ;;  %v1698_v37 = vadd.f32 %v1697_v22, %v3982_v1  ;;  %v2233_v23 = vmul.f32 %v3437_v16, %v4263_v49 }
 0x240   : > { %v1964_v24 = vpop.f32.mrf.mxu2  ;;  %3440 = vrcp.f32 %v2170_v11  ;;  %v1788_v8 = vpop.f32.mrf.mxu0 }
 0x241   : > { %v2044_v13 = vadd.f32 %v4260_v54, %v2008_v51  ;;  %v1787_v50 = vadd.f32 %v1786_v19, %v1698_v37  ;;  %v1877_v9 = vpop.f32.mrf.mxu1 }
 0x243   : > { %v2076_v32 = vsub.f32 0.0, %v2044_v13  ;;  %v1876_v0 = vadd.f32 %v1875_v53, %v1787_v50 }
 0x245   : > { %v3439_v17 = vpop.eup %3438  ;;  %v2133_v31 = vmul.f32 1.442695, %v2076_v32  ;;  %v1965_v20 = vadd.f32 %v1964_v24, %v1876_v0 }
 0x246   : > { %v3441_v36 = vpop.eup %3440  ;;  %v1699_v26 = vpop.f32.mrf.mxu3  ;;  %v2171_v10 = vadd.f32 1.0, %v3439_v17 }
 0x247   : > { %v2234_v14 = vmul.f32 %v3441_v36, %v2042_v55  ;;  %3442 = vpow2.f32 %v2133_v31  ;;  %v2009_v1 = vmul.f32 %v4253_v27, %v1965_v20  ;;  %v1700_v4 = vadd.f32 %v1699_v26, %v3995_v29 }
 0x248   : > { %v1966_v57 = vpop.f32.mrf.mxu2  ;;  %v1791_v56 = vpop.f32.mrf.mxu0  ;;  %3444 = vrcp.f32 %v2171_v10 }
 0x249   : > { %v3272_v61 = vpack.c.bf16 %v2234_v14, %v2233_v23  ;;  %v4285_v40 = vadd.f32 %v4260_v54, %v2009_v1  ;;  %v1789_v43 = vadd.f32 %v1788_v8, %v1700_v4  ;;  %v1880_v49 = vpop.f32.mrf.mxu1 }
 0x24b   : > { %3304 = vst [vmem:[%s4102_s22 + $0x58] sm:$0xff] %v3272_v61   ;;  %v2077_v48 = vsub.f32 0.0, %v4285_v40  ;;  %v1878_v46 = vadd.f32 %v1877_v9, %v1789_v43 }
 0x24d   : > { %v3443_v44 = vpop.eup %3442  ;;  %v2135_v55 = vmul.f32 1.442695, %v2077_v48  ;;  %v1967_v2 = vadd.f32 %v1966_v57, %v1878_v46 }
 0x24e   : > { %v2172_v39 = vadd.f32 1.0, %v3443_v44  ;;  %v1702_v59 = vpop.f32.mrf.mxu3  ;;  %v3445_v18 = vpop.eup %3444 }
 0x24f   : > { %3446 = vpow2.f32 %v2135_v55  ;;  %v2010_v29 = vmul.f32 %v4253_v27, %v1967_v2  ;;  %v1703_v28 = vadd.f32 %v1702_v59, %v4000_v41  ;;  %v2235_v12 = vmul.f32 %v3445_v18, %v4274_v63 }
 0x250   : > { %v1969_v47 = vpop.f32.mrf.mxu2  ;;  %3448 = vrcp.f32 %v2172_v39  ;;  %v1793_v60 = vpop.f32.mrf.mxu0 }
 0x251   : > { %v2046_v45 = vadd.f32 %v4260_v54, %v2010_v29  ;;  %v1792_v38 = vadd.f32 %v1791_v56, %v1703_v28  ;;  %v1882_v34 = vpop.f32.mrf.mxu1 }
 0x253   : > { %v2078_v6 = vsub.f32 0.0, %v2046_v45  ;;  %v1881_v58 = vadd.f32 %v1880_v49, %v1792_v38 }
 0x255   : > { %v3447_v30 = vpop.eup %3446  ;;  %v2137_v33 = vmul.f32 1.442695, %v2078_v6  ;;  %v1970_v5 = vadd.f32 %v1969_v47, %v1881_v58 }
 0x256   : > { %v3449_v19 = vpop.eup %3448  ;;  %v1704_v3 = vpop.f32.mrf.mxu3  ;;  %v2173_v52 = vadd.f32 1.0, %v3447_v30 }
 0x257   : > { %v2236_v53 = vmul.f32 %v3449_v19, %v2044_v13  ;;  %3450 = vpow2.f32 %v2137_v33  ;;  %v2011_v41 = vmul.f32 %v4253_v27, %v1970_v5  ;;  %v1705_v35 = vadd.f32 %v1704_v3, %v4013_v7 }
 0x258   : > { %v1971_v62 = vpop.f32.mrf.mxu2  ;;  %3452 = vrcp.f32 %v2173_v52  ;;  %v1796_v13 = vpop.f32.mrf.mxu0 }
 0x259   : > { %v3277_v42 = vpack.c.bf16 %v2236_v53, %v2235_v12  ;;  %v2047_v15 = vadd.f32 %v4260_v54, %v2011_v41  ;;  %v1794_v11 = vadd.f32 %v1793_v60, %v1705_v35  ;;  %v1885_v16 = vpop.f32.mrf.mxu1 }
 0x25b   : > { %3305 = vst [vmem:[%s4102_s22 + $0x60] sm:$0xff] %v3277_v42   ;;  %v2079_v22 = vsub.f32 0.0, %v2047_v15  ;;  %v1883_v51 = vadd.f32 %v1882_v34, %v1794_v11 }
 0x25d   : > { %v3451_v37 = vpop.eup %3450  ;;  %v2139_v63 = vmul.f32 1.442695, %v2079_v22  ;;  %v1972_v24 = vadd.f32 %v1971_v62, %v1883_v51 }
 0x25e   : > { %v2174_v8 = vadd.f32 1.0, %v3451_v37  ;;  %v1707_v50 = vpop.f32.mrf.mxu3  ;;  %v3453_v31 = vpop.eup %3452 }
 0x25f   : > { %v2012_v9 = vmul.f32 %v4253_v27, %v1972_v24  ;;  %v1708_v7 = vadd.f32 %v1707_v50, %v4018_v25  ;;  %v2237_v1 = vmul.f32 %v3453_v31, %v4285_v40 }
 0x260   : > { %3454 = vrcp.f32 %v2174_v8  ;;  %v1974_v17 = vpop.f32.mrf.mxu2  ;;  %v1798_v43 = vpop.f32.mrf.mxu0 }
 0x261   : > { %3456 = vpow2.f32 %v2139_v63  ;;  %v2048_v32 = vadd.f32 %v4260_v54, %v2012_v9  ;;  %v1797_v0 = vadd.f32 %v1796_v13, %v1708_v7  ;;  %v1887_v44 = vpop.f32.mrf.mxu1 }
 0x263   : > { %v2080_v20 = vsub.f32 0.0, %v2048_v32  ;;  %v1886_v36 = vadd.f32 %v1885_v16, %v1797_v0 }
 0x265   : > { %v2141_v23 = vmul.f32 1.442695, %v2080_v20  ;;  %v1975_v26 = vadd.f32 %v1974_v17, %v1886_v36 }
 0x266   : > { %v3455_v14 = vpop.eup %3454  ;;  %v1709_v4 = vpop.f32.mrf.mxu3 }
 0x267   : > { %v3457_v57 = vpop.eup %3456  ;;  %v2238_v61 = vmul.f32 %v3455_v14, %v2046_v45  ;;  %3458 = vpow2.f32 %v2141_v23  ;;  %v2013_v25 = vmul.f32 %v4253_v27, %v1975_v26  ;;  %v1710_v10 = vadd.f32 %v1709_v4, %v4031_v21 }
 0x268   : > { %v2175_v49 = vadd.f32 1.0, %v3457_v57  ;;  %v1976_v39 = vpop.f32.mrf.mxu2 }
 0x269   : > { %v3282_v56 = vpack.c.bf16 %v2238_v61, %v2237_v1  ;;  %v2049_v48 = vadd.f32 %v4260_v54, %v2013_v25  ;;  %v1799_v46 = vadd.f32 %v1798_v43, %v1710_v10 }
 0x26a   : > { %3460 = vrcp.f32 %v2175_v49 }
 0x26b   : > { %3306 = vst [vmem:[%s4102_s22 + $0x68] sm:$0xff] %v3282_v56   ;;  %v2081_v55 = vsub.f32 0.0, %v2049_v48  ;;  %v1888_v2 = vadd.f32 %v1887_v44, %v1799_v46 }
 0x26d   : > { %v3459_v40 = vpop.eup %3458  ;;  %v2143_v59 = vmul.f32 1.442695, %v2081_v55  ;;  %v1977_v29 = vadd.f32 %v1976_v39, %v1888_v2 }
 0x26e   : > { %v2176_v28 = vadd.f32 1.0, %v3459_v40 }
 0x26f   : > { %v2014_v47 = vmul.f32 %v4253_v27, %v1977_v29 }
 0x270   : > { %3462 = vrcp.f32 %v2176_v28  ;;  %v3461_v38 = vpop.eup %3460 }
 0x271   : > { %3464 = vpow2.f32 %v2143_v59  ;;  %v2050_v21 = vadd.f32 %v4260_v54, %v2014_v47  ;;  %v2239_v60 = vmul.f32 %v3461_v38, %v2047_v15 }
 0x273   : > { %v2082_v45 = vsub.f32 0.0, %v2050_v21 }
 0x275   : > { %v2145_v18 = vmul.f32 1.442695, %v2082_v45 }
 0x276   : > { %v3463_v6 = vpop.eup %3462 }
 0x277   : > { %v3465_v58 = vpop.eup %3464  ;;  %v2240_v30 = vmul.f32 %v3463_v6, %v2048_v32  ;;  %3466 = vpow2.f32 %v2145_v18 }
 0x278   : > { %v2177_v5 = vadd.f32 1.0, %v3465_v58 }
 0x279   : > { %v3287_v33 = vpack.c.bf16 %v2240_v30, %v2239_v60 }
 0x27a   : > { %3468 = vrcp.f32 %v2177_v5 }
 0x27b   : > { %3307 = vst [vmem:[%s4102_s22 + $0x70] sm:$0xff] %v3287_v33  }
 0x27d   : > { %v3467_v19 = vpop.eup %3466 }
 0x27e   : > { %v2178_v12 = vadd.f32 1.0, %v3467_v19 }
 0x280   : > { %3470 = vrcp.f32 %v2178_v12  ;;  %v3469_v27 = vpop.eup %3468 }
 0x281   : > { %v2241_v3 = vmul.f32 %v3469_v27, %v2049_v48 }
 0x286   : > { %v3471_v34 = vpop.eup %3470 }
 0x287   : > { %v2242_v54 = vmul.f32 %v3471_v34, %v2050_v21 }
 0x289   : > { %v3292_v53 = vpack.c.bf16 %v2242_v54, %v2241_v3 }
 0x28b   : > { %3308 = vst [vmem:[%s4102_s22 + $0x78] sm:$0xff] %v3292_v53  }
 0x28c PF: > { %s14_s15 = sadd.s32 1, %s3480_s15  }
 0x28d   : > { %p11_p4 = scmp.ge.s32.totalorder %s14_s15, 4  }
 0x28f   :  { %13 = sbr.rel (!%p11_p4) target bundleno = 1 (0x1), region = 66 }

// kernel: simple_cnn2d_forward.7
= control target key start
LH: loop header
LB: loop body
LE: loop exit
PB: predicated region body
PF: predicated region fallthrough
CT: control target
= control target key end

     0   :  { %s1891_s1 = inlined_call_operand.vmem [shape: bf16[640,128], index: 1, kind: input, shape index: {}]   ;;  %s1892_s0 = inlined_call_operand.vmem [shape: bf16[112,640], index: 0, kind: input, shape index: {}]   ;;  %s1893_s2 = inlined_call_operand.vmem [shape: f32[1,128], index: 2, kind: input, shape index: {}]   ;;  %s1894_s3 = inlined_call_operand.vmem [shape: f32[1,128], index: 3, kind: input, shape index: {}]   ;;  %s1895_s4 = inlined_call_operand.vmem [shape: bf16[112,128], index: 4, kind: output, shape index: {}]  }
   0x1   :  { %v1275_v0 = vld [vmem:[%s1891_s1 + $0x38] sm:$0xff]  ;;  %v1274_v1 = vld [vmem:[%s1891_s1 + $0x30] sm:$0xff]  ;;  %v1273_v2 = vld [vmem:[%s1891_s1 + $0x28] sm:$0xff] }
   0x2   :  { %1349 = vmatpush.bf16.msra.mxu1 %v1275_v0  ;;  %1350 = vmatpush.bf16.msra.mxu2 %v1275_v0  ;;  %v1272_v3 = vld [vmem:[%s1891_s1 + $0x20] sm:$0xff]  ;;  %v1271_v4 = vld [vmem:[%s1891_s1 + $0x18] sm:$0xff]  ;;  %v1270_v5 = vld [vmem:[%s1891_s1 + $0x10] sm:$0xff] }
   0x3   :  { %1351 = vmatpush.bf16.msra.mxu3 %v1275_v0  ;;  %561 = vmatpush.bf16.msra.mxu0 %v1275_v0  ;;  %v1269_v6 = vld [vmem:[%s1891_s1 + $0x8] sm:$0xff]  ;;  %v1268_v7 = vld [vmem:[%s1891_s1] sm:$0xff]  ;;  %v975_v8 = vld [vmem:[%s1892_s0 + $0x50] sm:$0xf] }
   0x4   :  { %v1245_v9 = vld [vmem:[%s1892_s0 + $0x60] sm:$0xf0]  ;;  %v1015_v10 = vld [vmem:[%s1892_s0 + $0xa0] sm:$0xf]  ;;  %v1255_v11 = vld [vmem:[%s1892_s0 + $0xb0] sm:$0xf0] }
   0x5   :  { %v1299_v12 = vld [vmem:[%s1891_s1 + $0xf8] sm:$0xff]  ;;  %v935_v13 = vld [vmem:[%s1892_s0] sm:$0xf]  ;;  %v1235_v14 = vld [vmem:[%s1892_s0 + $0x10] sm:$0xf0]  ;;  %v976_v18 = vor.u32 %v1245_v9, %v975_v8  ;;  %v1016_v19 = vor.u32 %v1255_v11, %v1015_v10 }
   0x6   :  { %1352 = vmatpush.bf16.msra.mxu1 %v1274_v1  ;;  %1353 = vmatpush.bf16.msra.mxu2 %v1274_v1  ;;  %v1291_v15 = vld [vmem:[%s1891_s1 + $0xb8] sm:$0xff]  ;;  %v1055_v16 = vld [vmem:[%s1892_s0 + $0xf0] sm:$0xf]  ;;  %v1265_v17 = vld [vmem:[%s1892_s0 + $0x100] sm:$0xf0]  ;;  %v936_v21 = vor.u32 %v1235_v14, %v935_v13 }
   0x7   :  { %1354 = vmatpush.bf16.msra.mxu3 %v1274_v1  ;;  %562 = vmatpush.bf16.msra.mxu0 %v1274_v1  ;;  %v1283_v20 = vld [vmem:[%s1891_s1 + $0x78] sm:$0xff]  ;;  %v1056_v23 = vor.u32 %v1265_v17, %v1055_v16  ;;  %v1298_v24 = vld [vmem:[%s1891_s1 + $0xf0] sm:$0xff]  ;;  %v1297_v28 = vld [vmem:[%s1891_s1 + $0xe8] sm:$0xff] }
   0x8   :  { %v1307_v22 = vld [vmem:[%s1891_s1 + $0x138] sm:$0xff]  ;;  %v1290_v25 = vld [vmem:[%s1891_s1 + $0xb0] sm:$0xff]  ;;  %v1289_v29 = vld [vmem:[%s1891_s1 + $0xa8] sm:$0xff] }
   0x9   :  { %v1282_v26 = vld [vmem:[%s1891_s1 + $0x70] sm:$0xff]  ;;  %v1281_v30 = vld [vmem:[%s1891_s1 + $0x68] sm:$0xff]  ;;  %v1296_v32 = vld [vmem:[%s1891_s1 + $0xe0] sm:$0xff] }
   0xa   :  { %1355 = vmatpush.bf16.msra.mxu1 %v1273_v2  ;;  %1356 = vmatpush.bf16.msra.mxu2 %v1273_v2  ;;  %v1306_v27 = vld [vmem:[%s1891_s1 + $0x130] sm:$0xff]  ;;  %v1305_v31 = vld [vmem:[%s1891_s1 + $0x128] sm:$0xff]  ;;  %v1288_v33 = vld [vmem:[%s1891_s1 + $0xa0] sm:$0xff] }
   0xb   :  { %1357 = vmatpush.bf16.msra.mxu3 %v1273_v2  ;;  %563 = vmatpush.bf16.msra.mxu0 %v1273_v2  ;;  %v1280_v34 = vld [vmem:[%s1891_s1 + $0x60] sm:$0xff]  ;;  %v995_v35 = vld [vmem:[%s1892_s0 + $0x78] sm:$0xf]  ;;  %v1250_v36 = vld [vmem:[%s1892_s0 + $0x88] sm:$0xf0] }
   0xc   :  { %v1035_v37 = vld [vmem:[%s1892_s0 + $0xc8] sm:$0xf]  ;;  %v1260_v38 = vld [vmem:[%s1892_s0 + $0xd8] sm:$0xf0]  ;;  %v1304_v39 = vld [vmem:[%s1891_s1 + $0x120] sm:$0xff]  ;;  %v996_v44 = vor.u32 %v1250_v36, %v995_v35 }
   0xd   :  { %v955_v40 = vld [vmem:[%s1892_s0 + $0x28] sm:$0xf]  ;;  %v1240_v41 = vld [vmem:[%s1892_s0 + $0x38] sm:$0xf0]  ;;  %v1036_v45 = vor.u32 %v1260_v38, %v1035_v37  ;;  %v1294_v49 = vld [vmem:[%s1891_s1 + $0xd0] sm:$0xff] }
   0xe   :  { %1358 = vmatpush.bf16.msra.mxu1 %v1272_v3  ;;  %1359 = vmatpush.bf16.msra.mxu2 %v1272_v3  ;;  %v1295_v42 = vld [vmem:[%s1891_s1 + $0xd8] sm:$0xff]  ;;  %v956_v47 = vor.u32 %v1240_v41, %v955_v40  ;;  %v1286_v50 = vld [vmem:[%s1891_s1 + $0x90] sm:$0xff]  ;;  %v1293_v53 = vld [vmem:[%s1891_s1 + $0xc8] sm:$0xff] }
   0xf   :  { %1360 = vmatpush.bf16.msra.mxu3 %v1272_v3  ;;  %564 = vmatpush.bf16.msra.mxu0 %v1272_v3  ;;  %v1287_v43 = vld [vmem:[%s1891_s1 + $0x98] sm:$0xff]  ;;  %v1278_v51 = vld [vmem:[%s1891_s1 + $0x50] sm:$0xff]  ;;  %v1285_v54 = vld [vmem:[%s1891_s1 + $0x88] sm:$0xff] }
  0x10   :  { %v1279_v46 = vld [vmem:[%s1891_s1 + $0x58] sm:$0xff]  ;;  %v1302_v52 = vld [vmem:[%s1891_s1 + $0x110] sm:$0xff]  ;;  %v1277_v55 = vld [vmem:[%s1891_s1 + $0x48] sm:$0xff] }
  0x11   :  { %v1303_v48 = vld [vmem:[%s1891_s1 + $0x118] sm:$0xff]  ;;  %v1292_v56 = vld [vmem:[%s1891_s1 + $0xc0] sm:$0xff]  ;;  %v1301_v57 = vld [vmem:[%s1891_s1 + $0x108] sm:$0xff] }
  0x12   :  { %1361 = vmatpush.bf16.msra.mxu1 %v1271_v4  ;;  %1362 = vmatpush.bf16.msra.mxu2 %v1271_v4  ;;  %v1284_v58 = vld [vmem:[%s1891_s1 + $0x80] sm:$0xff]  ;;  %v1234_v59 = vld [vmem:[%s1892_s0 + $0xc] sm:$0xf]  ;;  %v937_v63 = vld [vmem:[%s1892_s0 + $0x14] sm:$0xf0] }
  0x13   :  { %1363 = vmatpush.bf16.msra.mxu3 %v1271_v4  ;;  %565 = vmatpush.bf16.msra.mxu0 %v1271_v4  ;;  %v945_v60 = vld [vmem:[%s1892_s0 + $0x1c] sm:$0xf0]  ;;  %v1233_v62 = vld [vmem:[%s1892_s0 + $0x4] sm:$0xf]  ;;  %v943_v0 = vld [vmem:[%s1892_s0 + $0x8] sm:$0xf] }
  0x14   :  { %v1276_v61 = vld [vmem:[%s1891_s1 + $0x40] sm:$0xff]  ;;  %v1236_v1 = vld [vmem:[%s1892_s0 + $0x18] sm:$0xf0]  ;;  %v948_v2 = vor.u32 %v1234_v59, %v945_v60  ;;  %v951_v4 = vld [vmem:[%s1892_s0 + $0x10] sm:$0xf] }
  0x15   :  { %v1300_v3 = vld [vmem:[%s1891_s1 + $0x100] sm:$0xff]  ;;  %v1239_v9 = vld [vmem:[%s1892_s0 + $0x34] sm:$0xf]  ;;  %v965_v10 = vld [vmem:[%s1892_s0 + $0x44] sm:$0xf0] }
  0x16   :  { %1364 = vmatpush.bf16.msra.mxu1 %v1270_v5  ;;  %1365 = vmatpush.bf16.msra.mxu2 %v1270_v5  ;;  %v1238_v11 = vld [vmem:[%s1892_s0 + $0x2c] sm:$0xf]  ;;  %v963_v13 = vld [vmem:[%s1892_s0 + $0x30] sm:$0xf]  ;;  %v1241_v14 = vld [vmem:[%s1892_s0 + $0x40] sm:$0xf0] }
  0x17   :  { %1366 = vmatpush.bf16.msra.mxu3 %v1270_v5  ;;  %566 = vmatpush.bf16.msra.mxu0 %v1270_v5  ;;  %v1237_v5 = vld [vmem:[%s1892_s0 + $0x20] sm:$0xf0]  ;;  %v971_v16 = vld [vmem:[%s1892_s0 + $0x38] sm:$0xf]  ;;  %v1242_v17 = vld [vmem:[%s1892_s0 + $0x48] sm:$0xf0] }
  0x18   :  { %v952_v8 = vor.u32 %v1237_v5, %v951_v4  ;;  %v1248_v35 = vld [vmem:[%s1892_s0 + $0x7c] sm:$0xf]  ;;  %v997_v36 = vld [vmem:[%s1892_s0 + $0x8c] sm:$0xf0]  ;;  %v1003_v37 = vld [vmem:[%s1892_s0 + $0x80] sm:$0xf] }
  0x19   :  { %v1251_v38 = vld [vmem:[%s1892_s0 + $0x90] sm:$0xf0]  ;;  %v1011_v40 = vld [vmem:[%s1892_s0 + $0x88] sm:$0xf]  ;;  %v1252_v41 = vld [vmem:[%s1892_s0 + $0x98] sm:$0xf0] }
  0x1a   :  { %1367 = vmatpush.bf16.msra.mxu1 %v1269_v6  ;;  %1368 = vmatpush.bf16.msra.mxu2 %v1269_v6  ;;  %v1258_v59 = vld [vmem:[%s1892_s0 + $0xcc] sm:$0xf]  ;;  %v1037_v60 = vld [vmem:[%s1892_s0 + $0xdc] sm:$0xf0]  ;;  %v1264_v5 = vld [vmem:[%s1892_s0 + $0xfc] sm:$0xf] }
  0x1b   :  { %1369 = vmatpush.bf16.msra.mxu3 %v1269_v6  ;;  %567 = vmatpush.bf16.msra.mxu0 %v1269_v6  ;;  %v940_v6 = vor.u32 %v1233_v62, %v937_v63  ;;  %v1261_v62 = vld [vmem:[%s1892_s0 + $0xe0] sm:$0xf0] }
  0x1e   :  { %1370 = vmatpush.bf16.msra.mxu1 %v1268_v7  ;;  %1371 = vmatpush.bf16.msra.mxu2 %v1268_v7 }
  0x1f   :  { %1372 = vmatpush.bf16.msra.mxu3 %v1268_v7  ;;  %568 = vmatpush.bf16.msra.mxu0 %v1268_v7  ;;  %v944_v7 = vor.u32 %v1236_v1, %v943_v0  ;;  %v1051_v0 = vld [vmem:[%s1892_s0 + $0xd8] sm:$0xf]  ;;  %v1262_v1 = vld [vmem:[%s1892_s0 + $0xe8] sm:$0xf0] }
  0x20   :  { %v1052_v4 = vor.u32 %v1262_v1, %v1051_v0 }
  0x21   :  { %579 = vmatmul.bf16.vlgmr.msra.gmra.mxu1 %v976_v18  ;;  %589 = vmatmul.bf16.vlgmr.msra.gmra.mxu2 %v1016_v19  ;;  %v964_v19 = vor.u32 %v1241_v14, %v963_v13  ;;  %v1267_v13 = vld [vmem:[%s1892_s0 + $0x110] sm:$0xf0] }
  0x22   :  { %649 = vmatpush.bf16.msrb.mxu2 %v1291_v15  ;;  %605 = vmatpush.bf16.msrb.mxu1 %v1283_v20  ;;  %v968_v15 = vor.u32 %v1239_v9, %v965_v10  ;;  %v972_v20 = vor.u32 %v1242_v17, %v971_v16  ;;  %v1063_v9 = vld [vmem:[%s1892_s0 + $0xf8] sm:$0xf]  ;;  %v1266_v10 = vld [vmem:[%s1892_s0 + $0x108] sm:$0xf0] }
  0x23   :  { %693 = vmatpush.bf16.msrb.mxu3 %v1299_v12  ;;  %569 = vmatmul.bf16.vlgmr.msra.gmra.mxu0 %v936_v21  ;;  %v957_v12 = vld [vmem:[%s1892_s0 + $0x3c] sm:$0xf0]  ;;  %v1244_v21 = vld [vmem:[%s1892_s0 + $0x5c] sm:$0xf] }
  0x24   :  { %737 = vmatpush.bf16.msrb.mxu0 %v1307_v22  ;;  %599 = vmatmul.bf16.vlgmr.msra.gmra.mxu3 %v1056_v23  ;;  %v960_v18 = vor.u32 %v1238_v11, %v957_v12  ;;  %v985_v22 = vld [vmem:[%s1892_s0 + $0x6c] sm:$0xf0]  ;;  %v1243_v23 = vld [vmem:[%s1892_s0 + $0x54] sm:$0xf]  ;;  %v1071_v12 = vld [vmem:[%s1892_s0 + $0x100] sm:$0xf] }
  0x25   :  { %v1072_v17 = vor.u32 %v1267_v13, %v1071_v12 }
  0x26   :  { %650 = vmatpush.bf16.msrb.mxu2 %v1290_v25  ;;  %606 = vmatpush.bf16.msrb.mxu1 %v1282_v26  ;;  %v983_v25 = vld [vmem:[%s1892_s0 + $0x58] sm:$0xf]  ;;  %v1246_v26 = vld [vmem:[%s1892_s0 + $0x68] sm:$0xf0] }
  0x27   :  { %694 = vmatpush.bf16.msrb.mxu3 %v1298_v24  ;;  %v977_v24 = vld [vmem:[%s1892_s0 + $0x64] sm:$0xf0] }
  0x28   :  { %738 = vmatpush.bf16.msrb.mxu0 %v1306_v27  ;;  %v988_v27 = vor.u32 %v1244_v21, %v985_v22 }
  0x2a   :  { %651 = vmatpush.bf16.msrb.mxu2 %v1289_v29  ;;  %607 = vmatpush.bf16.msrb.mxu1 %v1281_v30  ;;  %v1247_v29 = vld [vmem:[%s1892_s0 + $0x70] sm:$0xf0]  ;;  %v980_v30 = vor.u32 %v1243_v23, %v977_v24 }
  0x2b   :  { %695 = vmatpush.bf16.msrb.mxu3 %v1297_v28  ;;  %v991_v28 = vld [vmem:[%s1892_s0 + $0x60] sm:$0xf] }
  0x2c   :  { %739 = vmatpush.bf16.msrb.mxu0 %v1305_v31  ;;  %v984_v31 = vor.u32 %v1246_v26, %v983_v25 }
  0x2e   :  { %652 = vmatpush.bf16.msrb.mxu2 %v1288_v33  ;;  %608 = vmatpush.bf16.msrb.mxu1 %v1280_v34  ;;  %v1249_v33 = vld [vmem:[%s1892_s0 + $0x84] sm:$0xf]  ;;  %v1005_v34 = vld [vmem:[%s1892_s0 + $0x94] sm:$0xf0] }
  0x2f   :  { %696 = vmatpush.bf16.msrb.mxu3 %v1296_v32  ;;  %v992_v32 = vor.u32 %v1247_v29, %v991_v28 }
  0x30   :  { %740 = vmatpush.bf16.msrb.mxu0 %v1304_v39  ;;  %v1008_v39 = vor.u32 %v1249_v33, %v1005_v34 }
  0x31   :  { %584 = vmatmul.bf16.gmra.mxu1 %v996_v44  ;;  %594 = vmatmul.bf16.gmra.mxu2 %v1036_v45  ;;  %v1012_v44 = vor.u32 %v1252_v41, %v1011_v40  ;;  %v1254_v45 = vld [vmem:[%s1892_s0 + $0xac] sm:$0xf] }
  0x32   :  { %653 = vmatpush.bf16.msrb.mxu2 %v1287_v43  ;;  %609 = vmatpush.bf16.msrb.mxu1 %v1279_v46  ;;  %v1004_v43 = vor.u32 %v1251_v38, %v1003_v37  ;;  %v1025_v46 = vld [vmem:[%s1892_s0 + $0xbc] sm:$0xf0] }
  0x33   :  { %697 = vmatpush.bf16.msrb.mxu3 %v1295_v42  ;;  %574 = vmatmul.bf16.gmra.mxu0 %v956_v47  ;;  %v1000_v42 = vor.u32 %v1248_v35, %v997_v36  ;;  %v1253_v47 = vld [vmem:[%s1892_s0 + $0xa4] sm:$0xf] }
  0x34   :  { %741 = vmatpush.bf16.msrb.mxu0 %v1303_v48  ;;  %v1017_v48 = vld [vmem:[%s1892_s0 + $0xb4] sm:$0xf0] }
  0x36   :  { %654 = vmatpush.bf16.msrb.mxu2 %v1286_v50  ;;  %610 = vmatpush.bf16.msrb.mxu1 %v1278_v51  ;;  %v1256_v50 = vld [vmem:[%s1892_s0 + $0xb8] sm:$0xf0]  ;;  %v1028_v51 = vor.u32 %v1254_v45, %v1025_v46 }
  0x37   :  { %698 = vmatpush.bf16.msrb.mxu3 %v1294_v49  ;;  %v1023_v49 = vld [vmem:[%s1892_s0 + $0xa8] sm:$0xf] }
  0x38   :  { %742 = vmatpush.bf16.msrb.mxu0 %v1302_v52  ;;  %v1031_v52 = vld [vmem:[%s1892_s0 + $0xb0] sm:$0xf] }
  0x3a   :  { %655 = vmatpush.bf16.msrb.mxu2 %v1285_v54  ;;  %611 = vmatpush.bf16.msrb.mxu1 %v1277_v55  ;;  %v1020_v54 = vor.u32 %v1253_v47, %v1017_v48  ;;  %v1024_v55 = vor.u32 %v1256_v50, %v1023_v49 }
  0x3b   :  { %699 = vmatpush.bf16.msrb.mxu3 %v1293_v53  ;;  %v1257_v53 = vld [vmem:[%s1892_s0 + $0xc0] sm:$0xf0] }
  0x3c   :  { %743 = vmatpush.bf16.msrb.mxu0 %v1301_v57  ;;  %v1259_v57 = vld [vmem:[%s1892_s0 + $0xd4] sm:$0xf] }
  0x3e   :  { %656 = vmatpush.bf16.msrb.mxu2 %v1284_v58  ;;  %612 = vmatpush.bf16.msrb.mxu1 %v1276_v61  ;;  %v1045_v58 = vld [vmem:[%s1892_s0 + $0xe4] sm:$0xf0]  ;;  %v1043_v61 = vld [vmem:[%s1892_s0 + $0xd0] sm:$0xf] }
  0x3f   :  { %700 = vmatpush.bf16.msrb.mxu3 %v1292_v56  ;;  %v1032_v56 = vor.u32 %v1257_v53, %v1031_v52  ;;  %v1048_v63 = vor.u32 %v1259_v57, %v1045_v58 }
  0x40   :  { %744 = vmatpush.bf16.msrb.mxu0 %v1300_v3  ;;  %v1044_v3 = vor.u32 %v1261_v62, %v1043_v61 }
  0x41   :  { %613 = vmatmul.bf16.vlgmr.msrb.gmra.mxu1 %v940_v6  ;;  %657 = vmatmul.bf16.vlgmr.msrb.gmra.mxu2 %v944_v7  ;;  %v1065_v6 = vld [vmem:[%s1892_s0 + $0x10c] sm:$0xf0]  ;;  %v1263_v7 = vld [vmem:[%s1892_s0 + $0xf4] sm:$0xf] }
  0x42   :  { %701 = vmatmul.bf16.vlgmr.msrb.gmra.mxu3 %v948_v2  ;;  %v1040_v2 = vor.u32 %v1258_v59, %v1037_v60  ;;  %v1068_v11 = vor.u32 %v1264_v5, %v1065_v6 }
  0x43   :  { %745 = vmatmul.bf16.vlgmr.msrb.gmra.mxu0 %v952_v8  ;;  %v1057_v8 = vld [vmem:[%s1892_s0 + $0x104] sm:$0xf0] }
  0x44   :  { %v1060_v14 = vor.u32 %v1263_v7, %v1057_v8 }
  0x51   :  { %618 = vmatmul.bf16.gmra.mxu1 %v960_v18  ;;  %662 = vmatmul.bf16.gmra.mxu2 %v964_v19 }
  0x52   :  { %706 = vmatmul.bf16.gmra.mxu3 %v968_v15  ;;  %v1064_v15 = vor.u32 %v1266_v10, %v1063_v9 }
  0x53   :  { %750 = vmatmul.bf16.gmra.mxu0 %v972_v20 }
  0x61   :  { %623 = vmatmul.bf16.gmra.mxu1 %v980_v30  ;;  %667 = vmatmul.bf16.gmra.mxu2 %v984_v31 }
  0x62   :  { %711 = vmatmul.bf16.gmra.mxu3 %v988_v27 }
  0x63   :  { %755 = vmatmul.bf16.gmra.mxu0 %v992_v32 }
  0x71   :  { %628 = vmatmul.bf16.gmra.mxu1 %v1000_v42  ;;  %672 = vmatmul.bf16.gmra.mxu2 %v1004_v43  ;;  %v1814_v42 = vld [vmem:[%s1894_s3] ss:$0 sm:$0xff] }
  0x72   :  { %716 = vmatmul.bf16.gmra.mxu3 %v1008_v39  ;;  %v1809_v39 = vld [vmem:[%s1893_s2] ss:$0 sm:$0xff] }
  0x73   :  { %760 = vmatmul.bf16.gmra.mxu0 %v1012_v44 }
  0x81   :  { %633 = vmatmul.bf16.gmra.mxu1 %v1020_v54  ;;  %677 = vmatmul.bf16.gmra.mxu2 %v1024_v55 }
  0x82   :  { %721 = vmatmul.bf16.gmra.mxu3 %v1028_v51 }
  0x83   :  { %765 = vmatmul.bf16.gmra.mxu0 %v1032_v56 }
  0x91   :  { %638 = vmatmul.bf16.gmra.mxu1 %v1040_v2  ;;  %682 = vmatmul.bf16.gmra.mxu2 %v1044_v3 }
  0x92   :  { %726 = vmatmul.bf16.gmra.mxu3 %v1048_v63 }
  0x93   :  { %770 = vmatmul.bf16.gmra.mxu0 %v1052_v4 }
  0x9e   :  { %v1786_v16 = vpop.f32.mrf.mxu1 }
  0xa0   :  { %v570_v18 = vpop.f32.mrf.mxu0 }
  0xa1   :  { %643 = vmatmul.bf16.gmra.mxu1 %v1060_v14  ;;  %687 = vmatmul.bf16.gmra.mxu2 %v1064_v15 }
  0xa2   :  { %731 = vmatmul.bf16.gmra.mxu3 %v1068_v11 }
  0xa3   :  { %775 = vmatmul.bf16.gmra.mxu0 %v1072_v17 }
  0xa4   :  { %v1788_v19 = vpop.f32.mrf.mxu2 }
  0xa6   :  { %v1790_v20 = vpop.f32.mrf.mxu1 }
  0xa7   :  { %v1796_v25 = vpop.f32.mrf.mxu3 }
  0xa8   :  { %v572_v21 = vpop.f32.mrf.mxu0 }
  0xac   :  { %v1792_v22 = vpop.f32.mrf.mxu2 }
  0xae   :  { %v1794_v23 = vpop.f32.mrf.mxu1 }
  0xaf   :  { %v1802_v29 = vpop.f32.mrf.mxu3 }
  0xb0   :  { %v575_v24 = vpop.f32.mrf.mxu0 }
  0xb4   :  { %v1798_v26 = vpop.f32.mrf.mxu2 }
  0xb6   :  { %v1800_v27 = vpop.f32.mrf.mxu1 }
  0xb8   :  { %v577_v28 = vpop.f32.mrf.mxu0 }
  0xbc   :  { %v1804_v30 = vpop.f32.mrf.mxu2 }
  0xbe   :  { %v614_v31 = vpop.f32.mrf.mxu1 }
  0xbf   :  { %v615_v34 = vadd.f32 %v614_v31, %v570_v18 }
  0xc0   :  { %v746_v32 = vpop.f32.mrf.mxu0 }
  0xc4   :  { %v658_v35 = vpop.f32.mrf.mxu2 }
  0xc5   :  { %v702_v33 = vpop.f32.mrf.mxu3  ;;  %v659_v36 = vadd.f32 %v658_v35, %v615_v34 }
  0xc6   :  { %v616_v37 = vpop.f32.mrf.mxu1 }
  0xc7   :  { %v703_v38 = vadd.f32 %v702_v33, %v659_v36  ;;  %v617_v45 = vadd.f32 %v616_v37, %v572_v21 }
  0xc8   :  { %v748_v40 = vpop.f32.mrf.mxu0 }
  0xc9   :  { %v747_v41 = vadd.f32 %v746_v32, %v703_v38 }
  0xcb   :  { %v785_v44 = vmul.f32 %v1809_v39, %v747_v41 }
  0xcc   :  { %v660_v46 = vpop.f32.mrf.mxu2 }
  0xcd   :  { %v704_v43 = vpop.f32.mrf.mxu3  ;;  %v803_v47 = vadd.f32 %v1814_v42, %v785_v44  ;;  %v661_v48 = vadd.f32 %v660_v46, %v617_v45 }
  0xce   :  { %v619_v49 = vpop.f32.mrf.mxu1 }
  0xcf   :  { %v817_v50 = vsub.f32 0.0, %v803_v47  ;;  %v705_v51 = vadd.f32 %v704_v43, %v661_v48  ;;  %v620_v57 = vadd.f32 %v619_v49, %v575_v24 }
  0xd0   :  { %v751_v52 = vpop.f32.mrf.mxu0 }
  0xd1   :  { %v831_v53 = vmul.f32 1.442695, %v817_v50  ;;  %v749_v54 = vadd.f32 %v748_v40, %v705_v51 }
  0xd3   :  { %v786_v56 = vmul.f32 %v1809_v39, %v749_v54  ;;  %1375 = vpow2.f32 %v831_v53 }
  0xd4   :  { %v663_v58 = vpop.f32.mrf.mxu2 }
  0xd5   :  { %v707_v55 = vpop.f32.mrf.mxu3  ;;  %v804_v59 = vadd.f32 %v1814_v42, %v786_v56  ;;  %v664_v60 = vadd.f32 %v663_v58, %v620_v57 }
  0xd6   :  { %v621_v61 = vpop.f32.mrf.mxu1 }
  0xd7   :  { %v818_v62 = vsub.f32 0.0, %v804_v59  ;;  %v708_v63 = vadd.f32 %v707_v55, %v664_v60  ;;  %v622_v6 = vadd.f32 %v621_v61, %v577_v28 }
  0xd8   :  { %v753_v0 = vpop.f32.mrf.mxu0 }
  0xd9   :  { %v833_v1 = vmul.f32 1.442695, %v818_v62  ;;  %v752_v2 = vadd.f32 %v751_v52, %v708_v63  ;;  %v1376_v3 = vpop.eup %1375 }
  0xda   :  { %v859_v8 = vadd.f32 1.0, %v1376_v3 }
  0xdb   :  { %1377 = vpow2.f32 %v833_v1  ;;  %v787_v5 = vmul.f32 %v1809_v39, %v752_v2 }
  0xdc   :  { %v665_v7 = vpop.f32.mrf.mxu2  ;;  %1379 = vrcp.f32 %v859_v8 }
  0xdd   :  { %v709_v4 = vpop.f32.mrf.mxu3  ;;  %v1822_v9 = vadd.f32 %v1814_v42, %v787_v5  ;;  %v666_v10 = vadd.f32 %v665_v7, %v622_v6 }
  0xde   :  { %v624_v11 = vpop.f32.mrf.mxu1 }
  0xdf   :  { %v819_v12 = vsub.f32 0.0, %v1822_v9  ;;  %v710_v13 = vadd.f32 %v709_v4, %v666_v10  ;;  %v625_v31 = vadd.f32 %v624_v11, %v1786_v16 }
  0xe0   :  { %v756_v14 = vpop.f32.mrf.mxu0 }
  0xe1   :  { %v1378_v15 = vpop.eup %1377  ;;  %v835_v17 = vmul.f32 1.442695, %v819_v12  ;;  %v754_v18 = vadd.f32 %v753_v0, %v710_v13 }
  0xe2   :  { %v860_v21 = vadd.f32 1.0, %v1378_v15  ;;  %v1380_v36 = vpop.eup %1379 }
  0xe3   :  { %1381 = vpow2.f32 %v835_v17  ;;  %v788_v28 = vmul.f32 %v1809_v39, %v754_v18  ;;  %v887_v46 = vmul.f32 %v1380_v36, %v803_v47 }
  0xe4   :  { %1383 = vrcp.f32 %v860_v21  ;;  %v668_v32 = vpop.f32.mrf.mxu2 }
  0xe5   :  { %v712_v24 = vpop.f32.mrf.mxu3  ;;  %v806_v33 = vadd.f32 %v1814_v42, %v788_v28  ;;  %v669_v34 = vadd.f32 %v668_v32, %v625_v31 }
  0xe6   :  { %v626_v35 = vpop.f32.mrf.mxu1 }
  0xe7   :  { %v820_v37 = vsub.f32 0.0, %v806_v33  ;;  %v713_v38 = vadd.f32 %v712_v24, %v669_v34  ;;  %v627_v50 = vadd.f32 %v626_v35, %v1790_v20 }
  0xe8   :  { %v758_v40 = vpop.f32.mrf.mxu0 }
  0xe9   :  { %v1382_v41 = vpop.eup %1381  ;;  %v837_v43 = vmul.f32 1.442695, %v820_v37  ;;  %v757_v44 = vadd.f32 %v756_v14, %v713_v38 }
  0xea   :  { %v1384_v45 = vpop.eup %1383  ;;  %v861_v53 = vadd.f32 1.0, %v1382_v41 }
  0xeb   :  { %v888_v49 = vmul.f32 %v1384_v45, %v804_v59  ;;  %1385 = vpow2.f32 %v837_v43  ;;  %v789_v16 = vmul.f32 %v1809_v39, %v757_v44 }
  0xec   :  { %v670_v51 = vpop.f32.mrf.mxu2  ;;  %1387 = vrcp.f32 %v861_v53 }
  0xed   :  { %v714_v48 = vpop.f32.mrf.mxu3  ;;  %v1311_v52 = vpack.c.bf16 %v888_v49, %v887_v46  ;;  %v1831_v54 = vadd.f32 %v1814_v42, %v789_v16  ;;  %v671_v55 = vadd.f32 %v670_v51, %v627_v50 }
  0xee   :  { %v629_v56 = vpop.f32.mrf.mxu1 }
  0xef   :  { %1312 = vst [vmem:[%s1895_s4] sm:$0xff] %v1311_v52   ;;  %v821_v47 = vsub.f32 0.0, %v1831_v54  ;;  %v715_v57 = vadd.f32 %v714_v48, %v671_v55  ;;  %v630_v0 = vadd.f32 %v629_v56, %v1794_v23 }
  0xf0   :  { %v761_v58 = vpop.f32.mrf.mxu0 }
  0xf1   :  { %v1386_v59 = vpop.eup %1385  ;;  %v839_v60 = vmul.f32 1.442695, %v821_v47  ;;  %v759_v20 = vadd.f32 %v758_v40, %v715_v57 }
  0xf2   :  { %v862_v61 = vadd.f32 1.0, %v1386_v59  ;;  %v1388_v5 = vpop.eup %1387 }
  0xf3   :  { %1389 = vpow2.f32 %v839_v60  ;;  %v790_v63 = vmul.f32 %v1809_v39, %v759_v20  ;;  %v889_v14 = vmul.f32 %v1388_v5, %v1822_v9 }
  0xf4   :  { %1391 = vrcp.f32 %v862_v61  ;;  %v673_v1 = vpop.f32.mrf.mxu2 }
  0xf5   :  { %v717_v62 = vpop.f32.mrf.mxu3  ;;  %v808_v2 = vadd.f32 %v1814_v42, %v790_v63  ;;  %v674_v3 = vadd.f32 %v673_v1, %v630_v0 }
  0xf6   :  { %v631_v4 = vpop.f32.mrf.mxu1 }
  0xf7   :  { %v822_v6 = vsub.f32 0.0, %v808_v2  ;;  %v718_v7 = vadd.f32 %v717_v62, %v674_v3  ;;  %v632_v18 = vadd.f32 %v631_v4, %v1800_v27 }
  0xf8   :  { %v763_v8 = vpop.f32.mrf.mxu0 }
  0xf9   :  { %v1390_v10 = vpop.eup %1389  ;;  %v841_v11 = vmul.f32 1.442695, %v822_v6  ;;  %v762_v12 = vadd.f32 %v761_v58, %v718_v7 }
  0xfa   :  { %v1392_v13 = vpop.eup %1391  ;;  %v863_v28 = vadd.f32 1.0, %v1390_v10 }
  0xfb   :  { %v890_v17 = vmul.f32 %v1392_v13, %v806_v33  ;;  %1393 = vpow2.f32 %v841_v11  ;;  %v791_v23 = vmul.f32 %v1809_v39, %v762_v12 }
  0xfc   :  { %v675_v21 = vpop.f32.mrf.mxu2  ;;  %1395 = vrcp.f32 %v863_v28 }
  0xfd   :  { %v719_v15 = vpop.f32.mrf.mxu3  ;;  %v1316_v24 = vpack.c.bf16 %v890_v17, %v889_v14  ;;  %v1844_v31 = vadd.f32 %v1814_v42, %v791_v23  ;;  %v676_v32 = vadd.f32 %v675_v21, %v632_v18 }
  0xfe   :  { %v634_v34 = vpop.f32.mrf.mxu1 }
  0xff   :  { %1343 = vst [vmem:[%s1895_s4 + $0x8] sm:$0xff] %v1316_v24   ;;  %v823_v9 = vsub.f32 0.0, %v1844_v31  ;;  %v720_v33 = vadd.f32 %v719_v15, %v676_v32  ;;  %v635_v43 = vadd.f32 %v634_v34, %v1788_v19 }
 0x100   :  { %v766_v35 = vpop.f32.mrf.mxu0 }
 0x101   :  { %v1394_v36 = vpop.eup %1393  ;;  %v843_v37 = vmul.f32 1.442695, %v823_v9  ;;  %v764_v27 = vadd.f32 %v763_v8, %v720_v33 }
 0x102   :  { %v864_v38 = vadd.f32 1.0, %v1394_v36  ;;  %v1396_v49 = vpop.eup %1395 }
 0x103   :  { %1397 = vpow2.f32 %v843_v37  ;;  %v792_v41 = vmul.f32 %v1809_v39, %v764_v27  ;;  %v891_v47 = vmul.f32 %v1396_v49, %v1831_v54 }
 0x104   :  { %1399 = vrcp.f32 %v864_v38  ;;  %v678_v44 = vpop.f32.mrf.mxu2 }
 0x105   :  { %v722_v40 = vpop.f32.mrf.mxu3  ;;  %v810_v45 = vadd.f32 %v1814_v42, %v792_v41  ;;  %v679_v46 = vadd.f32 %v678_v44, %v635_v43 }
 0x106   :  { %v636_v48 = vpop.f32.mrf.mxu1 }
 0x107   :  { %v824_v16 = vsub.f32 0.0, %v810_v45  ;;  %v723_v50 = vadd.f32 %v722_v40, %v679_v46  ;;  %v637_v59 = vadd.f32 %v636_v48, %v1792_v22 }
 0x108   :  { %v768_v51 = vpop.f32.mrf.mxu0 }
 0x109   :  { %v1398_v52 = vpop.eup %1397  ;;  %v845_v53 = vmul.f32 1.442695, %v824_v16  ;;  %v767_v55 = vadd.f32 %v766_v35, %v723_v50 }
 0x10a   :  { %v1400_v56 = vpop.eup %1399  ;;  %v865_v61 = vadd.f32 1.0, %v1398_v52 }
 0x10b   :  { %v892_v58 = vmul.f32 %v1400_v56, %v808_v2  ;;  %1401 = vpow2.f32 %v845_v53  ;;  %v793_v19 = vmul.f32 %v1809_v39, %v767_v55 }
 0x10c   :  { %v680_v60 = vpop.f32.mrf.mxu2  ;;  %1403 = vrcp.f32 %v865_v61 }
 0x10d   :  { %v724_v57 = vpop.f32.mrf.mxu3  ;;  %v1321_v20 = vpack.c.bf16 %v892_v58, %v891_v47  ;;  %v1857_v62 = vadd.f32 %v1814_v42, %v793_v19  ;;  %v681_v63 = vadd.f32 %v680_v60, %v637_v59 }
 0x10e   :  { %v639_v0 = vpop.f32.mrf.mxu1 }
 0x10f   :  { %1344 = vst [vmem:[%s1895_s4 + $0x10] sm:$0xff] %v1321_v20   ;;  %v825_v54 = vsub.f32 0.0, %v1857_v62  ;;  %v725_v1 = vadd.f32 %v724_v57, %v681_v63  ;;  %v640_v8 = vadd.f32 %v639_v0, %v1798_v26 }
 0x110   :  { %v771_v5 = vpop.f32.mrf.mxu0 }
 0x111   :  { %v1402_v2 = vpop.eup %1401  ;;  %v847_v3 = vmul.f32 1.442695, %v825_v54  ;;  %v769_v4 = vadd.f32 %v768_v51, %v725_v1 }
 0x112   :  { %v866_v22 = vadd.f32 1.0, %v1402_v2  ;;  %v1404_v14 = vpop.eup %1403 }
 0x113   :  { %1405 = vpow2.f32 %v847_v3  ;;  %v794_v7 = vmul.f32 %v1809_v39, %v769_v4  ;;  %v893_v28 = vmul.f32 %v1404_v14, %v1844_v31 }
 0x114   :  { %1407 = vrcp.f32 %v866_v22  ;;  %v683_v10 = vpop.f32.mrf.mxu2 }
 0x115   :  { %v727_v6 = vpop.f32.mrf.mxu3  ;;  %v812_v11 = vadd.f32 %v1814_v42, %v794_v7  ;;  %v684_v12 = vadd.f32 %v683_v10, %v640_v8 }
 0x116   :  { %v641_v13 = vpop.f32.mrf.mxu1 }
 0x117   :  { %v826_v15 = vsub.f32 0.0, %v812_v11  ;;  %v728_v17 = vadd.f32 %v727_v6, %v684_v12  ;;  %v642_v9 = vadd.f32 %v641_v13, %v1804_v30 }
 0x118   :  { %v773_v33 = vpop.f32.mrf.mxu0 }
 0x119   :  { %v1406_v23 = vpop.eup %1405  ;;  %v849_v18 = vmul.f32 1.442695, %v826_v15  ;;  %v772_v21 = vadd.f32 %v771_v5, %v728_v17 }
 0x11a   :  { %v1408_v24 = vpop.eup %1407  ;;  %v867_v37 = vadd.f32 1.0, %v1406_v23 }
 0x11b   :  { %v894_v34 = vmul.f32 %v1408_v24, %v810_v45  ;;  %1409 = vpow2.f32 %v849_v18  ;;  %v795_v26 = vmul.f32 %v1809_v39, %v772_v21 }
 0x11c   :  { %v685_v35 = vpop.f32.mrf.mxu2  ;;  %1411 = vrcp.f32 %v867_v37 }
 0x11d   :  { %v729_v32 = vpop.f32.mrf.mxu3  ;;  %v1326_v36 = vpack.c.bf16 %v894_v34, %v893_v28  ;;  %v813_v27 = vadd.f32 %v1814_v42, %v795_v26  ;;  %v686_v38 = vadd.f32 %v685_v35, %v642_v9 }
 0x11e   :  { %v644_v40 = vpop.f32.mrf.mxu1 }
 0x11f   :  { %1345 = vst [vmem:[%s1895_s4 + $0x18] sm:$0xff] %v1326_v36   ;;  %v827_v31 = vsub.f32 0.0, %v813_v27  ;;  %v730_v41 = vadd.f32 %v729_v32, %v686_v38  ;;  %v645_v48 = vadd.f32 %v644_v40, %v1796_v25 }
 0x120   :  { %v776_v52 = vpop.f32.mrf.mxu0 }
 0x121   :  { %v1410_v43 = vpop.eup %1409  ;;  %v851_v44 = vmul.f32 1.442695, %v827_v31  ;;  %v774_v45 = vadd.f32 %v773_v33, %v730_v41 }
 0x122   :  { %v868_v46 = vadd.f32 1.0, %v1410_v43  ;;  %v1412_v53 = vpop.eup %1411 }
 0x123   :  { %v796_v30 = vmul.f32 %v1809_v39, %v774_v45  ;;  %v895_v59 = vmul.f32 %v1412_v53, %v1857_v62 }
 0x124   :  { %1413 = vrcp.f32 %v868_v46  ;;  %v688_v16 = vpop.f32.mrf.mxu2 }
 0x125   :  { %v732_v49 = vpop.f32.mrf.mxu3  ;;  %1415 = vpow2.f32 %v851_v44  ;;  %v814_v50 = vadd.f32 %v1814_v42, %v796_v30  ;;  %v689_v51 = vadd.f32 %v688_v16, %v645_v48 }
 0x126   :  { %v646_v47 = vpop.f32.mrf.mxu1 }
 0x127   :  { %v828_v55 = vsub.f32 0.0, %v814_v50  ;;  %v733_v56 = vadd.f32 %v732_v49, %v689_v51  ;;  %v647_v61 = vadd.f32 %v646_v47, %v1802_v29 }
 0x128   :  { %v778_v22 = vpop.f32.mrf.mxu0 }
 0x129   :  { %v853_v57 = vmul.f32 1.442695, %v828_v55  ;;  %v777_v58 = vadd.f32 %v776_v52, %v733_v56 }
 0x12a   :  { %v1414_v19 = vpop.eup %1413 }
 0x12b   :  { %v1416_v60 = vpop.eup %1415  ;;  %v896_v20 = vmul.f32 %v1414_v19, %v812_v11  ;;  %1417 = vpow2.f32 %v853_v57  ;;  %v797_v25 = vmul.f32 %v1809_v39, %v777_v58 }
 0x12c   :  { %v690_v63 = vpop.f32.mrf.mxu2  ;;  %v869_v2 = vadd.f32 1.0, %v1416_v60 }
 0x12d   :  { %v1331_v0 = vpack.c.bf16 %v896_v20, %v895_v59  ;;  %v815_v54 = vadd.f32 %v1814_v42, %v797_v25  ;;  %v691_v1 = vadd.f32 %v690_v63, %v647_v61  ;;  %v734_v3 = vpop.f32.mrf.mxu3 }
 0x12e   :  { %1419 = vrcp.f32 %v869_v2 }
 0x12f   :  { %1346 = vst [vmem:[%s1895_s4 + $0x20] sm:$0xff] %v1331_v0   ;;  %v829_v4 = vsub.f32 0.0, %v815_v54  ;;  %v735_v62 = vadd.f32 %v734_v3, %v691_v1 }
 0x131   :  { %v1418_v5 = vpop.eup %1417  ;;  %v855_v6 = vmul.f32 1.442695, %v829_v4  ;;  %v779_v7 = vadd.f32 %v778_v22, %v735_v62 }
 0x132   :  { %v870_v8 = vadd.f32 1.0, %v1418_v5 }
 0x133   :  { %v798_v29 = vmul.f32 %v1809_v39, %v779_v7 }
 0x134   :  { %1421 = vrcp.f32 %v870_v8  ;;  %v1420_v12 = vpop.eup %1419 }
 0x135   :  { %1423 = vpow2.f32 %v855_v6  ;;  %v816_v10 = vadd.f32 %v1814_v42, %v798_v29  ;;  %v897_v17 = vmul.f32 %v1420_v12, %v813_v27 }
 0x137   :  { %v830_v11 = vsub.f32 0.0, %v816_v10 }
 0x139   :  { %v857_v13 = vmul.f32 1.442695, %v830_v11 }
 0x13a   :  { %v1422_v14 = vpop.eup %1421 }
 0x13b   :  { %v1424_v15 = vpop.eup %1423  ;;  %v898_v23 = vmul.f32 %v1422_v14, %v814_v50  ;;  %1425 = vpow2.f32 %v857_v13 }
 0x13c   :  { %v871_v21 = vadd.f32 1.0, %v1424_v15 }
 0x13d   :  { %v1336_v18 = vpack.c.bf16 %v898_v23, %v897_v17 }
 0x13e   :  { %1427 = vrcp.f32 %v871_v21 }
 0x13f   :  { %1347 = vst [vmem:[%s1895_s4 + $0x28] sm:$0xff] %v1336_v18  }
 0x141   :  { %v1426_v24 = vpop.eup %1425 }
 0x142   :  { %v872_v39 = vadd.f32 1.0, %v1426_v24 }
 0x144   :  { %1429 = vrcp.f32 %v872_v39  ;;  %v1428_v28 = vpop.eup %1427 }
 0x145   :  { %v899_v32 = vmul.f32 %v1428_v28, %v815_v54 }
 0x14a   :  { %v1430_v42 = vpop.eup %1429 }
 0x14b   :  { %v900_v34 = vmul.f32 %v1430_v42, %v816_v10 }
 0x14d   :  { %v1341_v26 = vpack.c.bf16 %v900_v34, %v899_v32 }
 0x14f   :  { %1348 = vst [vmem:[%s1895_s4 + $0x30] sm:$0xff] %v1341_v26  }

// kernel: simple_cnn2d_forward.8
= control target key start
LH: loop header
LB: loop body
LE: loop exit
PB: predicated region body
PF: predicated region fallthrough
CT: control target
= control target key end

     0   :  { %s3384_s1 = inlined_call_operand.vmem [shape: bf16[1152,256], index: 1, kind: input, shape index: {}]   ;;  %s3385_s0 = inlined_call_operand.vmem [shape: bf16[32,1152], index: 0, kind: input, shape index: {}]   ;;  %s3386_s2 = inlined_call_operand.vmem [shape: f32[1,256], index: 2, kind: input, shape index: {}]   ;;  %s3387_s3 = inlined_call_operand.vmem [shape: f32[1,256], index: 3, kind: input, shape index: {}]   ;;  %s3388_s4 = inlined_call_operand.vmem [shape: bf16[32,256], index: 4, kind: output, shape index: {}]  }
   0x1   :  { %v1553_v0 = vld [vmem:[%s3384_s1 + $0x70] sm:$0xf]  ;;  %v2104_v1 = vld [vmem:[%s3384_s1 + $0x74] sm:$0xf0]  ;;  %v1545_v11 = vld [vmem:[%s3384_s1 + $0x60] sm:$0xf] }
   0x2   :  { %v1617_v2 = vld [vmem:[%s3384_s1 + $0xf0] sm:$0xf]  ;;  %v1554_v3 = vor.u32 %v2104_v1, %v1553_v0  ;;  %v2120_v4 = vld [vmem:[%s3384_s1 + $0xf4] sm:$0xf0]  ;;  %v2102_v13 = vld [vmem:[%s3384_s1 + $0x64] sm:$0xf0] }
   0x3   :  { %v1681_v5 = vld [vmem:[%s3384_s1 + $0x170] sm:$0xf]  ;;  %v2136_v6 = vld [vmem:[%s3384_s1 + $0x174] sm:$0xf0]  ;;  %v1618_v7 = vor.u32 %v2120_v4, %v1617_v2  ;;  %v1609_v14 = vld [vmem:[%s3384_s1 + $0xe0] sm:$0xf]  ;;  %v1546_v16 = vor.u32 %v2102_v13, %v1545_v11 }
   0x4   :  { %v1682_v8 = vor.u32 %v2136_v6, %v1681_v5  ;;  %v1745_v9 = vld [vmem:[%s3384_s1 + $0x1f0] sm:$0xf]  ;;  %v2152_v10 = vld [vmem:[%s3384_s1 + $0x1f4] sm:$0xf0]  ;;  %993 = vmatpush.bf16.msra.mxu0 %v1554_v3  ;;  %v2118_v15 = vld [vmem:[%s3384_s1 + $0xe4] sm:$0xf0] }
   0x5   :  { %v1746_v12 = vor.u32 %v2152_v10, %v1745_v9  ;;  %1012 = vmatpush.bf16.msra.mxu1 %v1618_v7  ;;  %v1610_v17 = vor.u32 %v2118_v15, %v1609_v14  ;;  %v1673_v18 = vld [vmem:[%s3384_s1 + $0x160] sm:$0xf]  ;;  %v2134_v19 = vld [vmem:[%s3384_s1 + $0x164] sm:$0xf0]  ;;  %v1537_v23 = vld [vmem:[%s3384_s1 + $0x50] sm:$0xf] }
   0x6   :  { %1031 = vmatpush.bf16.msra.mxu2 %v1682_v8  ;;  %v1737_v20 = vld [vmem:[%s3384_s1 + $0x1e0] sm:$0xf]  ;;  %v1674_v21 = vor.u32 %v2134_v19, %v1673_v18  ;;  %v2150_v22 = vld [vmem:[%s3384_s1 + $0x1e4] sm:$0xf0]  ;;  %v2100_v24 = vld [vmem:[%s3384_s1 + $0x54] sm:$0xf0] }
   0x7   :  { %1050 = vmatpush.bf16.msra.mxu3 %v1746_v12  ;;  %v1738_v25 = vor.u32 %v2150_v22, %v1737_v20  ;;  %v1601_v26 = vld [vmem:[%s3384_s1 + $0xd0] sm:$0xf]  ;;  %v2116_v27 = vld [vmem:[%s3384_s1 + $0xd4] sm:$0xf0]  ;;  %v1538_v29 = vor.u32 %v2100_v24, %v1537_v23  ;;  %v1529_v35 = vld [vmem:[%s3384_s1 + $0x40] sm:$0xf] }
   0x8   :  { %v1665_v28 = vld [vmem:[%s3384_s1 + $0x150] sm:$0xf]  ;;  %994 = vmatpush.bf16.msra.mxu0 %v1546_v16  ;;  %v2132_v30 = vld [vmem:[%s3384_s1 + $0x154] sm:$0xf0]  ;;  %v1602_v33 = vor.u32 %v2116_v27, %v1601_v26  ;;  %v2098_v36 = vld [vmem:[%s3384_s1 + $0x44] sm:$0xf0] }
   0x9   :  { %v1729_v31 = vld [vmem:[%s3384_s1 + $0x1d0] sm:$0xf]  ;;  %v2148_v32 = vld [vmem:[%s3384_s1 + $0x1d4] sm:$0xf0]  ;;  %1013 = vmatpush.bf16.msra.mxu1 %v1610_v17  ;;  %v1666_v34 = vor.u32 %v2132_v30, %v1665_v28  ;;  %v1593_v37 = vld [vmem:[%s3384_s1 + $0xc0] sm:$0xf]  ;;  %v1530_v44 = vor.u32 %v2098_v36, %v1529_v35 }
   0xa   :  { %1032 = vmatpush.bf16.msra.mxu2 %v1674_v21  ;;  %v1730_v38 = vor.u32 %v2148_v32, %v1729_v31  ;;  %v2114_v39 = vld [vmem:[%s3384_s1 + $0xc4] sm:$0xf0]  ;;  %v1657_v40 = vld [vmem:[%s3384_s1 + $0x140] sm:$0xf]  ;;  %v1521_v47 = vld [vmem:[%s3384_s1 + $0x30] sm:$0xf] }
   0xb   :  { %1051 = vmatpush.bf16.msra.mxu3 %v1738_v25  ;;  %v2130_v41 = vld [vmem:[%s3384_s1 + $0x144] sm:$0xf0]  ;;  %v1721_v42 = vld [vmem:[%s3384_s1 + $0x1c0] sm:$0xf]  ;;  %v1594_v45 = vor.u32 %v2114_v39, %v1593_v37  ;;  %v2096_v48 = vld [vmem:[%s3384_s1 + $0x34] sm:$0xf0] }
   0xc   :  { %v2146_v43 = vld [vmem:[%s3384_s1 + $0x1c4] sm:$0xf0]  ;;  %995 = vmatpush.bf16.msra.mxu0 %v1538_v29  ;;  %v1658_v46 = vor.u32 %v2130_v41, %v1657_v40  ;;  %v1585_v49 = vld [vmem:[%s3384_s1 + $0xb0] sm:$0xf]  ;;  %v2112_v51 = vld [vmem:[%s3384_s1 + $0xb4] sm:$0xf0]  ;;  %v1522_v56 = vor.u32 %v2096_v48, %v1521_v47 }
   0xd   :  { %1014 = vmatpush.bf16.msra.mxu1 %v1602_v33  ;;  %v1722_v50 = vor.u32 %v2146_v43, %v1721_v42  ;;  %v1649_v52 = vld [vmem:[%s3384_s1 + $0x130] sm:$0xf]  ;;  %v2128_v53 = vld [vmem:[%s3384_s1 + $0x134] sm:$0xf0]  ;;  %v1586_v57 = vor.u32 %v2112_v51, %v1585_v49  ;;  %v1513_v59 = vld [vmem:[%s3384_s1 + $0x20] sm:$0xf] }
   0xe   :  { %1033 = vmatpush.bf16.msra.mxu2 %v1666_v34  ;;  %v1713_v54 = vld [vmem:[%s3384_s1 + $0x1b0] sm:$0xf]  ;;  %v2144_v55 = vld [vmem:[%s3384_s1 + $0x1b4] sm:$0xf0]  ;;  %v1650_v58 = vor.u32 %v2128_v53, %v1649_v52  ;;  %v2094_v60 = vld [vmem:[%s3384_s1 + $0x24] sm:$0xf0] }
   0xf   :  { %1052 = vmatpush.bf16.msra.mxu3 %v1730_v38  ;;  %v1577_v61 = vld [vmem:[%s3384_s1 + $0xa0] sm:$0xf]  ;;  %v1714_v62 = vor.u32 %v2144_v55, %v1713_v54  ;;  %v2110_v63 = vld [vmem:[%s3384_s1 + $0xa4] sm:$0xf0]  ;;  %v1514_v4 = vor.u32 %v2094_v60, %v1513_v59  ;;  %v1505_v7 = vld [vmem:[%s3384_s1 + $0x10] sm:$0xf] }
  0x10   :  { %996 = vmatpush.bf16.msra.mxu0 %v1530_v44  ;;  %v1641_v0 = vld [vmem:[%s3384_s1 + $0x120] sm:$0xf]  ;;  %v2126_v1 = vld [vmem:[%s3384_s1 + $0x124] sm:$0xf0]  ;;  %v1578_v5 = vor.u32 %v2110_v63, %v1577_v61  ;;  %v2092_v8 = vld [vmem:[%s3384_s1 + $0x14] sm:$0xf0] }
  0x11   :  { %1015 = vmatpush.bf16.msra.mxu1 %v1594_v45  ;;  %v1705_v2 = vld [vmem:[%s3384_s1 + $0x1a0] sm:$0xf]  ;;  %v2142_v3 = vld [vmem:[%s3384_s1 + $0x1a4] sm:$0xf0]  ;;  %v1642_v6 = vor.u32 %v2126_v1, %v1641_v0  ;;  %v1569_v9 = vld [vmem:[%s3384_s1 + $0x90] sm:$0xf]  ;;  %v1506_v17 = vor.u32 %v2092_v8, %v1505_v7 }
  0x12   :  { %1034 = vmatpush.bf16.msra.mxu2 %v1658_v46  ;;  %v1706_v10 = vor.u32 %v2142_v3, %v1705_v2  ;;  %v2108_v11 = vld [vmem:[%s3384_s1 + $0x94] sm:$0xf0]  ;;  %v1633_v12 = vld [vmem:[%s3384_s1 + $0x110] sm:$0xf]  ;;  %v1497_v16 = vld [vmem:[%s3384_s1] sm:$0xf] }
  0x13   :  { %1053 = vmatpush.bf16.msra.mxu3 %v1722_v50  ;;  %v2124_v13 = vld [vmem:[%s3384_s1 + $0x114] sm:$0xf0]  ;;  %v1697_v14 = vld [vmem:[%s3384_s1 + $0x190] sm:$0xf]  ;;  %v2090_v18 = vld [vmem:[%s3384_s1 + $0x4] sm:$0xf0]  ;;  %v1570_v21 = vor.u32 %v2108_v11, %v1569_v9 }
  0x14   :  { %997 = vmatpush.bf16.msra.mxu0 %v1522_v56  ;;  %v2140_v15 = vld [vmem:[%s3384_s1 + $0x194] sm:$0xf0]  ;;  %v1561_v19 = vld [vmem:[%s3384_s1 + $0x80] sm:$0xf]  ;;  %v2106_v20 = vld [vmem:[%s3384_s1 + $0x84] sm:$0xf0]  ;;  %v1634_v22 = vor.u32 %v2124_v13, %v1633_v12  ;;  %v1498_v34 = vor.u32 %v2090_v18, %v1497_v16 }
  0x15   :  { %1016 = vmatpush.bf16.msra.mxu1 %v1586_v57  ;;  %v1625_v23 = vld [vmem:[%s3384_s1 + $0x100] sm:$0xf]  ;;  %v2122_v24 = vld [vmem:[%s3384_s1 + $0x104] sm:$0xf0]  ;;  %v1698_v26 = vor.u32 %v2140_v15, %v1697_v14  ;;  %v2075_v29 = vld [vmem:[%s3385_s0 + $0x20] sm:$0xf0]  ;;  %v1562_v38 = vor.u32 %v2106_v20, %v1561_v19 }
  0x16   :  { %1035 = vmatpush.bf16.msra.mxu2 %v1650_v58  ;;  %v1689_v25 = vld [vmem:[%s3384_s1 + $0x180] sm:$0xf]  ;;  %v2138_v27 = vld [vmem:[%s3384_s1 + $0x184] sm:$0xf0]  ;;  %v2071_v30 = vld [vmem:[%s3385_s0 + $0x4] sm:$0xf]  ;;  %v1626_v39 = vor.u32 %v2122_v24, %v1625_v23 }
  0x17   :  { %1054 = vmatpush.bf16.msra.mxu3 %v1714_v62  ;;  %v1425_v28 = vld [vmem:[%s3385_s0] sm:$0xf]  ;;  %v1427_v31 = vld [vmem:[%s3385_s0 + $0x24] sm:$0xf0]  ;;  %v1937_v32 = vld [vmem:[%s3384_s1 + $0x370] sm:$0xf]  ;;  %v1690_v43 = vor.u32 %v2138_v27, %v1689_v25 }
  0x18   :  { %998 = vmatpush.bf16.msra.mxu0 %v1514_v4  ;;  %v2200_v33 = vld [vmem:[%s3384_s1 + $0x374] sm:$0xf0]  ;;  %v1433_v35 = vld [vmem:[%s3385_s0 + $0x8] sm:$0xf]  ;;  %v1873_v36 = vld [vmem:[%s3384_s1 + $0x2f0] sm:$0xf]  ;;  %v2543_v48 = vor.u32 %v2075_v29, %v1425_v28  ;;  %v2554_v53 = vor.u32 %v2071_v30, %v1427_v31 }
  0x19   :  { %1017 = vmatpush.bf16.msra.mxu1 %v1578_v5  ;;  %v2184_v37 = vld [vmem:[%s3384_s1 + $0x2f4] sm:$0xf0]  ;;  %v2076_v40 = vld [vmem:[%s3385_s0 + $0x28] sm:$0xf0]  ;;  %v1435_v42 = vld [vmem:[%s3385_s0 + $0x2c] sm:$0xf0]  ;;  %v1938_v44 = vor.u32 %v2200_v33, %v1937_v32 }
  0x1a   :  { %1036 = vmatpush.bf16.msra.mxu2 %v1642_v6  ;;  %v2072_v41 = vld [vmem:[%s3385_s0 + $0xc] sm:$0xf]  ;;  %v1809_v45 = vld [vmem:[%s3384_s1 + $0x270] sm:$0xf]  ;;  %v2168_v46 = vld [vmem:[%s3384_s1 + $0x274] sm:$0xf0]  ;;  %v1874_v49 = vor.u32 %v2184_v37, %v1873_v36  ;;  %v2556_v54 = vor.u32 %v2076_v40, %v1433_v35 }
  0x1b   :  { %1055 = vmatpush.bf16.msra.mxu3 %v1706_v10  ;;  %v2001_v47 = vld [vmem:[%s3384_s1 + $0x3f0] sm:$0xf]  ;;  %v2216_v50 = vld [vmem:[%s3384_s1 + $0x3f4] sm:$0xf0]  ;;  %v1929_v51 = vld [vmem:[%s3384_s1 + $0x360] sm:$0xf]  ;;  %v2564_v57 = vor.u32 %v2072_v41, %v1435_v42  ;;  %v1810_v58 = vor.u32 %v2168_v46, %v1809_v45 }
  0x1c   :  { %999 = vmatpush.bf16.msra.mxu0 %v1506_v17  ;;  %v2198_v52 = vld [vmem:[%s3384_s1 + $0x364] sm:$0xf0]  ;;  %v1865_v55 = vld [vmem:[%s3384_s1 + $0x2e0] sm:$0xf]  ;;  %v2002_v59 = vor.u32 %v2216_v50, %v2001_v47  ;;  %v1921_v2 = vld [vmem:[%s3384_s1 + $0x350] sm:$0xf] }
  0x1d   :  { %1018 = vmatpush.bf16.msra.mxu1 %v1570_v21  ;;  %v2182_v56 = vld [vmem:[%s3384_s1 + $0x2e4] sm:$0xf0]  ;;  %v1930_v60 = vor.u32 %v2198_v52, %v1929_v51  ;;  %v1801_v61 = vld [vmem:[%s3384_s1 + $0x260] sm:$0xf]  ;;  %v2196_v3 = vld [vmem:[%s3384_s1 + $0x354] sm:$0xf0] }
  0x1e   :  { %1037 = vmatpush.bf16.msra.mxu2 %v1634_v22  ;;  %v2166_v62 = vld [vmem:[%s3384_s1 + $0x264] sm:$0xf0]  ;;  %v1993_v63 = vld [vmem:[%s3384_s1 + $0x3e0] sm:$0xf]  ;;  %v1866_v0 = vor.u32 %v2182_v56, %v1865_v55  ;;  %v1857_v4 = vld [vmem:[%s3384_s1 + $0x2d0] sm:$0xf]  ;;  %v1922_v8 = vor.u32 %v2196_v3, %v1921_v2 }
  0x1f   :  { %1056 = vmatpush.bf16.msra.mxu3 %v1698_v26  ;;  %v2214_v1 = vld [vmem:[%s3384_s1 + $0x3e4] sm:$0xf0]  ;;  %v2180_v5 = vld [vmem:[%s3384_s1 + $0x2d4] sm:$0xf0]  ;;  %v1802_v6 = vor.u32 %v2166_v62, %v1801_v61  ;;  %v1793_v9 = vld [vmem:[%s3384_s1 + $0x250] sm:$0xf] }
  0x20   :  { %1000 = vmatpush.bf16.msra.mxu0 %v1498_v34  ;;  %v1994_v7 = vor.u32 %v2214_v1, %v1993_v63  ;;  %v2164_v10 = vld [vmem:[%s3384_s1 + $0x254] sm:$0xf0]  ;;  %v1985_v11 = vld [vmem:[%s3384_s1 + $0x3d0] sm:$0xf]  ;;  %v1858_v12 = vor.u32 %v2180_v5, %v1857_v4  ;;  %v1913_v14 = vld [vmem:[%s3384_s1 + $0x340] sm:$0xf] }
  0x21   :  { %1019 = vmatpush.bf16.msra.mxu1 %v1562_v38  ;;  %v2212_v13 = vld [vmem:[%s3384_s1 + $0x3d4] sm:$0xf0]  ;;  %v2194_v15 = vld [vmem:[%s3384_s1 + $0x344] sm:$0xf0]  ;;  %v1849_v16 = vld [vmem:[%s3384_s1 + $0x2c0] sm:$0xf]  ;;  %v1794_v18 = vor.u32 %v2164_v10, %v1793_v9 }
  0x22   :  { %1038 = vmatpush.bf16.msra.mxu2 %v1626_v39  ;;  %v2178_v17 = vld [vmem:[%s3384_s1 + $0x2c4] sm:$0xf0]  ;;  %v1785_v19 = vld [vmem:[%s3384_s1 + $0x240] sm:$0xf]  ;;  %v1986_v22 = vor.u32 %v2212_v13, %v1985_v11  ;;  %v1914_v23 = vor.u32 %v2194_v15, %v1913_v14  ;;  %v2084_v26 = vld [vmem:[%s3385_s0 + $0x68] sm:$0xf0] }
  0x23   :  { %1057 = vmatpush.bf16.msra.mxu3 %v1690_v43  ;;  %1001 = vmatmul.bf16.vlgmr.msra.gmra.mxu0 %v2543_v48  ;;  %v2162_v20 = vld [vmem:[%s3384_s1 + $0x244] sm:$0xf0]  ;;  %v1977_v21 = vld [vmem:[%s3384_s1 + $0x3c0] sm:$0xf]  ;;  %v1850_v27 = vor.u32 %v2178_v17, %v1849_v16  ;;  %v2080_v28 = vld [vmem:[%s3385_s0 + $0x4c] sm:$0xf] }
  0x24   :  { %1020 = vmatmul.bf16.vlgmr.msra.gmra.mxu1 %v2554_v53  ;;  %1069 = vmatpush.bf16.msrb.mxu0 %v1810_v58  ;;  %v2210_v24 = vld [vmem:[%s3384_s1 + $0x3c4] sm:$0xf0]  ;;  %v1463_v29 = vld [vmem:[%s3385_s0 + $0x6c] sm:$0xf0]  ;;  %v2192_v31 = vld [vmem:[%s3384_s1 + $0x334] sm:$0xf0]  ;;  %v1786_v35 = vor.u32 %v2162_v20, %v1785_v19 }
  0x25   :  { %1088 = vmatpush.bf16.msrb.mxu1 %v1874_v49  ;;  %1039 = vmatmul.bf16.vlgmr.msra.gmra.mxu2 %v2556_v54  ;;  %v1461_v25 = vld [vmem:[%s3385_s0 + $0x48] sm:$0xf]  ;;  %v1905_v30 = vld [vmem:[%s3384_s1 + $0x330] sm:$0xf]  ;;  %v2176_v34 = vld [vmem:[%s3384_s1 + $0x2b4] sm:$0xf0]  ;;  %v1978_v39 = vor.u32 %v2210_v24, %v1977_v21  ;;  %v2686_v50 = vor.u32 %v2080_v28, %v1463_v29 }
  0x26   :  { %1107 = vmatpush.bf16.msrb.mxu2 %v1938_v44  ;;  %1058 = vmatmul.bf16.vlgmr.msra.gmra.mxu3 %v2564_v57  ;;  %v1469_v32 = vld [vmem:[%s3385_s0 + $0x50] sm:$0xf]  ;;  %v2085_v36 = vld [vmem:[%s3385_s0 + $0x70] sm:$0xf0]  ;;  %v1471_v38 = vld [vmem:[%s3385_s0 + $0x74] sm:$0xf0]  ;;  %v1906_v40 = vor.u32 %v2192_v31, %v1905_v30  ;;  %v2675_v44 = vor.u32 %v2084_v26, %v1461_v25 }
  0x27   :  { %1126 = vmatpush.bf16.msrb.mxu3 %v2002_v59  ;;  %v1841_v33 = vld [vmem:[%s3384_s1 + $0x2b0] sm:$0xf]  ;;  %v2081_v37 = vld [vmem:[%s3385_s0 + $0x54] sm:$0xf]  ;;  %v2160_v42 = vld [vmem:[%s3384_s1 + $0x234] sm:$0xf0]  ;;  %v2688_v51 = vor.u32 %v2085_v36, %v1469_v32 }
  0x28   :  { %1070 = vmatpush.bf16.msrb.mxu0 %v1802_v6  ;;  %v1777_v41 = vld [vmem:[%s3384_s1 + $0x230] sm:$0xf]  ;;  %v1842_v45 = vor.u32 %v2176_v34, %v1841_v33  ;;  %v2208_v46 = vld [vmem:[%s3384_s1 + $0x3b4] sm:$0xf0]  ;;  %v1897_v47 = vld [vmem:[%s3384_s1 + $0x320] sm:$0xf]  ;;  %v2696_v56 = vor.u32 %v2081_v37, %v1471_v38 }
  0x29   :  { %1089 = vmatpush.bf16.msrb.mxu1 %v1866_v0  ;;  %v1969_v43 = vld [vmem:[%s3384_s1 + $0x3b0] sm:$0xf]  ;;  %v2190_v49 = vld [vmem:[%s3384_s1 + $0x324] sm:$0xf0]  ;;  %v1833_v52 = vld [vmem:[%s3384_s1 + $0x2a0] sm:$0xf]  ;;  %v1778_v58 = vor.u32 %v2160_v42, %v1777_v41 }
  0x2a   :  { %1108 = vmatpush.bf16.msrb.mxu2 %v1930_v60  ;;  %v2174_v55 = vld [vmem:[%s3384_s1 + $0x2a4] sm:$0xf0]  ;;  %v1970_v59 = vor.u32 %v2208_v46, %v1969_v43  ;;  %v1898_v60 = vor.u32 %v2190_v49, %v1897_v47  ;;  %v1769_v61 = vld [vmem:[%s3384_s1 + $0x220] sm:$0xf]  ;;  %v1889_v2 = vld [vmem:[%s3384_s1 + $0x310] sm:$0xf] }
  0x2b   :  { %1127 = vmatpush.bf16.msrb.mxu3 %v1994_v7  ;;  %v2158_v62 = vld [vmem:[%s3384_s1 + $0x224] sm:$0xf0]  ;;  %v1961_v63 = vld [vmem:[%s3384_s1 + $0x3a0] sm:$0xf]  ;;  %v1834_v0 = vor.u32 %v2174_v55, %v1833_v52  ;;  %v2188_v3 = vld [vmem:[%s3384_s1 + $0x314] sm:$0xf0] }
  0x2c   :  { %1071 = vmatpush.bf16.msrb.mxu0 %v1794_v18  ;;  %v2206_v1 = vld [vmem:[%s3384_s1 + $0x3a4] sm:$0xf0]  ;;  %v1825_v4 = vld [vmem:[%s3384_s1 + $0x290] sm:$0xf]  ;;  %v2172_v5 = vld [vmem:[%s3384_s1 + $0x294] sm:$0xf0]  ;;  %v1770_v6 = vor.u32 %v2158_v62, %v1769_v61  ;;  %v1890_v9 = vor.u32 %v2188_v3, %v1889_v2 }
  0x2d   :  { %1090 = vmatpush.bf16.msrb.mxu1 %v1858_v12  ;;  %v1761_v7 = vld [vmem:[%s3384_s1 + $0x210] sm:$0xf]  ;;  %v2156_v10 = vld [vmem:[%s3384_s1 + $0x214] sm:$0xf0]  ;;  %v1826_v13 = vor.u32 %v2172_v5, %v1825_v4  ;;  %v1881_v14 = vld [vmem:[%s3384_s1 + $0x300] sm:$0xf] }
  0x2e   :  { %1109 = vmatpush.bf16.msrb.mxu2 %v1922_v8  ;;  %v1962_v8 = vor.u32 %v2206_v1, %v1961_v63  ;;  %v1953_v11 = vld [vmem:[%s3384_s1 + $0x390] sm:$0xf]  ;;  %v2204_v12 = vld [vmem:[%s3384_s1 + $0x394] sm:$0xf0]  ;;  %v2186_v15 = vld [vmem:[%s3384_s1 + $0x304] sm:$0xf0]  ;;  %v1762_v20 = vor.u32 %v2156_v10, %v1761_v7 }
  0x2f   :  { %1128 = vmatpush.bf16.msrb.mxu3 %v1986_v22  ;;  %v1817_v16 = vld [vmem:[%s3384_s1 + $0x280] sm:$0xf]  ;;  %v2170_v17 = vld [vmem:[%s3384_s1 + $0x284] sm:$0xf0]  ;;  %v2119_v18 = vld [vmem:[%s3384_s1 + $0xf4] sm:$0xf]  ;;  %v1954_v24 = vor.u32 %v2204_v12, %v1953_v11  ;;  %v1882_v25 = vor.u32 %v2186_v15, %v1881_v14 }
  0x30   :  { %1072 = vmatpush.bf16.msrb.mxu0 %v1786_v35  ;;  %v1619_v19 = vld [vmem:[%s3384_s1 + $0xf8] sm:$0xf0]  ;;  %v1753_v21 = vld [vmem:[%s3384_s1 + $0x200] sm:$0xf]  ;;  %v2103_v22 = vld [vmem:[%s3384_s1 + $0x74] sm:$0xf]  ;;  %v1818_v29 = vor.u32 %v2170_v17, %v1817_v16 }
  0x31   :  { %1091 = vmatpush.bf16.msrb.mxu1 %v1850_v27  ;;  %v2154_v26 = vld [vmem:[%s3384_s1 + $0x204] sm:$0xf0]  ;;  %v1945_v27 = vld [vmem:[%s3384_s1 + $0x380] sm:$0xf]  ;;  %v1441_v30 = vld [vmem:[%s3385_s0 + $0x10] sm:$0xf]  ;;  %v1622_v34 = vor.u32 %v2119_v18, %v1619_v19 }
  0x32   :  { %1110 = vmatpush.bf16.msrb.mxu2 %v1914_v23  ;;  %v1555_v23 = vld [vmem:[%s3384_s1 + $0x78] sm:$0xf0]  ;;  %v2202_v28 = vld [vmem:[%s3384_s1 + $0x384] sm:$0xf0]  ;;  %v2077_v31 = vld [vmem:[%s3385_s0 + $0x30] sm:$0xf0]  ;;  %v1754_v42 = vor.u32 %v2154_v26, %v1753_v21 }
  0x33   :  { %1129 = vmatpush.bf16.msrb.mxu3 %v1978_v39  ;;  %1006 = vmatmul.bf16.gmra.mxu0 %v2675_v44  ;;  %v2073_v32 = vld [vmem:[%s3385_s0 + $0x14] sm:$0xf]  ;;  %v1443_v33 = vld [vmem:[%s3385_s0 + $0x34] sm:$0xf0]  ;;  %v2065_v35 = vld [vmem:[%s3384_s1 + $0x470] sm:$0xf]  ;;  %v1558_v38 = vor.u32 %v2103_v22, %v1555_v23  ;;  %v1946_v47 = vor.u32 %v2202_v28, %v1945_v27 }
  0x34   :  { %1025 = vmatmul.bf16.gmra.mxu1 %v2686_v50  ;;  %1073 = vmatpush.bf16.msrb.mxu0 %v1778_v58  ;;  %v2232_v36 = vld [vmem:[%s3384_s1 + $0x474] sm:$0xf0]  ;;  %v2135_v37 = vld [vmem:[%s3384_s1 + $0x174] sm:$0xf]  ;;  %v1683_v39 = vld [vmem:[%s3384_s1 + $0x178] sm:$0xf0]  ;;  %v2833_v1 = vor.u32 %v2073_v32, %v1443_v33 }
  0x35   :  { %1092 = vmatpush.bf16.msrb.mxu1 %v1842_v45  ;;  %1044 = vmatmul.bf16.gmra.mxu2 %v2688_v51  ;;  %v1611_v41 = vld [vmem:[%s3384_s1 + $0xe8] sm:$0xf0]  ;;  %v1449_v43 = vld [vmem:[%s3385_s0 + $0x18] sm:$0xf]  ;;  %v2078_v45 = vld [vmem:[%s3385_s0 + $0x38] sm:$0xf0]  ;;  %v2066_v52 = vor.u32 %v2232_v36, %v2065_v35 }
  0x36   :  { %1111 = vmatpush.bf16.msrb.mxu2 %v1906_v40  ;;  %1063 = vmatmul.bf16.gmra.mxu3 %v2696_v56  ;;  %v2117_v40 = vld [vmem:[%s3384_s1 + $0xe4] sm:$0xf]  ;;  %v2074_v46 = vld [vmem:[%s3385_s0 + $0x1c] sm:$0xf]  ;;  %v1451_v49 = vld [vmem:[%s3385_s0 + $0x3c] sm:$0xf0]  ;;  %v2844_v5 = vor.u32 %v2078_v45, %v1449_v43 }
  0x37   :  { %1130 = vmatpush.bf16.msrb.mxu3 %v1970_v59  ;;  %v2057_v55 = vld [vmem:[%s3384_s1 + $0x460] sm:$0xf]  ;;  %v2230_v58 = vld [vmem:[%s3384_s1 + $0x464] sm:$0xf0]  ;;  %v1686_v59 = vor.u32 %v2135_v37, %v1683_v39  ;;  %v2101_v61 = vld [vmem:[%s3384_s1 + $0x64] sm:$0xf] }
  0x38   :  { %1074 = vmatpush.bf16.msrb.mxu0 %v1770_v6  ;;  %v1547_v62 = vld [vmem:[%s3384_s1 + $0x68] sm:$0xf0]  ;;  %v2133_v63 = vld [vmem:[%s3384_s1 + $0x164] sm:$0xf]  ;;  %v2115_v3 = vld [vmem:[%s3384_s1 + $0xd4] sm:$0xf]  ;;  %v2846_v6 = vor.u32 %v2074_v46, %v1451_v49  ;;  %v2058_v7 = vor.u32 %v2230_v58, %v2057_v55 }
  0x39   :  { %1093 = vmatpush.bf16.msrb.mxu1 %v1834_v0  ;;  %v2831_v0 = vor.u32 %v2077_v31, %v1441_v30  ;;  %v1675_v2 = vld [vmem:[%s3384_s1 + $0x168] sm:$0xf0]  ;;  %v1603_v4 = vld [vmem:[%s3384_s1 + $0xd8] sm:$0xf0]  ;;  %v2228_v10 = vld [vmem:[%s3384_s1 + $0x454] sm:$0xf0] }
  0x3a   :  { %1112 = vmatpush.bf16.msrb.mxu2 %v1898_v60  ;;  %v1614_v60 = vor.u32 %v2117_v40, %v1611_v41  ;;  %v1678_v11 = vor.u32 %v2133_v63, %v1675_v2  ;;  %v1606_v12 = vor.u32 %v2115_v3, %v1603_v4  ;;  %v1539_v14 = vld [vmem:[%s3384_s1 + $0x58] sm:$0xf0]  ;;  %v2131_v15 = vld [vmem:[%s3384_s1 + $0x154] sm:$0xf]  ;;  %v2113_v17 = vld [vmem:[%s3384_s1 + $0xc4] sm:$0xf] }
  0x3b   :  { %1131 = vmatpush.bf16.msrb.mxu3 %v1962_v8  ;;  %v1550_v8 = vor.u32 %v2101_v61, %v1547_v62  ;;  %v1667_v16 = vld [vmem:[%s3384_s1 + $0x158] sm:$0xf0]  ;;  %v1595_v18 = vld [vmem:[%s3384_s1 + $0xc8] sm:$0xf0]  ;;  %v2041_v21 = vld [vmem:[%s3384_s1 + $0x440] sm:$0xf] }
  0x3c   :  { %1075 = vmatpush.bf16.msrb.mxu0 %v1762_v20  ;;  %v2226_v22 = vld [vmem:[%s3384_s1 + $0x444] sm:$0xf0]  ;;  %v1670_v23 = vor.u32 %v2131_v15, %v1667_v16  ;;  %v1531_v26 = vld [vmem:[%s3384_s1 + $0x48] sm:$0xf0]  ;;  %v2129_v27 = vld [vmem:[%s3384_s1 + $0x144] sm:$0xf] }
  0x3d   :  { %1094 = vmatpush.bf16.msrb.mxu1 %v1826_v13  ;;  %v2099_v13 = vld [vmem:[%s3384_s1 + $0x54] sm:$0xf]  ;;  %v1659_v28 = vld [vmem:[%s3384_s1 + $0x148] sm:$0xf0]  ;;  %v1587_v30 = vld [vmem:[%s3384_s1 + $0xb8] sm:$0xf0]  ;;  %v2042_v31 = vor.u32 %v2226_v22, %v2041_v21 }
  0x3e   :  { %1113 = vmatpush.bf16.msrb.mxu2 %v1890_v9  ;;  %v2049_v9 = vld [vmem:[%s3384_s1 + $0x450] sm:$0xf]  ;;  %v1542_v20 = vor.u32 %v2099_v13, %v1539_v14  ;;  %v1662_v35 = vor.u32 %v2129_v27, %v1659_v28  ;;  %v1477_v36 = vld [vmem:[%s3385_s0 + $0x58] sm:$0xf]  ;;  %v2086_v37 = vld [vmem:[%s3385_s0 + $0x78] sm:$0xf0] }
  0x3f   :  { %1132 = vmatpush.bf16.msrb.mxu3 %v1954_v24  ;;  %v2050_v19 = vor.u32 %v2228_v10, %v2049_v9  ;;  %v1598_v24 = vor.u32 %v2113_v17, %v1595_v18  ;;  %v2033_v33 = vld [vmem:[%s3384_s1 + $0x430] sm:$0xf]  ;;  %v1479_v39 = vld [vmem:[%s3385_s0 + $0x7c] sm:$0xf0]  ;;  %v2095_v41 = vld [vmem:[%s3384_s1 + $0x34] sm:$0xf] }
  0x40   :  { %1076 = vmatpush.bf16.msrb.mxu0 %v1754_v42  ;;  %v1523_v42 = vld [vmem:[%s3384_s1 + $0x38] sm:$0xf0]  ;;  %v2127_v43 = vld [vmem:[%s3384_s1 + $0x134] sm:$0xf]  ;;  %v2109_v46 = vld [vmem:[%s3384_s1 + $0xa4] sm:$0xf] }
  0x41   :  { %1095 = vmatpush.bf16.msrb.mxu1 %v1818_v29  ;;  %v2111_v29 = vld [vmem:[%s3384_s1 + $0xb4] sm:$0xf]  ;;  %v1651_v45 = vld [vmem:[%s3384_s1 + $0x138] sm:$0xf0]  ;;  %v1485_v49 = vld [vmem:[%s3385_s0 + $0x60] sm:$0xf] }
  0x42   :  { %1114 = vmatpush.bf16.msrb.mxu2 %v1882_v25  ;;  %v2097_v25 = vld [vmem:[%s3384_s1 + $0x44] sm:$0xf]  ;;  %v1590_v40 = vor.u32 %v2111_v29, %v1587_v30  ;;  %v1487_v58 = vld [vmem:[%s3385_s0 + $0x84] sm:$0xf0]  ;;  %v2025_v61 = vld [vmem:[%s3384_s1 + $0x420] sm:$0xf]  ;;  %v1654_v63 = vor.u32 %v2127_v43, %v1651_v45 }
  0x43   :  { %1133 = vmatpush.bf16.msrb.mxu3 %v1946_v47  ;;  %1077 = vmatmul.bf16.vlgmr.msrb.gmra.mxu0 %v2831_v0  ;;  %v1534_v32 = vor.u32 %v2097_v25, %v1531_v26  ;;  %v1579_v47 = vld [vmem:[%s3384_s1 + $0xa8] sm:$0xf0]  ;;  %v2083_v55 = vld [vmem:[%s3385_s0 + $0x64] sm:$0xf]  ;;  %v2222_v62 = vld [vmem:[%s3384_s1 + $0x424] sm:$0xf0] }
  0x44   :  { %1145 = vmatpush.bf16.msra.mxu0 %v2066_v52  ;;  %1096 = vmatmul.bf16.vlgmr.msrb.gmra.mxu1 %v2833_v1  ;;  %v2087_v52 = vld [vmem:[%s3385_s0 + $0x80] sm:$0xf0]  ;;  %v1582_v2 = vor.u32 %v2109_v46, %v1579_v47  ;;  %v1515_v4 = vld [vmem:[%s3384_s1 + $0x28] sm:$0xf0]  ;;  %v2978_v14 = vor.u32 %v2083_v55, %v1487_v58  ;;  %v2026_v15 = vor.u32 %v2222_v62, %v2025_v61  ;;  %v2017_v17 = vld [vmem:[%s3384_s1 + $0x410] sm:$0xf] }
  0x45   :  { %1164 = vmatpush.bf16.msra.mxu1 %v1558_v38  ;;  %1115 = vmatmul.bf16.vlgmr.msrb.gmra.mxu2 %v2844_v5  ;;  %v2082_v38 = vld [vmem:[%s3385_s0 + $0x5c] sm:$0xf]  ;;  %v2093_v3 = vld [vmem:[%s3384_s1 + $0x24] sm:$0xf]  ;;  %v1643_v10 = vld [vmem:[%s3384_s1 + $0x128] sm:$0xf0]  ;;  %v2976_v13 = vor.u32 %v2087_v52, %v1485_v49 }
  0x46   :  { %1183 = vmatpush.bf16.msra.mxu2 %v1622_v34  ;;  %1134 = vmatmul.bf16.vlgmr.msrb.gmra.mxu3 %v2846_v6  ;;  %v2224_v34 = vld [vmem:[%s3384_s1 + $0x434] sm:$0xf0]  ;;  %v2965_v9 = vor.u32 %v2082_v38, %v1479_v39  ;;  %v1518_v16 = vor.u32 %v2093_v3, %v1515_v4  ;;  %v2091_v21 = vld [vmem:[%s3384_s1 + $0x14] sm:$0xf]  ;;  %v1507_v22 = vld [vmem:[%s3384_s1 + $0x18] sm:$0xf0] }
  0x47   :  { %1202 = vmatpush.bf16.msra.mxu3 %v1686_v59  ;;  %v2034_v59 = vor.u32 %v2224_v34, %v2033_v33  ;;  %v2220_v18 = vld [vmem:[%s3384_s1 + $0x414] sm:$0xf0]  ;;  %v2105_v25 = vld [vmem:[%s3384_s1 + $0x84] sm:$0xf]  ;;  %v1563_v26 = vld [vmem:[%s3384_s1 + $0x88] sm:$0xf0]  ;;  %v1510_v30 = vor.u32 %v2091_v21, %v1507_v22 }
  0x48   :  { %1146 = vmatpush.bf16.msra.mxu0 %v2058_v7  ;;  %v2125_v7 = vld [vmem:[%s3384_s1 + $0x124] sm:$0xf]  ;;  %v2183_v27 = vld [vmem:[%s3384_s1 + $0x2f4] sm:$0xf]  ;;  %v1875_v28 = vld [vmem:[%s3384_s1 + $0x2f8] sm:$0xf0]  ;;  %v2018_v29 = vor.u32 %v2220_v18, %v2017_v17 }
  0x49   :  { %1165 = vmatpush.bf16.msra.mxu1 %v1550_v8  ;;  %v2963_v8 = vor.u32 %v2086_v37, %v1477_v36  ;;  %v2089_v33 = vld [vmem:[%s3384_s1 + $0x4] sm:$0xf]  ;;  %v1499_v36 = vld [vmem:[%s3384_s1 + $0x8] sm:$0xf0]  ;;  %v1878_v39 = vor.u32 %v2183_v27, %v1875_v28  ;;  %v1811_v43 = vld [vmem:[%s3384_s1 + $0x278] sm:$0xf0] }
  0x4a   :  { %1184 = vmatpush.bf16.msra.mxu2 %v1614_v60  ;;  %v1526_v60 = vor.u32 %v2095_v41, %v1523_v42  ;;  %v2121_v37 = vld [vmem:[%s3384_s1 + $0x104] sm:$0xf]  ;;  %v1627_v38 = vld [vmem:[%s3384_s1 + $0x108] sm:$0xf0]  ;;  %v1747_v41 = vld [vmem:[%s3384_s1 + $0x1f8] sm:$0xf0]  ;;  %v1502_v49 = vor.u32 %v2089_v33, %v1499_v36 }
  0x4b   :  { %1203 = vmatpush.bf16.msra.mxu3 %v1678_v11  ;;  %v2107_v11 = vld [vmem:[%s3384_s1 + $0x94] sm:$0xf]  ;;  %v1939_v46 = vld [vmem:[%s3384_s1 + $0x378] sm:$0xf0]  ;;  %v2181_v52 = vld [vmem:[%s3384_s1 + $0x2e4] sm:$0xf]  ;;  %v1630_v58 = vor.u32 %v2121_v37, %v1627_v38 }
  0x4c   :  { %1147 = vmatpush.bf16.msra.mxu0 %v2050_v19  ;;  %v1646_v19 = vor.u32 %v2125_v7, %v1643_v10  ;;  %v2167_v42 = vld [vmem:[%s3384_s1 + $0x274] sm:$0xf]  ;;  %v1867_v55 = vld [vmem:[%s3384_s1 + $0x2e8] sm:$0xf0]  ;;  %v2149_v62 = vld [vmem:[%s3384_s1 + $0x1e4] sm:$0xf] }
  0x4d   :  { %1166 = vmatpush.bf16.msra.mxu1 %v1542_v20  ;;  %v2199_v45 = vld [vmem:[%s3384_s1 + $0x374] sm:$0xf]  ;;  %v2079_v3 = vld [vmem:[%s3385_s0 + $0x40] sm:$0xf0]  ;;  %v1870_v4 = vor.u32 %v2181_v52, %v1867_v55  ;;  %v1803_v10 = vld [vmem:[%s3384_s1 + $0x268] sm:$0xf0] }
  0x4e   :  { %1185 = vmatpush.bf16.msra.mxu2 %v1606_v12  ;;  %v1571_v12 = vld [vmem:[%s3384_s1 + $0x98] sm:$0xf0]  ;;  %v1942_v61 = vor.u32 %v2199_v45, %v1939_v46  ;;  %v2165_v7 = vld [vmem:[%s3384_s1 + $0x264] sm:$0xf]  ;;  %v2195_v27 = vld [vmem:[%s3384_s1 + $0x354] sm:$0xf] }
  0x4f   :  { %1204 = vmatpush.bf16.msra.mxu3 %v1670_v23  ;;  %v1574_v20 = vor.u32 %v2107_v11, %v1571_v12  ;;  %v2123_v23 = vld [vmem:[%s3384_s1 + $0x114] sm:$0xf]  ;;  %v2197_v12 = vld [vmem:[%s3384_s1 + $0x364] sm:$0xf]  ;;  %v1859_v18 = vld [vmem:[%s3384_s1 + $0x2d8] sm:$0xf0]  ;;  %v1806_v21 = vor.u32 %v2165_v7, %v1803_v10 }
  0x50   :  { %1148 = vmatpush.bf16.msra.mxu0 %v2042_v31  ;;  %v2009_v31 = vld [vmem:[%s3384_s1 + $0x400] sm:$0xf]  ;;  %v1923_v28 = vld [vmem:[%s3384_s1 + $0x358] sm:$0xf0]  ;;  %v2175_v38 = vld [vmem:[%s3384_s1 + $0x2b4] sm:$0xf] }
  0x51   :  { %1167 = vmatpush.bf16.msra.mxu1 %v1534_v32  ;;  %v2218_v32 = vld [vmem:[%s3384_s1 + $0x404] sm:$0xf0]  ;;  %v2159_v45 = vld [vmem:[%s3384_s1 + $0x234] sm:$0xf]  ;;  %v1779_v46 = vld [vmem:[%s3384_s1 + $0x238] sm:$0xf0] }
  0x52   :  { %1186 = vmatpush.bf16.msra.mxu2 %v1598_v24  ;;  %v1635_v24 = vld [vmem:[%s3384_s1 + $0x118] sm:$0xf0]  ;;  %v2010_v47 = vor.u32 %v2218_v32, %v2009_v31  ;;  %v2145_v31 = vld [vmem:[%s3384_s1 + $0x1c4] sm:$0xf]  ;;  %v1723_v32 = vld [vmem:[%s3384_s1 + $0x1c8] sm:$0xf0] }
  0x53   :  { %1205 = vmatpush.bf16.msra.mxu3 %v1662_v35  ;;  %1082 = vmatmul.bf16.gmra.mxu0 %v2963_v8  ;;  %v1638_v34 = vor.u32 %v2123_v23, %v1635_v24  ;;  %v1566_v35 = vor.u32 %v2105_v25, %v1563_v26  ;;  %v2163_v23 = vld [vmem:[%s3384_s1 + $0x254] sm:$0xf]  ;;  %v1795_v24 = vld [vmem:[%s3384_s1 + $0x258] sm:$0xf0]  ;;  %v1726_v37 = vor.u32 %v2145_v31, %v1723_v32  ;;  %v1771_v7 = vld [vmem:[%s3384_s1 + $0x228] sm:$0xf0] }
  0x54   :  { %1149 = vmatpush.bf16.msra.mxu0 %v2034_v59  ;;  %1101 = vmatmul.bf16.gmra.mxu1 %v2965_v9  ;;  %v1798_v33 = vor.u32 %v2163_v23, %v1795_v24  ;;  %v2191_v52 = vld [vmem:[%s3384_s1 + $0x334] sm:$0xf]  ;;  %v1907_v55 = vld [vmem:[%s3384_s1 + $0x338] sm:$0xf0]  ;;  %v1819_v31 = vld [vmem:[%s3384_s1 + $0x288] sm:$0xf0] }
  0x55   :  { %1168 = vmatpush.bf16.msra.mxu1 %v1526_v60  ;;  %1120 = vmatmul.bf16.gmra.mxu2 %v2976_v13  ;;  %v1814_v60 = vor.u32 %v2167_v42, %v1811_v43  ;;  %v2155_v24 = vld [vmem:[%s3384_s1 + $0x214] sm:$0xf]  ;;  %v2137_v32 = vld [vmem:[%s3384_s1 + $0x184] sm:$0xf] }
  0x56   :  { %1187 = vmatpush.bf16.msra.mxu2 %v1590_v40  ;;  %1139 = vmatmul.bf16.gmra.mxu3 %v2978_v14  ;;  %v2151_v40 = vld [vmem:[%s3384_s1 + $0x1f4] sm:$0xf] }
  0x57   :  { %1206 = vmatpush.bf16.msra.mxu3 %v1654_v63  ;;  %v1750_v59 = vor.u32 %v2151_v40, %v1747_v41  ;;  %v1739_v63 = vld [vmem:[%s3384_s1 + $0x1e8] sm:$0xf0]  ;;  %v2143_v40 = vld [vmem:[%s3384_s1 + $0x1b4] sm:$0xf]  ;;  %v1715_v41 = vld [vmem:[%s3384_s1 + $0x1b8] sm:$0xf0] }
  0x58   :  { %1150 = vmatpush.bf16.msra.mxu0 %v2026_v15  ;;  %v1742_v11 = vor.u32 %v2149_v62, %v1739_v63  ;;  %v1931_v15 = vld [vmem:[%s3384_s1 + $0x368] sm:$0xf0]  ;;  %v1493_v62 = vld [vmem:[%s3385_s0 + $0x68] sm:$0xf] }
  0x59   :  { %1169 = vmatpush.bf16.msra.mxu1 %v1518_v16  ;;  %v2179_v16 = vld [vmem:[%s3384_s1 + $0x2d4] sm:$0xf]  ;;  %v1934_v22 = vor.u32 %v2197_v12, %v1931_v15  ;;  %v2088_v63 = vld [vmem:[%s3385_s0 + $0x88] sm:$0xf0]  ;;  %v2189_v12 = vld [vmem:[%s3384_s1 + $0x324] sm:$0xf] }
  0x5a   :  { %1188 = vmatpush.bf16.msra.mxu2 %v1582_v2  ;;  %v1457_v2 = vld [vmem:[%s3385_s0 + $0x20] sm:$0xf]  ;;  %v1862_v25 = vor.u32 %v2179_v16, %v1859_v18  ;;  %v1899_v15 = vld [vmem:[%s3384_s1 + $0x328] sm:$0xf0]  ;;  %v2171_v16 = vld [vmem:[%s3384_s1 + $0x294] sm:$0xf]  ;;  %v3191_v18 = vor.u32 %v2088_v63, %v1493_v62 }
  0x5b   :  { %1207 = vmatpush.bf16.msra.mxu3 %v1646_v19  ;;  %v3083_v17 = vor.u32 %v2079_v3, %v1457_v2  ;;  %v2147_v19 = vld [vmem:[%s3384_s1 + $0x1d4] sm:$0xf]  ;;  %v1782_v2 = vor.u32 %v2159_v45, %v1779_v46  ;;  %v1910_v3 = vor.u32 %v2191_v52, %v1907_v55  ;;  %v1902_v23 = vor.u32 %v2189_v12, %v1899_v15  ;;  %v2059_v52 = vld [vmem:[%s3384_s1 + $0x468] sm:$0xf0] }
  0x5c   :  { %1151 = vmatpush.bf16.msra.mxu0 %v2018_v29  ;;  %v2177_v29 = vld [vmem:[%s3384_s1 + $0x2c4] sm:$0xf] }
  0x5d   :  { %1170 = vmatpush.bf16.msra.mxu1 %v1510_v30  ;;  %v1851_v30 = vld [vmem:[%s3384_s1 + $0x2c8] sm:$0xf0] }
  0x5e   :  { %1189 = vmatpush.bf16.msra.mxu2 %v1574_v20  ;;  %v1731_v20 = vld [vmem:[%s3384_s1 + $0x1d8] sm:$0xf0]  ;;  %v1854_v36 = vor.u32 %v2177_v29, %v1851_v30  ;;  %v2169_v30 = vld [vmem:[%s3384_s1 + $0x284] sm:$0xf] }
  0x5f   :  { %1208 = vmatpush.bf16.msra.mxu3 %v1638_v34  ;;  %v1734_v26 = vor.u32 %v2147_v19, %v1731_v20  ;;  %v2161_v34 = vld [vmem:[%s3384_s1 + $0x244] sm:$0xf]  ;;  %v1827_v19 = vld [vmem:[%s3384_s1 + $0x298] sm:$0xf0]  ;;  %v2139_v20 = vld [vmem:[%s3384_s1 + $0x194] sm:$0xf] }
  0x60   :  { %1152 = vmatpush.bf16.msra.mxu0 %v2010_v47  ;;  %v1891_v29 = vld [vmem:[%s3384_s1 + $0x318] sm:$0xf0] }
  0x61   :  { %1171 = vmatpush.bf16.msra.mxu1 %v1502_v49  ;;  %v1718_v49 = vor.u32 %v2143_v40, %v1715_v41  ;;  %v2067_v40 = vld [vmem:[%s3384_s1 + $0x478] sm:$0xf0]  ;;  %v2213_v41 = vld [vmem:[%s3384_s1 + $0x3e4] sm:$0xf] }
  0x62   :  { %1190 = vmatpush.bf16.msra.mxu2 %v1566_v35  ;;  %v1787_v35 = vld [vmem:[%s3384_s1 + $0x248] sm:$0xf0] }
  0x63   :  { %1209 = vmatpush.bf16.msra.mxu3 %v1630_v58  ;;  %1153 = vmatmul.bf16.vlgmr.msra.gmra.mxu0 %v3083_v17  ;;  %v1790_v42 = vor.u32 %v2161_v34, %v1787_v35  ;;  %v2173_v58 = vld [vmem:[%s3384_s1 + $0x2a4] sm:$0xf] }
  0x64   :  { %1221 = vmatpush.bf16.msrb.mxu0 %v1750_v59  ;;  %1172 = vmatmul.bf16.vlgmr.msra.gmra.mxu1 %v2543_v48  ;;  %v1926_v48 = vor.u32 %v2195_v27, %v1923_v28  ;;  %v1835_v59 = vld [vmem:[%s3384_s1 + $0x2a8] sm:$0xf0]  ;;  %v2187_v28 = vld [vmem:[%s3384_s1 + $0x314] sm:$0xf] }
  0x65   :  { %1240 = vmatpush.bf16.msrb.mxu1 %v1814_v60  ;;  %1191 = vmatmul.bf16.vlgmr.msra.gmra.mxu2 %v2554_v53  ;;  %v2193_v53 = vld [vmem:[%s3384_s1 + $0x344] sm:$0xf]  ;;  %v1838_v10 = vor.u32 %v2173_v58, %v1835_v59  ;;  %v1894_v35 = vor.u32 %v2187_v28, %v1891_v29  ;;  %v2211_v58 = vld [vmem:[%s3384_s1 + $0x3d4] sm:$0xf]  ;;  %v1987_v59 = vld [vmem:[%s3384_s1 + $0x3d8] sm:$0xf0] }
  0x66   :  { %1259 = vmatpush.bf16.msrb.mxu2 %v1878_v39  ;;  %1210 = vmatmul.bf16.vlgmr.msra.gmra.mxu3 %v2556_v54  ;;  %v1915_v54 = vld [vmem:[%s3384_s1 + $0x348] sm:$0xf0]  ;;  %v1843_v39 = vld [vmem:[%s3384_s1 + $0x2b8] sm:$0xf0]  ;;  %v2141_v60 = vld [vmem:[%s3384_s1 + $0x1a4] sm:$0xf]  ;;  %v1990_v62 = vor.u32 %v2211_v58, %v1987_v59 }
  0x67   :  { %1278 = vmatpush.bf16.msrb.mxu3 %v1942_v61  ;;  %v1918_v43 = vor.u32 %v2193_v53, %v1915_v54  ;;  %v1846_v47 = vor.u32 %v2175_v38, %v1843_v39  ;;  %v1707_v61 = vld [vmem:[%s3384_s1 + $0x1a8] sm:$0xf0]  ;;  %v2185_v53 = vld [vmem:[%s3384_s1 + $0x304] sm:$0xf]  ;;  %v2231_v39 = vld [vmem:[%s3384_s1 + $0x474] sm:$0xf] }
  0x68   :  { %1222 = vmatpush.bf16.msrb.mxu0 %v1742_v11  ;;  %v1710_v11 = vor.u32 %v2141_v60, %v1707_v61  ;;  %v1883_v54 = vld [vmem:[%s3384_s1 + $0x308] sm:$0xf0]  ;;  %v2070_v46 = vor.u32 %v2231_v39, %v2067_v40  ;;  %v2227_v60 = vld [vmem:[%s3384_s1 + $0x454] sm:$0xf]  ;;  %v2051_v61 = vld [vmem:[%s3384_s1 + $0x458] sm:$0xf0] }
  0x69   :  { %1241 = vmatpush.bf16.msrb.mxu1 %v1806_v21  ;;  %v1699_v21 = vld [vmem:[%s3384_s1 + $0x198] sm:$0xf0]  ;;  %v1886_v45 = vor.u32 %v2185_v53, %v1883_v54  ;;  %v2054_v63 = vor.u32 %v2227_v60, %v2051_v61 }
  0x6a   :  { %1260 = vmatpush.bf16.msrb.mxu2 %v1870_v4  ;;  %v2157_v4 = vld [vmem:[%s3384_s1 + $0x224] sm:$0xf]  ;;  %v1702_v27 = vor.u32 %v2139_v20, %v1699_v21  ;;  %v2027_v21 = vld [vmem:[%s3384_s1 + $0x428] sm:$0xf0] }
  0x6b   :  { %1279 = vmatpush.bf16.msrb.mxu3 %v1934_v22  ;;  %v1774_v22 = vor.u32 %v2157_v4, %v1771_v7  ;;  %v2225_v4 = vld [vmem:[%s3384_s1 + $0x444] sm:$0xf]  ;;  %v2043_v7 = vld [vmem:[%s3384_s1 + $0x448] sm:$0xf0] }
  0x6c   :  { %1223 = vmatpush.bf16.msrb.mxu0 %v1734_v26  ;;  %v1830_v26 = vor.u32 %v2171_v16, %v1827_v19  ;;  %v2205_v16 = vld [vmem:[%s3384_s1 + $0x3a4] sm:$0xf]  ;;  %v1963_v19 = vld [vmem:[%s3384_s1 + $0x3a8] sm:$0xf0] }
  0x6d   :  { %1242 = vmatpush.bf16.msrb.mxu1 %v1798_v33  ;;  %v1691_v33 = vld [vmem:[%s3384_s1 + $0x188] sm:$0xf0]  ;;  %v2221_v20 = vld [vmem:[%s3384_s1 + $0x424] sm:$0xf] }
  0x6e   :  { %1261 = vmatpush.bf16.msrb.mxu2 %v1862_v25  ;;  %v1763_v25 = vld [vmem:[%s3384_s1 + $0x218] sm:$0xf0] }
  0x6f   :  { %1280 = vmatpush.bf16.msrb.mxu3 %v1926_v48  ;;  %v2003_v48 = vld [vmem:[%s3384_s1 + $0x3f8] sm:$0xf0]  ;;  %v1766_v34 = vor.u32 %v2155_v24, %v1763_v25  ;;  %v2203_v24 = vld [vmem:[%s3384_s1 + $0x394] sm:$0xf] }
  0x70   :  { %1224 = vmatpush.bf16.msrb.mxu0 %v1726_v37  ;;  %v1755_v37 = vld [vmem:[%s3384_s1 + $0x208] sm:$0xf0]  ;;  %v1955_v25 = vld [vmem:[%s3384_s1 + $0x398] sm:$0xf0] }
  0x71   :  { %1243 = vmatpush.bf16.msrb.mxu1 %v1790_v42  ;;  %v1995_v42 = vld [vmem:[%s3384_s1 + $0x3e8] sm:$0xf0]  ;;  %v1958_v28 = vor.u32 %v2203_v24, %v1955_v25 }
  0x72   :  { %1262 = vmatpush.bf16.msrb.mxu2 %v1854_v36  ;;  %v2153_v36 = vld [vmem:[%s3384_s1 + $0x204] sm:$0xf] }
  0x73   :  { %1281 = vmatpush.bf16.msrb.mxu3 %v1918_v43  ;;  %1158 = vmatmul.bf16.gmra.mxu0 %v3191_v18  ;;  %v1758_v43 = vor.u32 %v2153_v36, %v1755_v37 }
  0x74   :  { %1225 = vmatpush.bf16.msrb.mxu0 %v1718_v49  ;;  %1177 = vmatmul.bf16.gmra.mxu1 %v2675_v44  ;;  %v2215_v44 = vld [vmem:[%s3384_s1 + $0x3f4] sm:$0xf]  ;;  %v2229_v49 = vld [vmem:[%s3384_s1 + $0x464] sm:$0xf] }
  0x75   :  { %1244 = vmatpush.bf16.msrb.mxu1 %v1782_v2  ;;  %1196 = vmatmul.bf16.gmra.mxu2 %v2686_v50  ;;  %v1822_v50 = vor.u32 %v2169_v30, %v1819_v31  ;;  %v2006_v38 = vor.u32 %v2215_v44, %v2003_v48  ;;  %v2062_v55 = vor.u32 %v2229_v49, %v2059_v52  ;;  %v2209_v2 = vld [vmem:[%s3384_s1 + $0x3c4] sm:$0xf]  ;;  %v1947_v31 = vld [vmem:[%s3384_s1 + $0x388] sm:$0xf0] }
  0x76   :  { %1263 = vmatpush.bf16.msrb.mxu2 %v1846_v47  ;;  %1215 = vmatmul.bf16.gmra.mxu3 %v2688_v51  ;;  %v1694_v51 = vor.u32 %v2137_v32, %v1691_v33  ;;  %v1998_v47 = vor.u32 %v2213_v41, %v1995_v42  ;;  %v2201_v30 = vld [vmem:[%s3384_s1 + $0x384] sm:$0xf]  ;;  %v2011_v33 = vld [vmem:[%s3384_s1 + $0x408] sm:$0xf0] }
  0x77   :  { %1282 = vmatpush.bf16.msrb.mxu3 %v1910_v3  ;;  %v1979_v3 = vld [vmem:[%s3384_s1 + $0x3c8] sm:$0xf0]  ;;  %v2217_v32 = vld [vmem:[%s3384_s1 + $0x404] sm:$0xf]  ;;  %v1950_v44 = vor.u32 %v2201_v30, %v1947_v31 }
  0x78   :  { %1226 = vmatpush.bf16.msrb.mxu0 %v1710_v11  ;;  %v1971_v11 = vld [vmem:[%s3384_s1 + $0x3b8] sm:$0xf0] }
  0x79   :  { %1245 = vmatpush.bf16.msrb.mxu1 %v1774_v22  ;;  %v1966_v22 = vor.u32 %v2205_v16, %v1963_v19 }
  0x7a   :  { %1264 = vmatpush.bf16.msrb.mxu2 %v1838_v10  ;;  %v1982_v10 = vor.u32 %v2209_v2, %v1979_v3 }
  0x7b   :  { %1283 = vmatpush.bf16.msrb.mxu3 %v1902_v23  ;;  %v2030_v23 = vor.u32 %v2221_v20, %v2027_v21 }
  0x7c   :  { %1227 = vmatpush.bf16.msrb.mxu0 %v1702_v27  ;;  %v2019_v27 = vld [vmem:[%s3384_s1 + $0x418] sm:$0xf0] }
  0x7d   :  { %1246 = vmatpush.bf16.msrb.mxu1 %v1766_v34 }
  0x7e   :  { %1265 = vmatpush.bf16.msrb.mxu2 %v1830_v26  ;;  %v2219_v26 = vld [vmem:[%s3384_s1 + $0x414] sm:$0xf] }
  0x7f   :  { %1284 = vmatpush.bf16.msrb.mxu3 %v1894_v35  ;;  %v2022_v29 = vor.u32 %v2219_v26, %v2019_v27 }
  0x80   :  { %1228 = vmatpush.bf16.msrb.mxu0 %v1694_v51 }
  0x81   :  { %1247 = vmatpush.bf16.msrb.mxu1 %v1758_v43 }
  0x82   :  { %1266 = vmatpush.bf16.msrb.mxu2 %v1822_v50 }
  0x83   :  { %1285 = vmatpush.bf16.msrb.mxu3 %v1886_v45  ;;  %1229 = vmatmul.bf16.vlgmr.msrb.gmra.mxu0 %v2564_v57  ;;  %v2046_v57 = vor.u32 %v2225_v4, %v2043_v7 }
  0x84   :  { %1297 = vmatpush.bf16.msra.mxu0 %v2006_v38  ;;  %1248 = vmatmul.bf16.vlgmr.msrb.gmra.mxu1 %v2831_v0  ;;  %v2207_v0 = vld [vmem:[%s3384_s1 + $0x3b4] sm:$0xf] }
  0x85   :  { %1316 = vmatpush.bf16.msra.mxu1 %v2070_v46  ;;  %1267 = vmatmul.bf16.vlgmr.msrb.gmra.mxu2 %v2833_v1  ;;  %v2223_v1 = vld [vmem:[%s3384_s1 + $0x434] sm:$0xf]  ;;  %v1974_v12 = vor.u32 %v2207_v0, %v1971_v11 }
  0x86   :  { %2233 = vmatpush.bf16.msra.mxu2 %v2006_v38  ;;  %1286 = vmatmul.bf16.vlgmr.msrb.gmra.mxu3 %v2844_v5  ;;  %v2035_v5 = vld [vmem:[%s3384_s1 + $0x438] sm:$0xf0] }
  0x87   :  { %2241 = vmatpush.bf16.msra.mxu3 %v2070_v46  ;;  %v2038_v15 = vor.u32 %v2223_v1, %v2035_v5 }
  0x88   :  { %1298 = vmatpush.bf16.msra.mxu0 %v1998_v47 }
  0x89   :  { %1317 = vmatpush.bf16.msra.mxu1 %v2062_v55 }
  0x8a   :  { %2234 = vmatpush.bf16.msra.mxu2 %v1998_v47 }
  0x8b   :  { %2242 = vmatpush.bf16.msra.mxu3 %v2062_v55 }
  0x8c   :  { %1299 = vmatpush.bf16.msra.mxu0 %v1990_v62 }
  0x8d   :  { %1318 = vmatpush.bf16.msra.mxu1 %v2054_v63 }
  0x8e   :  { %2235 = vmatpush.bf16.msra.mxu2 %v1990_v62 }
  0x8f   :  { %2243 = vmatpush.bf16.msra.mxu3 %v2054_v63 }
  0x90   :  { %1300 = vmatpush.bf16.msra.mxu0 %v1982_v10 }
  0x91   :  { %1319 = vmatpush.bf16.msra.mxu1 %v2046_v57 }
  0x92   :  { %2236 = vmatpush.bf16.msra.mxu2 %v1982_v10 }
  0x93   :  { %2244 = vmatpush.bf16.msra.mxu3 %v2046_v57  ;;  %1234 = vmatmul.bf16.gmra.mxu0 %v2696_v56  ;;  %v2014_v56 = vor.u32 %v2217_v32, %v2011_v33 }
  0x94   :  { %1301 = vmatpush.bf16.msra.mxu0 %v1974_v12  ;;  %1253 = vmatmul.bf16.gmra.mxu1 %v2963_v8 }
  0x95   :  { %1320 = vmatpush.bf16.msra.mxu1 %v2038_v15  ;;  %1272 = vmatmul.bf16.gmra.mxu2 %v2965_v9 }
  0x96   :  { %2237 = vmatpush.bf16.msra.mxu2 %v1974_v12  ;;  %1291 = vmatmul.bf16.gmra.mxu3 %v2976_v13 }
  0x97   :  { %2245 = vmatpush.bf16.msra.mxu3 %v2038_v15 }
  0x98   :  { %1302 = vmatpush.bf16.msra.mxu0 %v1966_v22 }
  0x99   :  { %1321 = vmatpush.bf16.msra.mxu1 %v2030_v23 }
  0x9a   :  { %2238 = vmatpush.bf16.msra.mxu2 %v1966_v22 }
  0x9b   :  { %2246 = vmatpush.bf16.msra.mxu3 %v2030_v23 }
  0x9c   :  { %1303 = vmatpush.bf16.msra.mxu0 %v1958_v28 }
  0x9d   :  { %1322 = vmatpush.bf16.msra.mxu1 %v2022_v29 }
  0x9e   :  { %2239 = vmatpush.bf16.msra.mxu2 %v1958_v28 }
  0x9f   :  { %2247 = vmatpush.bf16.msra.mxu3 %v2022_v29 }
  0xa0   :  { %1304 = vmatpush.bf16.msra.mxu0 %v1950_v44  ;;  %v1002_v8 = vpop.f32.mrf.mxu0 }
  0xa1   :  { %1323 = vmatpush.bf16.msra.mxu1 %v2014_v56  ;;  %v1021_v48 = vpop.f32.mrf.mxu1 }
  0xa2   :  { %2240 = vmatpush.bf16.msra.mxu2 %v1950_v44  ;;  %v1022_v34 = vadd.f32 %v1021_v48, %v1002_v8 }
  0xa3   :  { %2248 = vmatpush.bf16.msra.mxu3 %v2014_v56  ;;  %1305 = vmatmul.bf16.vlgmr.msra.gmra.mxu0 %v2846_v6 }
  0xa4   :  { %1324 = vmatmul.bf16.vlgmr.msra.gmra.mxu1 %v3083_v17 }
  0xa5   :  { %1310 = vmatmul.bf16.vlgmr.msra.gmra.mxu2 %v2978_v14 }
  0xa6   :  { %1329 = vmatmul.bf16.vlgmr.msra.gmra.mxu3 %v3191_v18 }
  0xa8   :  { %v1040_v9 = vpop.f32.mrf.mxu2  ;;  %v1004_v36 = vpop.f32.mrf.mxu0 }
  0xa9   :  { %v1041_v13 = vadd.f32 %v1040_v9, %v1022_v34  ;;  %v1059_v35 = vpop.f32.mrf.mxu3  ;;  %v1023_v50 = vpop.f32.mrf.mxu1 }
  0xaa   :  { %v1024_v37 = vadd.f32 %v1023_v50, %v1004_v36 }
  0xab   :  { %v1060_v51 = vadd.f32 %v1059_v35, %v1041_v13 }
  0xb0   :  { %v1042_v53 = vpop.f32.mrf.mxu2  ;;  %v1007_v39 = vpop.f32.mrf.mxu0 }
  0xb1   :  { %v1043_v54 = vadd.f32 %v1042_v53, %v1024_v37  ;;  %v1061_v38 = vpop.f32.mrf.mxu3  ;;  %v1026_v40 = vpop.f32.mrf.mxu1 }
  0xb2   :  { %v1027_v6 = vadd.f32 %v1026_v40, %v1007_v39 }
  0xb3   :  { %v1062_v41 = vadd.f32 %v1061_v38, %v1043_v54 }
  0xb8   :  { %v1045_v42 = vpop.f32.mrf.mxu2  ;;  %v1009_v14 = vpop.f32.mrf.mxu0 }
  0xb9   :  { %v1046_v17 = vadd.f32 %v1045_v42, %v1027_v6  ;;  %v1064_v43 = vpop.f32.mrf.mxu3  ;;  %v1028_v45 = vpop.f32.mrf.mxu1 }
  0xba   :  { %v1029_v46 = vadd.f32 %v1028_v45, %v1009_v14  ;;  %v1335_v14 = vld [vmem:[%s3386_s2] sm:$0x3] }
  0xbb   :  { %v1065_v18 = vadd.f32 %v1064_v43, %v1046_v17 }
  0xc0   :  { %v1047_v47 = vpop.f32.mrf.mxu2  ;;  %v1078_v55 = vpop.f32.mrf.mxu0 }
  0xc1   :  { %v1048_v49 = vadd.f32 %v1047_v47, %v1029_v46  ;;  %v1066_v52 = vpop.f32.mrf.mxu3  ;;  %v1097_v58 = vpop.f32.mrf.mxu1  ;;  %v1079_v60 = vadd.f32 %v1078_v55, %v1060_v51  ;;  %v1349_v55 = vld [vmem:[%s3387_s3] sm:$0x3] }
  0xc3   :  { %v1067_v59 = vadd.f32 %v1066_v52, %v1048_v49  ;;  %v1098_v61 = vadd.f32 %v1097_v58, %v1079_v60  ;;  %v1337_v52 = vperm.slane %v1335_v14, 0  ;;  %v1351_v60 = vperm.slane %v1349_v55, 0 }
  0xc8   :  { %v1116_v62 = vpop.f32.mrf.mxu2  ;;  %v1080_v3 = vpop.f32.mrf.mxu0 }
  0xc9   :  { %v1135_v63 = vpop.f32.mrf.mxu3  ;;  %v1117_v2 = vadd.f32 %v1116_v62, %v1098_v61  ;;  %v1099_v4 = vpop.f32.mrf.mxu1  ;;  %v1081_v7 = vadd.f32 %v1080_v3, %v1062_v41 }
  0xcb   :  { %v1136_v10 = vadd.f32 %v1135_v63, %v1117_v2  ;;  %v1100_v57 = vadd.f32 %v1099_v4, %v1081_v7 }
  0xd0   :  { %v1118_v0 = vpop.f32.mrf.mxu2  ;;  %v1083_v5 = vpop.f32.mrf.mxu0 }
  0xd1   :  { %v1137_v11 = vpop.f32.mrf.mxu3  ;;  %v1119_v1 = vadd.f32 %v1118_v0, %v1100_v57  ;;  %v1102_v12 = vpop.f32.mrf.mxu1  ;;  %v1084_v15 = vadd.f32 %v1083_v5, %v1065_v18 }
  0xd3   :  { %v1138_v16 = vadd.f32 %v1137_v11, %v1119_v1  ;;  %v1103_v19 = vadd.f32 %v1102_v12, %v1084_v15 }
  0xd8   :  { %v1121_v20 = vpop.f32.mrf.mxu2  ;;  %v1085_v23 = vpop.f32.mrf.mxu0 }
  0xd9   :  { %v1140_v21 = vpop.f32.mrf.mxu3  ;;  %v1122_v22 = vadd.f32 %v1121_v20, %v1103_v19  ;;  %v1104_v24 = vpop.f32.mrf.mxu1  ;;  %v1086_v25 = vadd.f32 %v1085_v23, %v1067_v59 }
  0xdb   :  { %v1141_v26 = vadd.f32 %v1140_v21, %v1122_v22  ;;  %v1105_v27 = vadd.f32 %v1104_v24, %v1086_v25 }
  0xe0   :  { %v1123_v28 = vpop.f32.mrf.mxu2  ;;  %v1154_v31 = vpop.f32.mrf.mxu0 }
  0xe1   :  { %v1142_v29 = vpop.f32.mrf.mxu3  ;;  %v1124_v30 = vadd.f32 %v1123_v28, %v1105_v27  ;;  %v1173_v32 = vpop.f32.mrf.mxu1  ;;  %v1155_v33 = vadd.f32 %v1154_v31, %v1136_v10 }
  0xe3   :  { %v1143_v44 = vadd.f32 %v1142_v29, %v1124_v30  ;;  %v1341_v59 = vmul.f32 %v1337_v52, %v1155_v33  ;;  %v1338_v33 = vperm.slane %v1335_v14, 1 }
  0xe5   :  { %v3356_v10 = vadd.f32 %v1351_v60, %v1341_v59 }
  0xe8   :  { %v1192_v56 = vpop.f32.mrf.mxu2  ;;  %v1156_v48 = vpop.f32.mrf.mxu0 }
  0xe9   :  { %v1211_v8 = vpop.f32.mrf.mxu3  ;;  %v1175_v34 = vpop.f32.mrf.mxu1  ;;  %v1157_v9 = vadd.f32 %v1156_v48, %v1138_v16  ;;  %v1193_v45 = vadd.f32 %v1192_v56, %v1173_v32  ;;  %v1363_v16 = vsub.f32 0.0, %v3356_v10 }
  0xeb   :  { %v1212_v58 = vadd.f32 %v1211_v8, %v1193_v45  ;;  %v1343_v12 = vmul.f32 %v1337_v52, %v1157_v9 }
  0xed   :  { %v3359_v27 = vadd.f32 %v1351_v60, %v1343_v12 }
  0xf0   :  { %v1194_v13 = vpop.f32.mrf.mxu2  ;;  %v1159_v36 = vpop.f32.mrf.mxu0 }
  0xf1   :  { %v1213_v35 = vpop.f32.mrf.mxu3  ;;  %v1178_v50 = vpop.f32.mrf.mxu1  ;;  %v1195_v63 = vadd.f32 %v1194_v13, %v1175_v34  ;;  %v1160_v0 = vadd.f32 %v1159_v36, %v1141_v26  ;;  %v1371_v26 = vmul.f32 1.442695, %v1363_v16 }
  0xf3   :  { %v1214_v1 = vadd.f32 %v1213_v35, %v1195_v63  ;;  %v1345_v20 = vmul.f32 %v1337_v52, %v1160_v0  ;;  %v1365_v35 = vsub.f32 0.0, %v3359_v27  ;;  %2249 = vpow2.f32 %v1371_v26 }
  0xf5   :  { %v3361_v56 = vadd.f32 %v1351_v60, %v1345_v20 }
  0xf8   :  { %v1197_v51 = vpop.f32.mrf.mxu2  ;;  %v1161_v53 = vpop.f32.mrf.mxu0 }
  0xf9   :  { %v1216_v37 = vpop.f32.mrf.mxu3  ;;  %v1180_v54 = vpop.f32.mrf.mxu1  ;;  %v1198_v62 = vadd.f32 %v1197_v51, %v1178_v50  ;;  %v1162_v22 = vadd.f32 %v1161_v53, %v1143_v44  ;;  %v1352_v44 = vperm.slane %v1349_v55, 1  ;;  %v1367_v51 = vsub.f32 0.0, %v3361_v56 }
  0xfb   :  { %v1217_v11 = vadd.f32 %v1216_v37, %v1198_v62  ;;  %v1347_v34 = vmul.f32 %v1337_v52, %v1162_v22  ;;  %v1379_v45 = vmul.f32 1.442695, %v1367_v51  ;;  %v2250_v52 = vpop.eup %2249 }
  0xfd   :  { %v3365_v53 = vadd.f32 %v1351_v60, %v1347_v34 }
  0xff   :  { %v1369_v55 = vsub.f32 0.0, %v3365_v53 }
 0x100   :  { %v1199_v38 = vpop.f32.mrf.mxu2  ;;  %v1230_v40 = vpop.f32.mrf.mxu0 }
 0x101   :  { %v1218_v39 = vpop.f32.mrf.mxu3  ;;  %v1249_v41 = vpop.f32.mrf.mxu1  ;;  %v1231_v61 = vadd.f32 %v1230_v40, %v1212_v58  ;;  %v1200_v21 = vadd.f32 %v1199_v38, %v1180_v54 }
 0x103   :  { %v1250_v57 = vadd.f32 %v1249_v41, %v1231_v61  ;;  %v1219_v8 = vadd.f32 %v1218_v39, %v1200_v21  ;;  %v1375_v39 = vmul.f32 1.442695, %v1365_v35  ;;  %v1387_v61 = vadd.f32 1.0, %v2250_v52 }
 0x105   :  { %2251 = vpow2.f32 %v1375_v39 }
 0x108   :  { %v1268_v6 = vpop.f32.mrf.mxu2  ;;  %v1232_v17 = vpop.f32.mrf.mxu0 }
 0x109   :  { %v1287_v42 = vpop.f32.mrf.mxu3  ;;  %v1251_v43 = vpop.f32.mrf.mxu1  ;;  %v1269_v5 = vadd.f32 %v1268_v6, %v1250_v57  ;;  %v1233_v19 = vadd.f32 %v1232_v17, %v1214_v1 }
 0x10b   :  { %v1288_v23 = vadd.f32 %v1287_v42, %v1269_v5  ;;  %v1252_v31 = vadd.f32 %v1251_v43, %v1233_v19  ;;  %v2252_v1 = vpop.eup %2251 }
 0x10c   :  { %v1389_v22 = vadd.f32 1.0, %v2252_v1 }
 0x110   :  { %v1270_v18 = vpop.f32.mrf.mxu2  ;;  %v1235_v47 = vpop.f32.mrf.mxu0 }
 0x111   :  { %v1289_v46 = vpop.f32.mrf.mxu3  ;;  %v1254_v49 = vpop.f32.mrf.mxu1  ;;  %v1236_v15 = vadd.f32 %v1235_v47, %v1217_v11  ;;  %v1271_v9 = vadd.f32 %v1270_v18, %v1252_v31 }
 0x113   :  { %v1255_v28 = vadd.f32 %v1254_v49, %v1236_v15  ;;  %v1290_v54 = vadd.f32 %v1289_v46, %v1271_v9 }
 0x118   :  { %v1273_v2 = vpop.f32.mrf.mxu2  ;;  %v1237_v4 = vpop.f32.mrf.mxu0 }
 0x119   :  { %v1292_v3 = vpop.f32.mrf.mxu3  ;;  %v1256_v7 = vpop.f32.mrf.mxu1  ;;  %v1274_v48 = vadd.f32 %v1273_v2, %v1255_v28  ;;  %v1238_v36 = vadd.f32 %v1237_v4, %v1219_v8  ;;  %v1383_v2 = vmul.f32 1.442695, %v1369_v55 }
 0x11b   :  { %v1293_v37 = vadd.f32 %v1292_v3, %v1274_v48  ;;  %v1257_v6 = vadd.f32 %v1256_v7, %v1238_v36 }
 0x120   :  { %v1275_v24 = vpop.f32.mrf.mxu2  ;;  %v1306_v29 = vpop.f32.mrf.mxu0 }
 0x121   :  { %v1294_v25 = vpop.f32.mrf.mxu3  ;;  %v1325_v30 = vpop.f32.mrf.mxu1  ;;  %v1307_v32 = vadd.f32 %v1306_v29, %v1288_v23  ;;  %v1276_v18 = vadd.f32 %v1275_v24, %v1257_v6 }
 0x123   :  { %v1326_v13 = vadd.f32 %v1325_v30, %v1307_v32  ;;  %v1295_v62 = vadd.f32 %v1294_v25, %v1276_v18 }
 0x125   :  { %v1342_v50 = vmul.f32 %v1338_v33, %v1326_v13 }
 0x127   :  { %v1356_v38 = vadd.f32 %v1352_v44, %v1342_v50 }
 0x128   :  { %v1311_v40 = vpop.f32.mrf.mxu2  ;;  %v1308_v17 = vpop.f32.mrf.mxu0 }
 0x129   :  { %v1330_v41 = vpop.f32.mrf.mxu3  ;;  %v1312_v42 = vadd.f32 %v1311_v40, %v1293_v37  ;;  %v1364_v43 = vsub.f32 0.0, %v1356_v38  ;;  %v1309_v14 = vadd.f32 %v1308_v17, %v1290_v54  ;;  %v1327_v49 = vpop.f32.mrf.mxu1 }
 0x12b   :  { %v1331_v47 = vadd.f32 %v1330_v41, %v1312_v42  ;;  %v1373_v58 = vmul.f32 1.442695, %v1364_v43  ;;  %v1328_v59 = vadd.f32 %v1327_v49, %v1309_v14 }
 0x12d   :  { %v1346_v46 = vmul.f32 %v1338_v33, %v1331_v47  ;;  %2253 = vpow2.f32 %v1373_v58  ;;  %v1344_v60 = vmul.f32 %v1338_v33, %v1328_v59 }
 0x12e   :  { %2255 = vpow2.f32 %v1379_v45 }
 0x12f   :  { %v1360_v63 = vadd.f32 %v1352_v44, %v1346_v46  ;;  %v1358_v3 = vadd.f32 %v1352_v44, %v1344_v60  ;;  %2257 = vrcp.f32 %v1387_v61 }
 0x130   :  { %v1313_v4 = vpop.f32.mrf.mxu2  ;;  %2259 = vpow2.f32 %v1383_v2 }
 0x131   :  { %v1368_v7 = vsub.f32 0.0, %v1360_v63  ;;  %v1314_v57 = vadd.f32 %v1313_v4, %v1295_v62  ;;  %v1366_v0 = vsub.f32 0.0, %v1358_v3  ;;  %v1332_v11 = vpop.f32.mrf.mxu3 }
 0x133   :  { %v1381_v5 = vmul.f32 1.442695, %v1368_v7  ;;  %v1333_v12 = vadd.f32 %v1332_v11, %v1314_v57  ;;  %v2254_v15 = vpop.eup %2253  ;;  %v1377_v16 = vmul.f32 1.442695, %v1366_v0 }
 0x134   :  { %v2256_v19 = vpop.eup %2255  ;;  %v1388_v20 = vadd.f32 1.0, %v2254_v15 }
 0x135   :  { %2261 = vpow2.f32 %v1381_v5  ;;  %v1348_v21 = vmul.f32 %v1338_v33, %v1333_v12  ;;  %v1391_v24 = vadd.f32 1.0, %v2256_v19  ;;  %v2258_v25 = vpop.eup %2257 }
 0x136   :  { %2263 = vpow2.f32 %v1377_v16  ;;  %v2260_v29 = vpop.eup %2259  ;;  %v1403_v34 = vmul.f32 %v2258_v25, %v3356_v10 }
 0x137   :  { %2265 = vrcp.f32 %v1388_v20  ;;  %v1362_v23 = vadd.f32 %v1352_v44, %v1348_v21  ;;  %v1393_v9 = vadd.f32 1.0, %v2260_v29 }
 0x138   :  { %2267 = vrcp.f32 %v1389_v22 }
 0x139   :  { %v1370_v28 = vsub.f32 0.0, %v1362_v23  ;;  %2269 = vrcp.f32 %v1391_v24 }
 0x13b   :  { %v2262_v30 = vpop.eup %2261  ;;  %v1385_v26 = vmul.f32 1.442695, %v1370_v28 }
 0x13c   :  { %v2264_v31 = vpop.eup %2263  ;;  %v1392_v32 = vadd.f32 1.0, %v2262_v30 }
 0x13d   :  { %v2266_v8 = vpop.eup %2265  ;;  %v1390_v48 = vadd.f32 1.0, %v2264_v31  ;;  %2271 = vpow2.f32 %v1385_v26 }
 0x13e   :  { %v1404_v33 = vmul.f32 %v2266_v8, %v1356_v38  ;;  %2273 = vrcp.f32 %v1392_v32  ;;  %v2268_v44 = vpop.eup %2267 }
 0x13f   :  { %2275 = vrcp.f32 %v1390_v48  ;;  %v2270_v35 = vpop.eup %2269  ;;  %v1405_v10 = vmul.f32 %v2268_v44, %v3359_v27 }
 0x140   :  { %v1411_v13 = vpack.c.bf16 %v1404_v33, %v1403_v34  ;;  %2277 = vrcp.f32 %v1393_v9  ;;  %v1407_v54 = vmul.f32 %v2270_v35, %v3361_v56 }
 0x142   :  { %1415 = vst [vmem:[%s3388_s4] sm:$0xff] %v1411_v13 }
 0x143   :  { %v2272_v36 = vpop.eup %2271 }
 0x144   :  { %v2274_v50 = vpop.eup %2273  ;;  %v1394_v51 = vadd.f32 1.0, %v2272_v36 }
 0x145   :  { %v2276_v37 = vpop.eup %2275  ;;  %v1408_v40 = vmul.f32 %v2274_v50, %v1360_v63 }
 0x146   :  { %v1406_v38 = vmul.f32 %v2276_v37, %v1358_v3  ;;  %2279 = vrcp.f32 %v1394_v51  ;;  %v2278_v6 = vpop.eup %2277 }
 0x147   :  { %v1413_v41 = vpack.c.bf16 %v1408_v40, %v1407_v54  ;;  %v1409_v17 = vmul.f32 %v2278_v6, %v3365_v53 }
 0x148   :  { %v1412_v39 = vpack.c.bf16 %v1406_v38, %v1405_v10 }
 0x149   :  { %1417 = vst [vmem:[%s3388_s4 + $0x10] sm:$0xff] %v1413_v41 }
 0x14a   :  { %1416 = vst [vmem:[%s3388_s4 + $0x8] sm:$0xff] %v1412_v39 }
 0x14c   :  { %v2280_v42 = vpop.eup %2279 }
 0x14d   :  { %v1410_v56 = vmul.f32 %v2280_v42, %v1362_v23 }
 0x14f   :  { %v1414_v43 = vpack.c.bf16 %v1410_v56, %v1409_v17 }
 0x151   :  { %1418 = vst [vmem:[%s3388_s4 + $0x18] sm:$0xff] %v1414_v43 }

// kernel: simple_cnn2d_forward.9
= control target key start
LH: loop header
LB: loop body
LE: loop exit
PB: predicated region body
PF: predicated region fallthrough
CT: control target
= control target key end

     0   :  { %s2951_s1 = inlined_call_operand.vmem [shape: bf16[2304,128], index: 1, kind: input, shape index: {}]   ;;  %s2952_s0 = inlined_call_operand.vmem [shape: bf16[16,2304], index: 0, kind: input, shape index: {}]   ;;  %s2953_s2 = inlined_call_operand.vmem [shape: f32[1,128], index: 2, kind: input, shape index: {}]   ;;  %s2954_s3 = inlined_call_operand.vmem [shape: f32[16,128], index: 3, kind: output, shape index: {}]  }
   0x1   :  { %v2236_v0 = vld [vmem:[%s2951_s1 + $0x38] sm:$0xff]  ;;  %v2235_v4 = vld [vmem:[%s2951_s1 + $0x30] sm:$0xff]  ;;  %v2234_v8 = vld [vmem:[%s2951_s1 + $0x28] sm:$0xff] }
   0x2   :  { %v2244_v1 = vld [vmem:[%s2951_s1 + $0x78] sm:$0xff]  ;;  %1278 = vmatpush.bf16.msra.mxu0 %v2236_v0  ;;  %v2243_v5 = vld [vmem:[%s2951_s1 + $0x70] sm:$0xff]  ;;  %v2242_v9 = vld [vmem:[%s2951_s1 + $0x68] sm:$0xff] }
   0x3   :  { %v2252_v2 = vld [vmem:[%s2951_s1 + $0xb8] sm:$0xff]  ;;  %1292 = vmatpush.bf16.msra.mxu1 %v2244_v1  ;;  %v2251_v6 = vld [vmem:[%s2951_s1 + $0xb0] sm:$0xff]  ;;  %v2250_v10 = vld [vmem:[%s2951_s1 + $0xa8] sm:$0xff] }
   0x4   :  { %v2260_v3 = vld [vmem:[%s2951_s1 + $0xf8] sm:$0xff]  ;;  %1306 = vmatpush.bf16.msra.mxu2 %v2252_v2  ;;  %v2259_v7 = vld [vmem:[%s2951_s1 + $0xf0] sm:$0xff]  ;;  %v2258_v11 = vld [vmem:[%s2951_s1 + $0xe8] sm:$0xff] }
   0x5   :  { %1320 = vmatpush.bf16.msra.mxu3 %v2260_v3  ;;  %v2233_v12 = vld [vmem:[%s2951_s1 + $0x20] sm:$0xff]  ;;  %v2232_v16 = vld [vmem:[%s2951_s1 + $0x18] sm:$0xff]  ;;  %v2231_v20 = vld [vmem:[%s2951_s1 + $0x10] sm:$0xff] }
   0x6   :  { %1279 = vmatpush.bf16.msra.mxu0 %v2235_v4  ;;  %v2241_v13 = vld [vmem:[%s2951_s1 + $0x60] sm:$0xff]  ;;  %v2240_v17 = vld [vmem:[%s2951_s1 + $0x58] sm:$0xff]  ;;  %v2239_v21 = vld [vmem:[%s2951_s1 + $0x50] sm:$0xff] }
   0x7   :  { %1293 = vmatpush.bf16.msra.mxu1 %v2243_v5  ;;  %v2249_v14 = vld [vmem:[%s2951_s1 + $0xa0] sm:$0xff]  ;;  %v2248_v18 = vld [vmem:[%s2951_s1 + $0x98] sm:$0xff]  ;;  %v2247_v22 = vld [vmem:[%s2951_s1 + $0x90] sm:$0xff] }
   0x8   :  { %1307 = vmatpush.bf16.msra.mxu2 %v2251_v6  ;;  %v2257_v15 = vld [vmem:[%s2951_s1 + $0xe0] sm:$0xff]  ;;  %v2256_v19 = vld [vmem:[%s2951_s1 + $0xd8] sm:$0xff]  ;;  %v2255_v23 = vld [vmem:[%s2951_s1 + $0xd0] sm:$0xff] }
   0x9   :  { %1321 = vmatpush.bf16.msra.mxu3 %v2259_v7  ;;  %v2230_v24 = vld [vmem:[%s2951_s1 + $0x8] sm:$0xff]  ;;  %v2229_v28 = vld [vmem:[%s2951_s1] sm:$0xff]  ;;  %v2268_v31 = vld [vmem:[%s2951_s1 + $0x138] sm:$0xff] }
   0xa   :  { %1280 = vmatpush.bf16.msra.mxu0 %v2234_v8  ;;  %v2238_v25 = vld [vmem:[%s2951_s1 + $0x48] sm:$0xff]  ;;  %v2237_v29 = vld [vmem:[%s2951_s1 + $0x40] sm:$0xff]  ;;  %v2276_v32 = vld [vmem:[%s2951_s1 + $0x178] sm:$0xff] }
   0xb   :  { %1294 = vmatpush.bf16.msra.mxu1 %v2242_v9  ;;  %v2246_v26 = vld [vmem:[%s2951_s1 + $0x88] sm:$0xff]  ;;  %v2245_v30 = vld [vmem:[%s2951_s1 + $0x80] sm:$0xff]  ;;  %v2284_v35 = vld [vmem:[%s2951_s1 + $0x1b8] sm:$0xff] }
   0xc   :  { %1308 = vmatpush.bf16.msra.mxu2 %v2250_v10  ;;  %v2254_v27 = vld [vmem:[%s2951_s1 + $0xc8] sm:$0xff]  ;;  %v1565_v33 = vld [vmem:[%s2952_s0] sm:$0xf]  ;;  %v2221_v37 = vld [vmem:[%s2952_s0 + $0x4c] sm:$0xf0] }
   0xd   :  { %1322 = vmatpush.bf16.msra.mxu3 %v2258_v11  ;;  %v2220_v34 = vld [vmem:[%s2952_s0 + $0x44] sm:$0xf0]  ;;  %v2211_v38 = vld [vmem:[%s2952_s0 + $0x4] sm:$0xf]  ;;  %v1567_v39 = vld [vmem:[%s2952_s0 + $0x48] sm:$0xf0] }
   0xe   :  { %1281 = vmatpush.bf16.msra.mxu0 %v2233_v12  ;;  %v1573_v36 = vld [vmem:[%s2952_s0 + $0x8] sm:$0xf]  ;;  %v2253_v40 = vld [vmem:[%s2951_s1 + $0xc0] sm:$0xff]  ;;  %v1566_v41 = vor.u32 %v2220_v34, %v1565_v33  ;;  %v2292_v42 = vld [vmem:[%s2951_s1 + $0x1f8] sm:$0xff]  ;;  %v1570_v47 = vor.u32 %v2211_v38, %v1567_v39 }
   0xf   :  { %1295 = vmatpush.bf16.msra.mxu1 %v2241_v13  ;;  %v1574_v43 = vor.u32 %v2221_v37, %v1573_v36  ;;  %v2212_v44 = vld [vmem:[%s2952_s0 + $0xc] sm:$0xf]  ;;  %v1575_v45 = vld [vmem:[%s2952_s0 + $0x50] sm:$0xf0]  ;;  %v2265_v56 = vld [vmem:[%s2951_s1 + $0x120] sm:$0xff] }
  0x10   :  { %1309 = vmatpush.bf16.msra.mxu2 %v2249_v14  ;;  %v2267_v46 = vld [vmem:[%s2951_s1 + $0x130] sm:$0xff]  ;;  %v1578_v50 = vor.u32 %v2212_v44, %v1575_v45  ;;  %v2266_v52 = vld [vmem:[%s2951_s1 + $0x128] sm:$0xff]  ;;  %v2273_v57 = vld [vmem:[%s2951_s1 + $0x160] sm:$0xff] }
  0x11   :  { %1323 = vmatpush.bf16.msra.mxu3 %v2257_v15  ;;  %v2275_v48 = vld [vmem:[%s2951_s1 + $0x170] sm:$0xff]  ;;  %v2274_v53 = vld [vmem:[%s2951_s1 + $0x168] sm:$0xff]  ;;  %v2281_v58 = vld [vmem:[%s2951_s1 + $0x1a0] sm:$0xff] }
  0x12   :  { %1282 = vmatpush.bf16.msra.mxu0 %v2232_v16  ;;  %v2283_v49 = vld [vmem:[%s2951_s1 + $0x1b0] sm:$0xff]  ;;  %v2282_v54 = vld [vmem:[%s2951_s1 + $0x1a8] sm:$0xff]  ;;  %v2289_v59 = vld [vmem:[%s2951_s1 + $0x1e0] sm:$0xff] }
  0x13   :  { %1296 = vmatpush.bf16.msra.mxu1 %v2240_v17  ;;  %v2291_v51 = vld [vmem:[%s2951_s1 + $0x1f0] sm:$0xff]  ;;  %v2290_v55 = vld [vmem:[%s2951_s1 + $0x1e8] sm:$0xff]  ;;  %v2264_v60 = vld [vmem:[%s2951_s1 + $0x118] sm:$0xff] }
  0x14   :  { %1310 = vmatpush.bf16.msra.mxu2 %v2248_v18  ;;  %v2272_v61 = vld [vmem:[%s2951_s1 + $0x158] sm:$0xff]  ;;  %v2263_v0 = vld [vmem:[%s2951_s1 + $0x110] sm:$0xff]  ;;  %v2262_v4 = vld [vmem:[%s2951_s1 + $0x108] sm:$0xff] }
  0x15   :  { %1324 = vmatpush.bf16.msra.mxu3 %v2256_v19  ;;  %v2280_v62 = vld [vmem:[%s2951_s1 + $0x198] sm:$0xff]  ;;  %v2271_v1 = vld [vmem:[%s2951_s1 + $0x150] sm:$0xff]  ;;  %v2270_v5 = vld [vmem:[%s2951_s1 + $0x148] sm:$0xff] }
  0x16   :  { %1283 = vmatpush.bf16.msra.mxu0 %v2231_v20  ;;  %v2288_v63 = vld [vmem:[%s2951_s1 + $0x1d8] sm:$0xff]  ;;  %v2279_v2 = vld [vmem:[%s2951_s1 + $0x190] sm:$0xff]  ;;  %v2278_v6 = vld [vmem:[%s2951_s1 + $0x188] sm:$0xff] }
  0x17   :  { %1297 = vmatpush.bf16.msra.mxu1 %v2239_v21  ;;  %v2287_v3 = vld [vmem:[%s2951_s1 + $0x1d0] sm:$0xff]  ;;  %v2286_v7 = vld [vmem:[%s2951_s1 + $0x1c8] sm:$0xff]  ;;  %v2261_v8 = vld [vmem:[%s2951_s1 + $0x100] sm:$0xff] }
  0x18   :  { %1311 = vmatpush.bf16.msra.mxu2 %v2247_v22  ;;  %v2269_v9 = vld [vmem:[%s2951_s1 + $0x140] sm:$0xff]  ;;  %v2300_v11 = vld [vmem:[%s2951_s1 + $0x238] sm:$0xff]  ;;  %v1581_v13 = vld [vmem:[%s2952_s0 + $0x10] sm:$0xf] }
  0x19   :  { %1325 = vmatpush.bf16.msra.mxu3 %v2255_v23  ;;  %v2277_v10 = vld [vmem:[%s2951_s1 + $0x180] sm:$0xff]  ;;  %v2308_v12 = vld [vmem:[%s2951_s1 + $0x278] sm:$0xff]  ;;  %v2213_v18 = vld [vmem:[%s2952_s0 + $0x14] sm:$0xf] }
  0x1a   :  { %1284 = vmatpush.bf16.msra.mxu0 %v2230_v24  ;;  %v2222_v14 = vld [vmem:[%s2952_s0 + $0x54] sm:$0xf0]  ;;  %v2223_v16 = vld [vmem:[%s2952_s0 + $0x5c] sm:$0xf0]  ;;  %v1583_v19 = vld [vmem:[%s2952_s0 + $0x58] sm:$0xf0] }
  0x1b   :  { %1298 = vmatpush.bf16.msra.mxu1 %v2238_v25  ;;  %v1589_v15 = vld [vmem:[%s2952_s0 + $0x18] sm:$0xf]  ;;  %v2285_v20 = vld [vmem:[%s2951_s1 + $0x1c0] sm:$0xff]  ;;  %v2214_v21 = vld [vmem:[%s2952_s0 + $0x1c] sm:$0xf]  ;;  %v1582_v23 = vor.u32 %v2222_v14, %v1581_v13 }
  0x1c   :  { %1312 = vmatpush.bf16.msra.mxu2 %v2246_v26  ;;  %v2316_v17 = vld [vmem:[%s2951_s1 + $0x2b8] sm:$0xff]  ;;  %v1591_v22 = vld [vmem:[%s2952_s0 + $0x60] sm:$0xf0]  ;;  %v1590_v24 = vor.u32 %v2223_v16, %v1589_v15  ;;  %v1586_v26 = vor.u32 %v2213_v18, %v1583_v19  ;;  %v2306_v33 = vld [vmem:[%s2951_s1 + $0x268] sm:$0xff] }
  0x1d   :  { %1326 = vmatpush.bf16.msra.mxu3 %v2254_v27  ;;  %v2324_v25 = vld [vmem:[%s2951_s1 + $0x2f8] sm:$0xff]  ;;  %v1594_v27 = vor.u32 %v2214_v21, %v1591_v22  ;;  %v2314_v34 = vld [vmem:[%s2951_s1 + $0x2a8] sm:$0xff]  ;;  %v2297_v36 = vld [vmem:[%s2951_s1 + $0x220] sm:$0xff] }
  0x1e   :  { %1285 = vmatpush.bf16.msra.mxu0 %v2229_v28  ;;  %v2299_v28 = vld [vmem:[%s2951_s1 + $0x230] sm:$0xff]  ;;  %v2305_v37 = vld [vmem:[%s2951_s1 + $0x260] sm:$0xff]  ;;  %v2338_v13 = vld [vmem:[%s2951_s1 + $0x368] sm:$0xff] }
  0x1f   :  { %1299 = vmatpush.bf16.msra.mxu1 %v2237_v29  ;;  %v2307_v29 = vld [vmem:[%s2951_s1 + $0x270] sm:$0xff]  ;;  %v2313_v38 = vld [vmem:[%s2951_s1 + $0x2a0] sm:$0xff]  ;;  %v2346_v14 = vld [vmem:[%s2951_s1 + $0x3a8] sm:$0xff] }
  0x20   :  { %1313 = vmatpush.bf16.msra.mxu2 %v2245_v30  ;;  %v2315_v30 = vld [vmem:[%s2951_s1 + $0x2b0] sm:$0xff]  ;;  %v2321_v39 = vld [vmem:[%s2951_s1 + $0x2e0] sm:$0xff]  ;;  %v2354_v15 = vld [vmem:[%s2951_s1 + $0x3e8] sm:$0xff] }
  0x21   :  { %1327 = vmatpush.bf16.msra.mxu3 %v2253_v40  ;;  %1286 = vmatmul.bf16.vlgmr.msra.gmra.mxu0 %v1566_v41  ;;  %v2296_v40 = vld [vmem:[%s2951_s1 + $0x218] sm:$0xff]  ;;  %v2295_v44 = vld [vmem:[%s2951_s1 + $0x210] sm:$0xff]  ;;  %v2329_v16 = vld [vmem:[%s2951_s1 + $0x320] sm:$0xff] }
  0x22   :  { %1334 = vmatpush.bf16.msrb.mxu0 %v2268_v31  ;;  %1300 = vmatmul.bf16.vlgmr.msra.gmra.mxu1 %v1570_v47  ;;  %v2323_v31 = vld [vmem:[%s2951_s1 + $0x2f0] sm:$0xff]  ;;  %v2304_v41 = vld [vmem:[%s2951_s1 + $0x258] sm:$0xff]  ;;  %v2345_v18 = vld [vmem:[%s2951_s1 + $0x3a0] sm:$0xff] }
  0x23   :  { %1348 = vmatpush.bf16.msrb.mxu1 %v2276_v32  ;;  %1314 = vmatmul.bf16.vlgmr.msra.gmra.mxu2 %v1574_v43  ;;  %v2298_v32 = vld [vmem:[%s2951_s1 + $0x228] sm:$0xff]  ;;  %v2320_v43 = vld [vmem:[%s2951_s1 + $0x2d8] sm:$0xff]  ;;  %v2303_v45 = vld [vmem:[%s2951_s1 + $0x250] sm:$0xff] }
  0x24   :  { %1362 = vmatpush.bf16.msrb.mxu2 %v2284_v35  ;;  %1328 = vmatmul.bf16.vlgmr.msra.gmra.mxu3 %v1578_v50  ;;  %v2322_v35 = vld [vmem:[%s2951_s1 + $0x2e8] sm:$0xff]  ;;  %v2319_v47 = vld [vmem:[%s2951_s1 + $0x2d0] sm:$0xff]  ;;  %v2353_v19 = vld [vmem:[%s2951_s1 + $0x3e0] sm:$0xff] }
  0x25   :  { %1376 = vmatpush.bf16.msrb.mxu3 %v2292_v42  ;;  %v2312_v42 = vld [vmem:[%s2951_s1 + $0x298] sm:$0xff]  ;;  %v2310_v50 = vld [vmem:[%s2951_s1 + $0x288] sm:$0xff] }
  0x26   :  { %1335 = vmatpush.bf16.msrb.mxu0 %v2267_v46  ;;  %v2311_v46 = vld [vmem:[%s2951_s1 + $0x290] sm:$0xff]  ;;  %v2336_v21 = vld [vmem:[%s2951_s1 + $0x358] sm:$0xff] }
  0x27   :  { %1349 = vmatpush.bf16.msrb.mxu1 %v2275_v48  ;;  %v2294_v48 = vld [vmem:[%s2951_s1 + $0x208] sm:$0xff]  ;;  %v2344_v22 = vld [vmem:[%s2951_s1 + $0x398] sm:$0xff] }
  0x28   :  { %1363 = vmatpush.bf16.msrb.mxu2 %v2283_v49  ;;  %v2302_v49 = vld [vmem:[%s2951_s1 + $0x248] sm:$0xff] }
  0x29   :  { %1377 = vmatpush.bf16.msrb.mxu3 %v2291_v51  ;;  %v2318_v51 = vld [vmem:[%s2951_s1 + $0x2c8] sm:$0xff] }
  0x2a   :  { %1336 = vmatpush.bf16.msrb.mxu0 %v2266_v52  ;;  %v2293_v52 = vld [vmem:[%s2951_s1 + $0x200] sm:$0xff] }
  0x2b   :  { %1350 = vmatpush.bf16.msrb.mxu1 %v2274_v53  ;;  %v2301_v53 = vld [vmem:[%s2951_s1 + $0x240] sm:$0xff] }
  0x2c   :  { %1364 = vmatpush.bf16.msrb.mxu2 %v2282_v54  ;;  %v2309_v54 = vld [vmem:[%s2951_s1 + $0x280] sm:$0xff] }
  0x2d   :  { %1378 = vmatpush.bf16.msrb.mxu3 %v2290_v55  ;;  %v2332_v55 = vld [vmem:[%s2951_s1 + $0x338] sm:$0xff] }
  0x2e   :  { %1337 = vmatpush.bf16.msrb.mxu0 %v2265_v56  ;;  %v2340_v56 = vld [vmem:[%s2951_s1 + $0x378] sm:$0xff] }
  0x2f   :  { %1351 = vmatpush.bf16.msrb.mxu1 %v2273_v57  ;;  %v1597_v57 = vld [vmem:[%s2952_s0 + $0x20] sm:$0xf] }
  0x30   :  { %1365 = vmatpush.bf16.msrb.mxu2 %v2281_v58  ;;  %v2224_v58 = vld [vmem:[%s2952_s0 + $0x64] sm:$0xf0] }
  0x31   :  { %1379 = vmatpush.bf16.msrb.mxu3 %v2289_v59  ;;  %v1605_v59 = vld [vmem:[%s2952_s0 + $0x28] sm:$0xf] }
  0x32   :  { %1338 = vmatpush.bf16.msrb.mxu0 %v2264_v60  ;;  %v2225_v60 = vld [vmem:[%s2952_s0 + $0x6c] sm:$0xf0] }
  0x33   :  { %1352 = vmatpush.bf16.msrb.mxu1 %v2272_v61  ;;  %v2348_v61 = vld [vmem:[%s2951_s1 + $0x3b8] sm:$0xff] }
  0x34   :  { %1366 = vmatpush.bf16.msrb.mxu2 %v2280_v62  ;;  %v2215_v62 = vld [vmem:[%s2952_s0 + $0x24] sm:$0xf] }
  0x35   :  { %1380 = vmatpush.bf16.msrb.mxu3 %v2288_v63  ;;  %v1599_v63 = vld [vmem:[%s2952_s0 + $0x68] sm:$0xf0] }
  0x36   :  { %1339 = vmatpush.bf16.msrb.mxu0 %v2263_v0  ;;  %v2317_v0 = vld [vmem:[%s2951_s1 + $0x2c0] sm:$0xff] }
  0x37   :  { %1353 = vmatpush.bf16.msrb.mxu1 %v2271_v1  ;;  %v2216_v1 = vld [vmem:[%s2952_s0 + $0x2c] sm:$0xf] }
  0x38   :  { %1367 = vmatpush.bf16.msrb.mxu2 %v2279_v2  ;;  %v1607_v2 = vld [vmem:[%s2952_s0 + $0x70] sm:$0xf0] }
  0x39   :  { %1381 = vmatpush.bf16.msrb.mxu3 %v2287_v3  ;;  %v1598_v3 = vor.u32 %v2224_v58, %v1597_v57  ;;  %v2368_v57 = vld [vmem:[%s2951_s1 + $0x458] sm:$0xff]  ;;  %v2359_v58 = vld [vmem:[%s2951_s1 + $0x410] sm:$0xff] }
  0x3a   :  { %1340 = vmatpush.bf16.msrb.mxu0 %v2262_v4  ;;  %v1606_v4 = vor.u32 %v2225_v60, %v1605_v59  ;;  %v2367_v59 = vld [vmem:[%s2951_s1 + $0x450] sm:$0xff]  ;;  %v2358_v60 = vld [vmem:[%s2951_s1 + $0x408] sm:$0xff] }
  0x3b   :  { %1354 = vmatpush.bf16.msrb.mxu1 %v2270_v5  ;;  %v2356_v5 = vld [vmem:[%s2951_s1 + $0x3f8] sm:$0xff] }
  0x3c   :  { %1368 = vmatpush.bf16.msrb.mxu2 %v2278_v6  ;;  %v1602_v6 = vor.u32 %v2215_v62, %v1599_v63  ;;  %v2357_v62 = vld [vmem:[%s2951_s1 + $0x400] sm:$0xff] }
  0x3d   :  { %1382 = vmatpush.bf16.msrb.mxu3 %v2286_v7  ;;  %v1610_v7 = vor.u32 %v2216_v1, %v1607_v2  ;;  %v1629_v63 = vld [vmem:[%s2952_s0 + $0x40] sm:$0xf]  ;;  %v2219_v2 = vld [vmem:[%s2952_s0 + $0x44] sm:$0xf] }
  0x3e   :  { %1341 = vmatpush.bf16.msrb.mxu0 %v2261_v8  ;;  %v2331_v8 = vld [vmem:[%s2951_s1 + $0x330] sm:$0xff]  ;;  %v2365_v1 = vld [vmem:[%s2951_s1 + $0x440] sm:$0xff] }
  0x3f   :  { %1355 = vmatpush.bf16.msrb.mxu1 %v2269_v9  ;;  %v2339_v9 = vld [vmem:[%s2951_s1 + $0x370] sm:$0xff] }
  0x40   :  { %1369 = vmatpush.bf16.msrb.mxu2 %v2277_v10  ;;  %v2347_v10 = vld [vmem:[%s2951_s1 + $0x3b0] sm:$0xff] }
  0x41   :  { %1383 = vmatpush.bf16.msrb.mxu3 %v2285_v20  ;;  %1342 = vmatmul.bf16.vlgmr.msrb.gmra.mxu0 %v1582_v23  ;;  %v2328_v20 = vld [vmem:[%s2951_s1 + $0x318] sm:$0xff] }
  0x42   :  { %1390 = vmatpush.bf16.msra.mxu0 %v2300_v11  ;;  %1356 = vmatmul.bf16.vlgmr.msrb.gmra.mxu1 %v1586_v26  ;;  %v2355_v11 = vld [vmem:[%s2951_s1 + $0x3f0] sm:$0xff]  ;;  %v2352_v23 = vld [vmem:[%s2951_s1 + $0x3d8] sm:$0xff] }
  0x43   :  { %1404 = vmatpush.bf16.msra.mxu1 %v2308_v12  ;;  %1370 = vmatmul.bf16.vlgmr.msrb.gmra.mxu2 %v1590_v24  ;;  %v2330_v12 = vld [vmem:[%s2951_s1 + $0x328] sm:$0xff]  ;;  %v2327_v24 = vld [vmem:[%s2951_s1 + $0x310] sm:$0xff] }
  0x44   :  { %1418 = vmatpush.bf16.msra.mxu2 %v2316_v17  ;;  %1384 = vmatmul.bf16.vlgmr.msrb.gmra.mxu3 %v1594_v27  ;;  %v2337_v17 = vld [vmem:[%s2951_s1 + $0x360] sm:$0xff]  ;;  %v2343_v26 = vld [vmem:[%s2951_s1 + $0x390] sm:$0xff] }
  0x45   :  { %1432 = vmatpush.bf16.msra.mxu3 %v2324_v25  ;;  %v2335_v25 = vld [vmem:[%s2951_s1 + $0x350] sm:$0xff] }
  0x46   :  { %1391 = vmatpush.bf16.msra.mxu0 %v2299_v28  ;;  %v2351_v27 = vld [vmem:[%s2951_s1 + $0x3d0] sm:$0xff]  ;;  %v2326_v28 = vld [vmem:[%s2951_s1 + $0x308] sm:$0xff] }
  0x47   :  { %1405 = vmatpush.bf16.msra.mxu1 %v2307_v29  ;;  %v2334_v29 = vld [vmem:[%s2951_s1 + $0x348] sm:$0xff] }
  0x48   :  { %1419 = vmatpush.bf16.msra.mxu2 %v2315_v30  ;;  %v2342_v30 = vld [vmem:[%s2951_s1 + $0x388] sm:$0xff] }
  0x49   :  { %1433 = vmatpush.bf16.msra.mxu3 %v2323_v31  ;;  %v2350_v31 = vld [vmem:[%s2951_s1 + $0x3c8] sm:$0xff] }
  0x4a   :  { %1392 = vmatpush.bf16.msra.mxu0 %v2298_v32  ;;  %v2325_v32 = vld [vmem:[%s2951_s1 + $0x300] sm:$0xff] }
  0x4b   :  { %1406 = vmatpush.bf16.msra.mxu1 %v2306_v33  ;;  %v2333_v33 = vld [vmem:[%s2951_s1 + $0x340] sm:$0xff] }
  0x4c   :  { %1420 = vmatpush.bf16.msra.mxu2 %v2314_v34  ;;  %v2341_v34 = vld [vmem:[%s2951_s1 + $0x380] sm:$0xff] }
  0x4d   :  { %1434 = vmatpush.bf16.msra.mxu3 %v2322_v35  ;;  %v1613_v35 = vld [vmem:[%s2952_s0 + $0x30] sm:$0xf] }
  0x4e   :  { %1393 = vmatpush.bf16.msra.mxu0 %v2297_v36  ;;  %v2226_v36 = vld [vmem:[%s2952_s0 + $0x74] sm:$0xf0] }
  0x4f   :  { %1407 = vmatpush.bf16.msra.mxu1 %v2305_v37  ;;  %v1621_v37 = vld [vmem:[%s2952_s0 + $0x38] sm:$0xf] }
  0x50   :  { %1421 = vmatpush.bf16.msra.mxu2 %v2313_v38  ;;  %v2227_v38 = vld [vmem:[%s2952_s0 + $0x7c] sm:$0xf0] }
  0x51   :  { %1435 = vmatpush.bf16.msra.mxu3 %v2321_v39  ;;  %v2217_v39 = vld [vmem:[%s2952_s0 + $0x34] sm:$0xf] }
  0x52   :  { %1394 = vmatpush.bf16.msra.mxu0 %v2296_v40  ;;  %v1615_v40 = vld [vmem:[%s2952_s0 + $0x78] sm:$0xf0] }
  0x53   :  { %1408 = vmatpush.bf16.msra.mxu1 %v2304_v41  ;;  %v2364_v41 = vld [vmem:[%s2951_s1 + $0x438] sm:$0xff] }
  0x54   :  { %1422 = vmatpush.bf16.msra.mxu2 %v2312_v42  ;;  %v2372_v42 = vld [vmem:[%s2951_s1 + $0x478] sm:$0xff] }
  0x55   :  { %1436 = vmatpush.bf16.msra.mxu3 %v2320_v43  ;;  %v2349_v43 = vld [vmem:[%s2951_s1 + $0x3c0] sm:$0xff] }
  0x56   :  { %1395 = vmatpush.bf16.msra.mxu0 %v2295_v44  ;;  %v1614_v44 = vor.u32 %v2226_v36, %v1613_v35 }
  0x57   :  { %1409 = vmatpush.bf16.msra.mxu1 %v2303_v45  ;;  %v2218_v45 = vld [vmem:[%s2952_s0 + $0x3c] sm:$0xf] }
  0x58   :  { %1423 = vmatpush.bf16.msra.mxu2 %v2311_v46  ;;  %v1623_v46 = vld [vmem:[%s2952_s0 + $0x80] sm:$0xf0] }
  0x59   :  { %1437 = vmatpush.bf16.msra.mxu3 %v2319_v47  ;;  %v1622_v47 = vor.u32 %v2227_v38, %v1621_v37 }
  0x5a   :  { %1396 = vmatpush.bf16.msra.mxu0 %v2294_v48  ;;  %v1618_v48 = vor.u32 %v2217_v39, %v1615_v40 }
  0x5b   :  { %1410 = vmatpush.bf16.msra.mxu1 %v2302_v49  ;;  %v1626_v49 = vor.u32 %v2218_v45, %v1623_v46 }
  0x5c   :  { %1424 = vmatpush.bf16.msra.mxu2 %v2310_v50  ;;  %v2363_v50 = vld [vmem:[%s2951_s1 + $0x430] sm:$0xff] }
  0x5d   :  { %1438 = vmatpush.bf16.msra.mxu3 %v2318_v51  ;;  %v2371_v51 = vld [vmem:[%s2951_s1 + $0x470] sm:$0xff] }
  0x5e   :  { %1397 = vmatpush.bf16.msra.mxu0 %v2293_v52  ;;  %v2362_v52 = vld [vmem:[%s2951_s1 + $0x428] sm:$0xff] }
  0x5f   :  { %1411 = vmatpush.bf16.msra.mxu1 %v2301_v53  ;;  %v2370_v53 = vld [vmem:[%s2951_s1 + $0x468] sm:$0xff] }
  0x60   :  { %1425 = vmatpush.bf16.msra.mxu2 %v2309_v54  ;;  %v2361_v54 = vld [vmem:[%s2951_s1 + $0x420] sm:$0xff] }
  0x61   :  { %1439 = vmatpush.bf16.msra.mxu3 %v2317_v0  ;;  %1398 = vmatmul.bf16.vlgmr.msra.gmra.mxu0 %v1598_v3  ;;  %v2228_v0 = vld [vmem:[%s2952_s0 + $0x84] sm:$0xf0]  ;;  %v1631_v3 = vld [vmem:[%s2952_s0 + $0x88] sm:$0xf0] }
  0x62   :  { %1446 = vmatpush.bf16.msrb.mxu0 %v2332_v55  ;;  %1412 = vmatmul.bf16.vlgmr.msra.gmra.mxu1 %v1602_v6  ;;  %v2369_v55 = vld [vmem:[%s2951_s1 + $0x460] sm:$0xff] }
  0x63   :  { %1460 = vmatpush.bf16.msrb.mxu1 %v2340_v56  ;;  %1426 = vmatmul.bf16.vlgmr.msra.gmra.mxu2 %v1606_v4  ;;  %v2360_v56 = vld [vmem:[%s2951_s1 + $0x418] sm:$0xff]  ;;  %v1630_v4 = vor.u32 %v2228_v0, %v1629_v63 }
  0x64   :  { %1474 = vmatpush.bf16.msrb.mxu2 %v2348_v61  ;;  %1440 = vmatmul.bf16.vlgmr.msra.gmra.mxu3 %v1610_v7  ;;  %v2366_v61 = vld [vmem:[%s2951_s1 + $0x448] sm:$0xff] }
  0x65   :  { %1488 = vmatpush.bf16.msrb.mxu3 %v2356_v5  ;;  %v1634_v5 = vor.u32 %v2219_v2, %v1631_v3 }
  0x66   :  { %1447 = vmatpush.bf16.msrb.mxu0 %v2331_v8 }
  0x67   :  { %1461 = vmatpush.bf16.msrb.mxu1 %v2339_v9 }
  0x68   :  { %1475 = vmatpush.bf16.msrb.mxu2 %v2347_v10 }
  0x69   :  { %1489 = vmatpush.bf16.msrb.mxu3 %v2355_v11 }
  0x6a   :  { %1448 = vmatpush.bf16.msrb.mxu0 %v2330_v12  ;;  %v2373_v12 = vld [vmem:[%s2953_s2] ss:$0 sm:$0xff] }
  0x6b   :  { %1462 = vmatpush.bf16.msrb.mxu1 %v2338_v13 }
  0x6c   :  { %1476 = vmatpush.bf16.msrb.mxu2 %v2346_v14 }
  0x6d   :  { %1490 = vmatpush.bf16.msrb.mxu3 %v2354_v15 }
  0x6e   :  { %1449 = vmatpush.bf16.msrb.mxu0 %v2329_v16 }
  0x6f   :  { %1463 = vmatpush.bf16.msrb.mxu1 %v2337_v17 }
  0x70   :  { %1477 = vmatpush.bf16.msrb.mxu2 %v2345_v18 }
  0x71   :  { %1491 = vmatpush.bf16.msrb.mxu3 %v2353_v19 }
  0x72   :  { %1450 = vmatpush.bf16.msrb.mxu0 %v2328_v20 }
  0x73   :  { %1464 = vmatpush.bf16.msrb.mxu1 %v2336_v21 }
  0x74   :  { %1478 = vmatpush.bf16.msrb.mxu2 %v2344_v22 }
  0x75   :  { %1492 = vmatpush.bf16.msrb.mxu3 %v2352_v23 }
  0x76   :  { %1451 = vmatpush.bf16.msrb.mxu0 %v2327_v24 }
  0x77   :  { %1465 = vmatpush.bf16.msrb.mxu1 %v2335_v25 }
  0x78   :  { %1479 = vmatpush.bf16.msrb.mxu2 %v2343_v26 }
  0x79   :  { %1493 = vmatpush.bf16.msrb.mxu3 %v2351_v27 }
  0x7a   :  { %1452 = vmatpush.bf16.msrb.mxu0 %v2326_v28 }
  0x7b   :  { %1466 = vmatpush.bf16.msrb.mxu1 %v2334_v29 }
  0x7c   :  { %1480 = vmatpush.bf16.msrb.mxu2 %v2342_v30 }
  0x7d   :  { %1494 = vmatpush.bf16.msrb.mxu3 %v2350_v31 }
  0x7e   :  { %1453 = vmatpush.bf16.msrb.mxu0 %v2325_v32 }
  0x7f   :  { %1467 = vmatpush.bf16.msrb.mxu1 %v2333_v33 }
  0x80   :  { %1481 = vmatpush.bf16.msrb.mxu2 %v2341_v34 }
  0x81   :  { %1495 = vmatpush.bf16.msrb.mxu3 %v2349_v43  ;;  %1454 = vmatmul.bf16.vlgmr.msrb.gmra.mxu0 %v1614_v44 }
  0x82   :  { %1502 = vmatpush.bf16.msra.mxu0 %v2364_v41  ;;  %1468 = vmatmul.bf16.vlgmr.msrb.gmra.mxu1 %v1618_v48 }
  0x83   :  { %1516 = vmatpush.bf16.msra.mxu1 %v2372_v42  ;;  %1482 = vmatmul.bf16.vlgmr.msrb.gmra.mxu2 %v1622_v47 }
  0x84   :  { %1496 = vmatmul.bf16.vlgmr.msrb.gmra.mxu3 %v1626_v49 }
  0x86   :  { %1503 = vmatpush.bf16.msra.mxu0 %v2363_v50 }
  0x87   :  { %1517 = vmatpush.bf16.msra.mxu1 %v2371_v51 }
  0x8a   :  { %1504 = vmatpush.bf16.msra.mxu0 %v2362_v52 }
  0x8b   :  { %1518 = vmatpush.bf16.msra.mxu1 %v2370_v53 }
  0x8e   :  { %1505 = vmatpush.bf16.msra.mxu0 %v2361_v54 }
  0x8f   :  { %1519 = vmatpush.bf16.msra.mxu1 %v2369_v55 }
  0x92   :  { %1506 = vmatpush.bf16.msra.mxu0 %v2360_v56 }
  0x93   :  { %1520 = vmatpush.bf16.msra.mxu1 %v2368_v57 }
  0x96   :  { %1507 = vmatpush.bf16.msra.mxu0 %v2359_v58 }
  0x97   :  { %1521 = vmatpush.bf16.msra.mxu1 %v2367_v59 }
  0x9a   :  { %1508 = vmatpush.bf16.msra.mxu0 %v2358_v60 }
  0x9b   :  { %1522 = vmatpush.bf16.msra.mxu1 %v2366_v61 }
  0x9e   :  { %1509 = vmatpush.bf16.msra.mxu0 %v2357_v62  ;;  %v1287_v6 = vpop.f32.mrf.mxu0  ;;  %v1530_v62 = vlaneseq }
  0x9f   :  { %1523 = vmatpush.bf16.msra.mxu1 %v2365_v1  ;;  %v1301_v7 = vpop.f32.mrf.mxu1  ;;  %v1288_v15 = vadd.f32 %v2373_v12, %v1287_v6 }
  0xa0   :  { %v1531_v2 = vand.u32 127, %v1530_v62 }
  0xa1   :  { %1510 = vmatmul.bf16.vlgmr.msra.gmra.mxu0 %v1630_v4  ;;  %v1302_v18 = vadd.f32 %v1301_v7, %v1288_v15 }
  0xa2   :  { %1524 = vmatmul.bf16.vlgmr.msra.gmra.mxu1 %v1634_v5  ;;  %vm1532_vm0 = vcmp.lt.s32.totalorder %v1531_v2, 4 }
  0xa6   :  { %v1315_v8 = vpop.f32.mrf.mxu2  ;;  %v1289_v9 = vpop.f32.mrf.mxu0 }
  0xa7   :  { %v1303_v10 = vpop.f32.mrf.mxu1  ;;  %v1329_v11 = vpop.f32.mrf.mxu3  ;;  %v1316_v20 = vadd.f32 %v1315_v8, %v1302_v18  ;;  %v1290_v24 = vadd.f32 %v2373_v12, %v1289_v9 }
  0xa9   :  { %v1330_v25 = vadd.f32 %v1329_v11, %v1316_v20  ;;  %v1304_v26 = vadd.f32 %v1303_v10, %v1290_v24 }
  0xae   :  { %v1317_v13 = vpop.f32.mrf.mxu2 }
  0xaf   :  { %v1331_v17 = vpop.f32.mrf.mxu3  ;;  %v1318_v31 = vadd.f32 %v1317_v13, %v1304_v26 }
  0xb1   :  { %v1332_v34 = vadd.f32 %v1331_v17, %v1318_v31 }
  0xbe   :  { %v1343_v14 = vpop.f32.mrf.mxu0 }
  0xbf   :  { %v1357_v16 = vpop.f32.mrf.mxu1  ;;  %v1344_v27 = vadd.f32 %v1343_v14, %v1330_v25 }
  0xc1   :  { %v1358_v32 = vadd.f32 %v1357_v16, %v1344_v27 }
  0xc6   :  { %v1371_v19 = vpop.f32.mrf.mxu2  ;;  %v1345_v21 = vpop.f32.mrf.mxu0 }
  0xc7   :  { %v1359_v22 = vpop.f32.mrf.mxu1  ;;  %v1385_v23 = vpop.f32.mrf.mxu3  ;;  %v1372_v35 = vadd.f32 %v1371_v19, %v1358_v32  ;;  %v1346_v37 = vadd.f32 %v1345_v21, %v1332_v34 }
  0xc9   :  { %v1386_v39 = vadd.f32 %v1385_v23, %v1372_v35  ;;  %v1360_v42 = vadd.f32 %v1359_v22, %v1346_v37 }
  0xce   :  { %v1373_v28 = vpop.f32.mrf.mxu2 }
  0xcf   :  { %v1387_v33 = vpop.f32.mrf.mxu3  ;;  %v1374_v44 = vadd.f32 %v1373_v28, %v1360_v42 }
  0xd1   :  { %v1388_v48 = vadd.f32 %v1387_v33, %v1374_v44 }
  0xde   :  { %v1399_v29 = vpop.f32.mrf.mxu0 }
  0xdf   :  { %v1413_v30 = vpop.f32.mrf.mxu1  ;;  %v1400_v43 = vadd.f32 %v1399_v29, %v1386_v39 }
  0xe1   :  { %v1414_v45 = vadd.f32 %v1413_v30, %v1400_v43 }
  0xe6   :  { %v1427_v36 = vpop.f32.mrf.mxu2  ;;  %v1401_v38 = vpop.f32.mrf.mxu0 }
  0xe7   :  { %v1415_v40 = vpop.f32.mrf.mxu1  ;;  %v1441_v41 = vpop.f32.mrf.mxu3  ;;  %v1428_v49 = vadd.f32 %v1427_v36, %v1414_v45  ;;  %v1402_v51 = vadd.f32 %v1401_v38, %v1388_v48 }
  0xe9   :  { %v1442_v53 = vadd.f32 %v1441_v41, %v1428_v49  ;;  %v1416_v54 = vadd.f32 %v1415_v40, %v1402_v51 }
  0xee   :  { %v1429_v46 = vpop.f32.mrf.mxu2 }
  0xef   :  { %v1443_v52 = vpop.f32.mrf.mxu3  ;;  %v1430_v57 = vadd.f32 %v1429_v46, %v1416_v54 }
  0xf1   :  { %v1444_v63 = vadd.f32 %v1443_v52, %v1430_v57 }
  0xfe   :  { %v1455_v47 = vpop.f32.mrf.mxu0 }
  0xff   :  { %v1469_v50 = vpop.f32.mrf.mxu1  ;;  %v1456_v55 = vadd.f32 %v1455_v47, %v1442_v53 }
 0x101   :  { %v1470_v59 = vadd.f32 %v1469_v50, %v1456_v55 }
 0x106   :  { %v1483_v56 = vpop.f32.mrf.mxu2  ;;  %v1457_v58 = vpop.f32.mrf.mxu0 }
 0x107   :  { %v1471_v60 = vpop.f32.mrf.mxu1  ;;  %v1497_v61 = vpop.f32.mrf.mxu3  ;;  %v1484_v0 = vadd.f32 %v1483_v56, %v1470_v59  ;;  %v1458_v1 = vadd.f32 %v1457_v58, %v1444_v63 }
 0x109   :  { %v1498_v3 = vadd.f32 %v1497_v61, %v1484_v0  ;;  %v1472_v6 = vadd.f32 %v1471_v60, %v1458_v1 }
 0x10e   :  { %v1485_v4 = vpop.f32.mrf.mxu2 }
 0x10f   :  { %v1486_v9 = vadd.f32 %v1485_v4, %v1472_v6  ;;  %v1499_v11 = vpop.f32.mrf.mxu3 }
 0x111   :  { %v1500_v13 = vadd.f32 %v1499_v11, %v1486_v9 }
 0x11e   :  { %v1511_v5 = vpop.f32.mrf.mxu0 }
 0x11f   :  { %v1512_v7 = vadd.f32 %v1511_v5, %v1498_v3  ;;  %v1525_v8 = vpop.f32.mrf.mxu1 }
 0x121   :  { %v1526_v10 = vadd.f32 %v1525_v8, %v1512_v7 }
 0x123   :  { %v1533_v12 = vsel %vm1532_vm0, %v1526_v10, -1e+30 }
 0x124   :  { %1535 = vmax.xlane.f32.xlu0 %v1533_v12 }
 0x126   :  { %v1513_v14 = vpop.f32.mrf.mxu0 }
 0x127   :  { %v1514_v15 = vadd.f32 %v1513_v14, %v1500_v13  ;;  %v1527_v16 = vpop.f32.mrf.mxu1 }
 0x129   :  { %v1528_v17 = vadd.f32 %v1527_v16, %v1514_v15 }
 0x12b   :  { %v1534_v18 = vsel %vm1532_vm0, %v1528_v17, -1e+30 }
 0x12c   :  { %1537 = vmax.xlane.f32.xlu0 %v1534_v18 }
 0x197   :  { %v1536_v19 = vpop.xlane.xlu0 %1535 }
 0x198   :  { %v1539_v20 = vsub.f32 %v1533_v12, %v1536_v19 }
 0x19a   :  { %v1541_v21 = vmul.f32 1.442695, %v1539_v20 }
 0x19c   :  { %2374 = vpow2.f32 %v1541_v21 }
 0x19f   :  { %v1538_v22 = vpop.xlane.xlu0 %1537 }
 0x1a0   :  { %v1540_v23 = vsub.f32 %v1534_v18, %v1538_v22 }
 0x1a2   :  { %v2375_v24 = vpop.eup %2374  ;;  %v1543_v25 = vmul.f32 1.442695, %v1540_v23 }
 0x1a3   :  { %1545 = vadd.xlane.f32.xlu1 %v2375_v24 }
 0x1a4   :  { %2376 = vpow2.f32 %v1543_v25 }
 0x1aa   :  { %v2377_v26 = vpop.eup %2376 }
 0x1ab   :  { %1547 = vadd.xlane.f32.xlu1 %v2377_v26 }
 0x216   :  { %v1546_v27 = vpop.xlane.xlu1 %1545 }
 0x217   :  { %2378 = vlog2.f32 %v1546_v27 }
 0x21d   :  { %v2379_v28 = vpop.eup %2378 }
 0x21e   :  { %v1550_v29 = vmul.f32 0.6931472, %v2379_v28  ;;  %v1548_v30 = vpop.xlane.xlu1 %1547 }
 0x21f   :  { %2380 = vlog2.f32 %v1548_v30 }
 0x220   :  { %v1553_v31 = vadd.f32 %v1550_v29, %v1536_v19 }
 0x222   :  { %v1555_v32 = vsub.f32 %v1533_v12, %v1553_v31 }
 0x224   :  { %1557 = vst [vmem:[%s2954_s3] sm:$0xff] %v1555_v32 }
 0x225   :  { %v2381_v33 = vpop.eup %2380 }
 0x226   :  { %v1552_v34 = vmul.f32 0.6931472, %v2381_v33 }
 0x228   :  { %v1554_v35 = vadd.f32 %v1552_v34, %v1538_v22 }
 0x22a   :  { %v1556_v36 = vsub.f32 %v1534_v18, %v1554_v35 }
 0x22c   :  { %1558 = vst [vmem:[%s2954_s3 + $0x8] sm:$0xff] %v1556_v36 }

</bundles_post_ra>
